<compile_context>
chip_gen: v5e
topology: v5e:2x2
jax: 0.10.0
libtpu: 0.0.40
codegen_flags: <defaults>
</compile_context>

<pallas_src>
import functools

import jax
import jax.numpy as jnp
from jax.experimental import pallas as pl
from jax.experimental.pallas import tpu as pltpu


# ------------------------------------------------------------------
# Pallas kernels
# ------------------------------------------------------------------
def _conv_bias_lrelu_kernel(a_ref, w_ref, b_ref, o_ref, *, negative_slope):
    """(tm, K) @ (K, C) + bias + LeakyReLU (layer 1, no InstanceNorm)."""
    acc = jnp.dot(a_ref[...], w_ref[...], preferred_element_type=jnp.float32)
    acc = acc + b_ref[...].astype(jnp.float32)
    acc = jnp.where(acc >= 0.0, acc, acc * negative_slope)
    o_ref[...] = acc.astype(o_ref.dtype)


def _conv_bias_in_lrelu_kernel(a_ref, w_ref, b_ref, o_ref, *, n, hw, eps, negative_slope):
    """One (N*HW, K) @ (K, tc) matmul + bias, then per-instance InstanceNorm2d (two-pass
    variance over the HW rows of each instance) + LeakyReLU, all on the f32 accumulator."""
    acc = jnp.dot(a_ref[...], w_ref[...], preferred_element_type=jnp.float32)
    acc = acc + b_ref[...].astype(jnp.float32)                 # (n*hw, tc)
    tc = acc.shape[-1]
    acc3 = acc.reshape(n, hw, tc)                              # split rows per instance
    mean = jnp.mean(acc3, axis=1, keepdims=True)
    centered = acc3 - mean
    var = jnp.mean(centered * centered, axis=1, keepdims=True)  # two-pass, biased (PyTorch IN)
    y = centered * jax.lax.rsqrt(var + eps)
    y = jnp.where(y >= 0.0, y, y * negative_slope)
    o_ref[...] = y.reshape(o_ref.shape).astype(o_ref.dtype)


def _conv_cout1_kernel(a_ref, wt_ref, b_ref, o_ref):
    """Final conv with Cout == 1: VPU multiply + lane reduction (no 128-lane zero padding)."""
    a = a_ref[...].astype(jnp.float32)        # (M, K)
    w = wt_ref[...].astype(jnp.float32)       # (1, K)
    acc = jnp.sum(a * w, axis=1, keepdims=True) + b_ref[...]
    o_ref[...] = acc.astype(o_ref.dtype)


# ------------------------------------------------------------------
# Pallas wrappers
# ------------------------------------------------------------------
def pallas_conv_lrelu(a, w, b, *, negative_slope=0.2):
    """a: (M, K) bf16, w: (K, C) bf16, b: (C,) f32 -> (M, C) bf16. No InstanceNorm."""
    M, K = a.shape
    C = w.shape[1]
    # Keep >= 2 parallel M steps when possible (v7x megacore); weight (16 KB) is index-invariant
    # across steps so it is only DMA'd once.
    if M > 256 and M % 256 == 0:
        tm = 256
    elif M > 128 and M % 128 == 0:
        tm = 128
    else:
        tm = M
    grid = (M // tm,)
    kernel = functools.partial(_conv_bias_lrelu_kernel, negative_slope=negative_slope)
    return pl.pallas_call(
        kernel,
        out_shape=jax.ShapeDtypeStruct((M, C), jnp.bfloat16),
        grid=grid,
        in_specs=[
            pl.BlockSpec((tm, K), lambda i: (i, 0)),
            pl.BlockSpec((K, C), lambda i: (0, 0)),
            pl.BlockSpec((1, C), lambda i: (0, 0)),
        ],
        out_specs=pl.BlockSpec((tm, C), lambda i: (i, 0)),
        compiler_params=pltpu.CompilerParams(dimension_semantics=("parallel",)),
    )(a, w, b.reshape(1, C))


def pallas_conv_in_lrelu(a3, w, b, *, eps=1e-5, negative_slope=0.2):
    """a3: (N, HW, K) bf16, w: (K, C) bf16, b: (C,) f32 -> (N, HW, C) bf16.
    Fused conv-matmul + bias + InstanceNorm2d + LeakyReLU.
    N and HW are folded into the matmul M dimension (single activation block); the grid is only
    (C // tc,), so every weight tile is streamed from HBM exactly once per forward."""
    N, HW, K = a3.shape
    C = w.shape[1]
    M = N * HW
    a2 = a3.reshape(M, K)                       # contiguous -> free reshape in XLA

    # C-tile heuristic: >= 2 tiles for the big layers (v7x megacore splits the weight DMA),
    # while each tile (<= 2 MB bf16) double-buffers comfortably within any scoped-VMEM default.
    if C <= 128:
        tc = C
    elif C <= 256:
        tc = 128
    else:
        tc = 256
    grid = (C // tc,)

    kernel = functools.partial(_conv_bias_in_lrelu_kernel, n=N, hw=HW, eps=eps,
                               negative_slope=negative_slope)
    out = pl.pallas_call(
        kernel,
        out_shape=jax.ShapeDtypeStruct((M, C), jnp.bfloat16),
        grid=grid,
        in_specs=[
            pl.BlockSpec((M, K), lambda c: (0, 0)),   # whole activation, fetched once
            pl.BlockSpec((K, tc), lambda c: (0, c)),  # each weight tile fetched once
            pl.BlockSpec((1, tc), lambda c: (0, c)),
        ],
        out_specs=pl.BlockSpec((M, tc), lambda c: (0, c)),
        compiler_params=pltpu.CompilerParams(dimension_semantics=("parallel",)),
    )(a2, w, b.reshape(1, C))
    return out.reshape(N, HW, C)


def pallas_conv_cout1(a, wt, b):
    """a: (M, K) bf16, wt: (1, K) bf16, b: (1,) f32 -> (M, 1) f32 (final 1-channel conv)."""
    M, K = a.shape
    return pl.pallas_call(
        _conv_cout1_kernel,
        out_shape=jax.ShapeDtypeStruct((M, 1), jnp.float32),
        grid=(1,),
        in_specs=[
            pl.BlockSpec((M, K), lambda i: (0, 0)),
            pl.BlockSpec((1, K), lambda i: (0, 0)),
            pl.BlockSpec((1, 1), lambda i: (0, 0)),
        ],
        out_specs=pl.BlockSpec((M, 1), lambda i: (0, 0)),
        compiler_params=pltpu.CompilerParams(dimension_semantics=("arbitrary",)),
    )(a, wt, b.reshape(1, 1))


# ------------------------------------------------------------------
# Glue: im2col, spectral norm, parameter setup (plain JAX)
# ------------------------------------------------------------------
def im2col_nhwc(x, k, stride, pad):
    """x: (N, H, W, C) -> ((N, Ho*Wo, k*k*C), (N, Ho, Wo)); column order (kh, kw, cin)."""
    x = jnp.pad(x, ((0, 0), (pad, pad), (pad, pad), (0, 0)))
    N, Hp, Wp, C = x.shape
    Ho = (Hp - k) // stride + 1
    Wo = (Wp - k) // stride + 1
    cols = []
    for i in range(k):
        for j in range(k):
            cols.append(x[:, i:i + stride * Ho:stride, j:j + stride * Wo:stride, :])
    patches = jnp.concatenate(cols, axis=-1)                 # (N, Ho, Wo, k*k*C)
    return patches.reshape(N, Ho * Wo, k * k * C), (N, Ho, Wo)


def spectral_normalize(w, n_iter=30):
    """Divide conv weight (Cout, Cin, kh, kw) by its top singular value (flattened to 2D)."""
    wm = w.reshape(w.shape[0], -1)
    u = jnp.full((wm.shape[0],), 1.0 / jnp.sqrt(wm.shape[0]), jnp.float32)
    v = jnp.zeros((wm.shape[1],), jnp.float32)
    for _ in range(n_iter):
        v = wm.T @ u
        v = v / (jnp.linalg.norm(v) + 1e-12)
        u = wm @ v
        u = u / (jnp.linalg.norm(u) + 1e-12)
    sigma = jnp.dot(u, wm @ v)
    return w / sigma


def init_params(key, in_channels=6, base_channels=64, n_layers=3):
    k = 4
    specs = [dict(cin=in_channels, cout=base_channels, stride=2, inorm=False, final=False)]
    in_ch = base_channels
    for _ in range(n_layers):
        out_ch = min(in_ch * 2, 512)
        specs.append(dict(cin=in_ch, cout=out_ch, stride=2, inorm=True, final=False))
        in_ch = out_ch
    specs.append(dict(cin=in_ch, cout=1, stride=1, inorm=False, final=True))

    params = []
    for spec in specs:
        key, kw_, kb_ = jax.random.split(key, 3)
        cin, cout = spec["cin"], spec["cout"]
        w = 0.05 * jax.random.normal(kw_, (cout, cin, k, k), jnp.float32)
        w = spectral_normalize(w)
        b = 0.01 * jax.random.normal(kb_, (cout,), jnp.float32)
        # Pad Cin up to a multiple of 8 so K = 16*Cin is a multiple of 128 (layer 1: 6 -> 8).
        cin_pad = ((cin + 7) // 8) * 8
        if cin_pad != cin:
            w = jnp.pad(w, ((0, 0), (0, cin_pad - cin), (0, 0), (0, 0)))
        # (Cout, Cin, kh, kw) -> (kh, kw, cin, cout) -> (K, Cout); matches im2col column order.
        wm = jnp.transpose(w, (2, 3, 1, 0)).reshape(k * k * cin_pad, cout)
        if spec["final"]:
            wm = wm.T                                        # (1, K) for the lane-reduction kernel
        wm = wm.astype(jnp.bfloat16)
        params.append(dict(wm=wm, b=b, stride=spec["stride"], inorm=spec["inorm"],
                           final=spec["final"], cout=cout, cin_pad=cin_pad))
    return params


# ------------------------------------------------------------------
# Forward pass (PatchGAN discriminator)
# ------------------------------------------------------------------
def discriminator_forward(params, raw, beautified):
    """raw, beautified: NCHW float32. Returns NCHW patch prediction map (float32)."""
    x = jnp.concatenate([raw, beautified], axis=1)           # (N, 2C, H, W)
    x = jnp.transpose(x, (0, 2, 3, 1)).astype(jnp.bfloat16)  # NHWC bf16
    for layer in params:
        cpad = layer["cin_pad"] - x.shape[-1]
        if cpad > 0:                                          # only layer 1 (6 -> 8 channels)
            x = jnp.pad(x, ((0, 0), (0, 0), (0, 0), (0, cpad)))
        a3, (N, Ho, Wo) = im2col_nhwc(x, 4, layer["stride"], 1)
        K = a3.shape[-1]
        Cout = layer["cout"]
        if layer["final"]:
            y = pallas_conv_cout1(a3.reshape(N * Ho * Wo, K), layer["wm"], layer["b"])
            x = y.reshape(N, Ho, Wo, 1)
        elif layer["inorm"]:
            y = pallas_conv_in_lrelu(a3, layer["wm"], layer["b"], eps=1e-5, negative_slope=0.2)
            x = y.reshape(N, Ho, Wo, Cout)
        else:
            y = pallas_conv_lrelu(a3.reshape(N * Ho * Wo, K), layer["wm"], layer["b"],
                                  negative_slope=0.2)
            x = y.reshape(N, Ho, Wo, Cout)
    return jnp.transpose(x, (0, 3, 1, 2)).astype(jnp.float32)  # back to NCHW


# ------------------------------------------------------------------
if __name__ == "__main__":
    key = jax.random.PRNGKey(0)
    k_params, k_raw, k_beaut = jax.random.split(key, 3)

    N, C, H, W = 2, 3, 32, 32                                  # raw & beautified: 3 channels each
    raw = jax.random.normal(k_raw, (N, C, H, W), jnp.float32)
    beautified = jax.random.normal(k_beaut, (N, C, H, W), jnp.float32)

    params = init_params(k_params, in_channels=2 * C, base_channels=64, n_layers=3)

    fwd = jax.jit(lambda r, b: discriminator_forward(params, r, b))
    out = jax.block_until_ready(fwd(raw, beautified))

    # 32 -> 16 -> 8 -> 4 -> 2 (stride-2 convs) -> 1 (final k=4, s=1, p=1 conv)
    assert out.shape == (N, 1, 1, 1), out.shape
    assert out.dtype == jnp.float32
    assert bool(jnp.all(jnp.isfinite(out)))
    print("KERNEL_OK")
</pallas_src>

<mosaic_0001>
module attributes {stable_mosaic.version = 11 : i64} {
  func.func @_conv_bias_lrelu_kernel(%arg0: i32, %arg1: memref<256x128xbf16, #tpu.memory_space<vmem>>, %arg2: memref<128x64xbf16, #tpu.memory_space<vmem>>, %arg3: memref<1x64xf32, #tpu.memory_space<vmem>>, %arg4: memref<256x64xbf16, #tpu.memory_space<vmem>>) attributes {dimension_semantics = [#tpu.dimension_semantics<parallel>], iteration_bounds = array<i64: 2>, scalar_prefetch = 0 : i64, scratch_operands = 0 : i64, tpu.core_type = #tpu.core_type<tc>, window_params = [{transform_indices = @transform_0, window_bounds = array<i64: 256, 128>}, {pipeline_mode = #tpu.pipeline_mode<synchronous>, transform_indices = @transform_1, window_bounds = array<i64: 128, 64>}, {pipeline_mode = #tpu.pipeline_mode<synchronous>, transform_indices = @transform_2, window_bounds = array<i64: 1, 64>}, {transform_indices = @transform_3, window_bounds = array<i64: 256, 64>}]} {
    %c0 = arith.constant 0 : index
    %c0_0 = arith.constant 0 : index
    %0 = vector.load %arg1[%c0, %c0_0] : memref<256x128xbf16, #tpu.memory_space<vmem>>, vector<256x128xbf16>
    %c0_1 = arith.constant 0 : index
    %c0_2 = arith.constant 0 : index
    %1 = vector.load %arg2[%c0_1, %c0_2] : memref<128x64xbf16, #tpu.memory_space<vmem>>, vector<128x64xbf16>
    %cst = arith.constant dense<0.000000e+00> : vector<256x64xf32>
    %2 = tpu.matmul %0, %1, %cst {dimension_numbers = #tpu.dot_dimension_numbers<[1], [0], [0], [1], [0, 0, 1, 1], [], []>} : vector<256x128xbf16>, vector<128x64xbf16>, vector<256x64xf32> -> vector<256x64xf32>
    %c0_3 = arith.constant 0 : index
    %c0_4 = arith.constant 0 : index
    %3 = vector.load %arg3[%c0_3, %c0_4] : memref<1x64xf32, #tpu.memory_space<vmem>>, vector<1x64xf32>
    %4 = vector.broadcast %3 : vector<1x64xf32> to vector<256x64xf32>
    %5 = arith.addf %2, %4 : vector<256x64xf32>
    %cst_5 = arith.constant 0.000000e+00 : f32
    %6 = vector.broadcast %cst_5 : f32 to vector<256x64xf32>
    %7 = arith.cmpf oge, %5, %6 : vector<256x64xf32>
    %cst_6 = arith.constant 2.000000e-01 : f32
    %8 = vector.broadcast %cst_6 : f32 to vector<256x64xf32>
    %9 = arith.mulf %5, %8 : vector<256x64xf32>
    %10 = arith.select %7, %5, %9 : vector<256x64xi1>, vector<256x64xf32>
    %11 = arith.truncf %10 : vector<256x64xf32> to vector<256x64xbf16>
    %c0_7 = arith.constant 0 : index
    %c0_8 = arith.constant 0 : index
    %12 = vector.load %arg4[%c0_7, %c0_8] : memref<256x64xbf16, #tpu.memory_space<vmem>>, vector<256x64xbf16>
    tpu.vector_store %arg4[%c0_7, %c0_8], %11 {strides = array<i32>} : memref<256x64xbf16, #tpu.memory_space<vmem>>, vector<256x64xbf16>,
    return
  }
  func.func @transform_0(%arg0: i32) -> (i32, i32) {
    %c0_i32 = arith.constant 0 : i32
    %c0_i32_0 = arith.constant 0 : i32
    return %arg0, %c0_i32 : i32, i32
  }
  func.func @transform_1(%arg0: i32) -> (i32, i32) {
    %c0_i32 = arith.constant 0 : i32
    %c0_i32_0 = arith.constant 0 : i32
    %c0_i32_1 = arith.constant 0 : i32
    return %c0_i32, %c0_i32_0 : i32, i32
  }
  func.func @transform_2(%arg0: i32) -> (i32, i32) {
    %c0_i32 = arith.constant 0 : i32
    %c0_i32_0 = arith.constant 0 : i32
    %c0_i32_1 = arith.constant 0 : i32
    return %c0_i32, %c0_i32_0 : i32, i32
  }
  func.func @transform_3(%arg0: i32) -> (i32, i32) {
    %c0_i32 = arith.constant 0 : i32
    %c0_i32_0 = arith.constant 0 : i32
    return %arg0, %c0_i32 : i32, i32
  }
}

module attributes {stable_mosaic.version = 11 : i64} {
  func.func @_conv_bias_in_lrelu_kernel(%arg0: i32, %arg1: memref<128x1024xbf16, #tpu.memory_space<vmem>>, %arg2: memref<1024x128xbf16, #tpu.memory_space<vmem>>, %arg3: memref<1x128xf32, #tpu.memory_space<vmem>>, %arg4: memref<128x128xbf16, #tpu.memory_space<vmem>>) attributes {dimension_semantics = [#tpu.dimension_semantics<parallel>], iteration_bounds = array<i64: 1>, scalar_prefetch = 0 : i64, scratch_operands = 0 : i64, tpu.core_type = #tpu.core_type<tc>, window_params = [{pipeline_mode = #tpu.pipeline_mode<synchronous>, transform_indices = @transform_0, window_bounds = array<i64: 128, 1024>}, {transform_indices = @transform_1, window_bounds = array<i64: 1024, 128>}, {transform_indices = @transform_2, window_bounds = array<i64: 1, 128>}, {transform_indices = @transform_3, window_bounds = array<i64: 128, 128>}]} {
    %c0 = arith.constant 0 : index
    %c0_0 = arith.constant 0 : index
    %0 = vector.load %arg1[%c0, %c0_0] : memref<128x1024xbf16, #tpu.memory_space<vmem>>, vector<128x1024xbf16>
    %c0_1 = arith.constant 0 : index
    %c0_2 = arith.constant 0 : index
    %1 = vector.load %arg2[%c0_1, %c0_2] : memref<1024x128xbf16, #tpu.memory_space<vmem>>, vector<1024x128xbf16>
    %cst = arith.constant dense<0.000000e+00> : vector<128x128xf32>
    %2 = tpu.matmul %0, %1, %cst {dimension_numbers = #tpu.dot_dimension_numbers<[1], [0], [0], [1], [0, 0, 1, 1], [], []>} : vector<128x1024xbf16>, vector<1024x128xbf16>, vector<128x128xf32> -> vector<128x128xf32>
    %c0_3 = arith.constant 0 : index
    %c0_4 = arith.constant 0 : index
    %3 = vector.load %arg3[%c0_3, %c0_4] : memref<1x128xf32, #tpu.memory_space<vmem>>, vector<1x128xf32>
    %4 = vector.broadcast %3 : vector<1x128xf32> to vector<128x128xf32>
    %5 = arith.addf %2, %4 : vector<128x128xf32>
    %6 = vector.shape_cast %5 : vector<128x128xf32> to vector<2x64x128xf32>
    %cst_5 = arith.constant dense<0.000000e+00> : vector<2x128xf32>
    %7 = vector.multi_reduction <add>, %6, %cst_5 [1] : vector<2x64x128xf32> to vector<2x128xf32>
    %8 = vector.shape_cast %7 : vector<2x128xf32> to vector<2x1x128xf32>
    %cst_6 = arith.constant 6.400000e+01 : f32
    %9 = vector.broadcast %cst_6 : f32 to vector<2x1x128xf32>
    %10 = arith.divf %8, %9 : vector<2x1x128xf32>
    %11 = vector.broadcast %10 : vector<2x1x128xf32> to vector<2x64x128xf32>
    %12 = arith.subf %6, %11 : vector<2x64x128xf32>
    %13 = arith.mulf %12, %12 : vector<2x64x128xf32>
    %cst_7 = arith.constant dense<0.000000e+00> : vector<2x128xf32>
    %14 = vector.multi_reduction <add>, %13, %cst_7 [1] : vector<2x64x128xf32> to vector<2x128xf32>
    %15 = vector.shape_cast %14 : vector<2x128xf32> to vector<2x1x128xf32>
    %cst_8 = arith.constant 6.400000e+01 : f32
    %16 = vector.broadcast %cst_8 : f32 to vector<2x1x128xf32>
    %17 = arith.divf %15, %16 : vector<2x1x128xf32>
    %cst_9 = arith.constant 9.99999974E-6 : f32
    %18 = vector.broadcast %cst_9 : f32 to vector<2x1x128xf32>
    %19 = arith.addf %17, %18 : vector<2x1x128xf32>
    %20 = math.rsqrt %19 : vector<2x1x128xf32>
    %21 = vector.broadcast %20 : vector<2x1x128xf32> to vector<2x64x128xf32>
    %22 = arith.mulf %12, %21 : vector<2x64x128xf32>
    %cst_10 = arith.constant 0.000000e+00 : f32
    %23 = vector.broadcast %cst_10 : f32 to vector<2x64x128xf32>
    %24 = arith.cmpf oge, %22, %23 : vector<2x64x128xf32>
    %cst_11 = arith.constant 2.000000e-01 : f32
    %25 = vector.broadcast %cst_11 : f32 to vector<2x64x128xf32>
    %26 = arith.mulf %22, %25 : vector<2x64x128xf32>
    %27 = arith.select %24, %22, %26 : vector<2x64x128xi1>, vector<2x64x128xf32>
    %28 = vector.shape_cast %27 : vector<2x64x128xf32> to vector<128x128xf32>
    %29 = arith.truncf %28 : vector<128x128xf32> to vector<128x128xbf16>
    %c0_12 = arith.constant 0 : index
    %c0_13 = arith.constant 0 : index
    %30 = vector.load %arg4[%c0_12, %c0_13] : memref<128x128xbf16, #tpu.memory_space<vmem>>, vector<128x128xbf16>
    tpu.vector_store %arg4[%c0_12, %c0_13], %29 {strides = array<i32>} : memref<128x128xbf16, #tpu.memory_space<vmem>>, vector<128x128xbf16>,
    return
  }
  func.func @transform_0(%arg0: i32) -> (i32, i32) {
    %c0_i32 = arith.constant 0 : i32
    %c0_i32_0 = arith.constant 0 : i32
    %c0_i32_1 = arith.constant 0 : i32
    return %c0_i32, %c0_i32_0 : i32, i32
  }
  func.func @transform_1(%arg0: i32) -> (i32, i32) {
    %c0_i32 = arith.constant 0 : i32
    %c0_i32_0 = arith.constant 0 : i32
    return %c0_i32, %arg0 : i32, i32
  }
  func.func @transform_2(%arg0: i32) -> (i32, i32) {
    %c0_i32 = arith.constant 0 : i32
    %c0_i32_0 = arith.constant 0 : i32
    return %c0_i32, %arg0 : i32, i32
  }
  func.func @transform_3(%arg0: i32) -> (i32, i32) {
    %c0_i32 = arith.constant 0 : i32
    %c0_i32_0 = arith.constant 0 : i32
    return %c0_i32, %arg0 : i32, i32
  }
}

module attributes {stable_mosaic.version = 11 : i64} {
  func.func @_conv_bias_in_lrelu_kernel(%arg0: i32, %arg1: memref<32x2048xbf16, #tpu.memory_space<vmem>>, %arg2: memref<2048x128xbf16, #tpu.memory_space<vmem>>, %arg3: memref<1x128xf32, #tpu.memory_space<vmem>>, %arg4: memref<32x128xbf16, #tpu.memory_space<vmem>>) attributes {dimension_semantics = [#tpu.dimension_semantics<parallel>], iteration_bounds = array<i64: 2>, scalar_prefetch = 0 : i64, scratch_operands = 0 : i64, tpu.core_type = #tpu.core_type<tc>, window_params = [{pipeline_mode = #tpu.pipeline_mode<synchronous>, transform_indices = @transform_0, window_bounds = array<i64: 32, 2048>}, {transform_indices = @transform_1, window_bounds = array<i64: 2048, 128>}, {transform_indices = @transform_2, window_bounds = array<i64: 1, 128>}, {transform_indices = @transform_3, window_bounds = array<i64: 32, 128>}]} {
    %c0 = arith.constant 0 : index
    %c0_0 = arith.constant 0 : index
    %0 = vector.load %arg1[%c0, %c0_0] : memref<32x2048xbf16, #tpu.memory_space<vmem>>, vector<32x2048xbf16>
    %c0_1 = arith.constant 0 : index
    %c0_2 = arith.constant 0 : index
    %1 = vector.load %arg2[%c0_1, %c0_2] : memref<2048x128xbf16, #tpu.memory_space<vmem>>, vector<2048x128xbf16>
    %cst = arith.constant dense<0.000000e+00> : vector<32x128xf32>
    %2 = tpu.matmul %0, %1, %cst {dimension_numbers = #tpu.dot_dimension_numbers<[1], [0], [0], [1], [0, 0, 1, 1], [], []>} : vector<32x2048xbf16>, vector<2048x128xbf16>, vector<32x128xf32> -> vector<32x128xf32>
    %c0_3 = arith.constant 0 : index
    %c0_4 = arith.constant 0 : index
    %3 = vector.load %arg3[%c0_3, %c0_4] : memref<1x128xf32, #tpu.memory_space<vmem>>, vector<1x128xf32>
    %4 = vector.broadcast %3 : vector<1x128xf32> to vector<32x128xf32>
    %5 = arith.addf %2, %4 : vector<32x128xf32>
    %6 = vector.shape_cast %5 : vector<32x128xf32> to vector<2x16x128xf32>
    %cst_5 = arith.constant dense<0.000000e+00> : vector<2x128xf32>
    %7 = vector.multi_reduction <add>, %6, %cst_5 [1] : vector<2x16x128xf32> to vector<2x128xf32>
    %8 = vector.shape_cast %7 : vector<2x128xf32> to vector<2x1x128xf32>
    %cst_6 = arith.constant 1.600000e+01 : f32
    %9 = vector.broadcast %cst_6 : f32 to vector<2x1x128xf32>
    %10 = arith.divf %8, %9 : vector<2x1x128xf32>
    %11 = vector.broadcast %10 : vector<2x1x128xf32> to vector<2x16x128xf32>
    %12 = arith.subf %6, %11 : vector<2x16x128xf32>
    %13 = arith.mulf %12, %12 : vector<2x16x128xf32>
    %cst_7 = arith.constant dense<0.000000e+00> : vector<2x128xf32>
    %14 = vector.multi_reduction <add>, %13, %cst_7 [1] : vector<2x16x128xf32> to vector<2x128xf32>
    %15 = vector.shape_cast %14 : vector<2x128xf32> to vector<2x1x128xf32>
    %cst_8 = arith.constant 1.600000e+01 : f32
    %16 = vector.broadcast %cst_8 : f32 to vector<2x1x128xf32>
    %17 = arith.divf %15, %16 : vector<2x1x128xf32>
    %cst_9 = arith.constant 9.99999974E-6 : f32
    %18 = vector.broadcast %cst_9 : f32 to vector<2x1x128xf32>
    %19 = arith.addf %17, %18 : vector<2x1x128xf32>
    %20 = math.rsqrt %19 : vector<2x1x128xf32>
    %21 = vector.broadcast %20 : vector<2x1x128xf32> to vector<2x16x128xf32>
    %22 = arith.mulf %12, %21 : vector<2x16x128xf32>
    %cst_10 = arith.constant 0.000000e+00 : f32
    %23 = vector.broadcast %cst_10 : f32 to vector<2x16x128xf32>
    %24 = arith.cmpf oge, %22, %23 : vector<2x16x128xf32>
    %cst_11 = arith.constant 2.000000e-01 : f32
    %25 = vector.broadcast %cst_11 : f32 to vector<2x16x128xf32>
    %26 = arith.mulf %22, %25 : vector<2x16x128xf32>
    %27 = arith.select %24, %22, %26 : vector<2x16x128xi1>, vector<2x16x128xf32>
    %28 = vector.shape_cast %27 : vector<2x16x128xf32> to vector<32x128xf32>
    %29 = arith.truncf %28 : vector<32x128xf32> to vector<32x128xbf16>
    %c0_12 = arith.constant 0 : index
    %c0_13 = arith.constant 0 : index
    %30 = vector.load %arg4[%c0_12, %c0_13] : memref<32x128xbf16, #tpu.memory_space<vmem>>, vector<32x128xbf16>
    tpu.vector_store %arg4[%c0_12, %c0_13], %29 {strides = array<i32>} : memref<32x128xbf16, #tpu.memory_space<vmem>>, vector<32x128xbf16>,
    return
  }
  func.func @transform_0(%arg0: i32) -> (i32, i32) {
    %c0_i32 = arith.constant 0 : i32
    %c0_i32_0 = arith.constant 0 : i32
    %c0_i32_1 = arith.constant 0 : i32
    return %c0_i32, %c0_i32_0 : i32, i32
  }
  func.func @transform_1(%arg0: i32) -> (i32, i32) {
    %c0_i32 = arith.constant 0 : i32
    %c0_i32_0 = arith.constant 0 : i32
    return %c0_i32, %arg0 : i32, i32
  }
  func.func @transform_2(%arg0: i32) -> (i32, i32) {
    %c0_i32 = arith.constant 0 : i32
    %c0_i32_0 = arith.constant 0 : i32
    return %c0_i32, %arg0 : i32, i32
  }
  func.func @transform_3(%arg0: i32) -> (i32, i32) {
    %c0_i32 = arith.constant 0 : i32
    %c0_i32_0 = arith.constant 0 : i32
    return %c0_i32, %arg0 : i32, i32
  }
}

module attributes {stable_mosaic.version = 11 : i64} {
  func.func @_conv_bias_in_lrelu_kernel(%arg0: i32, %arg1: memref<8x4096xbf16, #tpu.memory_space<vmem>>, %arg2: memref<4096x256xbf16, #tpu.memory_space<vmem>>, %arg3: memref<1x256xf32, #tpu.memory_space<vmem>>, %arg4: memref<8x256xbf16, #tpu.memory_space<vmem>>) attributes {dimension_semantics = [#tpu.dimension_semantics<parallel>], iteration_bounds = array<i64: 2>, scalar_prefetch = 0 : i64, scratch_operands = 0 : i64, tpu.core_type = #tpu.core_type<tc>, window_params = [{pipeline_mode = #tpu.pipeline_mode<synchronous>, transform_indices = @transform_0, window_bounds = array<i64: 8, 4096>}, {transform_indices = @transform_1, window_bounds = array<i64: 4096, 256>}, {transform_indices = @transform_2, window_bounds = array<i64: 1, 256>}, {transform_indices = @transform_3, window_bounds = array<i64: 8, 256>}]} {
    %c0 = arith.constant 0 : index
    %c0_0 = arith.constant 0 : index
    %0 = vector.load %arg1[%c0, %c0_0] : memref<8x4096xbf16, #tpu.memory_space<vmem>>, vector<8x4096xbf16>
    %c0_1 = arith.constant 0 : index
    %c0_2 = arith.constant 0 : index
    %1 = vector.load %arg2[%c0_1, %c0_2] : memref<4096x256xbf16, #tpu.memory_space<vmem>>, vector<4096x256xbf16>
    %cst = arith.constant dense<0.000000e+00> : vector<8x256xf32>
    %2 = tpu.matmul %0, %1, %cst {dimension_numbers = #tpu.dot_dimension_numbers<[1], [0], [0], [1], [0, 0, 1, 1], [], []>} : vector<8x4096xbf16>, vector<4096x256xbf16>, vector<8x256xf32> -> vector<8x256xf32>
    %c0_3 = arith.constant 0 : index
    %c0_4 = arith.constant 0 : index
    %3 = vector.load %arg3[%c0_3, %c0_4] : memref<1x256xf32, #tpu.memory_space<vmem>>, vector<1x256xf32>
    %4 = vector.broadcast %3 : vector<1x256xf32> to vector<8x256xf32>
    %5 = arith.addf %2, %4 : vector<8x256xf32>
    %6 = vector.shape_cast %5 : vector<8x256xf32> to vector<2x4x256xf32>
    %cst_5 = arith.constant dense<0.000000e+00> : vector<2x256xf32>
    %7 = vector.multi_reduction <add>, %6, %cst_5 [1] : vector<2x4x256xf32> to vector<2x256xf32>
    %8 = vector.shape_cast %7 : vector<2x256xf32> to vector<2x1x256xf32>
    %cst_6 = arith.constant 4.000000e+00 : f32
    %9 = vector.broadcast %cst_6 : f32 to vector<2x1x256xf32>
    %10 = arith.divf %8, %9 : vector<2x1x256xf32>
    %11 = vector.broadcast %10 : vector<2x1x256xf32> to vector<2x4x256xf32>
    %12 = arith.subf %6, %11 : vector<2x4x256xf32>
    %13 = arith.mulf %12, %12 : vector<2x4x256xf32>
    %cst_7 = arith.constant dense<0.000000e+00> : vector<2x256xf32>
    %14 = vector.multi_reduction <add>, %13, %cst_7 [1] : vector<2x4x256xf32> to vector<2x256xf32>
    %15 = vector.shape_cast %14 : vector<2x256xf32> to vector<2x1x256xf32>
    %cst_8 = arith.constant 4.000000e+00 : f32
    %16 = vector.broadcast %cst_8 : f32 to vector<2x1x256xf32>
    %17 = arith.divf %15, %16 : vector<2x1x256xf32>
    %cst_9 = arith.constant 9.99999974E-6 : f32
    %18 = vector.broadcast %cst_9 : f32 to vector<2x1x256xf32>
    %19 = arith.addf %17, %18 : vector<2x1x256xf32>
    %20 = math.rsqrt %19 : vector<2x1x256xf32>
    %21 = vector.broadcast %20 : vector<2x1x256xf32> to vector<2x4x256xf32>
    %22 = arith.mulf %12, %21 : vector<2x4x256xf32>
    %cst_10 = arith.constant 0.000000e+00 : f32
    %23 = vector.broadcast %cst_10 : f32 to vector<2x4x256xf32>
    %24 = arith.cmpf oge, %22, %23 : vector<2x4x256xf32>
    %cst_11 = arith.constant 2.000000e-01 : f32
    %25 = vector.broadcast %cst_11 : f32 to vector<2x4x256xf32>
    %26 = arith.mulf %22, %25 : vector<2x4x256xf32>
    %27 = arith.select %24, %22, %26 : vector<2x4x256xi1>, vector<2x4x256xf32>
    %28 = vector.shape_cast %27 : vector<2x4x256xf32> to vector<8x256xf32>
    %29 = arith.truncf %28 : vector<8x256xf32> to vector<8x256xbf16>
    %c0_12 = arith.constant 0 : index
    %c0_13 = arith.constant 0 : index
    %30 = vector.load %arg4[%c0_12, %c0_13] : memref<8x256xbf16, #tpu.memory_space<vmem>>, vector<8x256xbf16>
    tpu.vector_store %arg4[%c0_12, %c0_13], %29 {strides = array<i32>} : memref<8x256xbf16, #tpu.memory_space<vmem>>, vector<8x256xbf16>,
    return
  }
  func.func @transform_0(%arg0: i32) -> (i32, i32) {
    %c0_i32 = arith.constant 0 : i32
    %c0_i32_0 = arith.constant 0 : i32
    %c0_i32_1 = arith.constant 0 : i32
    return %c0_i32, %c0_i32_0 : i32, i32
  }
  func.func @transform_1(%arg0: i32) -> (i32, i32) {
    %c0_i32 = arith.constant 0 : i32
    %c0_i32_0 = arith.constant 0 : i32
    return %c0_i32, %arg0 : i32, i32
  }
  func.func @transform_2(%arg0: i32) -> (i32, i32) {
    %c0_i32 = arith.constant 0 : i32
    %c0_i32_0 = arith.constant 0 : i32
    return %c0_i32, %arg0 : i32, i32
  }
  func.func @transform_3(%arg0: i32) -> (i32, i32) {
    %c0_i32 = arith.constant 0 : i32
    %c0_i32_0 = arith.constant 0 : i32
    return %c0_i32, %arg0 : i32, i32
  }
}

module attributes {stable_mosaic.version = 11 : i64} {
  func.func @_conv_cout1_kernel(%arg0: i32, %arg1: memref<2x8192xbf16, #tpu.memory_space<vmem>>, %arg2: memref<1x8192xbf16, #tpu.memory_space<vmem>>, %arg3: memref<1x1xf32, #tpu.memory_space<vmem>>, %arg4: memref<2x1xf32, #tpu.memory_space<vmem>>) attributes {dimension_semantics = [#tpu.dimension_semantics<arbitrary>], iteration_bounds = array<i64: 1>, scalar_prefetch = 0 : i64, scratch_operands = 0 : i64, tpu.core_type = #tpu.core_type<tc>, window_params = [{pipeline_mode = #tpu.pipeline_mode<synchronous>, transform_indices = @transform_0, window_bounds = array<i64: 2, 8192>}, {pipeline_mode = #tpu.pipeline_mode<synchronous>, transform_indices = @transform_1, window_bounds = array<i64: 1, 8192>}, {pipeline_mode = #tpu.pipeline_mode<synchronous>, transform_indices = @transform_2, window_bounds = array<i64: 1, 1>}, {pipeline_mode = #tpu.pipeline_mode<synchronous>, transform_indices = @transform_3, window_bounds = array<i64: 2, 1>}]} {
    %c0 = arith.constant 0 : index
    %c0_0 = arith.constant 0 : index
    %0 = vector.load %arg1[%c0, %c0_0] : memref<2x8192xbf16, #tpu.memory_space<vmem>>, vector<2x8192xbf16>
    %1 = arith.extf %0 : vector<2x8192xbf16> to vector<2x8192xf32>
    %c0_1 = arith.constant 0 : index
    %c0_2 = arith.constant 0 : index
    %2 = vector.load %arg2[%c0_1, %c0_2] : memref<1x8192xbf16, #tpu.memory_space<vmem>>, vector<1x8192xbf16>
    %3 = arith.extf %2 : vector<1x8192xbf16> to vector<1x8192xf32>
    %4 = vector.broadcast %3 : vector<1x8192xf32> to vector<2x8192xf32>
    %5 = arith.mulf %1, %4 : vector<2x8192xf32>
    %cst = arith.constant dense<0.000000e+00> : vector<2xf32>
    %6 = vector.multi_reduction <add>, %5, %cst [1] : vector<2x8192xf32> to vector<2xf32>
    %7 = vector.shape_cast %6 : vector<2xf32> to vector<2x1xf32>
    %c0_3 = arith.constant 0 : index
    %c0_4 = arith.constant 0 : index
    %8 = vector.load %arg3[%c0_3, %c0_4] : memref<1x1xf32, #tpu.memory_space<vmem>>, vector<1x1xf32>
    %9 = vector.broadcast %8 : vector<1x1xf32> to vector<2x1xf32>
    %10 = arith.addf %7, %9 : vector<2x1xf32>
    %c0_5 = arith.constant 0 : index
    %c0_6 = arith.constant 0 : index
    %11 = vector.load %arg4[%c0_5, %c0_6] : memref<2x1xf32, #tpu.memory_space<vmem>>, vector<2x1xf32>
    tpu.vector_store %arg4[%c0_5, %c0_6], %10 {strides = array<i32>} : memref<2x1xf32, #tpu.memory_space<vmem>>, vector<2x1xf32>,
    return
  }
  func.func @transform_0(%arg0: i32) -> (i32, i32) {
    %c0_i32 = arith.constant 0 : i32
    %c0_i32_0 = arith.constant 0 : i32
    %c0_i32_1 = arith.constant 0 : i32
    return %c0_i32, %c0_i32_0 : i32, i32
  }
  func.func @transform_1(%arg0: i32) -> (i32, i32) {
    %c0_i32 = arith.constant 0 : i32
    %c0_i32_0 = arith.constant 0 : i32
    %c0_i32_1 = arith.constant 0 : i32
    return %c0_i32, %c0_i32_0 : i32, i32
  }
  func.func @transform_2(%arg0: i32) -> (i32, i32) {
    %c0_i32 = arith.constant 0 : i32
    %c0_i32_0 = arith.constant 0 : i32
    %c0_i32_1 = arith.constant 0 : i32
    return %c0_i32, %c0_i32_0 : i32, i32
  }
  func.func @transform_3(%arg0: i32) -> (i32, i32) {
    %c0_i32 = arith.constant 0 : i32
    %c0_i32_0 = arith.constant 0 : i32
    %c0_i32_1 = arith.constant 0 : i32
    return %c0_i32, %c0_i32_0 : i32, i32
  }
}

</mosaic_0001>

<bundles_post_ra>
// kernel: _lambda_.5
= control target key start
LH: loop header
LB: loop body
LE: loop exit
PB: predicated region body
PF: predicated region fallthrough
CT: control target
= control target key end

     0   :  { %s868_s12 = smov 0   ;;  %s1037_s0 = inlined_call_operand.vmem [shape: bf16[512,128], index: 0, kind: input, shape index: {}]   ;;  %s1038_s1 = inlined_call_operand.vmem [shape: bf16[128,64], index: 1, kind: input, shape index: {}]   ;;  %s1039_s2 = inlined_call_operand.vmem [shape: f32[1,64], index: 2, kind: input, shape index: {}]   ;;  %s1040_s3 = inlined_call_operand.vmem [shape: bf16[512,64], index: 3, kind: output, shape index: {}]  }
   0x1 LB: > { %s676_s13 = sadd.s32 4294967295, %s846_s12   ;;  %p680_p0 = scmp.ge.s32.totalorder %s846_s12, 1  ;;  %s846_s12 = sphi %s868_s12, %s13_s12  }
   0x2   : > { %p138_p1 = scmp.lt.s32.totalorder %s846_s12, 3 }
   0x4   : > { %p139_p2 = pnand %p680_p0, %p138_p1 }
   0x5   : > { %s681_s22 = sshll.u32 (!%p139_p2), %s676_s13, 5 }
   0x6   : > { %142 = sbr.rel (%p139_p2) target bundleno = 241 (0xf1), region = 32  ;;  %p163_p3 = scmp.lt.s32.totalorder (!%p139_p2), %s681_s22, 63 }
   0xb   : > { %v806_v0 = vld [vmem:[%s1038_s1 + $0x38] sm:$0xff]  ;;  %v805_v1 = vld [vmem:[%s1038_s1 + $0x30] sm:$0xff]  ;;  %v804_v2 = vld [vmem:[%s1038_s1 + $0x28] sm:$0xff]  ;;  %s1042_s22 = smov (!%p163_p3, %s681_s22), 63  ;;  %vm587_vm2 = vcmask 519168  }
   0xc   : > { %370 = vmatpush.bf16.msra.mxu0 %v806_v0  ;;  %807 = vmatpush.bf16.msra.mxu1 %v806_v0  ;;  %v803_v3 = vld [vmem:[%s1038_s1 + $0x20] sm:$0xff]  ;;  %v802_v4 = vld [vmem:[%s1038_s1 + $0x18] sm:$0xff]  ;;  %v801_v5 = vld [vmem:[%s1038_s1 + $0x10] sm:$0xff]  ;;  %s682_s29 = sshll.u32 %s1042_s22, 2 }
   0xd   : > { %808 = vmatpush.bf16.msra.mxu2 %v806_v0  ;;  %809 = vmatpush.bf16.msra.mxu3 %v806_v0  ;;  %v800_v6 = vld [vmem:[%s1038_s1 + $0x8] sm:$0xff]  ;;  %v799_v7 = vld [vmem:[%s1038_s1] sm:$0xff]  ;;  %s908_s7 = scalar_lea.vmem %s1037_s0, %s682_s29  ;;  %s938_s13 = scalar_lea.vmem %s1040_s3, %s682_s29 }
   0xe   : > { %v783_v8 = vld [vmem:[%s908_s7] sm:$0xff]  ;;  %v784_v12 = vld [vmem:[%s908_s7 + $0x8] sm:$0xff]  ;;  %v785_v16 = vld [vmem:[%s908_s7 + $0x10] sm:$0xff] }
   0xf   : > { %v787_v9 = vld [vmem:[%s908_s7 + $0x20] sm:$0xff]  ;;  %v788_v13 = vld [vmem:[%s908_s7 + $0x28] sm:$0xff]  ;;  %v789_v17 = vld [vmem:[%s908_s7 + $0x30] sm:$0xff] }
  0x10   : > { %371 = vmatpush.bf16.msra.mxu0 %v805_v1  ;;  %810 = vmatpush.bf16.msra.mxu1 %v805_v1  ;;  %v791_v10 = vld [vmem:[%s908_s7 + $0x40] sm:$0xff]  ;;  %v792_v14 = vld [vmem:[%s908_s7 + $0x48] sm:$0xff]  ;;  %v793_v18 = vld [vmem:[%s908_s7 + $0x50] sm:$0xff] }
  0x11   : > { %811 = vmatpush.bf16.msra.mxu2 %v805_v1  ;;  %812 = vmatpush.bf16.msra.mxu3 %v805_v1  ;;  %v795_v11 = vld [vmem:[%s908_s7 + $0x60] sm:$0xff]  ;;  %v796_v15 = vld [vmem:[%s908_s7 + $0x68] sm:$0xff]  ;;  %v797_v19 = vld [vmem:[%s908_s7 + $0x70] sm:$0xff] }
  0x12   : > { %v786_v20 = vld [vmem:[%s908_s7 + $0x18] sm:$0xff]  ;;  %v929_v24 = vld [vmem:[%s1039_s2] ss:$0 sm:$0xff] }
  0x13   : > { %v790_v21 = vld [vmem:[%s908_s7 + $0x38] sm:$0xff] }
  0x14   : > { %372 = vmatpush.bf16.msra.mxu0 %v804_v2  ;;  %813 = vmatpush.bf16.msra.mxu1 %v804_v2  ;;  %v794_v22 = vld [vmem:[%s908_s7 + $0x58] sm:$0xff] }
  0x15   : > { %814 = vmatpush.bf16.msra.mxu2 %v804_v2  ;;  %815 = vmatpush.bf16.msra.mxu3 %v804_v2  ;;  %v798_v23 = vld [vmem:[%s908_s7 + $0x78] sm:$0xff] }
  0x18   : > { %373 = vmatpush.bf16.msra.mxu0 %v803_v3  ;;  %816 = vmatpush.bf16.msra.mxu1 %v803_v3 }
  0x19   : > { %817 = vmatpush.bf16.msra.mxu2 %v803_v3  ;;  %818 = vmatpush.bf16.msra.mxu3 %v803_v3 }
  0x1c   : > { %374 = vmatpush.bf16.msra.mxu0 %v802_v4  ;;  %819 = vmatpush.bf16.msra.mxu1 %v802_v4 }
  0x1d   : > { %820 = vmatpush.bf16.msra.mxu2 %v802_v4  ;;  %821 = vmatpush.bf16.msra.mxu3 %v802_v4 }
  0x20   : > { %375 = vmatpush.bf16.msra.mxu0 %v801_v5  ;;  %822 = vmatpush.bf16.msra.mxu1 %v801_v5 }
  0x21   : > { %823 = vmatpush.bf16.msra.mxu2 %v801_v5  ;;  %824 = vmatpush.bf16.msra.mxu3 %v801_v5 }
  0x24   : > { %376 = vmatpush.bf16.msra.mxu0 %v800_v6  ;;  %825 = vmatpush.bf16.msra.mxu1 %v800_v6 }
  0x25   : > { %826 = vmatpush.bf16.msra.mxu2 %v800_v6  ;;  %827 = vmatpush.bf16.msra.mxu3 %v800_v6 }
  0x28   : > { %377 = vmatpush.bf16.msra.mxu0 %v799_v7  ;;  %828 = vmatpush.bf16.msra.mxu1 %v799_v7 }
  0x29   : > { %829 = vmatpush.bf16.msra.mxu2 %v799_v7  ;;  %830 = vmatpush.bf16.msra.mxu3 %v799_v7 }
  0x2b   : > { %378 = vmatmul.bf16.vlgmr.msra.gmra.mxu0 %v783_v8  ;;  %398 = vmatmul.bf16.vlgmr.msra.gmra.mxu1 %v787_v9 }
  0x2c   : > { %418 = vmatmul.bf16.vlgmr.msra.gmra.mxu2 %v791_v10  ;;  %438 = vmatmul.bf16.vlgmr.msra.gmra.mxu3 %v795_v11 }
  0x3b   : > { %383 = vmatmul.bf16.gmra.mxu0 %v784_v12  ;;  %403 = vmatmul.bf16.gmra.mxu1 %v788_v13 }
  0x3c   : > { %423 = vmatmul.bf16.gmra.mxu2 %v792_v14  ;;  %443 = vmatmul.bf16.gmra.mxu3 %v796_v15 }
  0x4b   : > { %388 = vmatmul.bf16.gmra.mxu0 %v785_v16  ;;  %408 = vmatmul.bf16.gmra.mxu1 %v789_v17 }
  0x4c   : > { %428 = vmatmul.bf16.gmra.mxu2 %v793_v18  ;;  %448 = vmatmul.bf16.gmra.mxu3 %v797_v19 }
  0x5b   : > { %393 = vmatmul.bf16.gmra.mxu0 %v786_v20  ;;  %413 = vmatmul.bf16.gmra.mxu1 %v790_v21 }
  0x5c   : > { %433 = vmatmul.bf16.gmra.mxu2 %v794_v22  ;;  %453 = vmatmul.bf16.gmra.mxu3 %v798_v23 }
  0xa8   : > { %v379_v25 = vpop.f32.mrf.mxu0  ;;  %v399_v26 = vpop.f32.mrf.mxu1 }
  0xa9   : > { %v380_v27 = vadd.f32 %v929_v24, %v379_v25  ;;  %v400_v28 = vadd.f32 %v929_v24, %v399_v26 }
  0xab   : > { %vm459_vm0 = vcmp.ge.f32.partialorder %v380_v27, 0.0  ;;  %v491_v29 = vmul.f32 0.2, %v380_v27  ;;  %vm467_vm1 = vcmp.ge.f32.partialorder %v400_v28, 0.0  ;;  %v499_v30 = vmul.f32 0.2, %v400_v28 }
  0xad   : > { %v523_v31 = vsel %vm459_vm0, %v380_v27, %v491_v29  ;;  %v531_v32 = vsel %vm467_vm1, %v400_v28, %v499_v30 }
  0xae   : > { %v555_v33 = vpack.c.bf16 %v523_v31, %v523_v31  ;;  %v563_v34 = vpack.c.bf16 %v531_v32, %v531_v32 }
  0xaf   : > { %v419_v35 = vpop.f32.mrf.mxu2  ;;  %v439_v36 = vpop.f32.mrf.mxu3 }
  0xb0   : > { %588 = vst.msk [vmem:[%s938_s13] sm:$0xf] %vm587_vm2, %v555_v33  ;;  %v420_v37 = vadd.f32 %v929_v24, %v419_v35  ;;  %v440_v38 = vadd.f32 %v929_v24, %v439_v36  ;;  %v381_v39 = vpop.f32.mrf.mxu0  ;;  %v401_v40 = vpop.f32.mrf.mxu1 }
  0xb1   : > { %596 = vst.msk [vmem:[%s938_s13 + $0x20] sm:$0xf] %vm587_vm2, %v563_v34  ;;  %v382_v41 = vadd.f32 %v929_v24, %v381_v39  ;;  %v402_v42 = vadd.f32 %v929_v24, %v401_v40 }
  0xb2   : > { %vm475_vm3 = vcmp.ge.f32.partialorder %v420_v37, 0.0  ;;  %v507_v43 = vmul.f32 0.2, %v420_v37  ;;  %vm483_vm4 = vcmp.ge.f32.partialorder %v440_v38, 0.0  ;;  %v515_v44 = vmul.f32 0.2, %v440_v38 }
  0xb3   : > { %vm460_vm5 = vcmp.ge.f32.partialorder %v382_v41, 0.0  ;;  %v492_v45 = vmul.f32 0.2, %v382_v41  ;;  %vm468_vm6 = vcmp.ge.f32.partialorder %v402_v42, 0.0  ;;  %v500_v46 = vmul.f32 0.2, %v402_v42 }
  0xb4   : > { %v539_v47 = vsel %vm475_vm3, %v420_v37, %v507_v43  ;;  %v547_v48 = vsel %vm483_vm4, %v440_v38, %v515_v44 }
  0xb5   : > { %v571_v49 = vpack.c.bf16 %v539_v47, %v539_v47  ;;  %v579_v50 = vpack.c.bf16 %v547_v48, %v547_v48  ;;  %v524_v51 = vsel %vm460_vm5, %v382_v41, %v492_v45  ;;  %v532_v52 = vsel %vm468_vm6, %v402_v42, %v500_v46 }
  0xb6   : > { %v556_v53 = vpack.c.bf16 %v524_v51, %v524_v51  ;;  %v564_v54 = vpack.c.bf16 %v532_v52, %v532_v52 }
  0xb7   : > { %604 = vst.msk [vmem:[%s938_s13 + $0x40] sm:$0xf] %vm587_vm2, %v571_v49  ;;  %v421_v55 = vpop.f32.mrf.mxu2  ;;  %v441_v56 = vpop.f32.mrf.mxu3 }
  0xb8   : > { %612 = vst.msk [vmem:[%s938_s13 + $0x60] sm:$0xf] %vm587_vm2, %v579_v50  ;;  %v422_v57 = vadd.f32 %v929_v24, %v421_v55  ;;  %v442_v58 = vadd.f32 %v929_v24, %v441_v56  ;;  %v384_v59 = vpop.f32.mrf.mxu0  ;;  %v404_v60 = vpop.f32.mrf.mxu1 }
  0xb9   : > { %589 = vst.msk [vmem:[%s938_s13 + $0x4] sm:$0xf] %vm587_vm2, %v556_v53  ;;  %v385_v61 = vadd.f32 %v929_v24, %v384_v59  ;;  %v405_v62 = vadd.f32 %v929_v24, %v404_v60 }
  0xba   : > { %597 = vst.msk [vmem:[%s938_s13 + $0x24] sm:$0xf] %vm587_vm2, %v564_v54  ;;  %vm476_vm7 = vcmp.ge.f32.partialorder %v422_v57, 0.0  ;;  %v508_v63 = vmul.f32 0.2, %v422_v57  ;;  %vm484_vm8 = vcmp.ge.f32.partialorder %v442_v58, 0.0 }
  0xbb   : > { %v516_v0 = vmul.f32 0.2, %v442_v58  ;;  %vm461_vm9 = vcmp.ge.f32.partialorder %v385_v61, 0.0  ;;  %v493_v1 = vmul.f32 0.2, %v385_v61  ;;  %vm469_vm10 = vcmp.ge.f32.partialorder %v405_v62, 0.0 }
  0xbc   : > { %v540_v2 = vsel %vm476_vm7, %v422_v57, %v508_v63  ;;  %v501_v3 = vmul.f32 0.2, %v405_v62 }
  0xbd   : > { %v572_v4 = vpack.c.bf16 %v540_v2, %v540_v2  ;;  %v548_v5 = vsel %vm484_vm8, %v442_v58, %v516_v0  ;;  %v525_v6 = vsel %vm461_vm9, %v385_v61, %v493_v1 }
  0xbe   : > { %v580_v7 = vpack.c.bf16 %v548_v5, %v548_v5  ;;  %v557_v8 = vpack.c.bf16 %v525_v6, %v525_v6  ;;  %v533_v9 = vsel %vm469_vm10, %v405_v62, %v501_v3 }
  0xbf   : > { %605 = vst.msk [vmem:[%s938_s13 + $0x44] sm:$0xf] %vm587_vm2, %v572_v4  ;;  %v565_v10 = vpack.c.bf16 %v533_v9, %v533_v9  ;;  %v424_v11 = vpop.f32.mrf.mxu2  ;;  %v444_v12 = vpop.f32.mrf.mxu3 }
  0xc0   : > { %613 = vst.msk [vmem:[%s938_s13 + $0x64] sm:$0xf] %vm587_vm2, %v580_v7  ;;  %v425_v13 = vadd.f32 %v929_v24, %v424_v11  ;;  %v445_v14 = vadd.f32 %v929_v24, %v444_v12  ;;  %v386_v15 = vpop.f32.mrf.mxu0  ;;  %v406_v16 = vpop.f32.mrf.mxu1 }
  0xc1   : > { %590 = vst.msk [vmem:[%s938_s13 + $0x8] sm:$0xf] %vm587_vm2, %v557_v8  ;;  %v387_v17 = vadd.f32 %v929_v24, %v386_v15  ;;  %v407_v18 = vadd.f32 %v929_v24, %v406_v16 }
  0xc2   : > { %598 = vst.msk [vmem:[%s938_s13 + $0x28] sm:$0xf] %vm587_vm2, %v565_v10  ;;  %vm477_vm11 = vcmp.ge.f32.partialorder %v425_v13, 0.0  ;;  %v509_v19 = vmul.f32 0.2, %v425_v13  ;;  %vm485_vm12 = vcmp.ge.f32.partialorder %v445_v14, 0.0 }
  0xc3   : > { %v517_v20 = vmul.f32 0.2, %v445_v14  ;;  %vm462_vm13 = vcmp.ge.f32.partialorder %v387_v17, 0.0  ;;  %v494_v21 = vmul.f32 0.2, %v387_v17  ;;  %vm470_vm14 = vcmp.ge.f32.partialorder %v407_v18, 0.0 }
  0xc4   : > { %v541_v22 = vsel %vm477_vm11, %v425_v13, %v509_v19  ;;  %v502_v23 = vmul.f32 0.2, %v407_v18 }
  0xc5   : > { %v573_v25 = vpack.c.bf16 %v541_v22, %v541_v22  ;;  %v549_v26 = vsel %vm485_vm12, %v445_v14, %v517_v20  ;;  %v526_v27 = vsel %vm462_vm13, %v387_v17, %v494_v21 }
  0xc6   : > { %v581_v28 = vpack.c.bf16 %v549_v26, %v549_v26  ;;  %v558_v29 = vpack.c.bf16 %v526_v27, %v526_v27  ;;  %v534_v30 = vsel %vm470_vm14, %v407_v18, %v502_v23 }
  0xc7   : > { %606 = vst.msk [vmem:[%s938_s13 + $0x48] sm:$0xf] %vm587_vm2, %v573_v25  ;;  %v566_v31 = vpack.c.bf16 %v534_v30, %v534_v30  ;;  %v426_v32 = vpop.f32.mrf.mxu2  ;;  %v446_v33 = vpop.f32.mrf.mxu3 }
  0xc8   : > { %614 = vst.msk [vmem:[%s938_s13 + $0x68] sm:$0xf] %vm587_vm2, %v581_v28  ;;  %v427_v34 = vadd.f32 %v929_v24, %v426_v32  ;;  %v447_v35 = vadd.f32 %v929_v24, %v446_v33  ;;  %v389_v36 = vpop.f32.mrf.mxu0  ;;  %v409_v37 = vpop.f32.mrf.mxu1 }
  0xc9   : > { %591 = vst.msk [vmem:[%s938_s13 + $0xc] sm:$0xf] %vm587_vm2, %v558_v29  ;;  %v390_v38 = vadd.f32 %v929_v24, %v389_v36  ;;  %v410_v39 = vadd.f32 %v929_v24, %v409_v37 }
  0xca   : > { %599 = vst.msk [vmem:[%s938_s13 + $0x2c] sm:$0xf] %vm587_vm2, %v566_v31  ;;  %vm478_vm15 = vcmp.ge.f32.partialorder %v427_v34, 0.0  ;;  %v510_v40 = vmul.f32 0.2, %v427_v34  ;;  %vm486_vm0 = vcmp.ge.f32.partialorder %v447_v35, 0.0 }
  0xcb   : > { %v518_v41 = vmul.f32 0.2, %v447_v35  ;;  %vm463_vm1 = vcmp.ge.f32.partialorder %v390_v38, 0.0  ;;  %v495_v42 = vmul.f32 0.2, %v390_v38  ;;  %vm471_vm3 = vcmp.ge.f32.partialorder %v410_v39, 0.0 }
  0xcc   : > { %v542_v43 = vsel %vm478_vm15, %v427_v34, %v510_v40  ;;  %v503_v44 = vmul.f32 0.2, %v410_v39 }
  0xcd   : > { %v574_v45 = vpack.c.bf16 %v542_v43, %v542_v43  ;;  %v550_v46 = vsel %vm486_vm0, %v447_v35, %v518_v41  ;;  %v527_v47 = vsel %vm463_vm1, %v390_v38, %v495_v42 }
  0xce   : > { %v582_v48 = vpack.c.bf16 %v550_v46, %v550_v46  ;;  %v559_v49 = vpack.c.bf16 %v527_v47, %v527_v47  ;;  %v535_v50 = vsel %vm471_vm3, %v410_v39, %v503_v44 }
  0xcf   : > { %607 = vst.msk [vmem:[%s938_s13 + $0x4c] sm:$0xf] %vm587_vm2, %v574_v45  ;;  %v567_v51 = vpack.c.bf16 %v535_v50, %v535_v50  ;;  %v429_v52 = vpop.f32.mrf.mxu2  ;;  %v449_v53 = vpop.f32.mrf.mxu3 }
  0xd0   : > { %615 = vst.msk [vmem:[%s938_s13 + $0x6c] sm:$0xf] %vm587_vm2, %v582_v48  ;;  %v430_v54 = vadd.f32 %v929_v24, %v429_v52  ;;  %v450_v55 = vadd.f32 %v929_v24, %v449_v53  ;;  %v391_v56 = vpop.f32.mrf.mxu0  ;;  %v411_v57 = vpop.f32.mrf.mxu1 }
  0xd1   : > { %592 = vst.msk [vmem:[%s938_s13 + $0x10] sm:$0xf] %vm587_vm2, %v559_v49  ;;  %v392_v58 = vadd.f32 %v929_v24, %v391_v56  ;;  %v412_v59 = vadd.f32 %v929_v24, %v411_v57 }
  0xd2   : > { %600 = vst.msk [vmem:[%s938_s13 + $0x30] sm:$0xf] %vm587_vm2, %v567_v51  ;;  %vm479_vm4 = vcmp.ge.f32.partialorder %v430_v54, 0.0  ;;  %v511_v60 = vmul.f32 0.2, %v430_v54  ;;  %vm487_vm5 = vcmp.ge.f32.partialorder %v450_v55, 0.0 }
  0xd3   : > { %v519_v61 = vmul.f32 0.2, %v450_v55  ;;  %vm464_vm6 = vcmp.ge.f32.partialorder %v392_v58, 0.0  ;;  %v496_v62 = vmul.f32 0.2, %v392_v58  ;;  %vm472_vm7 = vcmp.ge.f32.partialorder %v412_v59, 0.0 }
  0xd4   : > { %v543_v63 = vsel %vm479_vm4, %v430_v54, %v511_v60  ;;  %v504_v0 = vmul.f32 0.2, %v412_v59 }
  0xd5   : > { %v575_v1 = vpack.c.bf16 %v543_v63, %v543_v63  ;;  %v551_v2 = vsel %vm487_vm5, %v450_v55, %v519_v61  ;;  %v528_v3 = vsel %vm464_vm6, %v392_v58, %v496_v62 }
  0xd6   : > { %v583_v4 = vpack.c.bf16 %v551_v2, %v551_v2  ;;  %v560_v5 = vpack.c.bf16 %v528_v3, %v528_v3  ;;  %v536_v6 = vsel %vm472_vm7, %v412_v59, %v504_v0 }
  0xd7   : > { %608 = vst.msk [vmem:[%s938_s13 + $0x50] sm:$0xf] %vm587_vm2, %v575_v1  ;;  %v568_v7 = vpack.c.bf16 %v536_v6, %v536_v6  ;;  %v431_v8 = vpop.f32.mrf.mxu2  ;;  %v451_v9 = vpop.f32.mrf.mxu3 }
  0xd8   : > { %616 = vst.msk [vmem:[%s938_s13 + $0x70] sm:$0xf] %vm587_vm2, %v583_v4  ;;  %v432_v10 = vadd.f32 %v929_v24, %v431_v8  ;;  %v452_v11 = vadd.f32 %v929_v24, %v451_v9  ;;  %v394_v12 = vpop.f32.mrf.mxu0  ;;  %v414_v13 = vpop.f32.mrf.mxu1 }
  0xd9   : > { %593 = vst.msk [vmem:[%s938_s13 + $0x14] sm:$0xf] %vm587_vm2, %v560_v5  ;;  %v395_v14 = vadd.f32 %v929_v24, %v394_v12  ;;  %v415_v15 = vadd.f32 %v929_v24, %v414_v13 }
  0xda   : > { %601 = vst.msk [vmem:[%s938_s13 + $0x34] sm:$0xf] %vm587_vm2, %v568_v7  ;;  %vm480_vm8 = vcmp.ge.f32.partialorder %v432_v10, 0.0  ;;  %v512_v16 = vmul.f32 0.2, %v432_v10  ;;  %vm488_vm9 = vcmp.ge.f32.partialorder %v452_v11, 0.0 }
  0xdb   : > { %v520_v17 = vmul.f32 0.2, %v452_v11  ;;  %vm465_vm10 = vcmp.ge.f32.partialorder %v395_v14, 0.0  ;;  %v497_v18 = vmul.f32 0.2, %v395_v14  ;;  %vm473_vm11 = vcmp.ge.f32.partialorder %v415_v15, 0.0 }
  0xdc   : > { %v544_v19 = vsel %vm480_vm8, %v432_v10, %v512_v16  ;;  %v505_v20 = vmul.f32 0.2, %v415_v15 }
  0xdd   : > { %v576_v21 = vpack.c.bf16 %v544_v19, %v544_v19  ;;  %v552_v22 = vsel %vm488_vm9, %v452_v11, %v520_v17  ;;  %v529_v23 = vsel %vm465_vm10, %v395_v14, %v497_v18 }
  0xde   : > { %v584_v25 = vpack.c.bf16 %v552_v22, %v552_v22  ;;  %v561_v26 = vpack.c.bf16 %v529_v23, %v529_v23  ;;  %v537_v27 = vsel %vm473_vm11, %v415_v15, %v505_v20 }
  0xdf   : > { %609 = vst.msk [vmem:[%s938_s13 + $0x54] sm:$0xf] %vm587_vm2, %v576_v21  ;;  %v569_v28 = vpack.c.bf16 %v537_v27, %v537_v27  ;;  %v434_v29 = vpop.f32.mrf.mxu2  ;;  %v454_v30 = vpop.f32.mrf.mxu3 }
  0xe0   : > { %617 = vst.msk [vmem:[%s938_s13 + $0x74] sm:$0xf] %vm587_vm2, %v584_v25  ;;  %v435_v31 = vadd.f32 %v929_v24, %v434_v29  ;;  %v455_v32 = vadd.f32 %v929_v24, %v454_v30  ;;  %v396_v33 = vpop.f32.mrf.mxu0  ;;  %v416_v34 = vpop.f32.mrf.mxu1 }
  0xe1   : > { %594 = vst.msk [vmem:[%s938_s13 + $0x18] sm:$0xf] %vm587_vm2, %v561_v26  ;;  %v397_v35 = vadd.f32 %v929_v24, %v396_v33  ;;  %v417_v36 = vadd.f32 %v929_v24, %v416_v34 }
  0xe2   : > { %602 = vst.msk [vmem:[%s938_s13 + $0x38] sm:$0xf] %vm587_vm2, %v569_v28  ;;  %vm481_vm12 = vcmp.ge.f32.partialorder %v435_v31, 0.0  ;;  %v513_v37 = vmul.f32 0.2, %v435_v31  ;;  %vm489_vm13 = vcmp.ge.f32.partialorder %v455_v32, 0.0 }
  0xe3   : > { %v521_v38 = vmul.f32 0.2, %v455_v32  ;;  %vm466_vm14 = vcmp.ge.f32.partialorder %v397_v35, 0.0  ;;  %v498_v39 = vmul.f32 0.2, %v397_v35  ;;  %vm474_vm15 = vcmp.ge.f32.partialorder %v417_v36, 0.0 }
  0xe4   : > { %v545_v40 = vsel %vm481_vm12, %v435_v31, %v513_v37  ;;  %v506_v41 = vmul.f32 0.2, %v417_v36 }
  0xe5   : > { %v577_v42 = vpack.c.bf16 %v545_v40, %v545_v40  ;;  %v553_v43 = vsel %vm489_vm13, %v455_v32, %v521_v38  ;;  %v530_v44 = vsel %vm466_vm14, %v397_v35, %v498_v39 }
  0xe6   : > { %v585_v45 = vpack.c.bf16 %v553_v43, %v553_v43  ;;  %v562_v46 = vpack.c.bf16 %v530_v44, %v530_v44  ;;  %v538_v47 = vsel %vm474_vm15, %v417_v36, %v506_v41 }
  0xe7   : > { %610 = vst.msk [vmem:[%s938_s13 + $0x58] sm:$0xf] %vm587_vm2, %v577_v42  ;;  %v570_v48 = vpack.c.bf16 %v538_v47, %v538_v47  ;;  %v436_v49 = vpop.f32.mrf.mxu2  ;;  %v456_v50 = vpop.f32.mrf.mxu3 }
  0xe8   : > { %618 = vst.msk [vmem:[%s938_s13 + $0x78] sm:$0xf] %vm587_vm2, %v585_v45  ;;  %v437_v51 = vadd.f32 %v929_v24, %v436_v49  ;;  %v457_v52 = vadd.f32 %v929_v24, %v456_v50 }
  0xe9   : > { %595 = vst.msk [vmem:[%s938_s13 + $0x1c] sm:$0xf] %vm587_vm2, %v562_v46 }
  0xea   : > { %603 = vst.msk [vmem:[%s938_s13 + $0x3c] sm:$0xf] %vm587_vm2, %v570_v48  ;;  %vm482_vm0 = vcmp.ge.f32.partialorder %v437_v51, 0.0  ;;  %v514_v53 = vmul.f32 0.2, %v437_v51  ;;  %vm490_vm1 = vcmp.ge.f32.partialorder %v457_v52, 0.0 }
  0xeb   : > { %v522_v54 = vmul.f32 0.2, %v457_v52 }
  0xec   : > { %v546_v55 = vsel %vm482_vm0, %v437_v51, %v514_v53 }
  0xed   : > { %v578_v56 = vpack.c.bf16 %v546_v55, %v546_v55  ;;  %v554_v57 = vsel %vm490_vm1, %v457_v52, %v522_v54 }
  0xee   : > { %v586_v58 = vpack.c.bf16 %v554_v57, %v554_v57 }
  0xef   : > { %611 = vst.msk [vmem:[%s938_s13 + $0x5c] sm:$0xf] %vm587_vm2, %v578_v56 }
  0xf0   : > { %619 = vst.msk [vmem:[%s938_s13 + $0x7c] sm:$0xf] %vm587_vm2, %v586_v58 }
  0xf1 PF: > { %s13_s12 = sadd.s32 1, %s846_s12  }
  0xf2   : > { %p10_p4 = scmp.ge.s32.totalorder %s13_s12, 4  }
  0xf4   :  { %12 = sbr.rel (!%p10_p4) target bundleno = 1 (0x1), region = 62 }

// kernel: _lambda_.6
= control target key start
LH: loop header
LB: loop body
LE: loop exit
PB: predicated region body
PF: predicated region fallthrough
CT: control target
= control target key end

     0   :  { %s3022_s1 = inlined_call_operand.vmem [shape: bf16[1024,128], index: 1, kind: input, shape index: {}]   ;;  %s3023_s2 = inlined_call_operand.vmem [shape: f32[1,128], index: 2, kind: input, shape index: {}]   ;;  %s3024_s0 = inlined_call_operand.vmem [shape: bf16[128,1024], index: 0, kind: input, shape index: {}]   ;;  %s3025_s3 = inlined_call_operand.vmem [shape: bf16[128,128], index: 3, kind: output, shape index: {}]  }
   0x1   :  { %v2106_v0 = vld [vmem:[%s3022_s1 + $0x38] sm:$0xff]  ;;  %v2105_v4 = vld [vmem:[%s3022_s1 + $0x30] sm:$0xff]  ;;  %v2104_v8 = vld [vmem:[%s3022_s1 + $0x28] sm:$0xff] }
   0x2   :  { %v2114_v1 = vld [vmem:[%s3022_s1 + $0x78] sm:$0xff]  ;;  %914 = vmatpush.bf16.msra.mxu0 %v2106_v0  ;;  %v2113_v5 = vld [vmem:[%s3022_s1 + $0x70] sm:$0xff]  ;;  %v2112_v9 = vld [vmem:[%s3022_s1 + $0x68] sm:$0xff] }
   0x3   :  { %v2122_v2 = vld [vmem:[%s3022_s1 + $0xb8] sm:$0xff]  ;;  %963 = vmatpush.bf16.msra.mxu1 %v2114_v1  ;;  %v2121_v6 = vld [vmem:[%s3022_s1 + $0xb0] sm:$0xff]  ;;  %v2120_v10 = vld [vmem:[%s3022_s1 + $0xa8] sm:$0xff] }
   0x4   :  { %v2130_v3 = vld [vmem:[%s3022_s1 + $0xf8] sm:$0xff]  ;;  %1012 = vmatpush.bf16.msra.mxu2 %v2122_v2  ;;  %v2129_v7 = vld [vmem:[%s3022_s1 + $0xf0] sm:$0xff]  ;;  %v2128_v11 = vld [vmem:[%s3022_s1 + $0xe8] sm:$0xff] }
   0x5   :  { %1061 = vmatpush.bf16.msra.mxu3 %v2130_v3  ;;  %v2103_v12 = vld [vmem:[%s3022_s1 + $0x20] sm:$0xff]  ;;  %v2102_v16 = vld [vmem:[%s3022_s1 + $0x18] sm:$0xff]  ;;  %v2101_v20 = vld [vmem:[%s3022_s1 + $0x10] sm:$0xff] }
   0x6   :  { %915 = vmatpush.bf16.msra.mxu0 %v2105_v4  ;;  %v2111_v13 = vld [vmem:[%s3022_s1 + $0x60] sm:$0xff]  ;;  %v2110_v17 = vld [vmem:[%s3022_s1 + $0x58] sm:$0xff]  ;;  %v2109_v21 = vld [vmem:[%s3022_s1 + $0x50] sm:$0xff] }
   0x7   :  { %964 = vmatpush.bf16.msra.mxu1 %v2113_v5  ;;  %v2119_v14 = vld [vmem:[%s3022_s1 + $0xa0] sm:$0xff]  ;;  %v2118_v18 = vld [vmem:[%s3022_s1 + $0x98] sm:$0xff]  ;;  %v2117_v22 = vld [vmem:[%s3022_s1 + $0x90] sm:$0xff] }
   0x8   :  { %1013 = vmatpush.bf16.msra.mxu2 %v2121_v6  ;;  %v2127_v15 = vld [vmem:[%s3022_s1 + $0xe0] sm:$0xff]  ;;  %v2126_v19 = vld [vmem:[%s3022_s1 + $0xd8] sm:$0xff]  ;;  %v2125_v23 = vld [vmem:[%s3022_s1 + $0xd0] sm:$0xff] }
   0x9   :  { %1062 = vmatpush.bf16.msra.mxu3 %v2129_v7  ;;  %v2100_v24 = vld [vmem:[%s3022_s1 + $0x8] sm:$0xff]  ;;  %v2099_v28 = vld [vmem:[%s3022_s1] sm:$0xff]  ;;  %v2154_v40 = vld [vmem:[%s3022_s1 + $0x1b8] sm:$0xff] }
   0xa   :  { %916 = vmatpush.bf16.msra.mxu0 %v2104_v8  ;;  %v2108_v25 = vld [vmem:[%s3022_s1 + $0x48] sm:$0xff]  ;;  %v2107_v29 = vld [vmem:[%s3022_s1 + $0x40] sm:$0xff]  ;;  %v2138_v41 = vld [vmem:[%s3022_s1 + $0x138] sm:$0xff] }
   0xb   :  { %965 = vmatpush.bf16.msra.mxu1 %v2112_v9  ;;  %v2116_v26 = vld [vmem:[%s3022_s1 + $0x88] sm:$0xff]  ;;  %v2115_v30 = vld [vmem:[%s3022_s1 + $0x80] sm:$0xff]  ;;  %v2162_v46 = vld [vmem:[%s3022_s1 + $0x1f8] sm:$0xff] }
   0xc   :  { %1014 = vmatpush.bf16.msra.mxu2 %v2120_v10  ;;  %v2124_v27 = vld [vmem:[%s3022_s1 + $0xc8] sm:$0xff]  ;;  %v2123_v31 = vld [vmem:[%s3022_s1 + $0xc0] sm:$0xff]  ;;  %v2146_v47 = vld [vmem:[%s3022_s1 + $0x178] sm:$0xff] }
   0xd   :  { %1063 = vmatpush.bf16.msra.mxu3 %v2128_v11  ;;  %v1525_v32 = vld [vmem:[%s3024_s0] sm:$0xf]  ;;  %v2035_v34 = vld [vmem:[%s3024_s0 + $0x4] sm:$0xf]  ;;  %v1533_v36 = vld [vmem:[%s3024_s0 + $0x8] sm:$0xf] }
   0xe   :  { %917 = vmatpush.bf16.msra.mxu0 %v2103_v12  ;;  %v2039_v33 = vld [vmem:[%s3024_s0 + $0x1c] sm:$0xf0]  ;;  %v1527_v35 = vld [vmem:[%s3024_s0 + $0x20] sm:$0xf0]  ;;  %v2040_v37 = vld [vmem:[%s3024_s0 + $0x24] sm:$0xf0] }
   0xf   :  { %966 = vmatpush.bf16.msra.mxu1 %v2111_v13  ;;  %v2036_v38 = vld [vmem:[%s3024_s0 + $0xc] sm:$0xf]  ;;  %v1526_v42 = vor.u32 %v2039_v33, %v1525_v32  ;;  %v1530_v43 = vor.u32 %v2035_v34, %v1527_v35  ;;  %v1534_v44 = vor.u32 %v2040_v37, %v1533_v36  ;;  %v2153_v48 = vld [vmem:[%s3022_s1 + $0x1b0] sm:$0xff]  ;;  %v1557_v56 = vld [vmem:[%s3024_s0 + $0x40] sm:$0xf] }
  0x10   :  { %1015 = vmatpush.bf16.msra.mxu2 %v2119_v14  ;;  %v1535_v39 = vld [vmem:[%s3024_s0 + $0x28] sm:$0xf0]  ;;  %v2137_v49 = vld [vmem:[%s3022_s1 + $0x130] sm:$0xff]  ;;  %v2047_v57 = vld [vmem:[%s3024_s0 + $0x5c] sm:$0xf0] }
  0x11   :  { %1064 = vmatpush.bf16.msra.mxu3 %v2127_v15  ;;  %v1538_v45 = vor.u32 %v2036_v38, %v1535_v39  ;;  %v2161_v50 = vld [vmem:[%s3022_s1 + $0x1f0] sm:$0xff]  ;;  %v2152_v52 = vld [vmem:[%s3022_s1 + $0x1a8] sm:$0xff]  ;;  %v2043_v58 = vld [vmem:[%s3024_s0 + $0x44] sm:$0xf]  ;;  %v1558_v0 = vor.u32 %v2047_v57, %v1557_v56 }
  0x12   :  { %918 = vmatpush.bf16.msra.mxu0 %v2102_v16  ;;  %v2145_v51 = vld [vmem:[%s3022_s1 + $0x170] sm:$0xff]  ;;  %v2136_v53 = vld [vmem:[%s3022_s1 + $0x128] sm:$0xff]  ;;  %v1559_v59 = vld [vmem:[%s3024_s0 + $0x60] sm:$0xf0] }
  0x13   :  { %967 = vmatpush.bf16.msra.mxu1 %v2110_v17  ;;  %v2160_v54 = vld [vmem:[%s3022_s1 + $0x1e8] sm:$0xff]  ;;  %v1562_v1 = vor.u32 %v2043_v58, %v1559_v59  ;;  %v2151_v4 = vld [vmem:[%s3022_s1 + $0x1a0] sm:$0xff]  ;;  %v2149_v36 = vld [vmem:[%s3022_s1 + $0x190] sm:$0xff] }
  0x14   :  { %1016 = vmatpush.bf16.msra.mxu2 %v2118_v18  ;;  %v2144_v55 = vld [vmem:[%s3022_s1 + $0x168] sm:$0xff]  ;;  %v2135_v5 = vld [vmem:[%s3022_s1 + $0x120] sm:$0xff]  ;;  %v2133_v37 = vld [vmem:[%s3022_s1 + $0x110] sm:$0xff] }
  0x15   :  { %1065 = vmatpush.bf16.msra.mxu3 %v2126_v19  ;;  %v1565_v60 = vld [vmem:[%s3024_s0 + $0x48] sm:$0xf]  ;;  %v2044_v62 = vld [vmem:[%s3024_s0 + $0x4c] sm:$0xf]  ;;  %v2159_v6 = vld [vmem:[%s3022_s1 + $0x1e0] sm:$0xff] }
  0x16   :  { %919 = vmatpush.bf16.msra.mxu0 %v2101_v20  ;;  %v2048_v61 = vld [vmem:[%s3024_s0 + $0x64] sm:$0xf0]  ;;  %v1567_v63 = vld [vmem:[%s3024_s0 + $0x68] sm:$0xf0]  ;;  %v2143_v7 = vld [vmem:[%s3022_s1 + $0x160] sm:$0xff] }
  0x17   :  { %968 = vmatpush.bf16.msra.mxu1 %v2109_v21  ;;  %v1566_v2 = vor.u32 %v2048_v61, %v1565_v60  ;;  %v1570_v3 = vor.u32 %v2044_v62, %v1567_v63  ;;  %v1589_v8 = vld [vmem:[%s3024_s0 + $0x80] sm:$0xf]  ;;  %v2051_v10 = vld [vmem:[%s3024_s0 + $0x84] sm:$0xf]  ;;  %v1597_v12 = vld [vmem:[%s3024_s0 + $0x88] sm:$0xf] }
  0x18   :  { %1017 = vmatpush.bf16.msra.mxu2 %v2117_v22  ;;  %v2055_v9 = vld [vmem:[%s3024_s0 + $0x9c] sm:$0xf0]  ;;  %v1591_v11 = vld [vmem:[%s3024_s0 + $0xa0] sm:$0xf0]  ;;  %v2056_v13 = vld [vmem:[%s3024_s0 + $0xa4] sm:$0xf0] }
  0x19   :  { %1066 = vmatpush.bf16.msra.mxu3 %v2125_v23  ;;  %v2052_v14 = vld [vmem:[%s3024_s0 + $0x8c] sm:$0xf]  ;;  %v1590_v16 = vor.u32 %v2055_v9, %v1589_v8  ;;  %v1594_v17 = vor.u32 %v2051_v10, %v1591_v11  ;;  %v1598_v18 = vor.u32 %v2056_v13, %v1597_v12  ;;  %v2150_v20 = vld [vmem:[%s3022_s1 + $0x198] sm:$0xff]  ;;  %v2157_v38 = vld [vmem:[%s3022_s1 + $0x1d0] sm:$0xff] }
  0x1a   :  { %920 = vmatpush.bf16.msra.mxu0 %v2100_v24  ;;  %v1599_v15 = vld [vmem:[%s3024_s0 + $0xa8] sm:$0xf0]  ;;  %v2134_v21 = vld [vmem:[%s3022_s1 + $0x118] sm:$0xff]  ;;  %v1621_v24 = vld [vmem:[%s3024_s0 + $0xc0] sm:$0xf] }
  0x1b   :  { %969 = vmatpush.bf16.msra.mxu1 %v2108_v25  ;;  %v1602_v19 = vor.u32 %v2052_v14, %v1599_v15  ;;  %v2158_v22 = vld [vmem:[%s3022_s1 + $0x1d8] sm:$0xff]  ;;  %v2063_v25 = vld [vmem:[%s3024_s0 + $0xdc] sm:$0xf0]  ;;  %v2141_v39 = vld [vmem:[%s3022_s1 + $0x150] sm:$0xff] }
  0x1c   :  { %1018 = vmatpush.bf16.msra.mxu2 %v2116_v26  ;;  %v2142_v23 = vld [vmem:[%s3022_s1 + $0x158] sm:$0xff]  ;;  %v2059_v26 = vld [vmem:[%s3024_s0 + $0xc4] sm:$0xf]  ;;  %v1622_v32 = vor.u32 %v2063_v25, %v1621_v24  ;;  %v1685_v56 = vld [vmem:[%s3024_s0 + $0x140] sm:$0xf] }
  0x1d   :  { %1067 = vmatpush.bf16.msra.mxu3 %v2124_v27  ;;  %v1623_v27 = vld [vmem:[%s3024_s0 + $0xe0] sm:$0xf0]  ;;  %v2079_v57 = vld [vmem:[%s3024_s0 + $0x15c] sm:$0xf0]  ;;  %v1693_v60 = vld [vmem:[%s3024_s0 + $0x148] sm:$0xf] }
  0x1e   :  { %921 = vmatpush.bf16.msra.mxu0 %v2099_v28  ;;  %v1629_v28 = vld [vmem:[%s3024_s0 + $0xc8] sm:$0xf]  ;;  %v1626_v33 = vor.u32 %v2059_v26, %v1623_v27  ;;  %v2075_v58 = vld [vmem:[%s3024_s0 + $0x144] sm:$0xf]  ;;  %v2076_v62 = vld [vmem:[%s3024_s0 + $0x14c] sm:$0xf] }
  0x1f   :  { %970 = vmatpush.bf16.msra.mxu1 %v2107_v29  ;;  %v2064_v29 = vld [vmem:[%s3024_s0 + $0xe4] sm:$0xf0]  ;;  %v1687_v59 = vld [vmem:[%s3024_s0 + $0x160] sm:$0xf0]  ;;  %v1695_v63 = vld [vmem:[%s3024_s0 + $0x168] sm:$0xf0] }
  0x20   :  { %1019 = vmatpush.bf16.msra.mxu2 %v2115_v30  ;;  %v2060_v30 = vld [vmem:[%s3024_s0 + $0xcc] sm:$0xf]  ;;  %v1630_v34 = vor.u32 %v2064_v29, %v1629_v28  ;;  %v2080_v61 = vld [vmem:[%s3024_s0 + $0x164] sm:$0xf0]  ;;  %v1717_v8 = vld [vmem:[%s3024_s0 + $0x180] sm:$0xf] }
  0x21   :  { %1068 = vmatpush.bf16.msra.mxu3 %v2123_v31  ;;  %922 = vmatmul.bf16.vlgmr.msra.gmra.mxu0 %v1526_v42  ;;  %v1631_v31 = vld [vmem:[%s3024_s0 + $0xe8] sm:$0xf0]  ;;  %v2067_v42 = vld [vmem:[%s3024_s0 + $0x104] sm:$0xf]  ;;  %v2087_v9 = vld [vmem:[%s3024_s0 + $0x19c] sm:$0xf0] }
  0x22   :  { %1110 = vmatpush.bf16.msrb.mxu0 %v2138_v41  ;;  %971 = vmatmul.bf16.vlgmr.msra.gmra.mxu1 %v1530_v43  ;;  %v1634_v35 = vor.u32 %v2060_v30, %v1631_v31  ;;  %v2071_v41 = vld [vmem:[%s3024_s0 + $0x11c] sm:$0xf0]  ;;  %v1655_v43 = vld [vmem:[%s3024_s0 + $0x120] sm:$0xf0]  ;;  %v1725_v12 = vld [vmem:[%s3024_s0 + $0x188] sm:$0xf] }
  0x23   :  { %1020 = vmatmul.bf16.vlgmr.msra.gmra.mxu2 %v1534_v44  ;;  %1159 = vmatpush.bf16.msrb.mxu1 %v2146_v47  ;;  %v1661_v44 = vld [vmem:[%s3024_s0 + $0x108] sm:$0xf]  ;;  %v1663_v47 = vld [vmem:[%s3024_s0 + $0x128] sm:$0xf0]  ;;  %v2083_v10 = vld [vmem:[%s3024_s0 + $0x184] sm:$0xf] }
  0x24   :  { %1208 = vmatpush.bf16.msrb.mxu2 %v2154_v40  ;;  %1069 = vmatmul.bf16.vlgmr.msra.gmra.mxu3 %v1538_v45  ;;  %v1653_v40 = vld [vmem:[%s3024_s0 + $0x100] sm:$0xf]  ;;  %v2072_v45 = vld [vmem:[%s3024_s0 + $0x124] sm:$0xf0]  ;;  %v1719_v11 = vld [vmem:[%s3024_s0 + $0x1a0] sm:$0xf0] }
  0x25   :  { %1257 = vmatpush.bf16.msrb.mxu3 %v2162_v46  ;;  %v2068_v46 = vld [vmem:[%s3024_s0 + $0x10c] sm:$0xf]  ;;  %v2088_v13 = vld [vmem:[%s3024_s0 + $0x1a4] sm:$0xf0] }
  0x26   :  { %1111 = vmatpush.bf16.msrb.mxu0 %v2137_v49  ;;  %v1658_v49 = vor.u32 %v2067_v42, %v1655_v43  ;;  %v2084_v14 = vld [vmem:[%s3024_s0 + $0x18c] sm:$0xf]  ;;  %v1757_v24 = vld [vmem:[%s3024_s0 + $0x1c8] sm:$0xf] }
  0x27   :  { %1160 = vmatpush.bf16.msrb.mxu1 %v2145_v51  ;;  %v1666_v51 = vor.u32 %v2068_v46, %v1663_v47  ;;  %v1727_v15 = vld [vmem:[%s3024_s0 + $0x1a8] sm:$0xf0]  ;;  %v2096_v25 = vld [vmem:[%s3024_s0 + $0x1e4] sm:$0xf0] }
  0x28   :  { %1209 = vmatpush.bf16.msrb.mxu2 %v2153_v48  ;;  %v1654_v48 = vor.u32 %v2071_v41, %v1653_v40  ;;  %v2092_v26 = vld [vmem:[%s3024_s0 + $0x1cc] sm:$0xf]  ;;  %v1758_v30 = vor.u32 %v2096_v25, %v1757_v24  ;;  %v1551_v40 = vld [vmem:[%s3024_s0 + $0x38] sm:$0xf0]  ;;  %v1607_v24 = vld [vmem:[%s3024_s0 + $0xb0] sm:$0xf0] }
  0x29   :  { %1258 = vmatpush.bf16.msrb.mxu3 %v2161_v50  ;;  %v1662_v50 = vor.u32 %v2072_v45, %v1661_v44  ;;  %v1759_v27 = vld [vmem:[%s3024_s0 + $0x1e8] sm:$0xf0]  ;;  %v1613_v25 = vld [vmem:[%s3024_s0 + $0x98] sm:$0xf] }
  0x2a   :  { %1112 = vmatpush.bf16.msrb.mxu0 %v2136_v53  ;;  %v2132_v53 = vld [vmem:[%s3022_s1 + $0x108] sm:$0xff]  ;;  %v1762_v31 = vor.u32 %v2092_v26, %v1759_v27  ;;  %v2058_v26 = vld [vmem:[%s3024_s0 + $0xb4] sm:$0xf0]  ;;  %v2054_v27 = vld [vmem:[%s3024_s0 + $0x9c] sm:$0xf] }
  0x2b   :  { %1161 = vmatpush.bf16.msrb.mxu1 %v2144_v55  ;;  %v2140_v55 = vld [vmem:[%s3022_s1 + $0x148] sm:$0xff] }
  0x2c   :  { %1210 = vmatpush.bf16.msrb.mxu2 %v2152_v52  ;;  %v2148_v52 = vld [vmem:[%s3022_s1 + $0x188] sm:$0xff] }
  0x2d   :  { %1259 = vmatpush.bf16.msrb.mxu3 %v2160_v54  ;;  %v2156_v54 = vld [vmem:[%s3022_s1 + $0x1c8] sm:$0xff] }
  0x2e   :  { %1113 = vmatpush.bf16.msrb.mxu0 %v2135_v5  ;;  %v2131_v5 = vld [vmem:[%s3022_s1 + $0x100] sm:$0xff] }
  0x2f   :  { %1162 = vmatpush.bf16.msrb.mxu1 %v2143_v7  ;;  %v2139_v7 = vld [vmem:[%s3022_s1 + $0x140] sm:$0xff] }
  0x30   :  { %1211 = vmatpush.bf16.msrb.mxu2 %v2151_v4  ;;  %v2147_v4 = vld [vmem:[%s3022_s1 + $0x180] sm:$0xff] }
  0x31   :  { %927 = vmatmul.bf16.gmra.mxu0 %v1558_v0  ;;  %1260 = vmatpush.bf16.msrb.mxu3 %v2159_v6  ;;  %v1686_v0 = vor.u32 %v2079_v57, %v1685_v56  ;;  %v2155_v6 = vld [vmem:[%s3022_s1 + $0x1c0] sm:$0xff]  ;;  %v1573_v57 = vld [vmem:[%s3024_s0 + $0x50] sm:$0xf] }
  0x32   :  { %976 = vmatmul.bf16.gmra.mxu1 %v1562_v1  ;;  %1114 = vmatpush.bf16.msrb.mxu0 %v2134_v21  ;;  %v1690_v1 = vor.u32 %v2075_v58, %v1687_v59  ;;  %v2095_v21 = vld [vmem:[%s3024_s0 + $0x1dc] sm:$0xf0]  ;;  %v2049_v58 = vld [vmem:[%s3024_s0 + $0x6c] sm:$0xf0]  ;;  %v2045_v59 = vld [vmem:[%s3024_s0 + $0x54] sm:$0xf] }
  0x33   :  { %1025 = vmatmul.bf16.gmra.mxu2 %v1566_v2  ;;  %1163 = vmatpush.bf16.msrb.mxu1 %v2142_v23  ;;  %v1694_v2 = vor.u32 %v2080_v61, %v1693_v60  ;;  %v1751_v23 = vld [vmem:[%s3024_s0 + $0x1e0] sm:$0xf0]  ;;  %v1575_v60 = vld [vmem:[%s3024_s0 + $0x70] sm:$0xf0]  ;;  %v1581_v61 = vld [vmem:[%s3024_s0 + $0x58] sm:$0xf] }
  0x34   :  { %1074 = vmatmul.bf16.gmra.mxu3 %v1570_v3  ;;  %1212 = vmatpush.bf16.msrb.mxu2 %v2150_v20  ;;  %v1698_v3 = vor.u32 %v2076_v62, %v1695_v63  ;;  %v1749_v20 = vld [vmem:[%s3024_s0 + $0x1c0] sm:$0xf]  ;;  %v2050_v62 = vld [vmem:[%s3024_s0 + $0x74] sm:$0xf0]  ;;  %v2046_v63 = vld [vmem:[%s3024_s0 + $0x5c] sm:$0xf] }
  0x35   :  { %1261 = vmatpush.bf16.msrb.mxu3 %v2158_v22  ;;  %v2091_v22 = vld [vmem:[%s3024_s0 + $0x1c4] sm:$0xf]  ;;  %v1750_v28 = vor.u32 %v2095_v21, %v1749_v20  ;;  %v1605_v21 = vld [vmem:[%s3024_s0 + $0x90] sm:$0xf] }
  0x36   :  { %1115 = vmatpush.bf16.msrb.mxu0 %v2133_v37  ;;  %v1754_v29 = vor.u32 %v2091_v22, %v1751_v23  ;;  %v1549_v37 = vld [vmem:[%s3024_s0 + $0x18] sm:$0xf]  ;;  %v2057_v22 = vld [vmem:[%s3024_s0 + $0xac] sm:$0xf0]  ;;  %v2053_v23 = vld [vmem:[%s3024_s0 + $0x94] sm:$0xf] }
  0x37   :  { %1164 = vmatpush.bf16.msrb.mxu1 %v2141_v39  ;;  %v2038_v39 = vld [vmem:[%s3024_s0 + $0x1c] sm:$0xf] }
  0x38   :  { %1213 = vmatpush.bf16.msrb.mxu2 %v2149_v36  ;;  %v1543_v36 = vld [vmem:[%s3024_s0 + $0x30] sm:$0xf0]  ;;  %v1554_v46 = vor.u32 %v2038_v39, %v1551_v40 }
  0x39   :  { %1262 = vmatpush.bf16.msrb.mxu3 %v2157_v38  ;;  %v2042_v38 = vld [vmem:[%s3024_s0 + $0x34] sm:$0xf0] }
  0x3a   :  { %1116 = vmatpush.bf16.msrb.mxu0 %v2132_v53  ;;  %v1550_v45 = vor.u32 %v2042_v38, %v1549_v37  ;;  %v1614_v37 = vor.u32 %v2058_v26, %v1613_v25 }
  0x3b   :  { %1165 = vmatpush.bf16.msrb.mxu1 %v2140_v55 }
  0x3c   :  { %1214 = vmatpush.bf16.msrb.mxu2 %v2148_v52 }
  0x3d   :  { %1263 = vmatpush.bf16.msrb.mxu3 %v2156_v54 }
  0x3e   :  { %1117 = vmatpush.bf16.msrb.mxu0 %v2131_v5 }
  0x3f   :  { %1166 = vmatpush.bf16.msrb.mxu1 %v2139_v7 }
  0x40   :  { %1215 = vmatpush.bf16.msrb.mxu2 %v2147_v4  ;;  %v1578_v4 = vor.u32 %v2045_v59, %v1575_v60 }
  0x41   :  { %932 = vmatmul.bf16.gmra.mxu0 %v1590_v16  ;;  %1264 = vmatpush.bf16.msrb.mxu3 %v2155_v6  ;;  %v1718_v16 = vor.u32 %v2087_v9, %v1717_v8  ;;  %v1582_v8 = vor.u32 %v2050_v62, %v1581_v61 }
  0x42   :  { %981 = vmatmul.bf16.gmra.mxu1 %v1594_v17  ;;  %v1722_v17 = vor.u32 %v2083_v10, %v1719_v11 }
  0x43   :  { %1030 = vmatmul.bf16.gmra.mxu2 %v1598_v18  ;;  %v1726_v18 = vor.u32 %v2088_v13, %v1725_v12 }
  0x44   :  { %1079 = vmatmul.bf16.gmra.mxu3 %v1602_v19  ;;  %v1730_v19 = vor.u32 %v2084_v14, %v1727_v15 }
  0x51   :  { %937 = vmatmul.bf16.gmra.mxu0 %v1622_v32  ;;  %v2626_v32 = vld [vmem:[%s3023_s2] ss:$0 sm:$0xff] }
  0x52   :  { %986 = vmatmul.bf16.gmra.mxu1 %v1626_v33  ;;  %v1541_v33 = vld [vmem:[%s3024_s0 + $0x10] sm:$0xf] }
  0x53   :  { %1035 = vmatmul.bf16.gmra.mxu2 %v1630_v34  ;;  %v2041_v34 = vld [vmem:[%s3024_s0 + $0x2c] sm:$0xf0] }
  0x54   :  { %1084 = vmatmul.bf16.gmra.mxu3 %v1634_v35  ;;  %v2037_v35 = vld [vmem:[%s3024_s0 + $0x14] sm:$0xf]  ;;  %v1542_v41 = vor.u32 %v2041_v34, %v1541_v33  ;;  %v1610_v33 = vor.u32 %v2053_v23, %v1607_v24  ;;  %v2070_v23 = vld [vmem:[%s3024_s0 + $0x11c] sm:$0xf] }
  0x55   :  { %v1546_v42 = vor.u32 %v2037_v35, %v1543_v36  ;;  %v1679_v24 = vld [vmem:[%s3024_s0 + $0x138] sm:$0xf0] }
  0x61   :  { %942 = vmatmul.bf16.gmra.mxu0 %v1654_v48 }
  0x62   :  { %991 = vmatmul.bf16.gmra.mxu1 %v1658_v49 }
  0x63   :  { %1040 = vmatmul.bf16.gmra.mxu2 %v1662_v50 }
  0x64   :  { %1089 = vmatmul.bf16.gmra.mxu3 %v1666_v51 }
  0x71   :  { %947 = vmatmul.bf16.gmra.mxu0 %v1686_v0  ;;  %v1583_v0 = vld [vmem:[%s3024_s0 + $0x78] sm:$0xf0] }
  0x72   :  { %996 = vmatmul.bf16.gmra.mxu1 %v1690_v1  ;;  %v1586_v9 = vor.u32 %v2046_v63, %v1583_v0 }
  0x73   :  { %1045 = vmatmul.bf16.gmra.mxu2 %v1694_v2 }
  0x74   :  { %1094 = vmatmul.bf16.gmra.mxu3 %v1698_v3  ;;  %v1574_v3 = vor.u32 %v2049_v58, %v1573_v57  ;;  %v2062_v57 = vld [vmem:[%s3024_s0 + $0xdc] sm:$0xf] }
  0x75   :  { %v1647_v58 = vld [vmem:[%s3024_s0 + $0xf8] sm:$0xf0] }
  0x81   :  { %952 = vmatmul.bf16.gmra.mxu0 %v1718_v16 }
  0x82   :  { %1001 = vmatmul.bf16.gmra.mxu1 %v1722_v17 }
  0x83   :  { %1050 = vmatmul.bf16.gmra.mxu2 %v1726_v18 }
  0x84   :  { %1099 = vmatmul.bf16.gmra.mxu3 %v1730_v19 }
  0x91   :  { %957 = vmatmul.bf16.gmra.mxu0 %v1750_v28  ;;  %v1615_v28 = vld [vmem:[%s3024_s0 + $0xb8] sm:$0xf0] }
  0x92   :  { %1006 = vmatmul.bf16.gmra.mxu1 %v1754_v29  ;;  %v1618_v38 = vor.u32 %v2054_v27, %v1615_v28 }
  0x93   :  { %1055 = vmatmul.bf16.gmra.mxu2 %v1758_v30 }
  0x94   :  { %1104 = vmatmul.bf16.gmra.mxu3 %v1762_v31  ;;  %v1606_v31 = vor.u32 %v2057_v22, %v1605_v21  ;;  %v1677_v21 = vld [vmem:[%s3024_s0 + $0x118] sm:$0xf] }
  0x95   :  { %v2074_v22 = vld [vmem:[%s3024_s0 + $0x134] sm:$0xf0] }
  0x9e   :  { %v923_v43 = vpop.f32.mrf.mxu0 }
  0x9f   :  { %v972_v44 = vpop.f32.mrf.mxu1  ;;  %v924_v47 = vadd.f32 %v2626_v32, %v923_v43 }
  0xa1   :  { %v973_v48 = vadd.f32 %v972_v44, %v924_v47  ;;  %1118 = vmatmul.bf16.vlgmr.msrb.gmra.mxu0 %v1542_v41 }
  0xa2   :  { %1167 = vmatmul.bf16.vlgmr.msrb.gmra.mxu1 %v1546_v42 }
  0xa3   :  { %1216 = vmatmul.bf16.vlgmr.msrb.gmra.mxu2 %v1550_v45 }
  0xa4   :  { %1265 = vmatmul.bf16.vlgmr.msrb.gmra.mxu3 %v1554_v46 }
  0xa6   :  { %v1021_v49 = vpop.f32.mrf.mxu2  ;;  %v925_v52 = vpop.f32.mrf.mxu0 }
  0xa7   :  { %v1070_v50 = vpop.f32.mrf.mxu3  ;;  %v1022_v51 = vadd.f32 %v1021_v49, %v973_v48  ;;  %v974_v53 = vpop.f32.mrf.mxu1  ;;  %v926_v54 = vadd.f32 %v2626_v32, %v925_v52  ;;  %v2061_v52 = vld [vmem:[%s3024_s0 + $0xd4] sm:$0xf] }
  0xa9   :  { %v2654_v55 = vadd.f32 %v1070_v50, %v1022_v51  ;;  %v975_v56 = vadd.f32 %v974_v53, %v926_v54  ;;  %v1637_v50 = vld [vmem:[%s3024_s0 + $0xd0] sm:$0xf]  ;;  %v1639_v53 = vld [vmem:[%s3024_s0 + $0xf0] sm:$0xf0]  ;;  %v1645_v54 = vld [vmem:[%s3024_s0 + $0xd8] sm:$0xf] }
  0xaa   :  { %v2065_v51 = vld [vmem:[%s3024_s0 + $0xec] sm:$0xf0]  ;;  %v1642_v62 = vor.u32 %v2061_v52, %v1639_v53  ;;  %v1709_v52 = vld [vmem:[%s3024_s0 + $0x158] sm:$0xf] }
  0xab   :  { %v1638_v61 = vor.u32 %v2065_v51, %v1637_v50  ;;  %v2077_v50 = vld [vmem:[%s3024_s0 + $0x154] sm:$0xf]  ;;  %v2082_v53 = vld [vmem:[%s3024_s0 + $0x174] sm:$0xf0] }
  0xac   :  { %v1703_v51 = vld [vmem:[%s3024_s0 + $0x170] sm:$0xf0] }
  0xae   :  { %v1023_v1 = vpop.f32.mrf.mxu2  ;;  %v928_v6 = vpop.f32.mrf.mxu0 }
  0xaf   :  { %v1072_v2 = vpop.f32.mrf.mxu3  ;;  %v1024_v5 = vadd.f32 %v1023_v1, %v975_v56  ;;  %v977_v7 = vpop.f32.mrf.mxu1  ;;  %v929_v10 = vadd.f32 %v2626_v32, %v928_v6  ;;  %v2066_v56 = vld [vmem:[%s3024_s0 + $0xf4] sm:$0xf0] }
  0xb1   :  { %v2681_v11 = vadd.f32 %v1072_v2, %v1024_v5  ;;  %v978_v12 = vadd.f32 %v977_v7, %v929_v10  ;;  %1123 = vmatmul.bf16.gmra.mxu0 %v1574_v3  ;;  %v1646_v2 = vor.u32 %v2066_v56, %v1645_v54  ;;  %v1650_v3 = vor.u32 %v2062_v57, %v1647_v58  ;;  %v2078_v54 = vld [vmem:[%s3024_s0 + $0x15c] sm:$0xf] }
  0xb2   :  { %1172 = vmatmul.bf16.gmra.mxu1 %v1578_v4  ;;  %v1711_v56 = vld [vmem:[%s3024_s0 + $0x178] sm:$0xf0] }
  0xb3   :  { %1221 = vmatmul.bf16.gmra.mxu2 %v1582_v8 }
  0xb4   :  { %1270 = vmatmul.bf16.gmra.mxu3 %v1586_v9 }
  0xb6   :  { %v1026_v13 = vpop.f32.mrf.mxu2  ;;  %v930_v16 = vpop.f32.mrf.mxu0 }
  0xb7   :  { %v1075_v14 = vpop.f32.mrf.mxu3  ;;  %v1027_v15 = vadd.f32 %v1026_v13, %v978_v12  ;;  %v979_v17 = vpop.f32.mrf.mxu1  ;;  %v931_v18 = vadd.f32 %v2626_v32, %v930_v16  ;;  %v1669_v16 = vld [vmem:[%s3024_s0 + $0x110] sm:$0xf] }
  0xb9   :  { %v2684_v19 = vadd.f32 %v1075_v14, %v1027_v15  ;;  %v980_v20 = vadd.f32 %v979_v17, %v931_v18  ;;  %v2073_v17 = vld [vmem:[%s3024_s0 + $0x12c] sm:$0xf0]  ;;  %v2069_v18 = vld [vmem:[%s3024_s0 + $0x114] sm:$0xf] }
  0xba   :  { %v1670_v27 = vor.u32 %v2073_v17, %v1669_v16  ;;  %v1733_v16 = vld [vmem:[%s3024_s0 + $0x190] sm:$0xf] }
  0xbb   :  { %v2089_v17 = vld [vmem:[%s3024_s0 + $0x1ac] sm:$0xf0] }
  0xbe   :  { %v1028_v29 = vpop.f32.mrf.mxu2  ;;  %v933_v35 = vpop.f32.mrf.mxu0 }
  0xbf   :  { %v1077_v30 = vpop.f32.mrf.mxu3  ;;  %v1029_v34 = vadd.f32 %v1028_v29, %v980_v20  ;;  %v982_v36 = vpop.f32.mrf.mxu1  ;;  %v934_v39 = vadd.f32 %v2626_v32, %v933_v35  ;;  %v1671_v20 = vld [vmem:[%s3024_s0 + $0x130] sm:$0xf0] }
  0xc0   :  { %v1674_v28 = vor.u32 %v2069_v18, %v1671_v20  ;;  %v2085_v18 = vld [vmem:[%s3024_s0 + $0x194] sm:$0xf] }
  0xc1   :  { %v2711_v40 = vadd.f32 %v1077_v30, %v1029_v34  ;;  %v983_v41 = vadd.f32 %v982_v36, %v934_v39  ;;  %1128 = vmatmul.bf16.gmra.mxu0 %v1606_v31  ;;  %v1682_v34 = vor.u32 %v2070_v23, %v1679_v24  ;;  %v1735_v20 = vld [vmem:[%s3024_s0 + $0x1b0] sm:$0xf0]  ;;  %v2086_v23 = vld [vmem:[%s3024_s0 + $0x19c] sm:$0xf] }
  0xc2   :  { %1177 = vmatmul.bf16.gmra.mxu1 %v1610_v33  ;;  %v1678_v33 = vor.u32 %v2074_v22, %v1677_v21  ;;  %v1741_v21 = vld [vmem:[%s3024_s0 + $0x198] sm:$0xf]  ;;  %v1743_v24 = vld [vmem:[%s3024_s0 + $0x1b8] sm:$0xf0] }
  0xc3   :  { %1226 = vmatmul.bf16.gmra.mxu2 %v1614_v37  ;;  %v2090_v22 = vld [vmem:[%s3024_s0 + $0x1b4] sm:$0xf0] }
  0xc4   :  { %1275 = vmatmul.bf16.gmra.mxu3 %v1618_v38 }
  0xc6   :  { %v1031_v42 = vpop.f32.mrf.mxu2  ;;  %v935_v45 = vpop.f32.mrf.mxu0 }
  0xc7   :  { %v1080_v43 = vpop.f32.mrf.mxu3  ;;  %v1032_v44 = vadd.f32 %v1031_v42, %v983_v41  ;;  %v984_v46 = vpop.f32.mrf.mxu1  ;;  %v936_v47 = vadd.f32 %v2626_v32, %v935_v45 }
  0xc9   :  { %v2714_v48 = vadd.f32 %v1080_v43, %v1032_v44  ;;  %v985_v49 = vadd.f32 %v984_v46, %v936_v47  ;;  %v1701_v47 = vld [vmem:[%s3024_s0 + $0x150] sm:$0xf] }
  0xce   :  { %v1033_v59 = vpop.f32.mrf.mxu2  ;;  %v938_v0 = vpop.f32.mrf.mxu0 }
  0xcf   :  { %v1082_v60 = vpop.f32.mrf.mxu3  ;;  %v1034_v63 = vadd.f32 %v1033_v59, %v985_v49  ;;  %v987_v1 = vpop.f32.mrf.mxu1  ;;  %v939_v4 = vadd.f32 %v2626_v32, %v938_v0  ;;  %v2081_v49 = vld [vmem:[%s3024_s0 + $0x16c] sm:$0xf0]  ;;  %v1710_v0 = vor.u32 %v2082_v53, %v1709_v52  ;;  %v2093_v52 = vld [vmem:[%s3024_s0 + $0x1d4] sm:$0xf] }
  0xd0   :  { %v1702_v59 = vor.u32 %v2081_v49, %v1701_v47  ;;  %v1767_v53 = vld [vmem:[%s3024_s0 + $0x1f0] sm:$0xf0] }
  0xd1   :  { %v2741_v5 = vadd.f32 %v1082_v60, %v1034_v63  ;;  %v988_v6 = vadd.f32 %v987_v1, %v939_v4  ;;  %1133 = vmatmul.bf16.gmra.mxu0 %v1638_v61  ;;  %v1706_v60 = vor.u32 %v2077_v50, %v1703_v51  ;;  %v1714_v1 = vor.u32 %v2078_v54, %v1711_v56  ;;  %v1765_v50 = vld [vmem:[%s3024_s0 + $0x1d0] sm:$0xf]  ;;  %v1773_v54 = vld [vmem:[%s3024_s0 + $0x1d8] sm:$0xf] }
  0xd2   :  { %1182 = vmatmul.bf16.gmra.mxu1 %v1642_v62  ;;  %v2097_v51 = vld [vmem:[%s3024_s0 + $0x1ec] sm:$0xf0]  ;;  %v2098_v56 = vld [vmem:[%s3024_s0 + $0x1f4] sm:$0xf0] }
  0xd3   :  { %1231 = vmatmul.bf16.gmra.mxu2 %v1646_v2 }
  0xd4   :  { %1280 = vmatmul.bf16.gmra.mxu3 %v1650_v3 }
  0xd6   :  { %v1036_v7 = vpop.f32.mrf.mxu2  ;;  %v940_v10 = vpop.f32.mrf.mxu0 }
  0xd7   :  { %v1085_v8 = vpop.f32.mrf.mxu3  ;;  %v1037_v9 = vadd.f32 %v1036_v7, %v988_v6  ;;  %v989_v12 = vpop.f32.mrf.mxu1  ;;  %v941_v13 = vadd.f32 %v2626_v32, %v940_v10 }
  0xd9   :  { %v2744_v14 = vadd.f32 %v1085_v8, %v1037_v9  ;;  %v990_v15 = vadd.f32 %v989_v12, %v941_v13 }
  0xde   :  { %v1038_v25 = vpop.f32.mrf.mxu2  ;;  %v943_v30 = vpop.f32.mrf.mxu0 }
  0xdf   :  { %v1087_v26 = vpop.f32.mrf.mxu3  ;;  %v1039_v29 = vadd.f32 %v1038_v25, %v990_v15  ;;  %v992_v31 = vpop.f32.mrf.mxu1  ;;  %v944_v35 = vadd.f32 %v2626_v32, %v943_v30 }
  0xe1   :  { %v2771_v36 = vadd.f32 %v1087_v26, %v1039_v29  ;;  %v993_v37 = vadd.f32 %v992_v31, %v944_v35  ;;  %1138 = vmatmul.bf16.gmra.mxu0 %v1670_v27  ;;  %v1734_v27 = vor.u32 %v2089_v17, %v1733_v16 }
  0xe2   :  { %1187 = vmatmul.bf16.gmra.mxu1 %v1674_v28  ;;  %v1738_v28 = vor.u32 %v2085_v18, %v1735_v20 }
  0xe3   :  { %1236 = vmatmul.bf16.gmra.mxu2 %v1678_v33  ;;  %v1742_v33 = vor.u32 %v2090_v22, %v1741_v21 }
  0xe4   :  { %1285 = vmatmul.bf16.gmra.mxu3 %v1682_v34  ;;  %v1746_v34 = vor.u32 %v2086_v23, %v1743_v24 }
  0xe6   :  { %v1041_v38 = vpop.f32.mrf.mxu2  ;;  %v945_v42 = vpop.f32.mrf.mxu0 }
  0xe7   :  { %v1090_v39 = vpop.f32.mrf.mxu3  ;;  %v1042_v41 = vadd.f32 %v1041_v38, %v993_v37  ;;  %v994_v43 = vpop.f32.mrf.mxu1  ;;  %v946_v44 = vadd.f32 %v2626_v32, %v945_v42 }
  0xe9   :  { %v2774_v45 = vadd.f32 %v1090_v39, %v1042_v41  ;;  %v995_v46 = vadd.f32 %v994_v43, %v946_v44 }
  0xee   :  { %v1043_v57 = vpop.f32.mrf.mxu2  ;;  %v948_v62 = vpop.f32.mrf.mxu0 }
  0xef   :  { %v1092_v58 = vpop.f32.mrf.mxu3  ;;  %v1044_v61 = vadd.f32 %v1043_v57, %v995_v46  ;;  %v997_v63 = vpop.f32.mrf.mxu1  ;;  %v949_v2 = vadd.f32 %v2626_v32, %v948_v62  ;;  %v2094_v57 = vld [vmem:[%s3024_s0 + $0x1dc] sm:$0xf]  ;;  %v1770_v62 = vor.u32 %v2093_v52, %v1767_v53 }
  0xf1   :  { %v2801_v3 = vadd.f32 %v1092_v58, %v1044_v61  ;;  %v998_v4 = vadd.f32 %v997_v63, %v949_v2  ;;  %1143 = vmatmul.bf16.gmra.mxu0 %v1702_v59  ;;  %v1775_v58 = vld [vmem:[%s3024_s0 + $0x1f8] sm:$0xf0]  ;;  %v1766_v61 = vor.u32 %v2097_v51, %v1765_v50  ;;  %v1774_v2 = vor.u32 %v2098_v56, %v1773_v54 }
  0xf2   :  { %1192 = vmatmul.bf16.gmra.mxu1 %v1706_v60 }
  0xf3   :  { %1241 = vmatmul.bf16.gmra.mxu2 %v1710_v0 }
  0xf4   :  { %1290 = vmatmul.bf16.gmra.mxu3 %v1714_v1 }
  0xf6   :  { %v1046_v6 = vpop.f32.mrf.mxu2  ;;  %v950_v9 = vpop.f32.mrf.mxu0 }
  0xf7   :  { %v1095_v7 = vpop.f32.mrf.mxu3  ;;  %v1047_v8 = vadd.f32 %v1046_v6, %v998_v4  ;;  %v999_v10 = vpop.f32.mrf.mxu1  ;;  %v951_v12 = vadd.f32 %v2626_v32, %v950_v9  ;;  %v1778_v4 = vor.u32 %v2094_v57, %v1775_v58 }
  0xf9   :  { %v2804_v13 = vadd.f32 %v1095_v7, %v1047_v8  ;;  %v1000_v15 = vadd.f32 %v999_v10, %v951_v12 }
  0xfe   :  { %v1048_v25 = vpop.f32.mrf.mxu2  ;;  %v953_v30 = vpop.f32.mrf.mxu0 }
  0xff   :  { %v1097_v26 = vpop.f32.mrf.mxu3  ;;  %v1049_v29 = vadd.f32 %v1048_v25, %v1000_v15  ;;  %v1002_v31 = vpop.f32.mrf.mxu1  ;;  %v954_v35 = vadd.f32 %v2626_v32, %v953_v30 }
 0x101   :  { %v2831_v37 = vadd.f32 %v1097_v26, %v1049_v29  ;;  %v1003_v38 = vadd.f32 %v1002_v31, %v954_v35  ;;  %1148 = vmatmul.bf16.gmra.mxu0 %v1734_v27 }
 0x102   :  { %1197 = vmatmul.bf16.gmra.mxu1 %v1738_v28 }
 0x103   :  { %1246 = vmatmul.bf16.gmra.mxu2 %v1742_v33 }
 0x104   :  { %1295 = vmatmul.bf16.gmra.mxu3 %v1746_v34 }
 0x106   :  { %v1051_v39 = vpop.f32.mrf.mxu2  ;;  %v955_v43 = vpop.f32.mrf.mxu0 }
 0x107   :  { %v1100_v41 = vpop.f32.mrf.mxu3  ;;  %v1052_v42 = vadd.f32 %v1051_v39, %v1003_v38  ;;  %v1004_v44 = vpop.f32.mrf.mxu1  ;;  %v956_v46 = vadd.f32 %v2626_v32, %v955_v43 }
 0x109   :  { %v2834_v47 = vadd.f32 %v1100_v41, %v1052_v42  ;;  %v1005_v49 = vadd.f32 %v1004_v44, %v956_v46 }
 0x10e   :  { %v1053_v59 = vpop.f32.mrf.mxu2  ;;  %v958_v0 = vpop.f32.mrf.mxu0 }
 0x10f   :  { %v1102_v60 = vpop.f32.mrf.mxu3  ;;  %v1054_v63 = vadd.f32 %v1053_v59, %v1005_v49  ;;  %v1007_v1 = vpop.f32.mrf.mxu1  ;;  %v959_v6 = vadd.f32 %v2626_v32, %v958_v0 }
 0x111   :  { %v2861_v7 = vadd.f32 %v1102_v60, %v1054_v63  ;;  %v1008_v8 = vadd.f32 %v1007_v1, %v959_v6  ;;  %1153 = vmatmul.bf16.gmra.mxu0 %v1766_v61 }
 0x112   :  { %1202 = vmatmul.bf16.gmra.mxu1 %v1770_v62 }
 0x113   :  { %1251 = vmatmul.bf16.gmra.mxu2 %v1774_v2 }
 0x114   :  { %1300 = vmatmul.bf16.gmra.mxu3 %v1778_v4 }
 0x116   :  { %v1056_v9 = vpop.f32.mrf.mxu2  ;;  %v960_v15 = vpop.f32.mrf.mxu0 }
 0x117   :  { %v1105_v10 = vpop.f32.mrf.mxu3  ;;  %v1057_v12 = vadd.f32 %v1056_v9, %v1008_v8  ;;  %v1009_v16 = vpop.f32.mrf.mxu1  ;;  %v961_v17 = vadd.f32 %v2626_v32, %v960_v15 }
 0x119   :  { %v2864_v18 = vadd.f32 %v1105_v10, %v1057_v12  ;;  %v1010_v20 = vadd.f32 %v1009_v16, %v961_v17 }
 0x11e   :  { %v1058_v21 = vpop.f32.mrf.mxu2  ;;  %v1119_v24 = vpop.f32.mrf.mxu0 }
 0x11f   :  { %v1107_v22 = vpop.f32.mrf.mxu3  ;;  %v1059_v23 = vadd.f32 %v1058_v21, %v1010_v20  ;;  %v1168_v25 = vpop.f32.mrf.mxu1  ;;  %v1120_v29 = vadd.f32 %v1119_v24, %v2654_v55 }
 0x121   :  { %v2866_v26 = vadd.f32 %v1107_v22, %v1059_v23  ;;  %v1169_v34 = vadd.f32 %v1168_v25, %v1120_v29  ;;  %v2218_v29 = vmov 64.0  }
 0x122   :  { %2212 = vrcp.f32 %v2218_v29 }
 0x126   :  { %v1217_v27 = vpop.f32.mrf.mxu2  ;;  %v1121_v30 = vpop.f32.mrf.mxu0 }
 0x127   :  { %v1266_v28 = vpop.f32.mrf.mxu3  ;;  %v1170_v31 = vpop.f32.mrf.mxu1  ;;  %v1122_v33 = vadd.f32 %v1121_v30, %v2681_v11  ;;  %v1218_v32 = vadd.f32 %v1217_v27, %v1169_v34 }
 0x129   :  { %v1171_v35 = vadd.f32 %v1170_v31, %v1122_v33  ;;  %v2870_v44 = vadd.f32 %v1266_v28, %v1218_v32 }
 0x12e   :  { %v1219_v38 = vpop.f32.mrf.mxu2  ;;  %v1124_v42 = vpop.f32.mrf.mxu0 }
 0x12f   :  { %v1268_v39 = vpop.f32.mrf.mxu3  ;;  %v1220_v41 = vadd.f32 %v1219_v38, %v1171_v35  ;;  %v1173_v43 = vpop.f32.mrf.mxu1  ;;  %v1125_v49 = vadd.f32 %v1124_v42, %v2684_v19 }
 0x130   :  { %v2213_v38 = vpop.eup %2212 }
 0x131   :  { %v2872_v46 = vadd.f32 %v1268_v39, %v1220_v41  ;;  %v1174_v50 = vadd.f32 %v1173_v43, %v1125_v49  ;;  %v1333_v49 = vmul.f32 64.0, %v2213_v38  ;;  %vm1337_vm0 = vweird.f32 %v2213_v38 }
 0x133   :  { %v1306_v55 = vadd.f32 %v2872_v46, %v2870_v44 }
 0x136   :  { %v1222_v51 = vpop.f32.mrf.mxu2  ;;  %v1126_v53 = vpop.f32.mrf.mxu0 }
 0x137   :  { %v1271_v11 = vpop.f32.mrf.mxu3  ;;  %v1223_v52 = vadd.f32 %v1222_v51, %v1174_v50  ;;  %v1175_v54 = vpop.f32.mrf.mxu1  ;;  %v1127_v57 = vadd.f32 %v1126_v53, %v2711_v40 }
 0x139   :  { %v2877_v56 = vadd.f32 %v1271_v11, %v1223_v52  ;;  %v1176_v59 = vadd.f32 %v1175_v54, %v1127_v57  ;;  %v1334_v11 = vsub.f32 1.0, %v1333_v49 }
 0x13b   :  { %v1307_v58 = vadd.f32 %v1306_v55, %v2877_v56  ;;  %v1335_v54 = vmul.f32 %v2213_v38, %v1334_v11 }
 0x13e   :  { %v1224_v60 = vpop.f32.mrf.mxu2  ;;  %v1129_v19 = vpop.f32.mrf.mxu0 }
 0x13f   :  { %v1273_v61 = vpop.f32.mrf.mxu3  ;;  %v1225_v62 = vadd.f32 %v1224_v60, %v1176_v59  ;;  %v1178_v63 = vpop.f32.mrf.mxu1  ;;  %v1130_v1 = vadd.f32 %v1129_v19, %v2714_v48  ;;  %v1336_v19 = vadd.f32 %v2213_v38, %v1335_v54 }
 0x141   :  { %v2881_v0 = vadd.f32 %v1273_v61, %v1225_v62  ;;  %v1179_v4 = vadd.f32 %v1178_v63, %v1130_v1 }
 0x143   :  { %v1308_v2 = vadd.f32 %v1307_v58, %v2881_v0 }
 0x146   :  { %v1227_v6 = vpop.f32.mrf.mxu2  ;;  %v1131_v10 = vpop.f32.mrf.mxu0 }
 0x147   :  { %v1276_v8 = vpop.f32.mrf.mxu3  ;;  %v1228_v9 = vadd.f32 %v1227_v6, %v1179_v4  ;;  %v1180_v40 = vpop.f32.mrf.mxu1  ;;  %v1132_v15 = vadd.f32 %v1131_v10, %v2741_v5  ;;  %v2893_v6 = vsel %vm1337_vm0, %v2213_v38, %v1336_v19 }
 0x149   :  { %v2885_v12 = vadd.f32 %v1276_v8, %v1228_v9  ;;  %v1181_v17 = vadd.f32 %v1180_v40, %v1132_v15 }
 0x14b   :  { %v1309_v16 = vadd.f32 %v1308_v2, %v2885_v12 }
 0x14e   :  { %v1229_v20 = vpop.f32.mrf.mxu2  ;;  %v1134_v23 = vpop.f32.mrf.mxu0 }
 0x14f   :  { %v1278_v21 = vpop.f32.mrf.mxu3  ;;  %v1230_v22 = vadd.f32 %v1229_v20, %v1181_v17  ;;  %v1183_v48 = vpop.f32.mrf.mxu1  ;;  %v1135_v25 = vadd.f32 %v1134_v23, %v2744_v14 }
 0x151   :  { %v1279_v24 = vadd.f32 %v1278_v21, %v1230_v22  ;;  %v1184_v28 = vadd.f32 %v1183_v48, %v1135_v25 }
 0x153   :  { %v1310_v27 = vadd.f32 %v1309_v16, %v1279_v24 }
 0x156   :  { %v1232_v30 = vpop.f32.mrf.mxu2  ;;  %v1136_v34 = vpop.f32.mrf.mxu0 }
 0x157   :  { %v1281_v31 = vpop.f32.mrf.mxu3  ;;  %v1233_v33 = vadd.f32 %v1232_v30, %v1184_v28  ;;  %v1185_v5 = vpop.f32.mrf.mxu1  ;;  %v1137_v35 = vadd.f32 %v1136_v34, %v2771_v36 }
 0x159   :  { %v1282_v32 = vadd.f32 %v1281_v31, %v1233_v33  ;;  %v1186_v41 = vadd.f32 %v1185_v5, %v1137_v35 }
 0x15b   :  { %v1311_v39 = vadd.f32 %v1310_v27, %v1282_v32 }
 0x15e   :  { %v1234_v42 = vpop.f32.mrf.mxu2  ;;  %v1139_v14 = vpop.f32.mrf.mxu0 }
 0x15f   :  { %v1283_v43 = vpop.f32.mrf.mxu3  ;;  %v1235_v55 = vadd.f32 %v1234_v42, %v1186_v41  ;;  %v1188_v50 = vpop.f32.mrf.mxu1  ;;  %v1140_v1 = vadd.f32 %v1139_v14, %v2774_v45 }
 0x161   :  { %v1284_v51 = vadd.f32 %v1283_v43, %v1235_v55  ;;  %v1189_v40 = vadd.f32 %v1188_v50, %v1140_v1 }
 0x163   :  { %v1312_v52 = vadd.f32 %v1311_v39, %v1284_v51 }
 0x165   :  { %v1313_v53 = vrot.slane %v1312_v52, 4 }
 0x166   :  { %v1237_v57 = vpop.f32.mrf.mxu2  ;;  %v1141_v60 = vpop.f32.mrf.mxu0 }
 0x167   :  { %v1286_v58 = vpop.f32.mrf.mxu3  ;;  %v1314_v59 = vadd.f32 %v1313_v53, %v1312_v52  ;;  %v1190_v61 = vpop.f32.mrf.mxu1  ;;  %v1142_v62 = vadd.f32 %v1141_v60, %v2801_v3  ;;  %v1238_v21 = vadd.f32 %v1237_v57, %v1189_v40 }
 0x169   :  { %v1315_v36 = vrot.slane %v1314_v59, 2  ;;  %v1191_v4 = vadd.f32 %v1190_v61, %v1142_v62 }
 0x16b   :  { %v1316_v63 = vadd.f32 %v1315_v36, %v1314_v59 }
 0x16d   :  { %v1317_v2 = vrot.slane %v1316_v63, 1 }
 0x16e   :  { %v1239_v8 = vpop.f32.mrf.mxu2  ;;  %v1144_v16 = vpop.f32.mrf.mxu0 }
 0x16f   :  { %v1288_v9 = vpop.f32.mrf.mxu3  ;;  %v1318_v10 = vadd.f32 %v1317_v2, %v1316_v63  ;;  %v1240_v15 = vadd.f32 %v1239_v8, %v1191_v4  ;;  %v1193_v17 = vpop.f32.mrf.mxu1  ;;  %v1145_v3 = vadd.f32 %v1144_v16, %v2804_v13 }
 0x171   :  { %v1339_v20 = vmul.f32 %v2893_v6, %v1318_v10  ;;  %v2897_v22 = vadd.f32 %v1288_v9, %v1240_v15  ;;  %v1194_v30 = vadd.f32 %v1193_v17, %v1145_v3 }
 0x173   :  { %v2900_v45 = vsub.f32 %v2870_v44, %v1339_v20  ;;  %v2903_v23 = vsub.f32 %v2872_v46, %v1339_v20  ;;  %v2906_v48 = vsub.f32 %v2877_v56, %v1339_v20  ;;  %v2909_v25 = vsub.f32 %v2881_v0, %v1339_v20 }
 0x174   :  { %v2912_v27 = vsub.f32 %v2885_v12, %v1339_v20  ;;  %v2914_v28 = vsub.f32 %v1279_v24, %v1339_v20  ;;  %v2916_v13 = vsub.f32 %v1282_v32, %v1339_v20  ;;  %v2918_v29 = vsub.f32 %v1284_v51, %v1339_v20 }
 0x175   :  { %v1357_v44 = vmul.f32 %v2900_v45, %v2900_v45  ;;  %v1358_v46 = vmul.f32 %v2903_v23, %v2903_v23  ;;  %v2924_v56 = vadd.f32 %v1286_v58, %v1238_v21  ;;  %v1359_v12 = vmul.f32 %v2906_v48, %v2906_v48 }
 0x176   :  { %v1242_v0 = vpop.f32.mrf.mxu2  ;;  %v1146_v5 = vpop.f32.mrf.mxu0  ;;  %v1360_v35 = vmul.f32 %v2909_v25, %v2909_v25  ;;  %v1361_v42 = vmul.f32 %v2912_v27, %v2912_v27  ;;  %v1362_v55 = vmul.f32 %v2914_v28, %v2914_v28  ;;  %v1363_v52 = vmul.f32 %v2916_v13, %v2916_v13 }
 0x177   :  { %v1291_v31 = vpop.f32.mrf.mxu3  ;;  %v1373_v24 = vadd.f32 %v1358_v46, %v1357_v44  ;;  %v1319_v33 = vadd.f32 %v2897_v22, %v2924_v56  ;;  %v1243_v34 = vadd.f32 %v1242_v0, %v1194_v30  ;;  %v1195_v32 = vpop.f32.mrf.mxu1  ;;  %v1147_v41 = vadd.f32 %v1146_v5, %v2831_v37 }
 0x178   :  { %v1364_v58 = vmul.f32 %v2918_v29, %v2918_v29 }
 0x179   :  { %v1374_v38 = vadd.f32 %v1373_v24, %v1359_v12  ;;  %v2932_v39 = vadd.f32 %v1291_v31, %v1243_v34  ;;  %v1196_v50 = vadd.f32 %v1195_v32, %v1147_v41 }
 0x17b   :  { %v1375_v43 = vadd.f32 %v1374_v38, %v1360_v35  ;;  %v1320_v49 = vadd.f32 %v1319_v33, %v2932_v39 }
 0x17d   :  { %v1376_v14 = vadd.f32 %v1375_v43, %v1361_v42 }
 0x17e   :  { %v1244_v51 = vpop.f32.mrf.mxu2  ;;  %v1149_v57 = vpop.f32.mrf.mxu0 }
 0x17f   :  { %v1293_v11 = vpop.f32.mrf.mxu3  ;;  %v1377_v53 = vadd.f32 %v1376_v14, %v1362_v55  ;;  %v1245_v54 = vadd.f32 %v1244_v51, %v1196_v50  ;;  %v1198_v37 = vpop.f32.mrf.mxu1  ;;  %v1150_v61 = vadd.f32 %v1149_v57, %v2834_v47 }
 0x181   :  { %v1378_v59 = vadd.f32 %v1377_v53, %v1363_v52  ;;  %v2944_v60 = vadd.f32 %v1293_v11, %v1245_v54  ;;  %v1199_v63 = vadd.f32 %v1198_v37, %v1150_v61 }
 0x183   :  { %v1379_v36 = vadd.f32 %v1378_v59, %v1364_v58  ;;  %v1321_v62 = vadd.f32 %v1320_v49, %v2944_v60 }
 0x185   :  { %v1380_v19 = vrot.slane %v1379_v36, 4 }
 0x186   :  { %v1247_v1 = vpop.f32.mrf.mxu2  ;;  %v1151_v9 = vpop.f32.mrf.mxu0 }
 0x187   :  { %v1296_v2 = vpop.f32.mrf.mxu3  ;;  %v1381_v4 = vadd.f32 %v1380_v19, %v1379_v36  ;;  %v1248_v8 = vadd.f32 %v1247_v1, %v1199_v63  ;;  %v1200_v10 = vpop.f32.mrf.mxu1  ;;  %v1152_v16 = vadd.f32 %v1151_v9, %v2861_v7 }
 0x189   :  { %v1382_v40 = vrot.slane %v1381_v4, 2  ;;  %v2948_v15 = vadd.f32 %v1296_v2, %v1248_v8  ;;  %v1201_v21 = vadd.f32 %v1200_v10, %v1152_v16 }
 0x18b   :  { %v1383_v17 = vadd.f32 %v1382_v40, %v1381_v4  ;;  %v1322_v20 = vadd.f32 %v1321_v62, %v2948_v15 }
 0x18d   :  { %v1384_v47 = vrot.slane %v1383_v17, 1 }
 0x18e   :  { %v1249_v3 = vpop.f32.mrf.mxu2  ;;  %v1154_v0 = vpop.f32.mrf.mxu0 }
 0x18f   :  { %v1298_v44 = vpop.f32.mrf.mxu3  ;;  %v1385_v46 = vadd.f32 %v1384_v47, %v1383_v17  ;;  %v1250_v30 = vadd.f32 %v1249_v3, %v1201_v21  ;;  %v1155_v24 = vadd.f32 %v1154_v0, %v2864_v18  ;;  %v1203_v33 = vpop.f32.mrf.mxu1 }
 0x191   :  { %v1399_v31 = vmul.f32 %v1385_v46, %v2893_v6  ;;  %v2953_v12 = vadd.f32 %v1298_v44, %v1250_v30  ;;  %v1204_v5 = vadd.f32 %v1203_v33, %v1155_v24 }
 0x193   :  { %v1401_v34 = vadd.f32 1e-05, %v1399_v31  ;;  %v1323_v7 = vadd.f32 %v1322_v20, %v2953_v12 }
 0x195   :  { %2214 = vrsqrt.f32 %v1401_v34  ;;  %vm1409_vm2 = vweird.f32 %v1401_v34 }
 0x196   :  { %v1252_v32 = vpop.f32.mrf.mxu2  ;;  %v1156_v41 = vpop.f32.mrf.mxu0 }
 0x197   :  { %v1301_v35 = vpop.f32.mrf.mxu3  ;;  %v1253_v38 = vadd.f32 %v1252_v32, %v1204_v5  ;;  %v1157_v43 = vadd.f32 %v1156_v41, %v2866_v26  ;;  %v1205_v50 = vpop.f32.mrf.mxu1 }
 0x199   :  { %v2957_v42 = vadd.f32 %v1301_v35, %v1253_v38  ;;  %v1206_v18 = vadd.f32 %v1205_v50, %v1157_v43 }
 0x19b   :  { %v2215_v49 = vpop.eup %2214  ;;  %v1324_v55 = vadd.f32 %v1323_v7, %v2957_v42 }
 0x19c   :  { %v1404_v14 = vmul.f32 %v2215_v49, %v1401_v34  ;;  %vm1410_vm1 = vweird.f32 %v2215_v49 }
 0x19d   :  { %vm1411_vm3 = vmor %vm1409_vm2, %vm1410_vm1 }
 0x19e   :  { %v1405_v51 = vmul.f32 %v2215_v49, %v1404_v14  ;;  %v1254_v11 = vpop.f32.mrf.mxu2 }
 0x19f   :  { %v1255_v52 = vadd.f32 %v1254_v11, %v1206_v18  ;;  %v1303_v54 = vpop.f32.mrf.mxu3 }
 0x1a0   :  { %v1406_v53 = vmul.f32 0.5, %v1405_v51 }
 0x1a1   :  { %v2961_v57 = vadd.f32 %v1303_v54, %v1255_v52 }
 0x1a2   :  { %v1407_v37 = vsub.f32 1.5, %v1406_v53 }
 0x1a3   :  { %v1325_v58 = vadd.f32 %v1324_v55, %v2961_v57 }
 0x1a4   :  { %v1408_v59 = vmul.f32 %v2215_v49, %v1407_v37 }
 0x1a5   :  { %v1326_v61 = vrot.slane %v1325_v58, 4 }
 0x1a6   :  { %v1412_v26 = vsel %vm1411_vm3, %v2215_v49, %v1408_v59 }
 0x1a7   :  { %v1423_v36 = vmul.f32 %v1412_v26, %v2900_v45  ;;  %v1424_v62 = vmul.f32 %v1412_v26, %v2903_v23  ;;  %v1425_v19 = vmul.f32 %v1412_v26, %v2906_v48  ;;  %v1426_v63 = vmul.f32 %v1412_v26, %v2909_v25 }
 0x1a8   :  { %v1427_v1 = vmul.f32 %v1412_v26, %v2912_v27  ;;  %v1428_v2 = vmul.f32 %v1412_v26, %v2914_v28  ;;  %v1429_v4 = vmul.f32 %v1412_v26, %v2916_v13  ;;  %v1430_v8 = vmul.f32 %v1412_v26, %v2918_v29 }
 0x1a9   :  { %vm1439_vm4 = vcmp.ge.f32.partialorder %v1423_v36, 0.0  ;;  %vm1440_vm5 = vcmp.ge.f32.partialorder %v1424_v62, 0.0  ;;  %vm1441_vm6 = vcmp.ge.f32.partialorder %v1425_v19, 0.0  ;;  %vm1442_vm7 = vcmp.ge.f32.partialorder %v1426_v63, 0.0 }
 0x1aa   :  { %vm1443_vm8 = vcmp.ge.f32.partialorder %v1427_v1, 0.0  ;;  %vm1444_vm9 = vcmp.ge.f32.partialorder %v1428_v2, 0.0  ;;  %vm1445_vm10 = vcmp.ge.f32.partialorder %v1429_v4, 0.0  ;;  %vm1446_vm11 = vcmp.ge.f32.partialorder %v1430_v8, 0.0 }
 0x1ab   :  { %v1455_v45 = vmul.f32 0.2, %v1423_v36  ;;  %v1456_v23 = vmul.f32 0.2, %v1424_v62  ;;  %v1457_v48 = vmul.f32 0.2, %v1425_v19  ;;  %v1327_v10 = vadd.f32 %v1326_v61, %v1325_v58 }
 0x1ac   :  { %v1458_v25 = vmul.f32 0.2, %v1426_v63  ;;  %v1459_v9 = vmul.f32 0.2, %v1427_v1  ;;  %v1460_v27 = vmul.f32 0.2, %v1428_v2 }
 0x1ad   :  { %v1461_v28 = vmul.f32 0.2, %v1429_v4  ;;  %v1462_v40 = vmul.f32 0.2, %v1430_v8  ;;  %v1471_v13 = vsel %vm1439_vm4, %v1423_v36, %v1455_v45  ;;  %v1472_v29 = vsel %vm1440_vm5, %v1424_v62, %v1456_v23 }
 0x1ae   :  { %v1473_v16 = vsel %vm1441_vm6, %v1425_v19, %v1457_v48  ;;  %v1474_v17 = vsel %vm1442_vm7, %v1426_v63, %v1458_v25  ;;  %v1475_v20 = vsel %vm1443_vm8, %v1427_v1, %v1459_v9  ;;  %v1476_v47 = vsel %vm1444_vm9, %v1428_v2, %v1460_v27 }
 0x1af   :  { %v1477_v21 = vsel %vm1445_vm10, %v1429_v4, %v1461_v28  ;;  %v1478_v3 = vsel %vm1446_vm11, %v1430_v8, %v1462_v40  ;;  %v2166_v44 = vpack.c.bf16 %v1472_v29, %v1471_v13  ;;  %v2171_v46 = vpack.c.bf16 %v1474_v17, %v1473_v16 }
 0x1b0   :  { %v2176_v30 = vpack.c.bf16 %v1476_v47, %v1475_v20  ;;  %v2181_v0 = vpack.c.bf16 %v1478_v3, %v1477_v21  ;;  %v1328_v31 = vrot.slane %v1327_v10, 2 }
 0x1b1   :  { %2167 = vst [vmem:[%s3025_s3] sm:$0xff] %v2166_v44  }
 0x1b2   :  { %2203 = vst [vmem:[%s3025_s3 + $0x8] sm:$0xff] %v2171_v46   ;;  %v1329_v24 = vadd.f32 %v1328_v31, %v1327_v10 }
 0x1b3   :  { %2204 = vst [vmem:[%s3025_s3 + $0x10] sm:$0xff] %v2176_v30  }
 0x1b4   :  { %2205 = vst [vmem:[%s3025_s3 + $0x18] sm:$0xff] %v2181_v0   ;;  %v1330_v33 = vrot.slane %v1329_v24, 1 }
 0x1b6   :  { %v1331_v34 = vadd.f32 %v1330_v33, %v1329_v24 }
 0x1b8   :  { %v1340_v7 = vmul.f32 %v2893_v6, %v1331_v34 }
 0x1ba   :  { %v1349_v5 = vsub.f32 %v2924_v56, %v1340_v7  ;;  %v1350_v32 = vsub.f32 %v2897_v22, %v1340_v7  ;;  %v1351_v35 = vsub.f32 %v2932_v39, %v1340_v7  ;;  %v1352_v38 = vsub.f32 %v2944_v60, %v1340_v7 }
 0x1bb   :  { %v1353_v41 = vsub.f32 %v2948_v15, %v1340_v7  ;;  %v1354_v43 = vsub.f32 %v2953_v12, %v1340_v7  ;;  %v1355_v49 = vsub.f32 %v2957_v42, %v1340_v7  ;;  %v1356_v55 = vsub.f32 %v2961_v57, %v1340_v7 }
 0x1bc   :  { %v1365_v14 = vmul.f32 %v1349_v5, %v1349_v5  ;;  %v1366_v50 = vmul.f32 %v1350_v32, %v1350_v32  ;;  %v1367_v18 = vmul.f32 %v1351_v35, %v1351_v35  ;;  %v1368_v11 = vmul.f32 %v1352_v38, %v1352_v38 }
 0x1bd   :  { %v1369_v52 = vmul.f32 %v1353_v41, %v1353_v41  ;;  %v1370_v53 = vmul.f32 %v1354_v43, %v1354_v43  ;;  %v1371_v54 = vmul.f32 %v1355_v49, %v1355_v49  ;;  %v1372_v37 = vmul.f32 %v1356_v55, %v1356_v55 }
 0x1be   :  { %v1386_v51 = vadd.f32 %v1366_v50, %v1365_v14 }
 0x1c0   :  { %v1387_v56 = vadd.f32 %v1386_v51, %v1367_v18 }
 0x1c2   :  { %v1388_v22 = vadd.f32 %v1387_v56, %v1368_v11 }
 0x1c4   :  { %v1389_v39 = vadd.f32 %v1388_v22, %v1369_v52 }
 0x1c6   :  { %v1390_v60 = vadd.f32 %v1389_v39, %v1370_v53 }
 0x1c8   :  { %v1391_v15 = vadd.f32 %v1390_v60, %v1371_v54 }
 0x1ca   :  { %v1392_v58 = vadd.f32 %v1391_v15, %v1372_v37 }
 0x1cc   :  { %v1393_v12 = vrot.slane %v1392_v58, 4 }
 0x1ce   :  { %v1394_v59 = vadd.f32 %v1393_v12, %v1392_v58 }
 0x1d0   :  { %v1395_v42 = vrot.slane %v1394_v59, 2 }
 0x1d2   :  { %v1396_v26 = vadd.f32 %v1395_v42, %v1394_v59 }
 0x1d4   :  { %v1397_v57 = vrot.slane %v1396_v26, 1 }
 0x1d6   :  { %v1398_v61 = vadd.f32 %v1397_v57, %v1396_v26 }
 0x1d8   :  { %v1400_v36 = vmul.f32 %v1398_v61, %v2893_v6 }
 0x1da   :  { %v1402_v62 = vadd.f32 1e-05, %v1400_v36 }
 0x1dc   :  { %2216 = vrsqrt.f32 %v1402_v62  ;;  %vm1419_vm13 = vweird.f32 %v1402_v62 }
 0x1e2   :  { %v2217_v19 = vpop.eup %2216 }
 0x1e3   :  { %v1414_v63 = vmul.f32 %v2217_v19, %v1402_v62  ;;  %vm1420_vm12 = vweird.f32 %v2217_v19 }
 0x1e4   :  { %vm1421_vm14 = vmor %vm1419_vm13, %vm1420_vm12 }
 0x1e5   :  { %v1415_v1 = vmul.f32 %v2217_v19, %v1414_v63 }
 0x1e7   :  { %v1416_v2 = vmul.f32 0.5, %v1415_v1 }
 0x1e9   :  { %v1417_v4 = vsub.f32 1.5, %v1416_v2 }
 0x1eb   :  { %v1418_v8 = vmul.f32 %v2217_v19, %v1417_v4 }
 0x1ed   :  { %v1422_v45 = vsel %vm1421_vm14, %v2217_v19, %v1418_v8 }
 0x1ee   :  { %v1431_v23 = vmul.f32 %v1422_v45, %v1349_v5  ;;  %v1432_v48 = vmul.f32 %v1422_v45, %v1350_v32  ;;  %v1433_v25 = vmul.f32 %v1422_v45, %v1351_v35  ;;  %v1434_v9 = vmul.f32 %v1422_v45, %v1352_v38 }
 0x1ef   :  { %v1435_v27 = vmul.f32 %v1422_v45, %v1353_v41  ;;  %v1436_v10 = vmul.f32 %v1422_v45, %v1354_v43  ;;  %v1437_v28 = vmul.f32 %v1422_v45, %v1355_v49  ;;  %v1438_v6 = vmul.f32 %v1422_v45, %v1356_v55 }
 0x1f0   :  { %vm1447_vm15 = vcmp.ge.f32.partialorder %v1431_v23, 0.0  ;;  %vm1448_vm0 = vcmp.ge.f32.partialorder %v1432_v48, 0.0  ;;  %vm1449_vm1 = vcmp.ge.f32.partialorder %v1433_v25, 0.0  ;;  %vm1450_vm2 = vcmp.ge.f32.partialorder %v1434_v9, 0.0 }
 0x1f1   :  { %vm1451_vm3 = vcmp.ge.f32.partialorder %v1435_v27, 0.0  ;;  %vm1452_vm4 = vcmp.ge.f32.partialorder %v1436_v10, 0.0  ;;  %vm1453_vm5 = vcmp.ge.f32.partialorder %v1437_v28, 0.0  ;;  %vm1454_vm6 = vcmp.ge.f32.partialorder %v1438_v6, 0.0 }
 0x1f2   :  { %v1463_v40 = vmul.f32 0.2, %v1431_v23  ;;  %v1464_v13 = vmul.f32 0.2, %v1432_v48  ;;  %v1465_v29 = vmul.f32 0.2, %v1433_v25 }
 0x1f3   :  { %v1466_v16 = vmul.f32 0.2, %v1434_v9  ;;  %v1467_v17 = vmul.f32 0.2, %v1435_v27  ;;  %v1468_v20 = vmul.f32 0.2, %v1436_v10 }
 0x1f4   :  { %v1469_v47 = vmul.f32 0.2, %v1437_v28  ;;  %v1470_v21 = vmul.f32 0.2, %v1438_v6  ;;  %v1479_v3 = vsel %vm1447_vm15, %v1431_v23, %v1463_v40  ;;  %v1480_v44 = vsel %vm1448_vm0, %v1432_v48, %v1464_v13 }
 0x1f5   :  { %v1481_v46 = vsel %vm1449_vm1, %v1433_v25, %v1465_v29  ;;  %v1482_v30 = vsel %vm1450_vm2, %v1434_v9, %v1466_v16  ;;  %v1483_v0 = vsel %vm1451_vm3, %v1435_v27, %v1467_v17  ;;  %v1484_v31 = vsel %vm1452_vm4, %v1436_v10, %v1468_v20 }
 0x1f6   :  { %v1485_v24 = vsel %vm1453_vm5, %v1437_v28, %v1469_v47  ;;  %v1486_v33 = vsel %vm1454_vm6, %v1438_v6, %v1470_v21  ;;  %v2186_v34 = vpack.c.bf16 %v1480_v44, %v1479_v3  ;;  %v2191_v7 = vpack.c.bf16 %v1482_v30, %v1481_v46 }
 0x1f7   :  { %v2196_v5 = vpack.c.bf16 %v1484_v31, %v1483_v0  ;;  %v2201_v32 = vpack.c.bf16 %v1486_v33, %v1485_v24 }
 0x1f8   :  { %2206 = vst [vmem:[%s3025_s3 + $0x20] sm:$0xff] %v2186_v34  }
 0x1f9   :  { %2207 = vst [vmem:[%s3025_s3 + $0x28] sm:$0xff] %v2191_v7  }
 0x1fa   :  { %2208 = vst [vmem:[%s3025_s3 + $0x30] sm:$0xff] %v2196_v5  }
 0x1fb   :  { %2209 = vst [vmem:[%s3025_s3 + $0x38] sm:$0xff] %v2201_v32  }

// kernel: _lambda_.7
= control target key start
LH: loop header
LB: loop body
LE: loop exit
PB: predicated region body
PF: predicated region fallthrough
CT: control target
= control target key end

     0   :  { %s4945_s12 = smov 0   ;;  %s4947_s13 = smov 0   ;;  %s5860_s0 = inlined_call_operand.vmem [shape: bf16[32,2048], index: 0, kind: input, shape index: {}]   ;;  %s5861_s1 = inlined_call_operand.vmem [shape: bf16[2048,256], index: 1, kind: input, shape index: {}]   ;;  %s5862_s2 = inlined_call_operand.vmem [shape: f32[1,256], index: 2, kind: input, shape index: {}]   ;;  %s5863_s3 = inlined_call_operand.vmem [shape: bf16[32,256], index: 3, kind: output, shape index: {}]  }
   0x1   :  { %s4949_s14 = smov 0  }
   0x2 LB: > { %s4961_s15 = sadd.s32 4294967295, %s4922_s14   ;;  %s4964_s16 = sadd.s32 1, %s4922_s14   ;;  %s4922_s14 = sphi %s4949_s14, %s5867_s14   ;;  %s4918_s13 = sphi %s4947_s13, %s5866_s13   ;;  %s4914_s12 = sphi %s4945_s12, %s5865_s12  }
   0x3   : > { %s38_s17 = ssub.s32 %s4922_s14, %s4964_s16  ;;  %s41_s18 = sadd.s32 1, %s4918_s13 }
   0x4   : > { %p39_p0 = scmp.eq.s32.totalorder %s38_s17, 0  ;;  %p48_p1 = scmp.ne.s32.totalorder %s4918_s13, %s4914_s12 }
   0x5   : > { %p49_p2 = scmp.eq.s32.totalorder %s4922_s14, 0  ;;  %p104_p3 = scmp.eq.s32.totalorder %s4961_s15, 1 }
   0x6   : > { %s4974_s19 = scalar_select %p39_p0, %s4918_s13, %s41_s18  }
   0x7   : > { %p50_p4 = por %p49_p2, %p48_p1  ;;  %p4976_p5 = por %p104_p3, %p48_p1 }
   0x8   : > { %p4047_p6 = scmp.ge.s32.totalorder %s4922_s14, 2 }
   0xa   : > { %129 = sbr.rel (%p4047_p6) target bundleno = 275 (0x113), region = 20 }
   0xf   : > { %132 = sbr.rel (!%p50_p4) target bundleno = 275 (0x113), region = 24  ;;  %s134_s21 = sand.u32 (%p50_p4), 1, %s4918_s13  }
  0x10   : > { %s4049_s22 = sshll.u32 (%p50_p4), %s4922_s14, 2  ;;  %s4048_s23 = sshll.u32 (%p50_p4), %s134_s21, 10 }
  0x11   : > { %s4986_s26 = scalar_lea.vmem (%p50_p4), %s5861_s1, %s4049_s22  ;;  %s4990_s27 = scalar_lea.vmem (%p50_p4), [#allocation2], %s4048_s23 }
  0x12   : > { %v155_v0 = vld [vmem:[%s4986_s26] sm:$0xf] (%p50_p4)  ;;  %v157_v1 = vld [vmem:[%s4986_s26 + $0x8] sm:$0xf] (%p50_p4)  ;;  %v159_v2 = vld [vmem:[%s4986_s26 + $0x10] sm:$0xf] (%p50_p4) }
  0x13   : > { %156 = vst [vmem:[%s4990_s27] sm:$0xf] (%p50_p4), %v155_v0  ;;  %v161_v3 = vld [vmem:[%s4986_s26 + $0x18] sm:$0xf] (%p50_p4)  ;;  %v163_v4 = vld [vmem:[%s4986_s26 + $0x20] sm:$0xf] (%p50_p4) }
  0x14   : > { %158 = vst [vmem:[%s4990_s27 + $0x4] sm:$0xf] %v157_v1  ;;  %v165_v5 = vld [vmem:[%s4986_s26 + $0x28] sm:$0xf]  ;;  %v167_v6 = vld [vmem:[%s4986_s26 + $0x30] sm:$0xf] }
  0x15   : > { %160 = vst [vmem:[%s4990_s27 + $0x8] sm:$0xf] %v159_v2  ;;  %v169_v7 = vld [vmem:[%s4986_s26 + $0x38] sm:$0xf]  ;;  %v171_v8 = vld [vmem:[%s4986_s26 + $0x40] sm:$0xf] }
  0x16   : > { %162 = vst [vmem:[%s4990_s27 + $0xc] sm:$0xf] %v161_v3  ;;  %v173_v9 = vld [vmem:[%s4986_s26 + $0x48] sm:$0xf]  ;;  %v175_v10 = vld [vmem:[%s4986_s26 + $0x50] sm:$0xf] }
  0x17   : > { %164 = vst [vmem:[%s4990_s27 + $0x10] sm:$0xf] %v163_v4  ;;  %v177_v11 = vld [vmem:[%s4986_s26 + $0x58] sm:$0xf]  ;;  %v179_v12 = vld [vmem:[%s4986_s26 + $0x60] sm:$0xf] }
  0x18   : > { %166 = vst [vmem:[%s4990_s27 + $0x14] sm:$0xf] %v165_v5  ;;  %v181_v13 = vld [vmem:[%s4986_s26 + $0x68] sm:$0xf]  ;;  %v183_v14 = vld [vmem:[%s4986_s26 + $0x70] sm:$0xf] }
  0x19   : > { %168 = vst [vmem:[%s4990_s27 + $0x18] sm:$0xf] %v167_v6  ;;  %v185_v15 = vld [vmem:[%s4986_s26 + $0x78] sm:$0xf]  ;;  %v187_v16 = vld [vmem:[%s4986_s26 + $0x80] sm:$0xf] }
  0x1a   : > { %170 = vst [vmem:[%s4990_s27 + $0x1c] sm:$0xf] %v169_v7  ;;  %v189_v17 = vld [vmem:[%s4986_s26 + $0x88] sm:$0xf]  ;;  %v191_v18 = vld [vmem:[%s4986_s26 + $0x90] sm:$0xf] }
  0x1b   : > { %172 = vst [vmem:[%s4990_s27 + $0x20] sm:$0xf] %v171_v8  ;;  %v193_v19 = vld [vmem:[%s4986_s26 + $0x98] sm:$0xf]  ;;  %v195_v20 = vld [vmem:[%s4986_s26 + $0xa0] sm:$0xf] }
  0x1c   : > { %174 = vst [vmem:[%s4990_s27 + $0x24] sm:$0xf] %v173_v9  ;;  %v197_v21 = vld [vmem:[%s4986_s26 + $0xa8] sm:$0xf]  ;;  %v199_v22 = vld [vmem:[%s4986_s26 + $0xb0] sm:$0xf] }
  0x1d   : > { %176 = vst [vmem:[%s4990_s27 + $0x28] sm:$0xf] %v175_v10  ;;  %v201_v23 = vld [vmem:[%s4986_s26 + $0xb8] sm:$0xf]  ;;  %v203_v24 = vld [vmem:[%s4986_s26 + $0xc0] sm:$0xf] }
  0x1e   : > { %178 = vst [vmem:[%s4990_s27 + $0x2c] sm:$0xf] %v177_v11  ;;  %v205_v25 = vld [vmem:[%s4986_s26 + $0xc8] sm:$0xf]  ;;  %v207_v26 = vld [vmem:[%s4986_s26 + $0xd0] sm:$0xf] }
  0x1f   : > { %180 = vst [vmem:[%s4990_s27 + $0x30] sm:$0xf] %v179_v12  ;;  %v209_v27 = vld [vmem:[%s4986_s26 + $0xd8] sm:$0xf]  ;;  %v211_v28 = vld [vmem:[%s4986_s26 + $0xe0] sm:$0xf] }
  0x20   : > { %182 = vst [vmem:[%s4990_s27 + $0x34] sm:$0xf] %v181_v13  ;;  %v213_v29 = vld [vmem:[%s4986_s26 + $0xe8] sm:$0xf]  ;;  %v215_v30 = vld [vmem:[%s4986_s26 + $0xf0] sm:$0xf] }
  0x21   : > { %184 = vst [vmem:[%s4990_s27 + $0x38] sm:$0xf] %v183_v14  ;;  %v217_v31 = vld [vmem:[%s4986_s26 + $0xf8] sm:$0xf]  ;;  %v219_v32 = vld [vmem:[%s4986_s26 + $0x100] sm:$0xf] }
  0x22   : > { %186 = vst [vmem:[%s4990_s27 + $0x3c] sm:$0xf] %v185_v15  ;;  %v221_v33 = vld [vmem:[%s4986_s26 + $0x108] sm:$0xf]  ;;  %v223_v34 = vld [vmem:[%s4986_s26 + $0x110] sm:$0xf] }
  0x23   : > { %188 = vst [vmem:[%s4990_s27 + $0x40] sm:$0xf] %v187_v16  ;;  %v225_v35 = vld [vmem:[%s4986_s26 + $0x118] sm:$0xf]  ;;  %v227_v36 = vld [vmem:[%s4986_s26 + $0x120] sm:$0xf] }
  0x24   : > { %190 = vst [vmem:[%s4990_s27 + $0x44] sm:$0xf] %v189_v17  ;;  %v229_v37 = vld [vmem:[%s4986_s26 + $0x128] sm:$0xf]  ;;  %v231_v38 = vld [vmem:[%s4986_s26 + $0x130] sm:$0xf] }
  0x25   : > { %192 = vst [vmem:[%s4990_s27 + $0x48] sm:$0xf] %v191_v18  ;;  %v233_v39 = vld [vmem:[%s4986_s26 + $0x138] sm:$0xf]  ;;  %v235_v40 = vld [vmem:[%s4986_s26 + $0x140] sm:$0xf] }
  0x26   : > { %194 = vst [vmem:[%s4990_s27 + $0x4c] sm:$0xf] %v193_v19  ;;  %v237_v41 = vld [vmem:[%s4986_s26 + $0x148] sm:$0xf]  ;;  %v239_v42 = vld [vmem:[%s4986_s26 + $0x150] sm:$0xf] }
  0x27   : > { %196 = vst [vmem:[%s4990_s27 + $0x50] sm:$0xf] %v195_v20  ;;  %v241_v43 = vld [vmem:[%s4986_s26 + $0x158] sm:$0xf]  ;;  %v243_v44 = vld [vmem:[%s4986_s26 + $0x160] sm:$0xf] }
  0x28   : > { %198 = vst [vmem:[%s4990_s27 + $0x54] sm:$0xf] %v197_v21  ;;  %v245_v45 = vld [vmem:[%s4986_s26 + $0x168] sm:$0xf]  ;;  %v247_v46 = vld [vmem:[%s4986_s26 + $0x170] sm:$0xf] }
  0x29   : > { %200 = vst [vmem:[%s4990_s27 + $0x58] sm:$0xf] %v199_v22  ;;  %v249_v47 = vld [vmem:[%s4986_s26 + $0x178] sm:$0xf]  ;;  %v251_v48 = vld [vmem:[%s4986_s26 + $0x180] sm:$0xf] }
  0x2a   : > { %202 = vst [vmem:[%s4990_s27 + $0x5c] sm:$0xf] %v201_v23  ;;  %v253_v49 = vld [vmem:[%s4986_s26 + $0x188] sm:$0xf]  ;;  %v255_v50 = vld [vmem:[%s4986_s26 + $0x190] sm:$0xf] }
  0x2b   : > { %204 = vst [vmem:[%s4990_s27 + $0x60] sm:$0xf] %v203_v24  ;;  %v257_v51 = vld [vmem:[%s4986_s26 + $0x198] sm:$0xf]  ;;  %v259_v52 = vld [vmem:[%s4986_s26 + $0x1a0] sm:$0xf] }
  0x2c   : > { %206 = vst [vmem:[%s4990_s27 + $0x64] sm:$0xf] %v205_v25  ;;  %v261_v53 = vld [vmem:[%s4986_s26 + $0x1a8] sm:$0xf]  ;;  %v263_v54 = vld [vmem:[%s4986_s26 + $0x1b0] sm:$0xf] }
  0x2d   : > { %208 = vst [vmem:[%s4990_s27 + $0x68] sm:$0xf] %v207_v26  ;;  %v265_v55 = vld [vmem:[%s4986_s26 + $0x1b8] sm:$0xf]  ;;  %v267_v56 = vld [vmem:[%s4986_s26 + $0x1c0] sm:$0xf] }
  0x2e   : > { %210 = vst [vmem:[%s4990_s27 + $0x6c] sm:$0xf] %v209_v27  ;;  %v269_v57 = vld [vmem:[%s4986_s26 + $0x1c8] sm:$0xf]  ;;  %v271_v58 = vld [vmem:[%s4986_s26 + $0x1d0] sm:$0xf] }
  0x2f   : > { %212 = vst [vmem:[%s4990_s27 + $0x70] sm:$0xf] %v211_v28  ;;  %v273_v59 = vld [vmem:[%s4986_s26 + $0x1d8] sm:$0xf]  ;;  %v275_v60 = vld [vmem:[%s4986_s26 + $0x1e0] sm:$0xf] }
  0x30   : > { %214 = vst [vmem:[%s4990_s27 + $0x74] sm:$0xf] %v213_v29  ;;  %v277_v61 = vld [vmem:[%s4986_s26 + $0x1e8] sm:$0xf]  ;;  %v279_v62 = vld [vmem:[%s4986_s26 + $0x1f0] sm:$0xf] }
  0x31   : > { %216 = vst [vmem:[%s4990_s27 + $0x78] sm:$0xf] %v215_v30  ;;  %v281_v63 = vld [vmem:[%s4986_s26 + $0x1f8] sm:$0xf]  ;;  %v283_v0 = vld [vmem:[%s4986_s26 + $0x200] sm:$0xf] }
  0x32   : > { %218 = vst [vmem:[%s4990_s27 + $0x7c] sm:$0xf] %v217_v31  ;;  %v285_v1 = vld [vmem:[%s4986_s26 + $0x208] sm:$0xf]  ;;  %v287_v2 = vld [vmem:[%s4986_s26 + $0x210] sm:$0xf] }
  0x33   : > { %220 = vst [vmem:[%s4990_s27 + $0x80] sm:$0xf] %v219_v32  ;;  %v289_v3 = vld [vmem:[%s4986_s26 + $0x218] sm:$0xf]  ;;  %v291_v4 = vld [vmem:[%s4986_s26 + $0x220] sm:$0xf] }
  0x34   : > { %222 = vst [vmem:[%s4990_s27 + $0x84] sm:$0xf] %v221_v33  ;;  %v293_v5 = vld [vmem:[%s4986_s26 + $0x228] sm:$0xf]  ;;  %v295_v6 = vld [vmem:[%s4986_s26 + $0x230] sm:$0xf] }
  0x35   : > { %224 = vst [vmem:[%s4990_s27 + $0x88] sm:$0xf] %v223_v34  ;;  %v297_v7 = vld [vmem:[%s4986_s26 + $0x238] sm:$0xf]  ;;  %v299_v8 = vld [vmem:[%s4986_s26 + $0x240] sm:$0xf] }
  0x36   : > { %226 = vst [vmem:[%s4990_s27 + $0x8c] sm:$0xf] %v225_v35  ;;  %v301_v9 = vld [vmem:[%s4986_s26 + $0x248] sm:$0xf]  ;;  %v303_v10 = vld [vmem:[%s4986_s26 + $0x250] sm:$0xf] }
  0x37   : > { %228 = vst [vmem:[%s4990_s27 + $0x90] sm:$0xf] %v227_v36  ;;  %v305_v11 = vld [vmem:[%s4986_s26 + $0x258] sm:$0xf]  ;;  %v307_v12 = vld [vmem:[%s4986_s26 + $0x260] sm:$0xf] }
  0x38   : > { %230 = vst [vmem:[%s4990_s27 + $0x94] sm:$0xf] %v229_v37  ;;  %v309_v13 = vld [vmem:[%s4986_s26 + $0x268] sm:$0xf]  ;;  %v311_v14 = vld [vmem:[%s4986_s26 + $0x270] sm:$0xf] }
  0x39   : > { %232 = vst [vmem:[%s4990_s27 + $0x98] sm:$0xf] %v231_v38  ;;  %v313_v15 = vld [vmem:[%s4986_s26 + $0x278] sm:$0xf]  ;;  %v315_v16 = vld [vmem:[%s4986_s26 + $0x280] sm:$0xf] }
  0x3a   : > { %234 = vst [vmem:[%s4990_s27 + $0x9c] sm:$0xf] %v233_v39  ;;  %v317_v17 = vld [vmem:[%s4986_s26 + $0x288] sm:$0xf]  ;;  %v319_v18 = vld [vmem:[%s4986_s26 + $0x290] sm:$0xf] }
  0x3b   : > { %236 = vst [vmem:[%s4990_s27 + $0xa0] sm:$0xf] %v235_v40  ;;  %v321_v19 = vld [vmem:[%s4986_s26 + $0x298] sm:$0xf]  ;;  %v323_v20 = vld [vmem:[%s4986_s26 + $0x2a0] sm:$0xf] }
  0x3c   : > { %238 = vst [vmem:[%s4990_s27 + $0xa4] sm:$0xf] %v237_v41  ;;  %v325_v21 = vld [vmem:[%s4986_s26 + $0x2a8] sm:$0xf]  ;;  %v327_v22 = vld [vmem:[%s4986_s26 + $0x2b0] sm:$0xf] }
  0x3d   : > { %240 = vst [vmem:[%s4990_s27 + $0xa8] sm:$0xf] %v239_v42  ;;  %v329_v23 = vld [vmem:[%s4986_s26 + $0x2b8] sm:$0xf]  ;;  %v331_v24 = vld [vmem:[%s4986_s26 + $0x2c0] sm:$0xf] }
  0x3e   : > { %242 = vst [vmem:[%s4990_s27 + $0xac] sm:$0xf] %v241_v43  ;;  %v333_v25 = vld [vmem:[%s4986_s26 + $0x2c8] sm:$0xf]  ;;  %v335_v26 = vld [vmem:[%s4986_s26 + $0x2d0] sm:$0xf] }
  0x3f   : > { %244 = vst [vmem:[%s4990_s27 + $0xb0] sm:$0xf] %v243_v44  ;;  %v337_v27 = vld [vmem:[%s4986_s26 + $0x2d8] sm:$0xf]  ;;  %v339_v28 = vld [vmem:[%s4986_s26 + $0x2e0] sm:$0xf] }
  0x40   : > { %246 = vst [vmem:[%s4990_s27 + $0xb4] sm:$0xf] %v245_v45  ;;  %v341_v29 = vld [vmem:[%s4986_s26 + $0x2e8] sm:$0xf]  ;;  %v343_v30 = vld [vmem:[%s4986_s26 + $0x2f0] sm:$0xf] }
  0x41   : > { %248 = vst [vmem:[%s4990_s27 + $0xb8] sm:$0xf] %v247_v46  ;;  %v345_v31 = vld [vmem:[%s4986_s26 + $0x2f8] sm:$0xf]  ;;  %v347_v32 = vld [vmem:[%s4986_s26 + $0x300] sm:$0xf] }
  0x42   : > { %250 = vst [vmem:[%s4990_s27 + $0xbc] sm:$0xf] %v249_v47  ;;  %v349_v33 = vld [vmem:[%s4986_s26 + $0x308] sm:$0xf]  ;;  %v351_v34 = vld [vmem:[%s4986_s26 + $0x310] sm:$0xf] }
  0x43   : > { %252 = vst [vmem:[%s4990_s27 + $0xc0] sm:$0xf] %v251_v48  ;;  %v353_v35 = vld [vmem:[%s4986_s26 + $0x318] sm:$0xf]  ;;  %v355_v36 = vld [vmem:[%s4986_s26 + $0x320] sm:$0xf] }
  0x44   : > { %254 = vst [vmem:[%s4990_s27 + $0xc4] sm:$0xf] %v253_v49  ;;  %v357_v37 = vld [vmem:[%s4986_s26 + $0x328] sm:$0xf]  ;;  %v359_v38 = vld [vmem:[%s4986_s26 + $0x330] sm:$0xf] }
  0x45   : > { %256 = vst [vmem:[%s4990_s27 + $0xc8] sm:$0xf] %v255_v50  ;;  %v361_v39 = vld [vmem:[%s4986_s26 + $0x338] sm:$0xf]  ;;  %v363_v40 = vld [vmem:[%s4986_s26 + $0x340] sm:$0xf] }
  0x46   : > { %258 = vst [vmem:[%s4990_s27 + $0xcc] sm:$0xf] %v257_v51  ;;  %v365_v41 = vld [vmem:[%s4986_s26 + $0x348] sm:$0xf]  ;;  %v367_v42 = vld [vmem:[%s4986_s26 + $0x350] sm:$0xf] }
  0x47   : > { %260 = vst [vmem:[%s4990_s27 + $0xd0] sm:$0xf] %v259_v52  ;;  %v369_v43 = vld [vmem:[%s4986_s26 + $0x358] sm:$0xf]  ;;  %v371_v44 = vld [vmem:[%s4986_s26 + $0x360] sm:$0xf] }
  0x48   : > { %262 = vst [vmem:[%s4990_s27 + $0xd4] sm:$0xf] %v261_v53  ;;  %v373_v45 = vld [vmem:[%s4986_s26 + $0x368] sm:$0xf]  ;;  %v375_v46 = vld [vmem:[%s4986_s26 + $0x370] sm:$0xf] }
  0x49   : > { %264 = vst [vmem:[%s4990_s27 + $0xd8] sm:$0xf] %v263_v54  ;;  %v377_v47 = vld [vmem:[%s4986_s26 + $0x378] sm:$0xf]  ;;  %v379_v48 = vld [vmem:[%s4986_s26 + $0x380] sm:$0xf] }
  0x4a   : > { %266 = vst [vmem:[%s4990_s27 + $0xdc] sm:$0xf] %v265_v55  ;;  %v381_v49 = vld [vmem:[%s4986_s26 + $0x388] sm:$0xf]  ;;  %v383_v50 = vld [vmem:[%s4986_s26 + $0x390] sm:$0xf] }
  0x4b   : > { %268 = vst [vmem:[%s4990_s27 + $0xe0] sm:$0xf] %v267_v56  ;;  %v385_v51 = vld [vmem:[%s4986_s26 + $0x398] sm:$0xf]  ;;  %v387_v52 = vld [vmem:[%s4986_s26 + $0x3a0] sm:$0xf] }
  0x4c   : > { %270 = vst [vmem:[%s4990_s27 + $0xe4] sm:$0xf] %v269_v57  ;;  %v389_v53 = vld [vmem:[%s4986_s26 + $0x3a8] sm:$0xf]  ;;  %v391_v54 = vld [vmem:[%s4986_s26 + $0x3b0] sm:$0xf] }
  0x4d   : > { %272 = vst [vmem:[%s4990_s27 + $0xe8] sm:$0xf] %v271_v58  ;;  %v393_v55 = vld [vmem:[%s4986_s26 + $0x3b8] sm:$0xf]  ;;  %v395_v56 = vld [vmem:[%s4986_s26 + $0x3c0] sm:$0xf] }
  0x4e   : > { %274 = vst [vmem:[%s4990_s27 + $0xec] sm:$0xf] %v273_v59  ;;  %v397_v57 = vld [vmem:[%s4986_s26 + $0x3c8] sm:$0xf]  ;;  %v399_v58 = vld [vmem:[%s4986_s26 + $0x3d0] sm:$0xf] }
  0x4f   : > { %276 = vst [vmem:[%s4990_s27 + $0xf0] sm:$0xf] %v275_v60  ;;  %v401_v59 = vld [vmem:[%s4986_s26 + $0x3d8] sm:$0xf]  ;;  %v403_v60 = vld [vmem:[%s4986_s26 + $0x3e0] sm:$0xf] }
  0x50   : > { %278 = vst [vmem:[%s4990_s27 + $0xf4] sm:$0xf] %v277_v61  ;;  %v405_v61 = vld [vmem:[%s4986_s26 + $0x3e8] sm:$0xf] }
  0x51   : > { %280 = vst [vmem:[%s4990_s27 + $0xf8] sm:$0xf] %v279_v62  ;;  %v407_v62 = vld [vmem:[%s4986_s26 + $0x3f0] sm:$0xf] }
  0x52   : > { %282 = vst [vmem:[%s4990_s27 + $0xfc] sm:$0xf] %v281_v63  ;;  %v409_v63 = vld [vmem:[%s4986_s26 + $0x3f8] sm:$0xf] }
  0x53   : > { %284 = vst [vmem:[%s4990_s27 + $0x100] sm:$0xf] %v283_v0  ;;  %v411_v0 = vld [vmem:[%s4986_s26 + $0x400] sm:$0xf] }
  0x54   : > { %286 = vst [vmem:[%s4990_s27 + $0x104] sm:$0xf] %v285_v1  ;;  %v413_v1 = vld [vmem:[%s4986_s26 + $0x408] sm:$0xf] }
  0x55   : > { %288 = vst [vmem:[%s4990_s27 + $0x108] sm:$0xf] %v287_v2  ;;  %v415_v2 = vld [vmem:[%s4986_s26 + $0x410] sm:$0xf] }
  0x56   : > { %290 = vst [vmem:[%s4990_s27 + $0x10c] sm:$0xf] %v289_v3  ;;  %v417_v3 = vld [vmem:[%s4986_s26 + $0x418] sm:$0xf] }
  0x57   : > { %292 = vst [vmem:[%s4990_s27 + $0x110] sm:$0xf] %v291_v4  ;;  %v419_v4 = vld [vmem:[%s4986_s26 + $0x420] sm:$0xf] }
  0x58   : > { %294 = vst [vmem:[%s4990_s27 + $0x114] sm:$0xf] %v293_v5  ;;  %v421_v5 = vld [vmem:[%s4986_s26 + $0x428] sm:$0xf] }
  0x59   : > { %296 = vst [vmem:[%s4990_s27 + $0x118] sm:$0xf] %v295_v6  ;;  %v423_v6 = vld [vmem:[%s4986_s26 + $0x430] sm:$0xf] }
  0x5a   : > { %298 = vst [vmem:[%s4990_s27 + $0x11c] sm:$0xf] %v297_v7  ;;  %v425_v7 = vld [vmem:[%s4986_s26 + $0x438] sm:$0xf] }
  0x5b   : > { %300 = vst [vmem:[%s4990_s27 + $0x120] sm:$0xf] %v299_v8  ;;  %v427_v8 = vld [vmem:[%s4986_s26 + $0x440] sm:$0xf] }
  0x5c   : > { %302 = vst [vmem:[%s4990_s27 + $0x124] sm:$0xf] %v301_v9  ;;  %v429_v9 = vld [vmem:[%s4986_s26 + $0x448] sm:$0xf] }
  0x5d   : > { %304 = vst [vmem:[%s4990_s27 + $0x128] sm:$0xf] %v303_v10  ;;  %v431_v10 = vld [vmem:[%s4986_s26 + $0x450] sm:$0xf] }
  0x5e   : > { %306 = vst [vmem:[%s4990_s27 + $0x12c] sm:$0xf] %v305_v11  ;;  %v433_v11 = vld [vmem:[%s4986_s26 + $0x458] sm:$0xf] }
  0x5f   : > { %308 = vst [vmem:[%s4990_s27 + $0x130] sm:$0xf] %v307_v12  ;;  %v435_v12 = vld [vmem:[%s4986_s26 + $0x460] sm:$0xf] }
  0x60   : > { %310 = vst [vmem:[%s4990_s27 + $0x134] sm:$0xf] %v309_v13  ;;  %v437_v13 = vld [vmem:[%s4986_s26 + $0x468] sm:$0xf] }
  0x61   : > { %312 = vst [vmem:[%s4990_s27 + $0x138] sm:$0xf] %v311_v14  ;;  %v439_v14 = vld [vmem:[%s4986_s26 + $0x470] sm:$0xf] }
  0x62   : > { %314 = vst [vmem:[%s4990_s27 + $0x13c] sm:$0xf] %v313_v15  ;;  %v441_v15 = vld [vmem:[%s4986_s26 + $0x478] sm:$0xf] }
  0x63   : > { %316 = vst [vmem:[%s4990_s27 + $0x140] sm:$0xf] %v315_v16  ;;  %v443_v16 = vld [vmem:[%s4986_s26 + $0x480] sm:$0xf] }
  0x64   : > { %318 = vst [vmem:[%s4990_s27 + $0x144] sm:$0xf] %v317_v17  ;;  %v445_v17 = vld [vmem:[%s4986_s26 + $0x488] sm:$0xf] }
  0x65   : > { %320 = vst [vmem:[%s4990_s27 + $0x148] sm:$0xf] %v319_v18  ;;  %v447_v18 = vld [vmem:[%s4986_s26 + $0x490] sm:$0xf] }
  0x66   : > { %322 = vst [vmem:[%s4990_s27 + $0x14c] sm:$0xf] %v321_v19  ;;  %v449_v19 = vld [vmem:[%s4986_s26 + $0x498] sm:$0xf] }
  0x67   : > { %324 = vst [vmem:[%s4990_s27 + $0x150] sm:$0xf] %v323_v20  ;;  %v451_v20 = vld [vmem:[%s4986_s26 + $0x4a0] sm:$0xf] }
  0x68   : > { %326 = vst [vmem:[%s4990_s27 + $0x154] sm:$0xf] %v325_v21  ;;  %v453_v21 = vld [vmem:[%s4986_s26 + $0x4a8] sm:$0xf] }
  0x69   : > { %328 = vst [vmem:[%s4990_s27 + $0x158] sm:$0xf] %v327_v22  ;;  %v455_v22 = vld [vmem:[%s4986_s26 + $0x4b0] sm:$0xf] }
  0x6a   : > { %330 = vst [vmem:[%s4990_s27 + $0x15c] sm:$0xf] %v329_v23  ;;  %v457_v23 = vld [vmem:[%s4986_s26 + $0x4b8] sm:$0xf] }
  0x6b   : > { %332 = vst [vmem:[%s4990_s27 + $0x160] sm:$0xf] %v331_v24  ;;  %v459_v24 = vld [vmem:[%s4986_s26 + $0x4c0] sm:$0xf] }
  0x6c   : > { %334 = vst [vmem:[%s4990_s27 + $0x164] sm:$0xf] %v333_v25  ;;  %v461_v25 = vld [vmem:[%s4986_s26 + $0x4c8] sm:$0xf] }
  0x6d   : > { %336 = vst [vmem:[%s4990_s27 + $0x168] sm:$0xf] %v335_v26  ;;  %v463_v26 = vld [vmem:[%s4986_s26 + $0x4d0] sm:$0xf] }
  0x6e   : > { %338 = vst [vmem:[%s4990_s27 + $0x16c] sm:$0xf] %v337_v27  ;;  %v465_v27 = vld [vmem:[%s4986_s26 + $0x4d8] sm:$0xf] }
  0x6f   : > { %340 = vst [vmem:[%s4990_s27 + $0x170] sm:$0xf] %v339_v28  ;;  %v467_v28 = vld [vmem:[%s4986_s26 + $0x4e0] sm:$0xf] }
  0x70   : > { %342 = vst [vmem:[%s4990_s27 + $0x174] sm:$0xf] %v341_v29  ;;  %v469_v29 = vld [vmem:[%s4986_s26 + $0x4e8] sm:$0xf] }
  0x71   : > { %344 = vst [vmem:[%s4990_s27 + $0x178] sm:$0xf] %v343_v30  ;;  %v471_v30 = vld [vmem:[%s4986_s26 + $0x4f0] sm:$0xf] }
  0x72   : > { %346 = vst [vmem:[%s4990_s27 + $0x17c] sm:$0xf] %v345_v31  ;;  %v473_v31 = vld [vmem:[%s4986_s26 + $0x4f8] sm:$0xf] }
  0x73   : > { %348 = vst [vmem:[%s4990_s27 + $0x180] sm:$0xf] %v347_v32  ;;  %v475_v32 = vld [vmem:[%s4986_s26 + $0x500] sm:$0xf] }
  0x74   : > { %350 = vst [vmem:[%s4990_s27 + $0x184] sm:$0xf] %v349_v33  ;;  %v477_v33 = vld [vmem:[%s4986_s26 + $0x508] sm:$0xf] }
  0x75   : > { %352 = vst [vmem:[%s4990_s27 + $0x188] sm:$0xf] %v351_v34  ;;  %v479_v34 = vld [vmem:[%s4986_s26 + $0x510] sm:$0xf] }
  0x76   : > { %354 = vst [vmem:[%s4990_s27 + $0x18c] sm:$0xf] %v353_v35  ;;  %v481_v35 = vld [vmem:[%s4986_s26 + $0x518] sm:$0xf] }
  0x77   : > { %356 = vst [vmem:[%s4990_s27 + $0x190] sm:$0xf] %v355_v36  ;;  %v483_v36 = vld [vmem:[%s4986_s26 + $0x520] sm:$0xf] }
  0x78   : > { %358 = vst [vmem:[%s4990_s27 + $0x194] sm:$0xf] %v357_v37  ;;  %v485_v37 = vld [vmem:[%s4986_s26 + $0x528] sm:$0xf] }
  0x79   : > { %360 = vst [vmem:[%s4990_s27 + $0x198] sm:$0xf] %v359_v38  ;;  %v487_v38 = vld [vmem:[%s4986_s26 + $0x530] sm:$0xf] }
  0x7a   : > { %362 = vst [vmem:[%s4990_s27 + $0x19c] sm:$0xf] %v361_v39  ;;  %v489_v39 = vld [vmem:[%s4986_s26 + $0x538] sm:$0xf] }
  0x7b   : > { %364 = vst [vmem:[%s4990_s27 + $0x1a0] sm:$0xf] %v363_v40  ;;  %v491_v40 = vld [vmem:[%s4986_s26 + $0x540] sm:$0xf] }
  0x7c   : > { %366 = vst [vmem:[%s4990_s27 + $0x1a4] sm:$0xf] %v365_v41  ;;  %v493_v41 = vld [vmem:[%s4986_s26 + $0x548] sm:$0xf] }
  0x7d   : > { %368 = vst [vmem:[%s4990_s27 + $0x1a8] sm:$0xf] %v367_v42  ;;  %v495_v42 = vld [vmem:[%s4986_s26 + $0x550] sm:$0xf] }
  0x7e   : > { %370 = vst [vmem:[%s4990_s27 + $0x1ac] sm:$0xf] %v369_v43  ;;  %v497_v43 = vld [vmem:[%s4986_s26 + $0x558] sm:$0xf] }
  0x7f   : > { %372 = vst [vmem:[%s4990_s27 + $0x1b0] sm:$0xf] %v371_v44  ;;  %v499_v44 = vld [vmem:[%s4986_s26 + $0x560] sm:$0xf] }
  0x80   : > { %374 = vst [vmem:[%s4990_s27 + $0x1b4] sm:$0xf] %v373_v45  ;;  %v501_v45 = vld [vmem:[%s4986_s26 + $0x568] sm:$0xf] }
  0x81   : > { %376 = vst [vmem:[%s4990_s27 + $0x1b8] sm:$0xf] %v375_v46  ;;  %v503_v46 = vld [vmem:[%s4986_s26 + $0x570] sm:$0xf] }
  0x82   : > { %378 = vst [vmem:[%s4990_s27 + $0x1bc] sm:$0xf] %v377_v47  ;;  %v505_v47 = vld [vmem:[%s4986_s26 + $0x578] sm:$0xf] }
  0x83   : > { %380 = vst [vmem:[%s4990_s27 + $0x1c0] sm:$0xf] %v379_v48  ;;  %v507_v48 = vld [vmem:[%s4986_s26 + $0x580] sm:$0xf] }
  0x84   : > { %382 = vst [vmem:[%s4990_s27 + $0x1c4] sm:$0xf] %v381_v49  ;;  %v509_v49 = vld [vmem:[%s4986_s26 + $0x588] sm:$0xf] }
  0x85   : > { %384 = vst [vmem:[%s4990_s27 + $0x1c8] sm:$0xf] %v383_v50  ;;  %v511_v50 = vld [vmem:[%s4986_s26 + $0x590] sm:$0xf] }
  0x86   : > { %386 = vst [vmem:[%s4990_s27 + $0x1cc] sm:$0xf] %v385_v51  ;;  %v513_v51 = vld [vmem:[%s4986_s26 + $0x598] sm:$0xf] }
  0x87   : > { %388 = vst [vmem:[%s4990_s27 + $0x1d0] sm:$0xf] %v387_v52  ;;  %v515_v52 = vld [vmem:[%s4986_s26 + $0x5a0] sm:$0xf] }
  0x88   : > { %390 = vst [vmem:[%s4990_s27 + $0x1d4] sm:$0xf] %v389_v53  ;;  %v517_v53 = vld [vmem:[%s4986_s26 + $0x5a8] sm:$0xf] }
  0x89   : > { %392 = vst [vmem:[%s4990_s27 + $0x1d8] sm:$0xf] %v391_v54  ;;  %v519_v54 = vld [vmem:[%s4986_s26 + $0x5b0] sm:$0xf] }
  0x8a   : > { %394 = vst [vmem:[%s4990_s27 + $0x1dc] sm:$0xf] %v393_v55  ;;  %v521_v55 = vld [vmem:[%s4986_s26 + $0x5b8] sm:$0xf] }
  0x8b   : > { %396 = vst [vmem:[%s4990_s27 + $0x1e0] sm:$0xf] %v395_v56  ;;  %v523_v56 = vld [vmem:[%s4986_s26 + $0x5c0] sm:$0xf] }
  0x8c   : > { %398 = vst [vmem:[%s4990_s27 + $0x1e4] sm:$0xf] %v397_v57  ;;  %v525_v57 = vld [vmem:[%s4986_s26 + $0x5c8] sm:$0xf] }
  0x8d   : > { %400 = vst [vmem:[%s4990_s27 + $0x1e8] sm:$0xf] %v399_v58  ;;  %v527_v58 = vld [vmem:[%s4986_s26 + $0x5d0] sm:$0xf] }
  0x8e   : > { %402 = vst [vmem:[%s4990_s27 + $0x1ec] sm:$0xf] %v401_v59  ;;  %v529_v59 = vld [vmem:[%s4986_s26 + $0x5d8] sm:$0xf] }
  0x8f   : > { %404 = vst [vmem:[%s4990_s27 + $0x1f0] sm:$0xf] %v403_v60  ;;  %v531_v60 = vld [vmem:[%s4986_s26 + $0x5e0] sm:$0xf] }
  0x90   : > { %406 = vst [vmem:[%s4990_s27 + $0x1f4] sm:$0xf] %v405_v61  ;;  %v533_v61 = vld [vmem:[%s4986_s26 + $0x5e8] sm:$0xf] }
  0x91   : > { %408 = vst [vmem:[%s4990_s27 + $0x1f8] sm:$0xf] %v407_v62  ;;  %v535_v62 = vld [vmem:[%s4986_s26 + $0x5f0] sm:$0xf] }
  0x92   : > { %410 = vst [vmem:[%s4990_s27 + $0x1fc] sm:$0xf] %v409_v63  ;;  %v537_v63 = vld [vmem:[%s4986_s26 + $0x5f8] sm:$0xf] }
  0x93   : > { %412 = vst [vmem:[%s4990_s27 + $0x200] sm:$0xf] %v411_v0  ;;  %v539_v0 = vld [vmem:[%s4986_s26 + $0x600] sm:$0xf] }
  0x94   : > { %414 = vst [vmem:[%s4990_s27 + $0x204] sm:$0xf] %v413_v1  ;;  %v541_v1 = vld [vmem:[%s4986_s26 + $0x608] sm:$0xf] }
  0x95   : > { %416 = vst [vmem:[%s4990_s27 + $0x208] sm:$0xf] %v415_v2  ;;  %v543_v2 = vld [vmem:[%s4986_s26 + $0x610] sm:$0xf] }
  0x96   : > { %418 = vst [vmem:[%s4990_s27 + $0x20c] sm:$0xf] %v417_v3  ;;  %v545_v3 = vld [vmem:[%s4986_s26 + $0x618] sm:$0xf] }
  0x97   : > { %420 = vst [vmem:[%s4990_s27 + $0x210] sm:$0xf] %v419_v4  ;;  %v547_v4 = vld [vmem:[%s4986_s26 + $0x620] sm:$0xf] }
  0x98   : > { %422 = vst [vmem:[%s4990_s27 + $0x214] sm:$0xf] %v421_v5  ;;  %v549_v5 = vld [vmem:[%s4986_s26 + $0x628] sm:$0xf] }
  0x99   : > { %424 = vst [vmem:[%s4990_s27 + $0x218] sm:$0xf] %v423_v6  ;;  %v551_v6 = vld [vmem:[%s4986_s26 + $0x630] sm:$0xf] }
  0x9a   : > { %426 = vst [vmem:[%s4990_s27 + $0x21c] sm:$0xf] %v425_v7  ;;  %v553_v7 = vld [vmem:[%s4986_s26 + $0x638] sm:$0xf] }
  0x9b   : > { %428 = vst [vmem:[%s4990_s27 + $0x220] sm:$0xf] %v427_v8  ;;  %v555_v8 = vld [vmem:[%s4986_s26 + $0x640] sm:$0xf] }
  0x9c   : > { %430 = vst [vmem:[%s4990_s27 + $0x224] sm:$0xf] %v429_v9  ;;  %v557_v9 = vld [vmem:[%s4986_s26 + $0x648] sm:$0xf] }
  0x9d   : > { %432 = vst [vmem:[%s4990_s27 + $0x228] sm:$0xf] %v431_v10  ;;  %v559_v10 = vld [vmem:[%s4986_s26 + $0x650] sm:$0xf] }
  0x9e   : > { %434 = vst [vmem:[%s4990_s27 + $0x22c] sm:$0xf] %v433_v11  ;;  %v561_v11 = vld [vmem:[%s4986_s26 + $0x658] sm:$0xf] }
  0x9f   : > { %436 = vst [vmem:[%s4990_s27 + $0x230] sm:$0xf] %v435_v12  ;;  %v563_v12 = vld [vmem:[%s4986_s26 + $0x660] sm:$0xf] }
  0xa0   : > { %438 = vst [vmem:[%s4990_s27 + $0x234] sm:$0xf] %v437_v13  ;;  %v565_v13 = vld [vmem:[%s4986_s26 + $0x668] sm:$0xf] }
  0xa1   : > { %440 = vst [vmem:[%s4990_s27 + $0x238] sm:$0xf] %v439_v14  ;;  %v567_v14 = vld [vmem:[%s4986_s26 + $0x670] sm:$0xf] }
  0xa2   : > { %442 = vst [vmem:[%s4990_s27 + $0x23c] sm:$0xf] %v441_v15  ;;  %v569_v15 = vld [vmem:[%s4986_s26 + $0x678] sm:$0xf] }
  0xa3   : > { %444 = vst [vmem:[%s4990_s27 + $0x240] sm:$0xf] %v443_v16  ;;  %v571_v16 = vld [vmem:[%s4986_s26 + $0x680] sm:$0xf] }
  0xa4   : > { %446 = vst [vmem:[%s4990_s27 + $0x244] sm:$0xf] %v445_v17  ;;  %v573_v17 = vld [vmem:[%s4986_s26 + $0x688] sm:$0xf] }
  0xa5   : > { %448 = vst [vmem:[%s4990_s27 + $0x248] sm:$0xf] %v447_v18  ;;  %v575_v18 = vld [vmem:[%s4986_s26 + $0x690] sm:$0xf] }
  0xa6   : > { %450 = vst [vmem:[%s4990_s27 + $0x24c] sm:$0xf] %v449_v19  ;;  %v577_v19 = vld [vmem:[%s4986_s26 + $0x698] sm:$0xf] }
  0xa7   : > { %452 = vst [vmem:[%s4990_s27 + $0x250] sm:$0xf] %v451_v20  ;;  %v579_v20 = vld [vmem:[%s4986_s26 + $0x6a0] sm:$0xf] }
  0xa8   : > { %454 = vst [vmem:[%s4990_s27 + $0x254] sm:$0xf] %v453_v21  ;;  %v581_v21 = vld [vmem:[%s4986_s26 + $0x6a8] sm:$0xf] }
  0xa9   : > { %456 = vst [vmem:[%s4990_s27 + $0x258] sm:$0xf] %v455_v22  ;;  %v583_v22 = vld [vmem:[%s4986_s26 + $0x6b0] sm:$0xf] }
  0xaa   : > { %458 = vst [vmem:[%s4990_s27 + $0x25c] sm:$0xf] %v457_v23  ;;  %v585_v23 = vld [vmem:[%s4986_s26 + $0x6b8] sm:$0xf] }
  0xab   : > { %460 = vst [vmem:[%s4990_s27 + $0x260] sm:$0xf] %v459_v24  ;;  %v587_v24 = vld [vmem:[%s4986_s26 + $0x6c0] sm:$0xf] }
  0xac   : > { %462 = vst [vmem:[%s4990_s27 + $0x264] sm:$0xf] %v461_v25  ;;  %v589_v25 = vld [vmem:[%s4986_s26 + $0x6c8] sm:$0xf] }
  0xad   : > { %464 = vst [vmem:[%s4990_s27 + $0x268] sm:$0xf] %v463_v26  ;;  %v591_v26 = vld [vmem:[%s4986_s26 + $0x6d0] sm:$0xf] }
  0xae   : > { %466 = vst [vmem:[%s4990_s27 + $0x26c] sm:$0xf] %v465_v27  ;;  %v593_v27 = vld [vmem:[%s4986_s26 + $0x6d8] sm:$0xf] }
  0xaf   : > { %468 = vst [vmem:[%s4990_s27 + $0x270] sm:$0xf] %v467_v28  ;;  %v595_v28 = vld [vmem:[%s4986_s26 + $0x6e0] sm:$0xf] }
  0xb0   : > { %470 = vst [vmem:[%s4990_s27 + $0x274] sm:$0xf] %v469_v29  ;;  %v597_v29 = vld [vmem:[%s4986_s26 + $0x6e8] sm:$0xf] }
  0xb1   : > { %472 = vst [vmem:[%s4990_s27 + $0x278] sm:$0xf] %v471_v30  ;;  %v599_v30 = vld [vmem:[%s4986_s26 + $0x6f0] sm:$0xf] }
  0xb2   : > { %474 = vst [vmem:[%s4990_s27 + $0x27c] sm:$0xf] %v473_v31  ;;  %v601_v31 = vld [vmem:[%s4986_s26 + $0x6f8] sm:$0xf] }
  0xb3   : > { %476 = vst [vmem:[%s4990_s27 + $0x280] sm:$0xf] %v475_v32  ;;  %v603_v32 = vld [vmem:[%s4986_s26 + $0x700] sm:$0xf] }
  0xb4   : > { %478 = vst [vmem:[%s4990_s27 + $0x284] sm:$0xf] %v477_v33  ;;  %v605_v33 = vld [vmem:[%s4986_s26 + $0x708] sm:$0xf] }
  0xb5   : > { %480 = vst [vmem:[%s4990_s27 + $0x288] sm:$0xf] %v479_v34  ;;  %v607_v34 = vld [vmem:[%s4986_s26 + $0x710] sm:$0xf] }
  0xb6   : > { %482 = vst [vmem:[%s4990_s27 + $0x28c] sm:$0xf] %v481_v35  ;;  %v609_v35 = vld [vmem:[%s4986_s26 + $0x718] sm:$0xf] }
  0xb7   : > { %484 = vst [vmem:[%s4990_s27 + $0x290] sm:$0xf] %v483_v36  ;;  %v611_v36 = vld [vmem:[%s4986_s26 + $0x720] sm:$0xf] }
  0xb8   : > { %486 = vst [vmem:[%s4990_s27 + $0x294] sm:$0xf] %v485_v37  ;;  %v613_v37 = vld [vmem:[%s4986_s26 + $0x728] sm:$0xf] }
  0xb9   : > { %488 = vst [vmem:[%s4990_s27 + $0x298] sm:$0xf] %v487_v38  ;;  %v615_v38 = vld [vmem:[%s4986_s26 + $0x730] sm:$0xf] }
  0xba   : > { %490 = vst [vmem:[%s4990_s27 + $0x29c] sm:$0xf] %v489_v39  ;;  %v617_v39 = vld [vmem:[%s4986_s26 + $0x738] sm:$0xf] }
  0xbb   : > { %492 = vst [vmem:[%s4990_s27 + $0x2a0] sm:$0xf] %v491_v40  ;;  %v619_v40 = vld [vmem:[%s4986_s26 + $0x740] sm:$0xf] }
  0xbc   : > { %494 = vst [vmem:[%s4990_s27 + $0x2a4] sm:$0xf] %v493_v41  ;;  %v621_v41 = vld [vmem:[%s4986_s26 + $0x748] sm:$0xf] }
  0xbd   : > { %496 = vst [vmem:[%s4990_s27 + $0x2a8] sm:$0xf] %v495_v42  ;;  %v623_v42 = vld [vmem:[%s4986_s26 + $0x750] sm:$0xf] }
  0xbe   : > { %498 = vst [vmem:[%s4990_s27 + $0x2ac] sm:$0xf] %v497_v43  ;;  %v625_v43 = vld [vmem:[%s4986_s26 + $0x758] sm:$0xf] }
  0xbf   : > { %500 = vst [vmem:[%s4990_s27 + $0x2b0] sm:$0xf] %v499_v44  ;;  %v627_v44 = vld [vmem:[%s4986_s26 + $0x760] sm:$0xf] }
  0xc0   : > { %502 = vst [vmem:[%s4990_s27 + $0x2b4] sm:$0xf] %v501_v45  ;;  %v629_v45 = vld [vmem:[%s4986_s26 + $0x768] sm:$0xf] }
  0xc1   : > { %504 = vst [vmem:[%s4990_s27 + $0x2b8] sm:$0xf] %v503_v46  ;;  %v631_v46 = vld [vmem:[%s4986_s26 + $0x770] sm:$0xf] }
  0xc2   : > { %506 = vst [vmem:[%s4990_s27 + $0x2bc] sm:$0xf] %v505_v47  ;;  %v633_v47 = vld [vmem:[%s4986_s26 + $0x778] sm:$0xf] }
  0xc3   : > { %508 = vst [vmem:[%s4990_s27 + $0x2c0] sm:$0xf] %v507_v48  ;;  %v635_v48 = vld [vmem:[%s4986_s26 + $0x780] sm:$0xf] }
  0xc4   : > { %510 = vst [vmem:[%s4990_s27 + $0x2c4] sm:$0xf] %v509_v49  ;;  %v637_v49 = vld [vmem:[%s4986_s26 + $0x788] sm:$0xf] }
  0xc5   : > { %512 = vst [vmem:[%s4990_s27 + $0x2c8] sm:$0xf] %v511_v50  ;;  %v639_v50 = vld [vmem:[%s4986_s26 + $0x790] sm:$0xf] }
  0xc6   : > { %514 = vst [vmem:[%s4990_s27 + $0x2cc] sm:$0xf] %v513_v51  ;;  %v641_v51 = vld [vmem:[%s4986_s26 + $0x798] sm:$0xf] }
  0xc7   : > { %516 = vst [vmem:[%s4990_s27 + $0x2d0] sm:$0xf] %v515_v52  ;;  %v643_v52 = vld [vmem:[%s4986_s26 + $0x7a0] sm:$0xf] }
  0xc8   : > { %518 = vst [vmem:[%s4990_s27 + $0x2d4] sm:$0xf] %v517_v53  ;;  %v645_v53 = vld [vmem:[%s4986_s26 + $0x7a8] sm:$0xf] }
  0xc9   : > { %520 = vst [vmem:[%s4990_s27 + $0x2d8] sm:$0xf] %v519_v54  ;;  %v647_v54 = vld [vmem:[%s4986_s26 + $0x7b0] sm:$0xf] }
  0xca   : > { %522 = vst [vmem:[%s4990_s27 + $0x2dc] sm:$0xf] %v521_v55  ;;  %v649_v55 = vld [vmem:[%s4986_s26 + $0x7b8] sm:$0xf] }
  0xcb   : > { %524 = vst [vmem:[%s4990_s27 + $0x2e0] sm:$0xf] %v523_v56  ;;  %v651_v56 = vld [vmem:[%s4986_s26 + $0x7c0] sm:$0xf] }
  0xcc   : > { %526 = vst [vmem:[%s4990_s27 + $0x2e4] sm:$0xf] %v525_v57  ;;  %v653_v57 = vld [vmem:[%s4986_s26 + $0x7c8] sm:$0xf] }
  0xcd   : > { %528 = vst [vmem:[%s4990_s27 + $0x2e8] sm:$0xf] %v527_v58  ;;  %v655_v58 = vld [vmem:[%s4986_s26 + $0x7d0] sm:$0xf] }
  0xce   : > { %530 = vst [vmem:[%s4990_s27 + $0x2ec] sm:$0xf] %v529_v59  ;;  %v657_v59 = vld [vmem:[%s4986_s26 + $0x7d8] sm:$0xf] }
  0xcf   : > { %532 = vst [vmem:[%s4990_s27 + $0x2f0] sm:$0xf] %v531_v60  ;;  %v659_v60 = vld [vmem:[%s4986_s26 + $0x7e0] sm:$0xf] }
  0xd0   : > { %534 = vst [vmem:[%s4990_s27 + $0x2f4] sm:$0xf] %v533_v61  ;;  %v661_v61 = vld [vmem:[%s4986_s26 + $0x7e8] sm:$0xf] }
  0xd1   : > { %536 = vst [vmem:[%s4990_s27 + $0x2f8] sm:$0xf] %v535_v62  ;;  %v663_v62 = vld [vmem:[%s4986_s26 + $0x7f0] sm:$0xf] }
  0xd2   : > { %538 = vst [vmem:[%s4990_s27 + $0x2fc] sm:$0xf] %v537_v63  ;;  %v665_v63 = vld [vmem:[%s4986_s26 + $0x7f8] sm:$0xf] }
  0xd3   : > { %540 = vst [vmem:[%s4990_s27 + $0x300] sm:$0xf] %v539_v0 }
  0xd4   : > { %542 = vst [vmem:[%s4990_s27 + $0x304] sm:$0xf] %v541_v1 }
  0xd5   : > { %544 = vst [vmem:[%s4990_s27 + $0x308] sm:$0xf] %v543_v2 }
  0xd6   : > { %546 = vst [vmem:[%s4990_s27 + $0x30c] sm:$0xf] %v545_v3 }
  0xd7   : > { %548 = vst [vmem:[%s4990_s27 + $0x310] sm:$0xf] %v547_v4 }
  0xd8   : > { %550 = vst [vmem:[%s4990_s27 + $0x314] sm:$0xf] %v549_v5 }
  0xd9   : > { %552 = vst [vmem:[%s4990_s27 + $0x318] sm:$0xf] %v551_v6 }
  0xda   : > { %554 = vst [vmem:[%s4990_s27 + $0x31c] sm:$0xf] %v553_v7 }
  0xdb   : > { %556 = vst [vmem:[%s4990_s27 + $0x320] sm:$0xf] %v555_v8 }
  0xdc   : > { %558 = vst [vmem:[%s4990_s27 + $0x324] sm:$0xf] %v557_v9 }
  0xdd   : > { %560 = vst [vmem:[%s4990_s27 + $0x328] sm:$0xf] %v559_v10 }
  0xde   : > { %562 = vst [vmem:[%s4990_s27 + $0x32c] sm:$0xf] %v561_v11 }
  0xdf   : > { %564 = vst [vmem:[%s4990_s27 + $0x330] sm:$0xf] %v563_v12 }
  0xe0   : > { %566 = vst [vmem:[%s4990_s27 + $0x334] sm:$0xf] %v565_v13 }
  0xe1   : > { %568 = vst [vmem:[%s4990_s27 + $0x338] sm:$0xf] %v567_v14 }
  0xe2   : > { %570 = vst [vmem:[%s4990_s27 + $0x33c] sm:$0xf] %v569_v15 }
  0xe3   : > { %572 = vst [vmem:[%s4990_s27 + $0x340] sm:$0xf] %v571_v16 }
  0xe4   : > { %574 = vst [vmem:[%s4990_s27 + $0x344] sm:$0xf] %v573_v17 }
  0xe5   : > { %576 = vst [vmem:[%s4990_s27 + $0x348] sm:$0xf] %v575_v18 }
  0xe6   : > { %578 = vst [vmem:[%s4990_s27 + $0x34c] sm:$0xf] %v577_v19 }
  0xe7   : > { %580 = vst [vmem:[%s4990_s27 + $0x350] sm:$0xf] %v579_v20 }
  0xe8   : > { %582 = vst [vmem:[%s4990_s27 + $0x354] sm:$0xf] %v581_v21 }
  0xe9   : > { %584 = vst [vmem:[%s4990_s27 + $0x358] sm:$0xf] %v583_v22 }
  0xea   : > { %586 = vst [vmem:[%s4990_s27 + $0x35c] sm:$0xf] %v585_v23 }
  0xeb   : > { %588 = vst [vmem:[%s4990_s27 + $0x360] sm:$0xf] %v587_v24 }
  0xec   : > { %590 = vst [vmem:[%s4990_s27 + $0x364] sm:$0xf] %v589_v25 }
  0xed   : > { %592 = vst [vmem:[%s4990_s27 + $0x368] sm:$0xf] %v591_v26 }
  0xee   : > { %594 = vst [vmem:[%s4990_s27 + $0x36c] sm:$0xf] %v593_v27 }
  0xef   : > { %596 = vst [vmem:[%s4990_s27 + $0x370] sm:$0xf] %v595_v28 }
  0xf0   : > { %598 = vst [vmem:[%s4990_s27 + $0x374] sm:$0xf] %v597_v29 }
  0xf1   : > { %600 = vst [vmem:[%s4990_s27 + $0x378] sm:$0xf] %v599_v30 }
  0xf2   : > { %602 = vst [vmem:[%s4990_s27 + $0x37c] sm:$0xf] %v601_v31 }
  0xf3   : > { %604 = vst [vmem:[%s4990_s27 + $0x380] sm:$0xf] %v603_v32 }
  0xf4   : > { %606 = vst [vmem:[%s4990_s27 + $0x384] sm:$0xf] %v605_v33 }
  0xf5   : > { %608 = vst [vmem:[%s4990_s27 + $0x388] sm:$0xf] %v607_v34 }
  0xf6   : > { %610 = vst [vmem:[%s4990_s27 + $0x38c] sm:$0xf] %v609_v35 }
  0xf7   : > { %612 = vst [vmem:[%s4990_s27 + $0x390] sm:$0xf] %v611_v36 }
  0xf8   : > { %614 = vst [vmem:[%s4990_s27 + $0x394] sm:$0xf] %v613_v37 }
  0xf9   : > { %616 = vst [vmem:[%s4990_s27 + $0x398] sm:$0xf] %v615_v38 }
  0xfa   : > { %618 = vst [vmem:[%s4990_s27 + $0x39c] sm:$0xf] %v617_v39 }
  0xfb   : > { %620 = vst [vmem:[%s4990_s27 + $0x3a0] sm:$0xf] %v619_v40 }
  0xfc   : > { %622 = vst [vmem:[%s4990_s27 + $0x3a4] sm:$0xf] %v621_v41 }
  0xfd   : > { %624 = vst [vmem:[%s4990_s27 + $0x3a8] sm:$0xf] %v623_v42 }
  0xfe   : > { %626 = vst [vmem:[%s4990_s27 + $0x3ac] sm:$0xf] %v625_v43 }
  0xff   : > { %628 = vst [vmem:[%s4990_s27 + $0x3b0] sm:$0xf] %v627_v44 }
 0x100   : > { %630 = vst [vmem:[%s4990_s27 + $0x3b4] sm:$0xf] %v629_v45 }
 0x101   : > { %632 = vst [vmem:[%s4990_s27 + $0x3b8] sm:$0xf] %v631_v46 }
 0x102   : > { %634 = vst [vmem:[%s4990_s27 + $0x3bc] sm:$0xf] %v633_v47 }
 0x103   : > { %636 = vst [vmem:[%s4990_s27 + $0x3c0] sm:$0xf] %v635_v48 }
 0x104   : > { %638 = vst [vmem:[%s4990_s27 + $0x3c4] sm:$0xf] %v637_v49 }
 0x105   : > { %640 = vst [vmem:[%s4990_s27 + $0x3c8] sm:$0xf] %v639_v50 }
 0x106   : > { %642 = vst [vmem:[%s4990_s27 + $0x3cc] sm:$0xf] %v641_v51 }
 0x107   : > { %644 = vst [vmem:[%s4990_s27 + $0x3d0] sm:$0xf] %v643_v52 }
 0x108   : > { %646 = vst [vmem:[%s4990_s27 + $0x3d4] sm:$0xf] %v645_v53 }
 0x109   : > { %648 = vst [vmem:[%s4990_s27 + $0x3d8] sm:$0xf] %v647_v54 }
 0x10a   : > { %650 = vst [vmem:[%s4990_s27 + $0x3dc] sm:$0xf] %v649_v55 }
 0x10b   : > { %652 = vst [vmem:[%s4990_s27 + $0x3e0] sm:$0xf] %v651_v56 }
 0x10c   : > { %654 = vst [vmem:[%s4990_s27 + $0x3e4] sm:$0xf] %v653_v57 }
 0x10d   : > { %656 = vst [vmem:[%s4990_s27 + $0x3e8] sm:$0xf] %v655_v58 }
 0x10e   : > { %658 = vst [vmem:[%s4990_s27 + $0x3ec] sm:$0xf] %v657_v59 }
 0x10f   : > { %660 = vst [vmem:[%s4990_s27 + $0x3f0] sm:$0xf] %v659_v60 }
 0x110   : > { %662 = vst [vmem:[%s4990_s27 + $0x3f4] sm:$0xf] %v661_v61 }
 0x111   : > { %664 = vst [vmem:[%s4990_s27 + $0x3f8] sm:$0xf] %v663_v62 }
 0x112   : > { %666 = vst [vmem:[%s4990_s27 + $0x3fc] sm:$0xf] %v665_v63 }
 0x113 PF: > { %p4050_p7 = scmp.ge.s32.totalorder %s4922_s14, 1  ;;  %p2257_p8 = scmp.lt.s32.totalorder %s4922_s14, 3 }
 0x115   : > { %p2258_p9 = pnand %p4050_p7, %p2257_p8 }
 0x116   : > { %s2264_s28 = sand.u32 (!%p2258_p9), 1, %s4914_s12   ;;  %p2289_p10 = scmp.lt.s32.totalorder (!%p2258_p9), %s4961_s15, 1 }
 0x117   : > { %2261 = sbr.rel (%p2258_p9) target bundleno = 647 (0x287), region = 80  ;;  %s4051_s29 = sshll.u32 (!%p2258_p9), %s2264_s28, 10 }
 0x118   : > { %s5507_s30 = scalar_lea.vmem (!%p2258_p9), [#allocation2], %s4051_s29 }
 0x11c   : > { %v4736_v0 = vld [vmem:[%s5507_s30 + $0x38] sm:$0xff]  ;;  %v4735_v4 = vld [vmem:[%s5507_s30 + $0x30] sm:$0xff]  ;;  %v4734_v8 = vld [vmem:[%s5507_s30 + $0x28] sm:$0xff]  ;;  %s5537_s4 = scalar_select %p2289_p10, %s4961_s15, 1 }
 0x11d   : > { %v4744_v1 = vld [vmem:[%s5507_s30 + $0x78] sm:$0xff]  ;;  %3512 = vmatpush.bf16.msra.mxu0 %v4736_v0  ;;  %v4743_v5 = vld [vmem:[%s5507_s30 + $0x70] sm:$0xff]  ;;  %v4742_v9 = vld [vmem:[%s5507_s30 + $0x68] sm:$0xff]  ;;  %s4694_s12 = sshll.u32 (%p4976_p5), %s4961_s15, 2 }
 0x11e   : > { %v4752_v2 = vld [vmem:[%s5507_s30 + $0xb8] sm:$0xff]  ;;  %3531 = vmatpush.bf16.msra.mxu1 %v4744_v1  ;;  %v4751_v6 = vld [vmem:[%s5507_s30 + $0xb0] sm:$0xff]  ;;  %v4750_v10 = vld [vmem:[%s5507_s30 + $0xa8] sm:$0xff]  ;;  %s2291_s11 = scalar_lea.vmem %s5862_s2, %s5537_s4  ;;  %s4052_s4 = sshll.u32 %s2264_s28, 4 }
 0x11f   : > { %v4760_v3 = vld [vmem:[%s5507_s30 + $0xf8] sm:$0xff]  ;;  %3550 = vmatpush.bf16.msra.mxu2 %v4752_v2  ;;  %v4759_v7 = vld [vmem:[%s5507_s30 + $0xf0] sm:$0xff]  ;;  %v4758_v11 = vld [vmem:[%s5507_s30 + $0xe8] sm:$0xff]  ;;  %s3917_s24 = scalar_lea.vmem (%p4976_p5), %s5863_s3, %s4694_s12 }
 0x120   : > { %3569 = vmatpush.bf16.msra.mxu3 %v4760_v3  ;;  %v4733_v12 = vld [vmem:[%s5507_s30 + $0x20] sm:$0xff]  ;;  %v4732_v16 = vld [vmem:[%s5507_s30 + $0x18] sm:$0xff]  ;;  %v4731_v20 = vld [vmem:[%s5507_s30 + $0x10] sm:$0xff] }
 0x121   : > { %3513 = vmatpush.bf16.msra.mxu0 %v4735_v4  ;;  %v4741_v13 = vld [vmem:[%s5507_s30 + $0x60] sm:$0xff]  ;;  %v4740_v17 = vld [vmem:[%s5507_s30 + $0x58] sm:$0xff]  ;;  %v4739_v21 = vld [vmem:[%s5507_s30 + $0x50] sm:$0xff] }
 0x122   : > { %3532 = vmatpush.bf16.msra.mxu1 %v4743_v5  ;;  %v4749_v14 = vld [vmem:[%s5507_s30 + $0xa0] sm:$0xff]  ;;  %v4748_v18 = vld [vmem:[%s5507_s30 + $0x98] sm:$0xff]  ;;  %v4747_v22 = vld [vmem:[%s5507_s30 + $0x90] sm:$0xff] }
 0x123   : > { %3551 = vmatpush.bf16.msra.mxu2 %v4751_v6  ;;  %v4757_v15 = vld [vmem:[%s5507_s30 + $0xe0] sm:$0xff]  ;;  %v4756_v19 = vld [vmem:[%s5507_s30 + $0xd8] sm:$0xff]  ;;  %v4755_v23 = vld [vmem:[%s5507_s30 + $0xd0] sm:$0xff] }
 0x124   : > { %3570 = vmatpush.bf16.msra.mxu3 %v4759_v7  ;;  %v4730_v24 = vld [vmem:[%s5507_s30 + $0x8] sm:$0xff]  ;;  %v4729_v28 = vld [vmem:[%s5507_s30] sm:$0xff]  ;;  %v4784_v40 = vld [vmem:[%s5507_s30 + $0x1b8] sm:$0xff] }
 0x125   : > { %3514 = vmatpush.bf16.msra.mxu0 %v4734_v8  ;;  %v4738_v25 = vld [vmem:[%s5507_s30 + $0x48] sm:$0xff]  ;;  %v4737_v29 = vld [vmem:[%s5507_s30 + $0x40] sm:$0xff]  ;;  %v4768_v41 = vld [vmem:[%s5507_s30 + $0x138] sm:$0xff] }
 0x126   : > { %3533 = vmatpush.bf16.msra.mxu1 %v4742_v9  ;;  %v4746_v26 = vld [vmem:[%s5507_s30 + $0x88] sm:$0xff]  ;;  %v4055_v30 = vld [vmem:[%s5860_s0] sm:$0xf]  ;;  %v4697_v34 = vld [vmem:[%s5860_s0 + $0x4] sm:$0xf] }
 0x127   : > { %3552 = vmatpush.bf16.msra.mxu2 %v4750_v10  ;;  %v4754_v27 = vld [vmem:[%s5507_s30 + $0xc8] sm:$0xff]  ;;  %v4705_v31 = vld [vmem:[%s5860_s0 + $0x3c] sm:$0xf0]  ;;  %v4057_v35 = vld [vmem:[%s5860_s0 + $0x40] sm:$0xf0] }
 0x128   : > { %3571 = vmatpush.bf16.msra.mxu3 %v4758_v11  ;;  %v4745_v32 = vld [vmem:[%s5507_s30 + $0x80] sm:$0xff]  ;;  %v4063_v36 = vld [vmem:[%s5860_s0 + $0x8] sm:$0xf]  ;;  %v4698_v38 = vld [vmem:[%s5860_s0 + $0xc] sm:$0xf]  ;;  %v4056_v42 = vor.u32 %v4705_v31, %v4055_v30  ;;  %v4060_v43 = vor.u32 %v4697_v34, %v4057_v35 }
 0x129   : > { %3515 = vmatpush.bf16.msra.mxu0 %v4733_v12  ;;  %v4753_v33 = vld [vmem:[%s5507_s30 + $0xc0] sm:$0xff]  ;;  %v4706_v37 = vld [vmem:[%s5860_s0 + $0x44] sm:$0xf0]  ;;  %v4065_v39 = vld [vmem:[%s5860_s0 + $0x48] sm:$0xf0] }
 0x12a   : > { %3534 = vmatpush.bf16.msra.mxu1 %v4741_v13  ;;  %v4064_v44 = vor.u32 %v4706_v37, %v4063_v36  ;;  %v4068_v45 = vor.u32 %v4698_v38, %v4065_v39  ;;  %v4776_v46 = vld [vmem:[%s5507_s30 + $0x178] sm:$0xff]  ;;  %v4783_v48 = vld [vmem:[%s5507_s30 + $0x1b0] sm:$0xff]  ;;  %v4782_v52 = vld [vmem:[%s5507_s30 + $0x1a8] sm:$0xff] }
 0x12b   : > { %3553 = vmatpush.bf16.msra.mxu2 %v4749_v14  ;;  %v4792_v47 = vld [vmem:[%s5507_s30 + $0x1f8] sm:$0xff]  ;;  %v4767_v49 = vld [vmem:[%s5507_s30 + $0x130] sm:$0xff]  ;;  %v4766_v53 = vld [vmem:[%s5507_s30 + $0x128] sm:$0xff] }
 0x12c   : > { %3572 = vmatpush.bf16.msra.mxu3 %v4757_v15  ;;  %v4775_v50 = vld [vmem:[%s5507_s30 + $0x170] sm:$0xff]  ;;  %v4774_v54 = vld [vmem:[%s5507_s30 + $0x168] sm:$0xff]  ;;  %v4781_v56 = vld [vmem:[%s5507_s30 + $0x1a0] sm:$0xff] }
 0x12d   : > { %3516 = vmatpush.bf16.msra.mxu0 %v4732_v16  ;;  %v4791_v51 = vld [vmem:[%s5507_s30 + $0x1f0] sm:$0xff]  ;;  %v4790_v55 = vld [vmem:[%s5507_s30 + $0x1e8] sm:$0xff]  ;;  %v4765_v57 = vld [vmem:[%s5507_s30 + $0x120] sm:$0xff] }
 0x12e   : > { %3535 = vmatpush.bf16.msra.mxu1 %v4740_v17  ;;  %v4773_v58 = vld [vmem:[%s5507_s30 + $0x160] sm:$0xff]  ;;  %v4127_v0 = vld [vmem:[%s5860_s0 + $0x88] sm:$0xf]  ;;  %v4714_v2 = vld [vmem:[%s5860_s0 + $0x8c] sm:$0xf] }
 0x12f   : > { %3554 = vmatpush.bf16.msra.mxu2 %v4748_v18  ;;  %v4789_v59 = vld [vmem:[%s5507_s30 + $0x1e0] sm:$0xff]  ;;  %v4722_v1 = vld [vmem:[%s5860_s0 + $0xc4] sm:$0xf0]  ;;  %v4129_v3 = vld [vmem:[%s5860_s0 + $0xc8] sm:$0xf0] }
 0x130   : > { %3573 = vmatpush.bf16.msra.mxu3 %v4756_v19  ;;  %v4119_v60 = vld [vmem:[%s5860_s0 + $0x80] sm:$0xf]  ;;  %v4713_v62 = vld [vmem:[%s5860_s0 + $0x84] sm:$0xf]  ;;  %v4780_v4 = vld [vmem:[%s5507_s30 + $0x198] sm:$0xff]  ;;  %v4128_v8 = vor.u32 %v4722_v1, %v4127_v0  ;;  %v4132_v9 = vor.u32 %v4714_v2, %v4129_v3 }
 0x131   : > { %3517 = vmatpush.bf16.msra.mxu0 %v4731_v20  ;;  %v4721_v61 = vld [vmem:[%s5860_s0 + $0xbc] sm:$0xf0]  ;;  %v4121_v63 = vld [vmem:[%s5860_s0 + $0xc0] sm:$0xf0]  ;;  %v4764_v5 = vld [vmem:[%s5507_s30 + $0x118] sm:$0xff] }
 0x132   : > { %3536 = vmatpush.bf16.msra.mxu1 %v4739_v21  ;;  %v4120_v6 = vor.u32 %v4721_v61, %v4119_v60  ;;  %v4124_v7 = vor.u32 %v4713_v62, %v4121_v63  ;;  %v4772_v10 = vld [vmem:[%s5507_s30 + $0x158] sm:$0xff]  ;;  %v4779_v12 = vld [vmem:[%s5507_s30 + $0x190] sm:$0xff]  ;;  %v4778_v16 = vld [vmem:[%s5507_s30 + $0x188] sm:$0xff] }
 0x133   : > { %3555 = vmatpush.bf16.msra.mxu2 %v4747_v22  ;;  %v4788_v11 = vld [vmem:[%s5507_s30 + $0x1d8] sm:$0xff]  ;;  %v4763_v13 = vld [vmem:[%s5507_s30 + $0x110] sm:$0xff]  ;;  %v4762_v17 = vld [vmem:[%s5507_s30 + $0x108] sm:$0xff] }
 0x134   : > { %3574 = vmatpush.bf16.msra.mxu3 %v4755_v23  ;;  %v4771_v14 = vld [vmem:[%s5507_s30 + $0x150] sm:$0xff]  ;;  %v4770_v18 = vld [vmem:[%s5507_s30 + $0x148] sm:$0xff]  ;;  %v4777_v20 = vld [vmem:[%s5507_s30 + $0x180] sm:$0xff] }
 0x135   : > { %3518 = vmatpush.bf16.msra.mxu0 %v4730_v24  ;;  %v4787_v15 = vld [vmem:[%s5507_s30 + $0x1d0] sm:$0xff]  ;;  %v4786_v19 = vld [vmem:[%s5507_s30 + $0x1c8] sm:$0xff]  ;;  %v4761_v21 = vld [vmem:[%s5507_s30 + $0x100] sm:$0xff] }
 0x136   : > { %3537 = vmatpush.bf16.msra.mxu1 %v4738_v25  ;;  %v4769_v22 = vld [vmem:[%s5507_s30 + $0x140] sm:$0xff]  ;;  %v4071_v24 = vld [vmem:[%s5860_s0 + $0x10] sm:$0xf]  ;;  %v4816_v25 = vld [vmem:[%s5507_s30 + $0x2b8] sm:$0xff] }
 0x137   : > { %3556 = vmatpush.bf16.msra.mxu2 %v4746_v26  ;;  %v4785_v23 = vld [vmem:[%s5507_s30 + $0x1c0] sm:$0xff]  ;;  %v4800_v26 = vld [vmem:[%s5507_s30 + $0x238] sm:$0xff]  ;;  %v4815_v37 = vld [vmem:[%s5507_s30 + $0x2b0] sm:$0xff] }
 0x138   : > { %3575 = vmatpush.bf16.msra.mxu3 %v4754_v27  ;;  %v4707_v27 = vld [vmem:[%s5860_s0 + $0x4c] sm:$0xf0]  ;;  %v4079_v30 = vld [vmem:[%s5860_s0 + $0x18] sm:$0xf]  ;;  %v4145_v61 = vld [vmem:[%s5860_s0 + $0xd8] sm:$0xf0] }
 0x139   : > { %3519 = vmatpush.bf16.msra.mxu0 %v4729_v28  ;;  %v4699_v28 = vld [vmem:[%s5860_s0 + $0x14] sm:$0xf]  ;;  %v4708_v31 = vld [vmem:[%s5860_s0 + $0x54] sm:$0xf0]  ;;  %v4072_v36 = vor.u32 %v4707_v27, %v4071_v24  ;;  %v4089_v24 = vld [vmem:[%s5860_s0 + $0x60] sm:$0xf0] }
 0x13a   : > { %3538 = vmatpush.bf16.msra.mxu1 %v4737_v29  ;;  %v4073_v29 = vld [vmem:[%s5860_s0 + $0x50] sm:$0xf0]  ;;  %v4808_v34 = vld [vmem:[%s5507_s30 + $0x278] sm:$0xff]  ;;  %v4080_v39 = vor.u32 %v4708_v31, %v4079_v30  ;;  %v4702_v27 = vld [vmem:[%s5860_s0 + $0x2c] sm:$0xf] }
 0x13b   : > { %3557 = vmatpush.bf16.msra.mxu2 %v4745_v32  ;;  %v4700_v32 = vld [vmem:[%s5860_s0 + $0x1c] sm:$0xf]  ;;  %v4076_v38 = vor.u32 %v4699_v28, %v4073_v29  ;;  %v4811_v1 = vld [vmem:[%s5507_s30 + $0x290] sm:$0xff]  ;;  %v4097_v28 = vld [vmem:[%s5860_s0 + $0x68] sm:$0xf0] }
 0x13c   : > { %3576 = vmatpush.bf16.msra.mxu3 %v4753_v33  ;;  %3520 = vmatmul.bf16.vlgmr.msra.gmra.mxu0 %v4056_v42  ;;  %v4081_v33 = vld [vmem:[%s5860_s0 + $0x58] sm:$0xf0]  ;;  %v4807_v42 = vld [vmem:[%s5507_s30 + $0x270] sm:$0xff] }
 0x13d   : > { %3588 = vmatpush.bf16.msrb.mxu0 %v4768_v41  ;;  %3539 = vmatmul.bf16.vlgmr.msra.gmra.mxu1 %v4060_v43  ;;  %v4824_v35 = vld [vmem:[%s5507_s30 + $0x2f8] sm:$0xff]  ;;  %v4799_v41 = vld [vmem:[%s5507_s30 + $0x230] sm:$0xff] }
 0x13e   : > { %3558 = vmatmul.bf16.vlgmr.msra.gmra.mxu2 %v4064_v44  ;;  %3607 = vmatpush.bf16.msrb.mxu1 %v4776_v46  ;;  %v4823_v43 = vld [vmem:[%s5507_s30 + $0x2f0] sm:$0xff]  ;;  %v4814_v44 = vld [vmem:[%s5507_s30 + $0x2a8] sm:$0xff]  ;;  %v4796_v60 = vld [vmem:[%s5507_s30 + $0x218] sm:$0xff] }
 0x13f   : > { %3626 = vmatpush.bf16.msrb.mxu2 %v4784_v40  ;;  %3577 = vmatmul.bf16.vlgmr.msra.gmra.mxu3 %v4068_v45  ;;  %v4084_v40 = vor.u32 %v4700_v32, %v4081_v33  ;;  %v4798_v45 = vld [vmem:[%s5507_s30 + $0x228] sm:$0xff]  ;;  %v4804_v62 = vld [vmem:[%s5507_s30 + $0x258] sm:$0xff]  ;;  %v4839_v30 = vld [vmem:[%s5507_s30 + $0x370] sm:$0xff]  ;;  %v4100_v33 = vor.u32 %v4702_v27, %v4097_v28 }
 0x140   : > { %3645 = vmatpush.bf16.msrb.mxu3 %v4792_v47  ;;  %v4806_v46 = vld [vmem:[%s5507_s30 + $0x268] sm:$0xff]  ;;  %v4820_v63 = vld [vmem:[%s5507_s30 + $0x2d8] sm:$0xff] }
 0x141   : > { %3589 = vmatpush.bf16.msrb.mxu0 %v4767_v49  ;;  %v4822_v47 = vld [vmem:[%s5507_s30 + $0x2e8] sm:$0xff]  ;;  %v4797_v49 = vld [vmem:[%s5507_s30 + $0x220] sm:$0xff]  ;;  %v4177_v27 = vld [vmem:[%s5860_s0 + $0xf8] sm:$0xf0] }
 0x142   : > { %3608 = vmatpush.bf16.msrb.mxu1 %v4775_v50  ;;  %v4805_v50 = vld [vmem:[%s5507_s30 + $0x260] sm:$0xff] }
 0x143   : > { %3627 = vmatpush.bf16.msrb.mxu2 %v4783_v48  ;;  %v4813_v48 = vld [vmem:[%s5507_s30 + $0x2a0] sm:$0xff] }
 0x144   : > { %3646 = vmatpush.bf16.msrb.mxu3 %v4791_v51  ;;  %v4821_v51 = vld [vmem:[%s5507_s30 + $0x2e0] sm:$0xff] }
 0x145   : > { %3590 = vmatpush.bf16.msrb.mxu0 %v4766_v53  ;;  %v4723_v53 = vld [vmem:[%s5860_s0 + $0xcc] sm:$0xf0] }
 0x146   : > { %3609 = vmatpush.bf16.msrb.mxu1 %v4774_v54  ;;  %v4812_v54 = vld [vmem:[%s5507_s30 + $0x298] sm:$0xff] }
 0x147   : > { %3628 = vmatpush.bf16.msrb.mxu2 %v4782_v52  ;;  %v4135_v52 = vld [vmem:[%s5860_s0 + $0x90] sm:$0xf] }
 0x148   : > { %3647 = vmatpush.bf16.msrb.mxu3 %v4790_v55  ;;  %v4715_v55 = vld [vmem:[%s5860_s0 + $0x94] sm:$0xf]  ;;  %v4136_v0 = vor.u32 %v4723_v53, %v4135_v52  ;;  %v4718_v52 = vld [vmem:[%s5860_s0 + $0xac] sm:$0xf]  ;;  %v4828_v53 = vld [vmem:[%s5507_s30 + $0x318] sm:$0xff] }
 0x149   : > { %3591 = vmatpush.bf16.msrb.mxu0 %v4765_v57  ;;  %v4143_v57 = vld [vmem:[%s5860_s0 + $0x98] sm:$0xf] }
 0x14a   : > { %3610 = vmatpush.bf16.msrb.mxu1 %v4773_v58  ;;  %v4724_v58 = vld [vmem:[%s5860_s0 + $0xd4] sm:$0xf0] }
 0x14b   : > { %3629 = vmatpush.bf16.msrb.mxu2 %v4781_v56  ;;  %v4137_v56 = vld [vmem:[%s5860_s0 + $0xd0] sm:$0xf0]  ;;  %v4144_v3 = vor.u32 %v4724_v58, %v4143_v57 }
 0x14c   : > { %3648 = vmatpush.bf16.msrb.mxu3 %v4789_v59  ;;  %3525 = vmatmul.bf16.gmra.mxu0 %v4120_v6  ;;  %v4716_v59 = vld [vmem:[%s5860_s0 + $0x9c] sm:$0xf]  ;;  %v4140_v2 = vor.u32 %v4715_v55, %v4137_v56  ;;  %v4803_v6 = vld [vmem:[%s5507_s30 + $0x250] sm:$0xff] }
 0x14d   : > { %3592 = vmatpush.bf16.msrb.mxu0 %v4764_v5  ;;  %3544 = vmatmul.bf16.gmra.mxu1 %v4124_v7  ;;  %v4795_v5 = vld [vmem:[%s5507_s30 + $0x210] sm:$0xff]  ;;  %v4852_v55 = vld [vmem:[%s5507_s30 + $0x3d8] sm:$0xff] }
 0x14e   : > { %3563 = vmatmul.bf16.gmra.mxu2 %v4128_v8  ;;  %3611 = vmatpush.bf16.msrb.mxu1 %v4772_v10  ;;  %v4819_v7 = vld [vmem:[%s5507_s30 + $0x2d0] sm:$0xff]  ;;  %v4810_v8 = vld [vmem:[%s5507_s30 + $0x288] sm:$0xff] }
 0x14f   : > { %3630 = vmatpush.bf16.msrb.mxu2 %v4780_v4  ;;  %3582 = vmatmul.bf16.gmra.mxu3 %v4132_v9  ;;  %v4148_v4 = vor.u32 %v4716_v59, %v4145_v61  ;;  %v4794_v9 = vld [vmem:[%s5507_s30 + $0x208] sm:$0xff]  ;;  %v4843_v56 = vld [vmem:[%s5507_s30 + $0x390] sm:$0xff] }
 0x150   : > { %3649 = vmatpush.bf16.msrb.mxu3 %v4788_v11  ;;  %v4802_v10 = vld [vmem:[%s5507_s30 + $0x248] sm:$0xff]  ;;  %v4835_v58 = vld [vmem:[%s5507_s30 + $0x350] sm:$0xff] }
 0x151   : > { %3593 = vmatpush.bf16.msrb.mxu0 %v4763_v13  ;;  %v4818_v11 = vld [vmem:[%s5507_s30 + $0x2c8] sm:$0xff]  ;;  %v4848_v13 = vld [vmem:[%s5507_s30 + $0x3b8] sm:$0xff] }
 0x152   : > { %3612 = vmatpush.bf16.msrb.mxu1 %v4771_v14  ;;  %v4793_v14 = vld [vmem:[%s5507_s30 + $0x200] sm:$0xff] }
 0x153   : > { %3631 = vmatpush.bf16.msrb.mxu2 %v4779_v12  ;;  %v4809_v12 = vld [vmem:[%s5507_s30 + $0x280] sm:$0xff] }
 0x154   : > { %3650 = vmatpush.bf16.msrb.mxu3 %v4787_v15  ;;  %v4801_v15 = vld [vmem:[%s5507_s30 + $0x240] sm:$0xff] }
 0x155   : > { %3594 = vmatpush.bf16.msrb.mxu0 %v4762_v17  ;;  %v4087_v17 = vld [vmem:[%s5860_s0 + $0x20] sm:$0xf] }
 0x156   : > { %3613 = vmatpush.bf16.msrb.mxu1 %v4770_v18  ;;  %v4709_v18 = vld [vmem:[%s5860_s0 + $0x5c] sm:$0xf0] }
 0x157   : > { %3632 = vmatpush.bf16.msrb.mxu2 %v4778_v16  ;;  %v4817_v16 = vld [vmem:[%s5507_s30 + $0x2c0] sm:$0xff]  ;;  %v4088_v29 = vor.u32 %v4709_v18, %v4087_v17 }
 0x158   : > { %3651 = vmatpush.bf16.msrb.mxu3 %v4786_v19  ;;  %v4832_v19 = vld [vmem:[%s5507_s30 + $0x338] sm:$0xff] }
 0x159   : > { %3595 = vmatpush.bf16.msrb.mxu0 %v4761_v21  ;;  %v4701_v21 = vld [vmem:[%s5860_s0 + $0x24] sm:$0xf] }
 0x15a   : > { %3614 = vmatpush.bf16.msrb.mxu1 %v4769_v22  ;;  %v4856_v22 = vld [vmem:[%s5507_s30 + $0x3f8] sm:$0xff]  ;;  %v4092_v31 = vor.u32 %v4701_v21, %v4089_v24  ;;  %v4727_v21 = vld [vmem:[%s5860_s0 + $0xec] sm:$0xf0] }
 0x15b   : > { %3633 = vmatpush.bf16.msrb.mxu2 %v4777_v20  ;;  %v4840_v20 = vld [vmem:[%s5507_s30 + $0x378] sm:$0xff] }
 0x15c   : > { %3652 = vmatpush.bf16.msrb.mxu3 %v4785_v23  ;;  %3596 = vmatmul.bf16.vlgmr.msrb.gmra.mxu0 %v4072_v36  ;;  %v4847_v23 = vld [vmem:[%s5507_s30 + $0x3b0] sm:$0xff]  ;;  %v4846_v36 = vld [vmem:[%s5507_s30 + $0x3a8] sm:$0xff]  ;;  %v4175_v24 = vld [vmem:[%s5860_s0 + $0xb8] sm:$0xf] }
 0x15d   : > { %3664 = vmatpush.bf16.msra.mxu0 %v4800_v26  ;;  %3615 = vmatmul.bf16.vlgmr.msrb.gmra.mxu1 %v4076_v38  ;;  %v4710_v26 = vld [vmem:[%s5860_s0 + $0x64] sm:$0xf0] }
 0x15e   : > { %3683 = vmatpush.bf16.msra.mxu1 %v4808_v34  ;;  %3634 = vmatmul.bf16.vlgmr.msrb.gmra.mxu2 %v4080_v39  ;;  %v4831_v34 = vld [vmem:[%s5507_s30 + $0x330] sm:$0xff]  ;;  %v4830_v38 = vld [vmem:[%s5507_s30 + $0x328] sm:$0xff] }
 0x15f   : > { %3702 = vmatpush.bf16.msra.mxu2 %v4816_v25  ;;  %3653 = vmatmul.bf16.vlgmr.msrb.gmra.mxu3 %v4084_v40  ;;  %v4095_v25 = vld [vmem:[%s5860_s0 + $0x28] sm:$0xf]  ;;  %v4845_v40 = vld [vmem:[%s5507_s30 + $0x3a0] sm:$0xff] }
 0x160   : > { %3721 = vmatpush.bf16.msra.mxu3 %v4824_v35  ;;  %v4096_v32 = vor.u32 %v4710_v26, %v4095_v25  ;;  %v4855_v35 = vld [vmem:[%s5507_s30 + $0x3f0] sm:$0xff]  ;;  %v4854_v39 = vld [vmem:[%s5507_s30 + $0x3e8] sm:$0xff]  ;;  %v4728_v25 = vld [vmem:[%s5860_s0 + $0xf4] sm:$0xf0] }
 0x161   : > { %3665 = vmatpush.bf16.msra.mxu0 %v4799_v41  ;;  %v4837_v41 = vld [vmem:[%s5507_s30 + $0x360] sm:$0xff]  ;;  %v4720_v26 = vld [vmem:[%s5860_s0 + $0xbc] sm:$0xf] }
 0x162   : > { %3684 = vmatpush.bf16.msra.mxu1 %v4807_v42  ;;  %v4829_v42 = vld [vmem:[%s5507_s30 + $0x320] sm:$0xff] }
 0x163   : > { %3703 = vmatpush.bf16.msra.mxu2 %v4815_v37  ;;  %v4838_v37 = vld [vmem:[%s5507_s30 + $0x368] sm:$0xff] }
 0x164   : > { %3722 = vmatpush.bf16.msra.mxu3 %v4823_v43  ;;  %v4853_v43 = vld [vmem:[%s5507_s30 + $0x3e0] sm:$0xff] }
 0x165   : > { %3666 = vmatpush.bf16.msra.mxu0 %v4798_v45  ;;  %v4151_v45 = vld [vmem:[%s5860_s0 + $0xa0] sm:$0xf] }
 0x166   : > { %3685 = vmatpush.bf16.msra.mxu1 %v4806_v46  ;;  %v4725_v46 = vld [vmem:[%s5860_s0 + $0xdc] sm:$0xf0] }
 0x167   : > { %3704 = vmatpush.bf16.msra.mxu2 %v4814_v44  ;;  %v4844_v44 = vld [vmem:[%s5507_s30 + $0x398] sm:$0xff]  ;;  %v4152_v57 = vor.u32 %v4725_v46, %v4151_v45 }
 0x168   : > { %3723 = vmatpush.bf16.msra.mxu3 %v4822_v47  ;;  %v4836_v47 = vld [vmem:[%s5507_s30 + $0x358] sm:$0xff] }
 0x169   : > { %3667 = vmatpush.bf16.msra.mxu0 %v4797_v49  ;;  %v4153_v49 = vld [vmem:[%s5860_s0 + $0xe0] sm:$0xf0] }
 0x16a   : > { %3686 = vmatpush.bf16.msra.mxu1 %v4805_v50  ;;  %v4159_v50 = vld [vmem:[%s5860_s0 + $0xa8] sm:$0xf] }
 0x16b   : > { %3705 = vmatpush.bf16.msra.mxu2 %v4813_v48  ;;  %v4717_v48 = vld [vmem:[%s5860_s0 + $0xa4] sm:$0xf] }
 0x16c   : > { %3724 = vmatpush.bf16.msra.mxu3 %v4821_v51  ;;  %3601 = vmatmul.bf16.gmra.mxu0 %v4136_v0  ;;  %v4726_v51 = vld [vmem:[%s5860_s0 + $0xe4] sm:$0xf0]  ;;  %v4156_v59 = vor.u32 %v4717_v48, %v4153_v49 }
 0x16d   : > { %3668 = vmatpush.bf16.msra.mxu0 %v4796_v60  ;;  %3620 = vmatmul.bf16.gmra.mxu1 %v4140_v2  ;;  %v4160_v60 = vor.u32 %v4726_v51, %v4159_v50  ;;  %v4842_v0 = vld [vmem:[%s5507_s30 + $0x388] sm:$0xff] }
 0x16e   : > { %3687 = vmatpush.bf16.msra.mxu1 %v4804_v62  ;;  %3639 = vmatmul.bf16.gmra.mxu2 %v4144_v3  ;;  %v4827_v62 = vld [vmem:[%s5507_s30 + $0x310] sm:$0xff]  ;;  %v4826_v2 = vld [vmem:[%s5507_s30 + $0x308] sm:$0xff] }
 0x16f   : > { %3706 = vmatpush.bf16.msra.mxu2 %v4812_v54  ;;  %3658 = vmatmul.bf16.gmra.mxu3 %v4148_v4  ;;  %v4161_v54 = vld [vmem:[%s5860_s0 + $0xe8] sm:$0xf0]  ;;  %v4841_v4 = vld [vmem:[%s5507_s30 + $0x380] sm:$0xff] }
 0x170   : > { %3725 = vmatpush.bf16.msra.mxu3 %v4820_v63  ;;  %v4164_v61 = vor.u32 %v4718_v52, %v4161_v54  ;;  %v4851_v63 = vld [vmem:[%s5507_s30 + $0x3d0] sm:$0xff]  ;;  %v4850_v3 = vld [vmem:[%s5507_s30 + $0x3c8] sm:$0xff] }
 0x171   : > { %3669 = vmatpush.bf16.msra.mxu0 %v4795_v5  ;;  %v4833_v5 = vld [vmem:[%s5507_s30 + $0x340] sm:$0xff] }
 0x172   : > { %3688 = vmatpush.bf16.msra.mxu1 %v4803_v6  ;;  %v4825_v6 = vld [vmem:[%s5507_s30 + $0x300] sm:$0xff] }
 0x173   : > { %3707 = vmatpush.bf16.msra.mxu2 %v4811_v1  ;;  %v4834_v1 = vld [vmem:[%s5507_s30 + $0x348] sm:$0xff] }
 0x174   : > { %3726 = vmatpush.bf16.msra.mxu3 %v4819_v7  ;;  %v4849_v7 = vld [vmem:[%s5507_s30 + $0x3c0] sm:$0xff] }
 0x175   : > { %3670 = vmatpush.bf16.msra.mxu0 %v4794_v9  ;;  %v4711_v9 = vld [vmem:[%s5860_s0 + $0x6c] sm:$0xf0] }
 0x176   : > { %3689 = vmatpush.bf16.msra.mxu1 %v4802_v10  ;;  %v4703_v10 = vld [vmem:[%s5860_s0 + $0x34] sm:$0xf] }
 0x177   : > { %3708 = vmatpush.bf16.msra.mxu2 %v4810_v8  ;;  %v4103_v8 = vld [vmem:[%s5860_s0 + $0x30] sm:$0xf] }
 0x178   : > { %3727 = vmatpush.bf16.msra.mxu3 %v4818_v11  ;;  %v4105_v11 = vld [vmem:[%s5860_s0 + $0x70] sm:$0xf0] }
 0x179   : > { %3671 = vmatpush.bf16.msra.mxu0 %v4793_v14  ;;  %v4704_v14 = vld [vmem:[%s5860_s0 + $0x3c] sm:$0xf]  ;;  %v4108_v17 = vor.u32 %v4703_v10, %v4105_v11 }
 0x17a   : > { %3690 = vmatpush.bf16.msra.mxu1 %v4801_v15  ;;  %v4113_v15 = vld [vmem:[%s5860_s0 + $0x78] sm:$0xf0] }
 0x17b   : > { %3709 = vmatpush.bf16.msra.mxu2 %v4809_v12  ;;  %v4111_v12 = vld [vmem:[%s5860_s0 + $0x38] sm:$0xf] }
 0x17c   : > { %3728 = vmatpush.bf16.msra.mxu3 %v4817_v16  ;;  %3672 = vmatmul.bf16.vlgmr.msra.gmra.mxu0 %v4088_v29  ;;  %v4104_v16 = vor.u32 %v4711_v9, %v4103_v8 }
 0x17d   : > { %3740 = vmatpush.bf16.msrb.mxu0 %v4832_v19  ;;  %3691 = vmatmul.bf16.vlgmr.msra.gmra.mxu1 %v4092_v31  ;;  %v4116_v19 = vor.u32 %v4704_v14, %v4113_v15  ;;  %v4180_v31 = vor.u32 %v4720_v26, %v4177_v27 }
 0x17e   : > { %3759 = vmatpush.bf16.msrb.mxu1 %v4840_v20  ;;  %3710 = vmatmul.bf16.vlgmr.msra.gmra.mxu2 %v4096_v32  ;;  %v4167_v20 = vld [vmem:[%s5860_s0 + $0xb0] sm:$0xf]  ;;  %v4893_v32 = vld [vmem:[%s2291_s11] ss:$0 sm:$0xff]  ;;  %s2288_s11 = scalar_lea.vmem [#allocation3], %s4052_s4 }
 0x17f   : > { %3778 = vmatpush.bf16.msrb.mxu2 %v4848_v13  ;;  %3729 = vmatmul.bf16.vlgmr.msra.gmra.mxu3 %v4100_v33  ;;  %v4712_v13 = vld [vmem:[%s5860_s0 + $0x74] sm:$0xf0]  ;;  %v4168_v28 = vor.u32 %v4727_v21, %v4167_v20 }
 0x180   : > { %3797 = vmatpush.bf16.msrb.mxu3 %v4856_v22  ;;  %v4112_v18 = vor.u32 %v4712_v13, %v4111_v12  ;;  %v4719_v22 = vld [vmem:[%s5860_s0 + $0xb4] sm:$0xf] }
 0x181   : > { %3741 = vmatpush.bf16.msrb.mxu0 %v4831_v34 }
 0x182   : > { %3760 = vmatpush.bf16.msrb.mxu1 %v4839_v30  ;;  %v4176_v30 = vor.u32 %v4728_v25, %v4175_v24 }
 0x183   : > { %3779 = vmatpush.bf16.msrb.mxu2 %v4847_v23  ;;  %v4169_v23 = vld [vmem:[%s5860_s0 + $0xf0] sm:$0xf0] }
 0x184   : > { %3798 = vmatpush.bf16.msrb.mxu3 %v4855_v35  ;;  %v4172_v29 = vor.u32 %v4719_v22, %v4169_v23 }
 0x185   : > { %3742 = vmatpush.bf16.msrb.mxu0 %v4830_v38 }
 0x186   : > { %3761 = vmatpush.bf16.msrb.mxu1 %v4838_v37 }
 0x187   : > { %3780 = vmatpush.bf16.msrb.mxu2 %v4846_v36 }
 0x188   : > { %3799 = vmatpush.bf16.msrb.mxu3 %v4854_v39 }
 0x189   : > { %3743 = vmatpush.bf16.msrb.mxu0 %v4829_v42 }
 0x18a   : > { %3762 = vmatpush.bf16.msrb.mxu1 %v4837_v41 }
 0x18b   : > { %3781 = vmatpush.bf16.msrb.mxu2 %v4845_v40 }
 0x18c   : > { %3800 = vmatpush.bf16.msrb.mxu3 %v4853_v43  ;;  %3677 = vmatmul.bf16.gmra.mxu0 %v4152_v57 }
 0x18d   : > { %3744 = vmatpush.bf16.msrb.mxu0 %v4828_v53  ;;  %3696 = vmatmul.bf16.gmra.mxu1 %v4156_v59 }
 0x18e   : > { %3763 = vmatpush.bf16.msrb.mxu1 %v4836_v47  ;;  %3715 = vmatmul.bf16.gmra.mxu2 %v4160_v60 }
 0x18f   : > { %3782 = vmatpush.bf16.msrb.mxu2 %v4844_v44  ;;  %3734 = vmatmul.bf16.gmra.mxu3 %v4164_v61 }
 0x190   : > { %3801 = vmatpush.bf16.msrb.mxu3 %v4852_v55 }
 0x191   : > { %3745 = vmatpush.bf16.msrb.mxu0 %v4827_v62 }
 0x192   : > { %3764 = vmatpush.bf16.msrb.mxu1 %v4835_v58 }
 0x193   : > { %3783 = vmatpush.bf16.msrb.mxu2 %v4843_v56 }
 0x194   : > { %3802 = vmatpush.bf16.msrb.mxu3 %v4851_v63 }
 0x195   : > { %3746 = vmatpush.bf16.msrb.mxu0 %v4826_v2 }
 0x196   : > { %3765 = vmatpush.bf16.msrb.mxu1 %v4834_v1 }
 0x197   : > { %3784 = vmatpush.bf16.msrb.mxu2 %v4842_v0 }
 0x198   : > { %3803 = vmatpush.bf16.msrb.mxu3 %v4850_v3 }
 0x199   : > { %3747 = vmatpush.bf16.msrb.mxu0 %v4825_v6 }
 0x19a   : > { %3766 = vmatpush.bf16.msrb.mxu1 %v4833_v5 }
 0x19b   : > { %3785 = vmatpush.bf16.msrb.mxu2 %v4841_v4 }
 0x19c   : > { %3804 = vmatpush.bf16.msrb.mxu3 %v4849_v7  ;;  %3748 = vmatmul.bf16.vlgmr.msrb.gmra.mxu0 %v4104_v16 }
 0x19d   : > { %3767 = vmatmul.bf16.vlgmr.msrb.gmra.mxu1 %v4108_v17 }
 0x19e   : > { %3786 = vmatmul.bf16.vlgmr.msrb.gmra.mxu2 %v4112_v18 }
 0x19f   : > { %3805 = vmatmul.bf16.vlgmr.msrb.gmra.mxu3 %v4116_v19 }
 0x1ac   : > { %3753 = vmatmul.bf16.gmra.mxu0 %v4168_v28 }
 0x1ad   : > { %3772 = vmatmul.bf16.gmra.mxu1 %v4172_v29 }
 0x1ae   : > { %3791 = vmatmul.bf16.gmra.mxu2 %v4176_v30 }
 0x1af   : > { %3810 = vmatmul.bf16.gmra.mxu3 %v4180_v31 }
 0x1b9   : > { %v3521_v33 = vpop.f32.mrf.mxu0 }
 0x1ba   : > { %v3540_v34 = vpop.f32.mrf.mxu1  ;;  %v3522_v35 = vadd.f32 %v4893_v32, %v3521_v33 }
 0x1bc   : > { %v3541_v36 = vadd.f32 %v3540_v34, %v3522_v35 }
 0x1c1   : > { %v3559_v37 = vpop.f32.mrf.mxu2  ;;  %v3523_v40 = vpop.f32.mrf.mxu0 }
 0x1c2   : > { %v3578_v38 = vpop.f32.mrf.mxu3  ;;  %v3560_v39 = vadd.f32 %v3559_v37, %v3541_v36  ;;  %v3542_v41 = vpop.f32.mrf.mxu1  ;;  %v3524_v42 = vadd.f32 %v4893_v32, %v3523_v40 }
 0x1c4   : > { %v3579_v43 = vadd.f32 %v3578_v38, %v3560_v39  ;;  %v3543_v44 = vadd.f32 %v3542_v41, %v3524_v42 }
 0x1c9   : > { %v3561_v45 = vpop.f32.mrf.mxu2  ;;  %v3526_v48 = vpop.f32.mrf.mxu0 }
 0x1ca   : > { %v3580_v46 = vpop.f32.mrf.mxu3  ;;  %v3562_v47 = vadd.f32 %v3561_v45, %v3543_v44  ;;  %v3545_v49 = vpop.f32.mrf.mxu1  ;;  %v3527_v50 = vadd.f32 %v4893_v32, %v3526_v48 }
 0x1cc   : > { %v3581_v51 = vadd.f32 %v3580_v46, %v3562_v47  ;;  %v3546_v52 = vadd.f32 %v3545_v49, %v3527_v50 }
 0x1d1   : > { %v3564_v53 = vpop.f32.mrf.mxu2  ;;  %v3528_v56 = vpop.f32.mrf.mxu0 }
 0x1d2   : > { %v3583_v54 = vpop.f32.mrf.mxu3  ;;  %v3565_v55 = vadd.f32 %v3564_v53, %v3546_v52  ;;  %v3547_v57 = vpop.f32.mrf.mxu1  ;;  %v3529_v58 = vadd.f32 %v4893_v32, %v3528_v56 }
 0x1d4   : > { %v3584_v59 = vadd.f32 %v3583_v54, %v3565_v55  ;;  %v3548_v60 = vadd.f32 %v3547_v57, %v3529_v58  ;;  %v4924_v55 = vmov 16.0  }
 0x1d5   : > { %4894 = vrcp.f32 %v4924_v55 }
 0x1d9   : > { %v3566_v61 = vpop.f32.mrf.mxu2  ;;  %v3597_v0 = vpop.f32.mrf.mxu0 }
 0x1da   : > { %v3585_v62 = vpop.f32.mrf.mxu3  ;;  %v3567_v63 = vadd.f32 %v3566_v61, %v3548_v60  ;;  %v3616_v1 = vpop.f32.mrf.mxu1  ;;  %v3598_v24 = vadd.f32 %v3597_v0, %v3579_v43 }
 0x1dc   : > { %v3586_v2 = vadd.f32 %v3585_v62, %v3567_v63  ;;  %v3617_v29 = vadd.f32 %v3616_v1, %v3598_v24  ;;  %v4895_v1 = vpop.eup %4894 }
 0x1dd   : > { %vm3835_vm0 = vweird.f32 %v4895_v1 }
 0x1e1   : > { %v3635_v3 = vpop.f32.mrf.mxu2  ;;  %v3599_v5 = vpop.f32.mrf.mxu0 }
 0x1e2   : > { %v3654_v4 = vpop.f32.mrf.mxu3  ;;  %v3618_v6 = vpop.f32.mrf.mxu1  ;;  %v3600_v28 = vadd.f32 %v3599_v5, %v3581_v51  ;;  %v3636_v30 = vadd.f32 %v3635_v3, %v3617_v29 }
 0x1e4   : > { %v3619_v31 = vadd.f32 %v3618_v6, %v3600_v28  ;;  %v3655_v37 = vadd.f32 %v3654_v4, %v3636_v30 }
 0x1e9   : > { %v3637_v7 = vpop.f32.mrf.mxu2  ;;  %v3602_v9 = vpop.f32.mrf.mxu0 }
 0x1ea   : > { %v3656_v8 = vpop.f32.mrf.mxu3  ;;  %v3621_v10 = vpop.f32.mrf.mxu1  ;;  %v3638_v33 = vadd.f32 %v3637_v7, %v3619_v31  ;;  %v3603_v42 = vadd.f32 %v3602_v9, %v3584_v59  ;;  %v3831_v9 = vmul.f32 16.0, %v4895_v1 }
 0x1ec   : > { %v3657_v38 = vadd.f32 %v3656_v8, %v3638_v33  ;;  %v3622_v50 = vadd.f32 %v3621_v10, %v3603_v42 }
 0x1f1   : > { %v3640_v11 = vpop.f32.mrf.mxu2  ;;  %v3604_v13 = vpop.f32.mrf.mxu0 }
 0x1f2   : > { %v3659_v12 = vpop.f32.mrf.mxu3  ;;  %v3623_v14 = vpop.f32.mrf.mxu1  ;;  %v3605_v47 = vadd.f32 %v3604_v13, %v3586_v2  ;;  %v3641_v52 = vadd.f32 %v3640_v11, %v3622_v50 }
 0x1f4   : > { %v3624_v53 = vadd.f32 %v3623_v14, %v3605_v47  ;;  %v3660_v63 = vadd.f32 %v3659_v12, %v3641_v52 }
 0x1f9   : > { %v3642_v15 = vpop.f32.mrf.mxu2  ;;  %v3673_v17 = vpop.f32.mrf.mxu0 }
 0x1fa   : > { %v3661_v16 = vpop.f32.mrf.mxu3  ;;  %v3692_v18 = vpop.f32.mrf.mxu1  ;;  %v3674_v39 = vadd.f32 %v3673_v17, %v3655_v37  ;;  %v3643_v57 = vadd.f32 %v3642_v15, %v3624_v53 }
 0x1fc   : > { %v3693_v44 = vadd.f32 %v3692_v18, %v3674_v39  ;;  %v3662_v2 = vadd.f32 %v3661_v16, %v3643_v57 }
 0x201   : > { %v3711_v19 = vpop.f32.mrf.mxu2  ;;  %v3675_v21 = vpop.f32.mrf.mxu0 }
 0x202   : > { %v3730_v20 = vpop.f32.mrf.mxu3  ;;  %v3694_v22 = vpop.f32.mrf.mxu1  ;;  %v3676_v40 = vadd.f32 %v3675_v21, %v3657_v38  ;;  %v3712_v48 = vadd.f32 %v3711_v19, %v3693_v44 }
 0x204   : > { %v3695_v49 = vadd.f32 %v3694_v22, %v3676_v40  ;;  %v3731_v54 = vadd.f32 %v3730_v20, %v3712_v48  ;;  %v3832_v20 = vsub.f32 1.0, %v3831_v9 }
 0x206   : > { %v3833_v24 = vmul.f32 %v4895_v1, %v3832_v20 }
 0x209   : > { %v3713_v23 = vpop.f32.mrf.mxu2  ;;  %v3678_v26 = vpop.f32.mrf.mxu0 }
 0x20a   : > { %v3732_v25 = vpop.f32.mrf.mxu3  ;;  %v3697_v27 = vpop.f32.mrf.mxu1  ;;  %v3714_v51 = vadd.f32 %v3713_v23, %v3695_v49  ;;  %v3679_v3 = vadd.f32 %v3678_v26, %v3660_v63 }
 0x20c   : > { %v3733_v58 = vadd.f32 %v3732_v25, %v3714_v51  ;;  %v3698_v10 = vadd.f32 %v3697_v27, %v3679_v3 }
 0x211   : > { %v3716_v32 = vpop.f32.mrf.mxu2  ;;  %v3680_v35 = vpop.f32.mrf.mxu0 }
 0x212   : > { %v3735_v34 = vpop.f32.mrf.mxu3  ;;  %v3699_v36 = vpop.f32.mrf.mxu1  ;;  %v3681_v5 = vadd.f32 %v3680_v35, %v3662_v2  ;;  %v3717_v15 = vadd.f32 %v3716_v32, %v3698_v10  ;;  %v3834_v35 = vadd.f32 %v4895_v1, %v3833_v24 }
 0x214   : > { %v3700_v17 = vadd.f32 %v3699_v36, %v3681_v5  ;;  %v3736_v16 = vadd.f32 %v3735_v34, %v3717_v15 }
 0x219   : > { %v3718_v41 = vpop.f32.mrf.mxu2  ;;  %v3749_v45 = vpop.f32.mrf.mxu0 }
 0x21a   : > { %v3737_v43 = vpop.f32.mrf.mxu3  ;;  %v3768_v46 = vpop.f32.mrf.mxu1  ;;  %v3750_v60 = vadd.f32 %v3749_v45, %v3731_v54  ;;  %v3719_v21 = vadd.f32 %v3718_v41, %v3700_v17  ;;  %v3836_v41 = vsel %vm3835_vm0, %v4895_v1, %v3834_v35 }
 0x21c   : > { %v3769_v4 = vadd.f32 %v3768_v46, %v3750_v60  ;;  %v3738_v26 = vadd.f32 %v3737_v43, %v3719_v21 }
 0x221   : > { %v3787_v56 = vpop.f32.mrf.mxu2  ;;  %v3751_v59 = vpop.f32.mrf.mxu0 }
 0x222   : > { %v3806_v61 = vpop.f32.mrf.mxu3  ;;  %v3770_v62 = vpop.f32.mrf.mxu1  ;;  %v3752_v0 = vadd.f32 %v3751_v59, %v3733_v58  ;;  %v3788_v6 = vadd.f32 %v3787_v56, %v3769_v4 }
 0x224   : > { %v3771_v7 = vadd.f32 %v3770_v62, %v3752_v0  ;;  %v3807_v18 = vadd.f32 %v3806_v61, %v3788_v6 }
 0x229   : > { %v3789_v8 = vpop.f32.mrf.mxu2  ;;  %v3754_v14 = vpop.f32.mrf.mxu0 }
 0x22a   : > { %v3790_v11 = vadd.f32 %v3789_v8, %v3771_v7  ;;  %v3808_v13 = vpop.f32.mrf.mxu3  ;;  %v3773_v12 = vpop.f32.mrf.mxu1  ;;  %v3755_v29 = vadd.f32 %v3754_v14, %v3736_v16 }
 0x22c   : > { %v3809_v19 = vadd.f32 %v3808_v13, %v3790_v11  ;;  %v3774_v36 = vadd.f32 %v3773_v12, %v3755_v29 }
 0x22e   : > { %v3816_v22 = vadd.f32 %v3809_v19, %v3807_v18 }
 0x230   : > { %v3817_v23 = vrot.slane %v3816_v22, 4 }
 0x231   : > { %v3792_v25 = vpop.f32.mrf.mxu2  ;;  %v3756_v27 = vpop.f32.mrf.mxu0 }
 0x232   : > { %v3818_v28 = vadd.f32 %v3817_v23, %v3816_v22  ;;  %v3811_v30 = vpop.f32.mrf.mxu3  ;;  %v3757_v33 = vadd.f32 %v3756_v27, %v3738_v26  ;;  %v3775_v37 = vpop.f32.mrf.mxu1  ;;  %v3793_v39 = vadd.f32 %v3792_v25, %v3774_v36 }
 0x234   : > { %v3819_v31 = vrot.slane %v3818_v28, 2  ;;  %v3776_v40 = vadd.f32 %v3775_v37, %v3757_v33  ;;  %v3812_v46 = vadd.f32 %v3811_v30, %v3793_v39 }
 0x236   : > { %v3820_v32 = vadd.f32 %v3819_v31, %v3818_v28 }
 0x238   : > { %v3821_v38 = vrot.slane %v3820_v32, 1 }
 0x239   : > { %v3794_v34 = vpop.f32.mrf.mxu2 }
 0x23a   : > { %v3822_v42 = vadd.f32 %v3821_v38, %v3820_v32  ;;  %v3795_v44 = vadd.f32 %v3794_v34, %v3776_v40  ;;  %v3813_v45 = vpop.f32.mrf.mxu3 }
 0x23c   : > { %v3837_v43 = vmul.f32 %v3836_v41, %v3822_v42  ;;  %v3814_v47 = vadd.f32 %v3813_v45, %v3795_v44 }
 0x23e   : > { %v3839_v48 = vsub.f32 %v3807_v18, %v3837_v43  ;;  %v3840_v49 = vsub.f32 %v3809_v19, %v3837_v43  ;;  %v3823_v50 = vadd.f32 %v3814_v47, %v3812_v46 }
 0x240   : > { %v3843_v51 = vmul.f32 %v3839_v48, %v3839_v48  ;;  %v3844_v52 = vmul.f32 %v3840_v49, %v3840_v49  ;;  %v3824_v53 = vrot.slane %v3823_v50, 4 }
 0x242   : > { %v3847_v54 = vadd.f32 %v3844_v52, %v3843_v51  ;;  %v3825_v55 = vadd.f32 %v3824_v53, %v3823_v50 }
 0x244   : > { %v3848_v56 = vrot.slane %v3847_v54, 4  ;;  %v3826_v57 = vrot.slane %v3825_v55, 2 }
 0x246   : > { %v3849_v58 = vadd.f32 %v3848_v56, %v3847_v54  ;;  %v3827_v60 = vadd.f32 %v3826_v57, %v3825_v55 }
 0x248   : > { %v3850_v61 = vrot.slane %v3849_v58, 2  ;;  %v3828_v59 = vrot.slane %v3827_v60, 1 }
 0x24a   : > { %v3851_v62 = vadd.f32 %v3850_v61, %v3849_v58  ;;  %v3829_v63 = vadd.f32 %v3828_v59, %v3827_v60 }
 0x24c   : > { %v3852_v0 = vrot.slane %v3851_v62, 1  ;;  %v3838_v1 = vmul.f32 %v3836_v41, %v3829_v63 }
 0x24e   : > { %v3853_v2 = vadd.f32 %v3852_v0, %v3851_v62  ;;  %v3841_v3 = vsub.f32 %v3812_v46, %v3838_v1  ;;  %v3842_v4 = vsub.f32 %v3814_v47, %v3838_v1 }
 0x250   : > { %v3861_v5 = vmul.f32 %v3853_v2, %v3836_v41  ;;  %v3845_v6 = vmul.f32 %v3841_v3, %v3841_v3  ;;  %v3846_v7 = vmul.f32 %v3842_v4, %v3842_v4 }
 0x252   : > { %v3863_v8 = vadd.f32 1e-05, %v3861_v5  ;;  %v3854_v9 = vadd.f32 %v3846_v7, %v3845_v6 }
 0x254   : > { %4896 = vrsqrt.f32 %v3863_v8  ;;  %v3855_v10 = vrot.slane %v3854_v9, 4  ;;  %vm3871_vm2 = vweird.f32 %v3863_v8 }
 0x256   : > { %v3856_v11 = vadd.f32 %v3855_v10, %v3854_v9 }
 0x258   : > { %v3857_v13 = vrot.slane %v3856_v11, 2 }
 0x25a   : > { %v4897_v14 = vpop.eup %4896  ;;  %v3858_v15 = vadd.f32 %v3857_v13, %v3856_v11 }
 0x25b   : > { %v3866_v17 = vmul.f32 %v4897_v14, %v3863_v8  ;;  %vm3872_vm1 = vweird.f32 %v4897_v14 }
 0x25c   : > { %v3859_v18 = vrot.slane %v3858_v15, 1  ;;  %vm3873_vm3 = vmor %vm3871_vm2, %vm3872_vm1 }
 0x25d   : > { %v3867_v19 = vmul.f32 %v4897_v14, %v3866_v17 }
 0x25e   : > { %v3860_v20 = vadd.f32 %v3859_v18, %v3858_v15 }
 0x25f   : > { %v3868_v12 = vmul.f32 0.5, %v3867_v19 }
 0x260   : > { %v3862_v21 = vmul.f32 %v3860_v20, %v3836_v41 }
 0x261   : > { %v3869_v22 = vsub.f32 1.5, %v3868_v12 }
 0x262   : > { %v3864_v16 = vadd.f32 1e-05, %v3862_v21 }
 0x263   : > { %v3870_v23 = vmul.f32 %v4897_v14, %v3869_v22 }
 0x264   : > { %4898 = vrsqrt.f32 %v3864_v16  ;;  %vm3881_vm7 = vweird.f32 %v3864_v16 }
 0x265   : > { %v3874_v24 = vsel %vm3873_vm3, %v4897_v14, %v3870_v23 }
 0x266   : > { %v3885_v25 = vmul.f32 %v3874_v24, %v3839_v48  ;;  %v3886_v26 = vmul.f32 %v3874_v24, %v3840_v49 }
 0x268   : > { %vm3889_vm4 = vcmp.ge.f32.partialorder %v3885_v25, 0.0  ;;  %vm3890_vm5 = vcmp.ge.f32.partialorder %v3886_v26, 0.0  ;;  %v3893_v28 = vmul.f32 0.2, %v3885_v25  ;;  %v3894_v29 = vmul.f32 0.2, %v3886_v26 }
 0x26a   : > { %v4899_v30 = vpop.eup %4898  ;;  %v3897_v27 = vsel %vm3889_vm4, %v3885_v25, %v3893_v28  ;;  %v3898_v31 = vsel %vm3890_vm5, %v3886_v26, %v3894_v29 }
 0x26b   : > { %v4860_v33 = vpack.c.bf16 %v3898_v31, %v3897_v27  ;;  %v3876_v35 = vmul.f32 %v4899_v30, %v3864_v16  ;;  %vm3882_vm6 = vweird.f32 %v4899_v30 }
 0x26c   : > { %vm3883_vm8 = vmor %vm3881_vm7, %vm3882_vm6 }
 0x26d   : > { %4861 = vst [vmem:[%s2288_s11] sm:$0xff] %v4860_v33   ;;  %v3877_v32 = vmul.f32 %v4899_v30, %v3876_v35 }
 0x26f   : > { %v3878_v36 = vmul.f32 0.5, %v3877_v32 }
 0x271   : > { %v3879_v37 = vsub.f32 1.5, %v3878_v36 }
 0x273   : > { %v3880_v38 = vmul.f32 %v4899_v30, %v3879_v37 }
 0x274   : > { %v3934_v46 = vld [vmem:[%s2288_s11] sm:$0xf] (%p4976_p5)  ;;  %v3936_v47 = vld [vmem:[%s2288_s11 + $0x4] sm:$0xf] (%p4976_p5) }
 0x275   : > { %v3884_v39 = vsel %vm3883_vm8, %v4899_v30, %v3880_v38  ;;  %3935 = vst [vmem:[%s3917_s24] sm:$0xf] (%p4976_p5), %v3934_v46 }
 0x276   : > { %v3887_v40 = vmul.f32 %v3884_v39, %v3841_v3  ;;  %v3888_v41 = vmul.f32 %v3884_v39, %v3842_v4  ;;  %3937 = vst [vmem:[%s3917_s24 + $0x8] sm:$0xf] (%p4976_p5), %v3936_v47 }
 0x278   : > { %vm3891_vm9 = vcmp.ge.f32.partialorder %v3887_v40, 0.0  ;;  %vm3892_vm10 = vcmp.ge.f32.partialorder %v3888_v41, 0.0  ;;  %v3895_v34 = vmul.f32 0.2, %v3887_v40  ;;  %v3896_v42 = vmul.f32 0.2, %v3888_v41 }
 0x279   : > { %3915 = sbr.rel (!%p4976_p5) target bundleno = 647 (0x287), region = 88 }
 0x27a   : > { %v3899_v44 = vsel %vm3891_vm9, %v3887_v40, %v3895_v34  ;;  %v3900_v45 = vsel %vm3892_vm10, %v3888_v41, %v3896_v42 }
 0x27b   : > { %v4865_v43 = vpack.c.bf16 %v3900_v45, %v3899_v44 }
 0x27d   : > { %4867 = vst [vmem:[%s2288_s11 + $0x8] sm:$0xff] %v4865_v43  }
 0x284   : > { %v3938_v48 = vld [vmem:[%s2288_s11 + $0x8] sm:$0xf]  ;;  %v3940_v49 = vld [vmem:[%s2288_s11 + $0xc] sm:$0xf] }
 0x285   : > { %3939 = vst [vmem:[%s3917_s24 + $0x10] sm:$0xf] %v3938_v48 }
 0x286   : > { %3941 = vst [vmem:[%s3917_s24 + $0x18] sm:$0xf] %v3940_v49 }
 0x287 PF: > { %p10_p11 = scmp.ge.s32.totalorder %s4964_s16, 4   ;;  %s5865_s12 = smov %s4918_s13 }
 0x288   : > { %s5866_s13 = smov %s4974_s19  ;;  %s5867_s14 = smov %s4964_s16 }
 0x289   :  { %12 = sbr.rel (!%p10_p11) target bundleno = 2 (0x2), region = 167 }

// kernel: _lambda_.9
= control target key start
LH: loop header
LB: loop body
LE: loop exit
PB: predicated region body
PF: predicated region fallthrough
CT: control target
= control target key end

     0   :  { %vm384_vm0 = vcmask 1041408   ;;  %vm386_vm1 = vcmask 1045508   ;;  %vm388_vm2 = vcmask 1043456   ;;  %vm762_vm3 = vcmask 1024   ;;  %s1228_s2 = inlined_call_operand.<no memory space> [shape: f32[1,1], index: 2, kind: input, shape index: {}]   ;;  %s1229_s0 = inlined_call_operand.vmem [shape: bf16[2,8192], index: 0, kind: input, shape index: {}]   ;;  %s1230_s1 = inlined_call_operand.vmem [shape: bf16[1,8192], index: 1, kind: input, shape index: {}]   ;;  %s1231_s3 = inlined_call_operand.vmem [shape: f32[2,1], index: 3, kind: output, shape index: {}]  }
   0x1   :  { %v8_v0 = vstv %s1228_s2  ;;  %v795_v1 = vld [vmem:[%s1229_s0] sm:$0xff]  ;;  %v800_v2 = vld [vmem:[%s1229_s0 + $0x8] sm:$0xff]  ;;  %v805_v3 = vld [vmem:[%s1229_s0 + $0x30] sm:$0xff] }
   0x2   :  { %9 = vst [vmem:[#allocation2] sm:$0x1] %v8_v0  ;;  %v810_v4 = vld [vmem:[%s1229_s0 + $0x38] sm:$0xff]  ;;  %v40_v5 = vld [vmem:[%s1230_s1] sm:$0xff]  ;;  %v41_v6 = vld [vmem:[%s1230_s1 + $0x8] sm:$0xff] }
   0x3   :  { %v42_v11 = vld [vmem:[%s1230_s1 + $0x10] sm:$0xff]  ;;  %v43_v12 = vld [vmem:[%s1230_s1 + $0x18] sm:$0xff]  ;;  %v44_v17 = vld [vmem:[%s1230_s1 + $0x20] sm:$0xff]  ;;  %v844_v21 = vunpack.c.l.bf16 %v40_v5  ;;  %v846_v22 = vunpack.c.h.bf16 %v40_v5  ;;  %v848_v23 = vunpack.c.l.bf16 %v41_v6  ;;  %v850_v24 = vunpack.c.h.bf16 %v41_v6 }
   0x4   :  { %v45_v18 = vld [vmem:[%s1230_s1 + $0x28] sm:$0xff]  ;;  %v46_v19 = vld [vmem:[%s1230_s1 + $0x30] sm:$0xff]  ;;  %v47_v20 = vld [vmem:[%s1230_s1 + $0x38] sm:$0xff]  ;;  %v852_v25 = vunpack.c.l.bf16 %v42_v11  ;;  %v854_v26 = vunpack.c.h.bf16 %v42_v11  ;;  %v856_v27 = vunpack.c.l.bf16 %v43_v12  ;;  %v858_v28 = vunpack.c.h.bf16 %v43_v12 }
   0x5   :  { %v860_v29 = vunpack.c.l.bf16 %v44_v17  ;;  %v862_v30 = vunpack.c.h.bf16 %v44_v17  ;;  %v864_v31 = vunpack.c.l.bf16 %v45_v18  ;;  %v866_v32 = vunpack.c.h.bf16 %v45_v18 }
   0x6   :  { %v868_v33 = vunpack.c.l.bf16 %v46_v19  ;;  %v870_v34 = vunpack.c.h.bf16 %v46_v19  ;;  %v872_v35 = vunpack.c.l.bf16 %v47_v20  ;;  %v874_v36 = vunpack.c.h.bf16 %v47_v20 }
   0x7   :  { %v80_v37 = vperm.slane %v844_v21, 0  ;;  %v81_v38 = vperm.slane %v844_v21, 2  ;;  %v82_v39 = vperm.slane %v844_v21, 4  ;;  %v83_v40 = vperm.slane %v844_v21, 6 }
   0x8   :  { %v84_v41 = vperm.slane %v846_v22, 0  ;;  %v85_v42 = vperm.slane %v846_v22, 2  ;;  %v86_v43 = vperm.slane %v846_v22, 4  ;;  %v87_v44 = vperm.slane %v846_v22, 6 }
   0x9   :  { %v88_v45 = vperm.slane %v848_v23, 0  ;;  %v89_v46 = vperm.slane %v848_v23, 2  ;;  %v90_v47 = vperm.slane %v848_v23, 4  ;;  %v91_v48 = vperm.slane %v848_v23, 6 }
   0xa   :  { %v92_v49 = vperm.slane %v850_v24, 0  ;;  %v93_v50 = vperm.slane %v850_v24, 2  ;;  %v94_v51 = vperm.slane %v850_v24, 4  ;;  %v95_v52 = vperm.slane %v850_v24, 6 }
   0xb   :  { %v128_v22 = vperm.slane %v868_v33, 0  ;;  %v129_v23 = vperm.slane %v868_v33, 2  ;;  %v130_v24 = vperm.slane %v868_v33, 4  ;;  %v131_v11 = vperm.slane %v868_v33, 6 }
   0xc   :  { %v132_v12 = vperm.slane %v870_v34, 0  ;;  %v133_v17 = vperm.slane %v870_v34, 2  ;;  %v134_v18 = vperm.slane %v870_v34, 4  ;;  %v135_v19 = vperm.slane %v870_v34, 6 }
   0xd   :  { %v136_v20 = vperm.slane %v872_v35, 0  ;;  %v137_v21 = vperm.slane %v872_v35, 2  ;;  %v138_v6 = vperm.slane %v872_v35, 4  ;;  %v139_v10 = vperm.slane %v872_v35, 6 }
   0xe   :  { %v140_v9 = vperm.slane %v874_v36, 0  ;;  %v141_v33 = vperm.slane %v874_v36, 2  ;;  %v142_v5 = vperm.slane %v874_v36, 4  ;;  %v143_v0 = vperm.slane %v874_v36, 6 }
   0xf   :  { %v208_v63 = vperm.slane %v80_v37, 0  ;;  %v209_v62 = vperm.slane %v81_v38, 0  ;;  %v210_v61 = vperm.slane %v82_v39, 0  ;;  %v211_v34 = vperm.slane %v83_v40, 0 }
  0x10   :  { %v212_v57 = vperm.slane %v84_v41, 0  ;;  %v213_v53 = vperm.slane %v85_v42, 0  ;;  %v214_v16 = vperm.slane %v86_v43, 0  ;;  %v215_v15 = vperm.slane %v87_v44, 0 }
  0x11   :  { %v939_v14 = vperm.slane %v88_v45, 0  ;;  %v941_v13 = vperm.slane %v89_v46, 0  ;;  %v943_v35 = vperm.slane %v90_v47, 0  ;;  %v945_v60 = vperm.slane %v91_v48, 0 }
  0x12   :  { %v947_v59 = vperm.slane %v92_v49, 0  ;;  %v949_v58 = vperm.slane %v93_v50, 0  ;;  %v951_v36 = vperm.slane %v94_v51, 0  ;;  %v953_v37 = vperm.slane %v95_v52, 0 }
  0x13   :  { %v256_v38 = vperm.slane %v128_v22, 0  ;;  %v257_v39 = vperm.slane %v129_v23, 0  ;;  %v258_v40 = vperm.slane %v130_v24, 0  ;;  %v259_v41 = vperm.slane %v131_v11, 0 }
  0x14   :  { %v260_v42 = vperm.slane %v132_v12, 0  ;;  %v261_v43 = vperm.slane %v133_v17, 0  ;;  %v262_v44 = vperm.slane %v134_v18, 0  ;;  %v263_v45 = vperm.slane %v135_v19, 0 }
  0x15   :  { %v264_v46 = vperm.slane %v136_v20, 0  ;;  %v265_v47 = vperm.slane %v137_v21, 0  ;;  %v266_v48 = vperm.slane %v138_v6, 0  ;;  %v267_v56 = vperm.slane %v139_v10, 0 }
  0x16   :  { %v268_v49 = vperm.slane %v140_v9, 0  ;;  %v269_v8 = vperm.slane %v141_v33, 0  ;;  %v270_v50 = vperm.slane %v142_v5, 0  ;;  %v271_v55 = vperm.slane %v143_v0, 0 }
  0x17   :  { %v336_v51 = vrot.slane %v209_v62, 6  ;;  %v337_v54 = vrot.slane %v210_v61, 4  ;;  %v338_v52 = vrot.slane %v211_v34, 2  ;;  %v339_v7 = vrot.slane %v213_v53, 6 }
  0x18   :  { %v340_v22 = vrot.slane %v214_v16, 4  ;;  %v341_v23 = vrot.slane %v215_v15, 2  ;;  %v342_v11 = vrot.slane %v941_v13, 6  ;;  %v343_v12 = vrot.slane %v943_v35, 4 }
  0x19   :  { %v344_v17 = vrot.slane %v945_v60, 2  ;;  %v372_v6 = vrot.slane %v257_v39, 6  ;;  %v373_v10 = vrot.slane %v258_v40, 4  ;;  %v374_v9 = vrot.slane %v259_v41, 2 }
  0x1a   :  { %v375_v18 = vrot.slane %v261_v43, 6  ;;  %v376_v5 = vrot.slane %v262_v44, 4  ;;  %v377_v0 = vrot.slane %v263_v45, 2  ;;  %v378_v62 = vrot.slane %v265_v47, 6 }
  0x1b   :  { %v385_v61 = vsel %vm384_vm0, %v208_v63, %v336_v51  ;;  %v387_v16 = vsel %vm386_vm1, %v337_v54, %v338_v52  ;;  %v379_v15 = vrot.slane %v266_v48, 4  ;;  %v380_v13 = vrot.slane %v267_v56, 2 }
  0x1c   :  { %v390_v53 = vsel %vm384_vm0, %v212_v57, %v339_v7  ;;  %v391_v19 = vsel %vm386_vm1, %v340_v22, %v341_v23  ;;  %v345_v60 = vrot.slane %v949_v58, 6  ;;  %v381_v20 = vrot.slane %v269_v8, 6 }
  0x1d   :  { %v382_v21 = vrot.slane %v270_v50, 4  ;;  %v383_v24 = vrot.slane %v271_v55, 2  ;;  %v346_v33 = vrot.slane %v951_v36, 4  ;;  %v347_v34 = vrot.slane %v953_v37, 2 }
  0x1e   :  { %v389_v63 = vsel %vm388_vm2, %v385_v61, %v387_v16  ;;  %v423_v54 = vsel %vm384_vm0, %v256_v38, %v372_v6  ;;  %v392_v35 = vsel %vm388_vm2, %v390_v53, %v391_v19  ;;  %v424_v56 = vsel %vm386_vm1, %v373_v10, %v374_v9 }
  0x1f   :  { %v426_v7 = vsel %vm384_vm0, %v260_v42, %v375_v18  ;;  %v427_v57 = vsel %vm386_vm1, %v376_v5, %v377_v0  ;;  %v425_v8 = vsel %vm388_vm2, %v423_v54, %v424_v56  ;;  %v429_v58 = vsel %vm384_vm0, %v264_v46, %v378_v62 }
  0x20   :  { %v428_v55 = vsel %vm388_vm2, %v426_v7, %v427_v57  ;;  %v430_v36 = vsel %vm386_vm1, %v379_v15, %v380_v13  ;;  %v432_v38 = vsel %vm384_vm0, %v268_v49, %v381_v20  ;;  %v433_v39 = vsel %vm386_vm1, %v382_v21, %v383_v24  ;;  %v18_v7 = vld [vmem:[%s1229_s0 + $0x10] sm:$0xff] }
  0x21   :  { %v431_v37 = vsel %vm388_vm2, %v429_v58, %v430_v36  ;;  %v1232_v40 = vunpack.c.l.bf16 %v795_v1  ;;  %v1233_v42 = vperm.slane %v852_v25, 2  ;;  %v1234_v44 = vperm.slane %v852_v25, 4 }
  0x22   :  { %v434_v47 = vsel %vm388_vm2, %v432_v38, %v433_v39  ;;  %v1235_v46 = vunpack.c.h.bf16 %v795_v1  ;;  %v1236_v50 = vperm.slane %v852_v25, 6  ;;  %v1237_v49 = vperm.slane %v854_v26, 2 }
  0x23   :  { %v451_v41 = vmul.f32 %v389_v63, %v1232_v40  ;;  %v225_v43 = vperm.slane %v1233_v42, 0  ;;  %v226_v45 = vperm.slane %v1234_v44, 0  ;;  %v1238_v22 = vperm.slane %v854_v26, 4 }
  0x24   :  { %v452_v48 = vmul.f32 %v392_v35, %v1235_v46  ;;  %v227_v51 = vperm.slane %v1236_v50, 0  ;;  %v229_v52 = vperm.slane %v1237_v49, 0  ;;  %v1239_v6 = vperm.slane %v854_v26, 6 }
  0x25   :  { %v230_v23 = vperm.slane %v1238_v22, 0  ;;  %483 = vst [vmem:[#allocation1] ss:$4 sm:$0xff] %v451_v41  ;;  %v393_v9 = vsel %vm384_vm0, %v939_v14, %v342_v11  ;;  %v394_v18 = vsel %vm386_vm1, %v343_v12, %v344_v17  ;;  %v396_v1 = vsel %vm384_vm0, %v947_v59, %v345_v60 }
  0x26   :  { %v231_v10 = vperm.slane %v1239_v6, 0  ;;  %v397_v5 = vsel %vm386_vm1, %v346_v33, %v347_v34  ;;  %485 = vst [vmem:[#allocation1 + $0x20] ss:$4 sm:$0xff] %v452_v48  ;;  %v1240_v0 = vunpack.c.l.bf16 %v805_v3  ;;  %v1241_v61 = vunpack.c.h.bf16 %v805_v3 }
  0x27   :  { %v1242_v15 = vunpack.c.l.bf16 %v810_v4  ;;  %v1243_v14 = vunpack.c.h.bf16 %v810_v4  ;;  %v127_v59 = vperm.slane %v866_v32, 6  ;;  %v1244_v12 = vperm.slane %v852_v25, 0 }
  0x28   :  { %v1003_v62 = vmul.f32 %v425_v8, %v1240_v0  ;;  %v1007_v16 = vmul.f32 %v428_v55, %v1241_v61  ;;  %v1245_v53 = vperm.slane %v854_v26, 0  ;;  %v1246_v3 = vperm.slane %v856_v27, 0 }
  0x29   :  { %v1011_v13 = vmul.f32 %v431_v37, %v1242_v15  ;;  %v1015_v11 = vmul.f32 %v434_v47, %v1243_v14  ;;  %v224_v17 = vperm.slane %v1244_v12, 0  ;;  %v1247_v20 = vperm.slane %v856_v27, 2 }
  0x2a   :  { %v228_v19 = vperm.slane %v1245_v53, 0  ;;  %v1024_v60 = vperm.slane %v1246_v3, 0  ;;  %v1248_v4 = vperm.slane %v856_v27, 4  ;;  %v1249_v33 = vperm.slane %v856_v27, 6 }
  0x2b   :  { %v1028_v21 = vperm.slane %v1247_v20, 0  ;;  %v395_v25 = vsel %vm388_vm2, %v393_v9, %v394_v18  ;;  %v1250_v26 = vperm.slane %v858_v28, 0  ;;  %v348_v54 = vrot.slane %v225_v43, 6 }
  0x2c   :  { %v1032_v24 = vperm.slane %v1248_v4, 0  ;;  %v1036_v34 = vperm.slane %v1249_v33, 0  ;;  %v349_v35 = vrot.slane %v226_v45, 4  ;;  %v398_v56 = vsel %vm388_vm2, %v396_v1, %v397_v5  ;;  %v486_v37 = vld.sshfl [vmem:[#allocation1] sm:$0xff pattern:$0x73625140] }
  0x2d   :  { %v1041_v63 = vperm.slane %v1250_v26, 0  ;;  %v350_v57 = vrot.slane %v227_v51, 2  ;;  %v351_v8 = vrot.slane %v229_v52, 6  ;;  %v352_v55 = vrot.slane %v230_v23, 4 }
  0x2e   :  { %v353_v27 = vrot.slane %v231_v10, 2  ;;  %v1251_v58 = vunpack.c.l.bf16 %v800_v2  ;;  %v487_v38 = vld.sshfl [vmem:[#allocation1 + $0x8] sm:$0xff pattern:$0x73625140]  ;;  %v1252_v39 = vunpack.c.h.bf16 %v800_v2  ;;  %v28_v45 = vunpack.c.l.bf16 %v18_v7 }
  0x2f   :  { %v488_v41 = vld.sshfl [vmem:[#allocation1 + $0x10] sm:$0xff pattern:$0x73625140]  ;;  %v489_v42 = vld.sshfl [vmem:[#allocation1 + $0x18] sm:$0xff pattern:$0x73625140]  ;;  %v29_v47 = vunpack.c.h.bf16 %v18_v7  ;;  %v399_v6 = vsel %vm384_vm0, %v224_v17, %v348_v54  ;;  %v400_v10 = vsel %vm386_vm1, %v349_v35, %v350_v57  ;;  %v402_v5 = vsel %vm384_vm0, %v228_v19, %v351_v8 }
  0x30   :  { %v453_v36 = vmul.f32 %v395_v25, %v1251_v58  ;;  %v454_v40 = vmul.f32 %v398_v56, %v1252_v39  ;;  %v490_v43 = vld.sshfl [vmem:[#allocation1 + $0x20] sm:$0xff pattern:$0x73625140]  ;;  %v491_v44 = vld.sshfl [vmem:[#allocation1 + $0x28] sm:$0xff pattern:$0x73625140]  ;;  %v403_v0 = vsel %vm386_vm1, %v352_v55, %v353_v27  ;;  %v401_v33 = vsel %vm388_vm2, %v399_v6, %v400_v10 }
  0x31   :  { %v492_v46 = vld.sshfl [vmem:[#allocation1 + $0x30] sm:$0xff pattern:$0x73625140]  ;;  %v493_v48 = vld.sshfl [vmem:[#allocation1 + $0x38] sm:$0xff pattern:$0x73625140]  ;;  %v404_v35 = vsel %vm388_vm2, %v402_v5, %v403_v0  ;;  %v455_v55 = vmul.f32 %v401_v33, %v28_v45 }
  0x32   :  { %v1253_v50 = vperm.slane %v858_v28, 2  ;;  %494 = vst [vmem:[#allocation1] ss:$4 sm:$0xff] %v453_v36  ;;  %v628_v49 = vsel %vm384_vm0, %v486_v37, 0.0  ;;  %v629_v52 = vsel %vm384_vm0, %v487_v38, 0.0  ;;  %v631_v22 = vsel %vm384_vm0, %v488_v41, 0.0 }
  0x33   :  { %v1254_v2 = vperm.slane %v858_v28, 4  ;;  %495 = vst [vmem:[#allocation1 + $0x20] ss:$4 sm:$0xff] %v454_v40  ;;  %v630_v9 = vadd.f32 %v629_v52, %v628_v49  ;;  %v1255_v18 = vperm.slane %v858_v28, 6  ;;  %v633_v61 = vsel %vm384_vm0, %v489_v42, 0.0 }
  0x34   :  { %v237_v51 = vperm.slane %v1253_v50, 0  ;;  %v1256_v15 = vperm.slane %v860_v29, 0  ;;  %v1257_v12 = vperm.slane %v860_v29, 2  ;;  %v1258_v53 = vperm.slane %v860_v29, 4 }
  0x35   :  { %v238_v23 = vperm.slane %v1254_v2, 0  ;;  %v239_v1 = vperm.slane %v1255_v18, 0  ;;  %v632_v28 = vadd.f32 %v631_v22, %v630_v9  ;;  %v1259_v20 = vperm.slane %v860_v29, 6 }
  0x36   :  { %v1067_v14 = vperm.slane %v1256_v15, 0  ;;  %v1071_v17 = vperm.slane %v1257_v12, 0  ;;  %v1075_v3 = vperm.slane %v1258_v53, 0  ;;  %v354_v4 = vrot.slane %v1028_v21, 6  ;;  %v19_v21 = vld [vmem:[%s1229_s0 + $0x18] sm:$0xff] }
  0x37   :  { %v1079_v19 = vperm.slane %v1259_v20, 0  ;;  %v635_v25 = vsel %vm384_vm0, %v490_v43, 0.0  ;;  %v355_v26 = vrot.slane %v1032_v24, 4  ;;  %v356_v54 = vrot.slane %v1036_v34, 2 }
  0x38   :  { %v634_v56 = vadd.f32 %v633_v61, %v632_v28  ;;  %v357_v7 = vrot.slane %v237_v51, 6  ;;  %v358_v57 = vrot.slane %v238_v23, 4  ;;  %v359_v8 = vrot.slane %v239_v1, 2 }
  0x39   :  { %v637_v29 = vsel %vm384_vm0, %v491_v44, 0.0  ;;  %v496_v27 = vld.sshfl [vmem:[#allocation1] sm:$0xff pattern:$0x73625140]  ;;  %v639_v36 = vsel %vm384_vm0, %v492_v46, 0.0  ;;  %v641_v24 = vsel %vm384_vm0, %v493_v48, 0.0  ;;  %v456_v34 = vmul.f32 %v404_v35, %v29_v47 }
  0x3a   :  { %v636_v58 = vadd.f32 %v635_v25, %v634_v56  ;;  %v497_v37 = vld.sshfl [vmem:[#allocation1 + $0x8] sm:$0xff pattern:$0x73625140]  ;;  %v498_v38 = vld.sshfl [vmem:[#allocation1 + $0x10] sm:$0xff pattern:$0x73625140]  ;;  %v30_v44 = vunpack.c.l.bf16 %v19_v21  ;;  %v31_v50 = vunpack.c.h.bf16 %v19_v21  ;;  %v405_v47 = vsel %vm384_vm0, %v1024_v60, %v354_v4 }
  0x3b   :  { %v499_v39 = vld.sshfl [vmem:[#allocation1 + $0x18] sm:$0xff pattern:$0x73625140]  ;;  %v500_v40 = vld.sshfl [vmem:[#allocation1 + $0x20] sm:$0xff pattern:$0x73625140]  ;;  %v406_v22 = vsel %vm386_vm1, %v355_v26, %v356_v54  ;;  %v408_v10 = vsel %vm384_vm0, %v1041_v63, %v357_v7  ;;  %v409_v9 = vsel %vm386_vm1, %v358_v57, %v359_v8 }
  0x3c   :  { %v638_v41 = vadd.f32 %v637_v29, %v636_v58  ;;  %v501_v42 = vld.sshfl [vmem:[#allocation1 + $0x28] sm:$0xff pattern:$0x73625140]  ;;  %v502_v43 = vld.sshfl [vmem:[#allocation1 + $0x30] sm:$0xff pattern:$0x73625140]  ;;  %v410_v26 = vsel %vm388_vm2, %v408_v10, %v409_v9 }
  0x3d   :  { %v1260_v51 = vperm.slane %v862_v30, 0  ;;  %v1095_v45 = vld.sshfl [vmem:[#allocation1 + $0x38] sm:$0xff pattern:$0x73625140]  ;;  %504 = vst [vmem:[#allocation1] ss:$4 sm:$0xff] %v455_v55 }
  0x3e   :  { %v640_v52 = vadd.f32 %v639_v36, %v638_v41  ;;  %v1261_v46 = vperm.slane %v862_v30, 2  ;;  %505 = vst [vmem:[#allocation1 + $0x20] ss:$4 sm:$0xff] %v456_v34  ;;  %v643_v2 = vsel %vm384_vm0, %v496_v27, 0.0  ;;  %v1262_v23 = vperm.slane %v862_v30, 4 }
  0x3f   :  { %v244_v49 = vperm.slane %v1260_v51, 0  ;;  %v1263_v1 = vperm.slane %v862_v30, 6  ;;  %v1264_v0 = vperm.slane %v864_v31, 2  ;;  %v1265_v61 = vperm.slane %v864_v31, 4 }
  0x40   :  { %v245_v48 = vperm.slane %v1261_v46, 0  ;;  %v246_v6 = vperm.slane %v1262_v23, 0  ;;  %v642_v18 = vadd.f32 %v641_v24, %v640_v52  ;;  %v645_v12 = vsel %vm384_vm0, %v497_v37, 0.0  ;;  %v20_v24 = vld [vmem:[%s1229_s0 + $0x20] sm:$0xff] }
  0x41   :  { %v247_v5 = vperm.slane %v1263_v1, 0  ;;  %v1112_v60 = vperm.slane %v1264_v0, 0  ;;  %v1116_v15 = vperm.slane %v1265_v61, 0  ;;  %v1266_v53 = vperm.slane %v864_v31, 6 }
  0x42   :  { %v1267_v63 = vperm.slane %v866_v32, 2  ;;  %v407_v30 = vsel %vm388_vm2, %v405_v47, %v406_v22  ;;  %v644_v4 = vadd.f32 %v643_v2, %v642_v18  ;;  %v360_v33 = vrot.slane %v1071_v17, 6 }
  0x43   :  { %v1121_v28 = vperm.slane %v1266_v53, 0  ;;  %v361_v25 = vrot.slane %v1075_v3, 4  ;;  %v647_v54 = vsel %vm384_vm0, %v498_v38, 0.0  ;;  %v362_v35 = vrot.slane %v1079_v19, 2 }
  0x44   :  { %v1125_v20 = vperm.slane %v1267_v63, 0  ;;  %v363_v56 = vrot.slane %v245_v48, 6  ;;  %v364_v7 = vrot.slane %v246_v6, 4  ;;  %v646_v57 = vadd.f32 %v645_v12, %v644_v4  ;;  %v506_v58 = vld.sshfl [vmem:[#allocation1] sm:$0xff pattern:$0x73625140] }
  0x45   :  { %v365_v8 = vrot.slane %v247_v5, 2  ;;  %v457_v29 = vmul.f32 %v407_v30, %v30_v44  ;;  %v649_v21 = vsel %vm384_vm0, %v499_v39, 0.0  ;;  %v651_v55 = vsel %vm384_vm0, %v500_v40, 0.0  ;;  %v507_v17 = vld.sshfl [vmem:[#allocation1 + $0x8] sm:$0xff pattern:$0x73625140] }
  0x46   :  { %v458_v27 = vmul.f32 %v410_v26, %v31_v50  ;;  %v508_v36 = vld.sshfl [vmem:[#allocation1 + $0x10] sm:$0xff pattern:$0x73625140]  ;;  %v648_v3 = vadd.f32 %v647_v54, %v646_v57  ;;  %v509_v34 = vld.sshfl [vmem:[#allocation1 + $0x18] sm:$0xff pattern:$0x73625140]  ;;  %v411_v51 = vsel %vm384_vm0, %v1067_v14, %v360_v33  ;;  %v412_v52 = vsel %vm386_vm1, %v361_v25, %v362_v35 }
  0x47   :  { %v510_v19 = vld.sshfl [vmem:[#allocation1 + $0x20] sm:$0xff pattern:$0x73625140]  ;;  %v511_v37 = vld.sshfl [vmem:[#allocation1 + $0x28] sm:$0xff pattern:$0x73625140]  ;;  %v414_v47 = vsel %vm384_vm0, %v244_v49, %v363_v56  ;;  %v415_v22 = vsel %vm386_vm1, %v364_v7, %v365_v8  ;;  %v33_v23 = vunpack.c.h.bf16 %v20_v24  ;;  %v413_v5 = vsel %vm388_vm2, %v411_v51, %v412_v52 }
  0x48   :  { %v1138_v38 = vld.sshfl [vmem:[#allocation1 + $0x30] sm:$0xff pattern:$0x73625140]  ;;  %v650_v41 = vadd.f32 %v649_v21, %v648_v3  ;;  %v513_v44 = vld.sshfl [vmem:[#allocation1 + $0x38] sm:$0xff pattern:$0x73625140]  ;;  %v416_v0 = vsel %vm388_vm2, %v414_v47, %v415_v22 }
  0x49   :  { %514 = vst [vmem:[#allocation1] ss:$4 sm:$0xff] %v457_v29  ;;  %v653_v39 = vsel %vm384_vm0, %v501_v42, 0.0  ;;  %v1268_v40 = vperm.slane %v866_v32, 4  ;;  %v255_v48 = vperm.slane %v127_v59, 0  ;;  %v655_v2 = vsel %vm384_vm0, %v502_v43, 0.0 }
  0x4a   :  { %515 = vst [vmem:[#allocation1 + $0x20] ss:$4 sm:$0xff] %v458_v27  ;;  %v652_v46 = vadd.f32 %v651_v55, %v650_v41  ;;  %v32_v42 = vunpack.c.l.bf16 %v20_v24  ;;  %v1269_v6 = vperm.slane %v864_v31, 0  ;;  %v1270_v14 = vperm.slane %v866_v32, 0 }
  0x4b   :  { %v254_v50 = vperm.slane %v1268_v40, 0  ;;  %v366_v1 = vrot.slane %v1112_v60, 6  ;;  %v657_v59 = vsel %vm384_vm0, %v1095_v45, 0.0  ;;  %v367_v49 = vrot.slane %v1116_v15, 4 }
  0x4c   :  { %v248_v10 = vperm.slane %v1269_v6, 0  ;;  %v654_v9 = vadd.f32 %v653_v39, %v652_v46  ;;  %v252_v18 = vperm.slane %v1270_v14, 0  ;;  %v368_v43 = vrot.slane %v1121_v28, 2 }
  0x4d   :  { %v369_v31 = vrot.slane %v1125_v20, 6  ;;  %v370_v12 = vrot.slane %v254_v50, 4  ;;  %v371_v53 = vrot.slane %v255_v48, 2  ;;  %v659_v32 = vsel %vm384_vm0, %v506_v58, 0.0  ;;  %v21_v20 = vld [vmem:[%s1229_s0 + $0x28] sm:$0xff] }
  0x4e   :  { %v656_v61 = vadd.f32 %v655_v2, %v654_v9  ;;  %v459_v63 = vmul.f32 %v413_v5, %v32_v42  ;;  %v661_v30 = vsel %vm384_vm0, %v507_v17, 0.0  ;;  %v663_v4 = vsel %vm384_vm0, %v508_v36, 0.0 }
  0x4f   :  { %v460_v45 = vmul.f32 %v416_v0, %v33_v23  ;;  %v417_v8 = vsel %vm384_vm0, %v248_v10, %v366_v1  ;;  %v418_v29 = vsel %vm386_vm1, %v367_v49, %v368_v43  ;;  %v665_v21 = vsel %vm384_vm0, %v509_v34, 0.0 }
  0x50   :  { %v658_v60 = vadd.f32 %v657_v59, %v656_v61  ;;  %v516_v33 = vld.sshfl [vmem:[#allocation1] sm:$0xff pattern:$0x73625140]  ;;  %v517_v15 = vld.sshfl [vmem:[#allocation1 + $0x8] sm:$0xff pattern:$0x73625140]  ;;  %v420_v55 = vsel %vm384_vm0, %v252_v18, %v369_v31  ;;  %v421_v27 = vsel %vm386_vm1, %v370_v12, %v371_v53  ;;  %v34_v17 = vunpack.c.l.bf16 %v21_v20 }
  0x51   :  { %v518_v25 = vld.sshfl [vmem:[#allocation1 + $0x10] sm:$0xff pattern:$0x73625140]  ;;  %v519_v28 = vld.sshfl [vmem:[#allocation1 + $0x18] sm:$0xff pattern:$0x73625140]  ;;  %v35_v3 = vunpack.c.h.bf16 %v21_v20  ;;  %v419_v24 = vsel %vm388_vm2, %v417_v8, %v418_v29  ;;  %v422_v39 = vsel %vm388_vm2, %v420_v55, %v421_v27 }
  0x52   :  { %v520_v26 = vld.sshfl [vmem:[#allocation1 + $0x20] sm:$0xff pattern:$0x73625140]  ;;  %v660_v54 = vadd.f32 %v659_v32, %v658_v60  ;;  %v521_v35 = vld.sshfl [vmem:[#allocation1 + $0x28] sm:$0xff pattern:$0x73625140]  ;;  %v461_v51 = vmul.f32 %v419_v24, %v34_v17 }
  0x53   :  { %v522_v56 = vld.sshfl [vmem:[#allocation1 + $0x30] sm:$0xff pattern:$0x73625140]  ;;  %v523_v7 = vld.sshfl [vmem:[#allocation1 + $0x38] sm:$0xff pattern:$0x73625140]  ;;  %v462_v46 = vmul.f32 %v422_v39, %v35_v3 }
  0x54   :  { %524 = vst [vmem:[#allocation1] ss:$4 sm:$0xff] %v459_v63  ;;  %v662_v57 = vadd.f32 %v661_v30, %v660_v54  ;;  %v667_v36 = vsel %vm384_vm0, %v510_v19, 0.0  ;;  %v669_v40 = vsel %vm384_vm0, %v511_v37, 0.0  ;;  %v671_v34 = vsel %vm384_vm0, %v1138_v38, 0.0 }
  0x55   :  { %525 = vst [vmem:[#allocation1 + $0x20] ss:$4 sm:$0xff] %v460_v45  ;;  %v673_v52 = vsel %vm384_vm0, %v513_v44, 0.0  ;;  %v675_v37 = vsel %vm384_vm0, %v516_v33, 0.0  ;;  %v677_v38 = vsel %vm384_vm0, %v517_v15, 0.0  ;;  %v679_v44 = vsel %vm384_vm0, %v518_v25, 0.0 }
  0x56   :  { %v664_v58 = vadd.f32 %v663_v4, %v662_v57  ;;  %v681_v5 = vsel %vm384_vm0, %v519_v28, 0.0  ;;  %v683_v49 = vsel %vm384_vm0, %v520_v26, 0.0  ;;  %v685_v43 = vsel %vm384_vm0, %v521_v35, 0.0 }
  0x57   :  { %v687_v45 = vsel %vm384_vm0, %v522_v56, 0.0  ;;  %v689_v15 = vsel %vm384_vm0, %v523_v7, 0.0 }
  0x58   :  { %v666_v41 = vadd.f32 %v665_v21, %v664_v58 }
  0x5a   :  { %v668_v50 = vadd.f32 %v667_v36, %v666_v41 }
  0x5b   :  { %v526_v48 = vld.sshfl [vmem:[#allocation1] sm:$0xff pattern:$0x73625140]  ;;  %v527_v47 = vld.sshfl [vmem:[#allocation1 + $0x8] sm:$0xff pattern:$0x73625140] }
  0x5c   :  { %v528_v22 = vld.sshfl [vmem:[#allocation1 + $0x10] sm:$0xff pattern:$0x73625140]  ;;  %v670_v19 = vadd.f32 %v669_v40, %v668_v50  ;;  %v529_v2 = vld.sshfl [vmem:[#allocation1 + $0x18] sm:$0xff pattern:$0x73625140] }
  0x5d   :  { %v530_v42 = vld.sshfl [vmem:[#allocation1 + $0x20] sm:$0xff pattern:$0x73625140]  ;;  %v531_v23 = vld.sshfl [vmem:[#allocation1 + $0x28] sm:$0xff pattern:$0x73625140] }
  0x5e   :  { %v532_v6 = vld.sshfl [vmem:[#allocation1 + $0x30] sm:$0xff pattern:$0x73625140]  ;;  %v672_v10 = vadd.f32 %v671_v34, %v670_v19  ;;  %v533_v9 = vld.sshfl [vmem:[#allocation1 + $0x38] sm:$0xff pattern:$0x73625140] }
  0x5f   :  { %534 = vst [vmem:[#allocation1] ss:$4 sm:$0xff] %v461_v51  ;;  %v691_v28 = vsel %vm384_vm0, %v526_v48, 0.0  ;;  %v693_v54 = vsel %vm384_vm0, %v527_v47, 0.0  ;;  %v695_v35 = vsel %vm384_vm0, %v528_v22, 0.0  ;;  %v697_v7 = vsel %vm384_vm0, %v529_v2, 0.0 }
  0x60   :  { %535 = vst [vmem:[#allocation1 + $0x20] ss:$4 sm:$0xff] %v462_v46  ;;  %v674_v14 = vadd.f32 %v673_v52, %v672_v10  ;;  %v699_v17 = vsel %vm384_vm0, %v530_v42, 0.0  ;;  %v701_v3 = vsel %vm384_vm0, %v531_v23, 0.0  ;;  %v703_v41 = vsel %vm384_vm0, %v532_v6, 0.0 }
  0x61   :  { %v705_v40 = vsel %vm384_vm0, %v533_v9, 0.0 }
  0x62   :  { %v676_v18 = vadd.f32 %v675_v37, %v674_v14 }
  0x64   :  { %v678_v1 = vadd.f32 %v677_v38, %v676_v18 }
  0x66   :  { %v680_v59 = vadd.f32 %v679_v44, %v678_v1  ;;  %v536_v0 = vld.sshfl [vmem:[#allocation1] sm:$0xff pattern:$0x73625140]  ;;  %v537_v61 = vld.sshfl [vmem:[#allocation1 + $0x8] sm:$0xff pattern:$0x73625140] }
  0x67   :  { %v538_v31 = vld.sshfl [vmem:[#allocation1 + $0x10] sm:$0xff pattern:$0x73625140]  ;;  %v539_v12 = vld.sshfl [vmem:[#allocation1 + $0x18] sm:$0xff pattern:$0x73625140] }
  0x68   :  { %v540_v53 = vld.sshfl [vmem:[#allocation1 + $0x20] sm:$0xff pattern:$0x73625140]  ;;  %v682_v32 = vadd.f32 %v681_v5, %v680_v59  ;;  %v541_v63 = vld.sshfl [vmem:[#allocation1 + $0x28] sm:$0xff pattern:$0x73625140] }
  0x69   :  { %v542_v60 = vld.sshfl [vmem:[#allocation1 + $0x30] sm:$0xff pattern:$0x73625140]  ;;  %v543_v30 = vld.sshfl [vmem:[#allocation1 + $0x38] sm:$0xff pattern:$0x73625140] }
  0x6a   :  { %544 = vst [vmem:[#allocation1] ss:$4 sm:$0xff] %v1003_v62  ;;  %v684_v4 = vadd.f32 %v683_v49, %v682_v32  ;;  %v707_v51 = vsel %vm384_vm0, %v536_v0, 0.0  ;;  %v709_v34 = vsel %vm384_vm0, %v537_v61, 0.0  ;;  %v713_v48 = vsel %vm384_vm0, %v539_v12, 0.0 }
  0x6b   :  { %545 = vst [vmem:[#allocation1 + $0x20] ss:$4 sm:$0xff] %v1007_v16  ;;  %v715_v22 = vsel %vm384_vm0, %v540_v53, 0.0  ;;  %v717_v2 = vsel %vm384_vm0, %v541_v63, 0.0  ;;  %v719_v23 = vsel %vm384_vm0, %v542_v60, 0.0  ;;  %v721_v10 = vsel %vm384_vm0, %v543_v30, 0.0 }
  0x6c   :  { %v686_v33 = vadd.f32 %v685_v43, %v684_v4 }
  0x6e   :  { %v688_v25 = vadd.f32 %v687_v45, %v686_v33 }
  0x70   :  { %v690_v26 = vadd.f32 %v689_v15, %v688_v25 }
  0x71   :  { %v546_v20 = vld.sshfl [vmem:[#allocation1] sm:$0xff pattern:$0x73625140]  ;;  %v547_v57 = vld.sshfl [vmem:[#allocation1 + $0x8] sm:$0xff pattern:$0x73625140] }
  0x72   :  { %v548_v8 = vld.sshfl [vmem:[#allocation1 + $0x10] sm:$0xff pattern:$0x73625140]  ;;  %v692_v62 = vadd.f32 %v691_v28, %v690_v26  ;;  %v549_v29 = vld.sshfl [vmem:[#allocation1 + $0x18] sm:$0xff pattern:$0x73625140] }
  0x73   :  { %v550_v21 = vld.sshfl [vmem:[#allocation1 + $0x20] sm:$0xff pattern:$0x73625140]  ;;  %v551_v16 = vld.sshfl [vmem:[#allocation1 + $0x28] sm:$0xff pattern:$0x73625140] }
  0x74   :  { %v552_v55 = vld.sshfl [vmem:[#allocation1 + $0x30] sm:$0xff pattern:$0x73625140]  ;;  %v694_v56 = vadd.f32 %v693_v54, %v692_v62  ;;  %v553_v27 = vld.sshfl [vmem:[#allocation1 + $0x38] sm:$0xff pattern:$0x73625140] }
  0x75   :  { %554 = vst [vmem:[#allocation1] ss:$4 sm:$0xff] %v1011_v13  ;;  %v723_v37 = vsel %vm384_vm0, %v546_v20, 0.0  ;;  %v725_v38 = vsel %vm384_vm0, %v547_v57, 0.0  ;;  %v727_v44 = vsel %vm384_vm0, %v548_v8, 0.0  ;;  %v729_v5 = vsel %vm384_vm0, %v549_v29, 0.0 }
  0x76   :  { %555 = vst [vmem:[#allocation1 + $0x20] ss:$4 sm:$0xff] %v1015_v11  ;;  %v696_v58 = vadd.f32 %v695_v35, %v694_v56  ;;  %v711_v11 = vsel %vm384_vm0, %v538_v31, 0.0  ;;  %v731_v49 = vsel %vm384_vm0, %v550_v21, 0.0  ;;  %v733_v0 = vsel %vm384_vm0, %v551_v16, 0.0 }
  0x77   :  { %v735_v31 = vsel %vm384_vm0, %v552_v55, 0.0  ;;  %v737_v32 = vsel %vm384_vm0, %v553_v27, 0.0 }
  0x78   :  { %v698_v36 = vadd.f32 %v697_v7, %v696_v58 }
  0x7a   :  { %v700_v24 = vadd.f32 %v699_v17, %v698_v36  ;;  %v768_v36 = vld [vmem:[#allocation2] ss:$0 sm:$0xff] }
  0x7c   :  { %v702_v39 = vadd.f32 %v701_v3, %v700_v24  ;;  %v556_v12 = vld.sshfl [vmem:[#allocation1] sm:$0xff pattern:$0x73625140]  ;;  %v557_v63 = vld.sshfl [vmem:[#allocation1 + $0x8] sm:$0xff pattern:$0x73625140] }
  0x7d   :  { %v739_v30 = vsel %vm384_vm0, %v556_v12, 0.0  ;;  %v558_v4 = vld.sshfl [vmem:[#allocation1 + $0x10] sm:$0xff pattern:$0x73625140]  ;;  %v741_v33 = vsel %vm384_vm0, %v557_v63, 0.0 }
  0x7e   :  { %v704_v50 = vadd.f32 %v703_v41, %v702_v39  ;;  %v559_v15 = vld.sshfl [vmem:[#allocation1 + $0x18] sm:$0xff pattern:$0x73625140]  ;;  %v743_v28 = vsel %vm384_vm0, %v558_v4, 0.0 }
  0x7f   :  { %v560_v26 = vld.sshfl [vmem:[#allocation1 + $0x20] sm:$0xff pattern:$0x73625140]  ;;  %v745_v35 = vsel %vm384_vm0, %v559_v15, 0.0 }
  0x80   :  { %v706_v13 = vadd.f32 %v705_v40, %v704_v50  ;;  %v561_v20 = vld.sshfl [vmem:[#allocation1 + $0x28] sm:$0xff pattern:$0x73625140]  ;;  %v747_v8 = vsel %vm384_vm0, %v560_v26, 0.0 }
  0x81   :  { %v562_v62 = vld.sshfl [vmem:[#allocation1 + $0x30] sm:$0xff pattern:$0x73625140]  ;;  %v749_v21 = vsel %vm384_vm0, %v561_v20, 0.0 }
  0x82   :  { %v708_v52 = vadd.f32 %v707_v51, %v706_v13  ;;  %v563_v16 = vld.sshfl [vmem:[#allocation1 + $0x38] sm:$0xff pattern:$0x73625140]  ;;  %v751_v56 = vsel %vm384_vm0, %v562_v62, 0.0 }
  0x83   :  { %v753_v7 = vsel %vm384_vm0, %v563_v16, 0.0 }
  0x84   :  { %v710_v46 = vadd.f32 %v709_v34, %v708_v52 }
  0x86   :  { %v712_v47 = vadd.f32 %v711_v11, %v710_v46 }
  0x88   :  { %v714_v19 = vadd.f32 %v713_v48, %v712_v47 }
  0x8a   :  { %v716_v42 = vadd.f32 %v715_v22, %v714_v19 }
  0x8c   :  { %v718_v6 = vadd.f32 %v717_v2, %v716_v42 }
  0x8e   :  { %v720_v9 = vadd.f32 %v719_v23, %v718_v6 }
  0x90   :  { %v722_v14 = vadd.f32 %v721_v10, %v720_v9 }
  0x92   :  { %v724_v18 = vadd.f32 %v723_v37, %v722_v14 }
  0x94   :  { %v726_v1 = vadd.f32 %v725_v38, %v724_v18 }
  0x96   :  { %v728_v59 = vadd.f32 %v727_v44, %v726_v1 }
  0x98   :  { %v730_v43 = vadd.f32 %v729_v5, %v728_v59 }
  0x9a   :  { %v732_v61 = vadd.f32 %v731_v49, %v730_v43 }
  0x9c   :  { %v734_v53 = vadd.f32 %v733_v0, %v732_v61 }
  0x9e   :  { %v736_v60 = vadd.f32 %v735_v31, %v734_v53 }
  0xa0   :  { %v738_v45 = vadd.f32 %v737_v32, %v736_v60 }
  0xa2   :  { %v740_v25 = vadd.f32 %v739_v30, %v738_v45 }
  0xa4   :  { %v742_v54 = vadd.f32 %v741_v33, %v740_v25 }
  0xa6   :  { %v744_v57 = vadd.f32 %v743_v28, %v742_v54 }
  0xa8   :  { %v746_v29 = vadd.f32 %v745_v35, %v744_v57 }
  0xaa   :  { %v748_v55 = vadd.f32 %v747_v8, %v746_v29 }
  0xac   :  { %v750_v27 = vadd.f32 %v749_v21, %v748_v55 }
  0xae   :  { %v752_v58 = vadd.f32 %v751_v56, %v750_v27 }
  0xb0   :  { %v754_v17 = vadd.f32 %v753_v7, %v752_v58 }
  0xb2   :  { %755 = vadd.xlane.f32.xlu0 %v754_v17 }
 0x125   :  { %v756_v3 = vpop.xlane.xlu0 %755 }
 0x126   :  { %v761_v24 = vadd.f32 %v768_v36, %v756_v3 }
 0x128   :  { %763 = vst.msk [vmem:[%s1231_s3] sm:$0x3] %vm762_vm3, %v761_v24 }

// kernel: _lambda_.8
= control target key start
LH: loop header
LB: loop body
LE: loop exit
PB: predicated region body
PF: predicated region fallthrough
CT: control target
= control target key end

     0   :  { %s11321_s12 = smov 0   ;;  %s11323_s13 = smov 0   ;;  %s13675_s0 = inlined_call_operand.vmem [shape: bf16[8,4096], index: 0, kind: input, shape index: {}]   ;;  %s13676_s1 = inlined_call_operand.vmem [shape: bf16[4096,512], index: 1, kind: input, shape index: {}]   ;;  %s13677_s2 = inlined_call_operand.vmem [shape: f32[1,512], index: 2, kind: input, shape index: {}]   ;;  %s13678_s3 = inlined_call_operand.vmem [shape: bf16[8,512], index: 3, kind: output, shape index: {}]  }
   0x1   :  { %s11325_s14 = smov 0  }
   0x2 LB: > { %s8665_s15 = sadd.s32 4294967295, %s11298_s14   ;;  %s11338_s16 = sadd.s32 1, %s11298_s14   ;;  %s11298_s14 = sphi %s11325_s14, %s13681_s14   ;;  %s11294_s13 = sphi %s11323_s13, %s13680_s13   ;;  %s11290_s12 = sphi %s11321_s12, %s13679_s12  }
   0x3   : > { %s38_s17 = ssub.s32 %s11298_s14, %s11338_s16  ;;  %s41_s18 = sadd.s32 1, %s11294_s13 }
   0x4   : > { %p39_p0 = scmp.eq.s32.totalorder %s38_s17, 0  ;;  %p48_p1 = scmp.ne.s32.totalorder %s11294_s13, %s11290_s12 }
   0x5   : > { %p49_p2 = scmp.eq.s32.totalorder %s11298_s14, 0  ;;  %p8668_p4 = scmp.ge.s32.totalorder %s11298_s14, 2 }
   0x6   : > { %s11347_s19 = scalar_select %p39_p0, %s11294_s13, %s41_s18  }
   0x7   : > { %p50_p3 = por %p49_p2, %p48_p1  ;;  %129 = sbr.rel (%p8668_p4) target bundleno = 528 (0x210), region = 20 }
   0xc   : > { %132 = sbr.rel (!%p50_p3) target bundleno = 528 (0x210), region = 24  ;;  %s134_s20 = sand.u32 (%p50_p3), 1, %s11294_s13  }
   0xd   : > { %s10727_s21 = sshll.u32 (%p50_p3), %s11298_s14, 3  ;;  %s8669_s22 = sshll.u32 (%p50_p3), %s134_s20, 12 }
   0xe   : > { %s11355_s25 = scalar_lea.vmem (%p50_p3), %s13676_s1, %s10727_s21  ;;  %s11360_s26 = scalar_lea.vmem (%p50_p3), [#allocation2], %s8669_s22 }
   0xf   : > { %v1191_v0 = vld [vmem:[%s11355_s25] sm:$0xff] (%p50_p3)  ;;  %v1193_v1 = vld [vmem:[%s11355_s25 + $0x10] sm:$0xff] (%p50_p3) }
  0x10   : > { %v1195_v2 = vld [vmem:[%s11355_s25 + $0x20] sm:$0xff] (%p50_p3)  ;;  %1192 = vst [vmem:[%s11360_s26] sm:$0xff] (%p50_p3), %v1191_v0  ;;  %v1197_v3 = vld [vmem:[%s11355_s25 + $0x30] sm:$0xff] (%p50_p3) }
  0x11   : > { %1194 = vst [vmem:[%s11360_s26 + $0x8] sm:$0xff] %v1193_v1  ;;  %v1199_v4 = vld [vmem:[%s11355_s25 + $0x40] sm:$0xff]  ;;  %v1201_v5 = vld [vmem:[%s11355_s25 + $0x50] sm:$0xff] }
  0x12   : > { %1196 = vst [vmem:[%s11360_s26 + $0x10] sm:$0xff] %v1195_v2  ;;  %v1203_v6 = vld [vmem:[%s11355_s25 + $0x60] sm:$0xff]  ;;  %v1205_v7 = vld [vmem:[%s11355_s25 + $0x70] sm:$0xff] }
  0x13   : > { %1198 = vst [vmem:[%s11360_s26 + $0x18] sm:$0xff] %v1197_v3  ;;  %v1207_v8 = vld [vmem:[%s11355_s25 + $0x80] sm:$0xff]  ;;  %v1209_v9 = vld [vmem:[%s11355_s25 + $0x90] sm:$0xff] }
  0x14   : > { %1200 = vst [vmem:[%s11360_s26 + $0x20] sm:$0xff] %v1199_v4  ;;  %v1211_v10 = vld [vmem:[%s11355_s25 + $0xa0] sm:$0xff]  ;;  %v1213_v11 = vld [vmem:[%s11355_s25 + $0xb0] sm:$0xff] }
  0x15   : > { %1202 = vst [vmem:[%s11360_s26 + $0x28] sm:$0xff] %v1201_v5  ;;  %v1215_v12 = vld [vmem:[%s11355_s25 + $0xc0] sm:$0xff]  ;;  %v1217_v13 = vld [vmem:[%s11355_s25 + $0xd0] sm:$0xff] }
  0x16   : > { %1204 = vst [vmem:[%s11360_s26 + $0x30] sm:$0xff] %v1203_v6  ;;  %v1219_v14 = vld [vmem:[%s11355_s25 + $0xe0] sm:$0xff]  ;;  %v1221_v15 = vld [vmem:[%s11355_s25 + $0xf0] sm:$0xff] }
  0x17   : > { %1206 = vst [vmem:[%s11360_s26 + $0x38] sm:$0xff] %v1205_v7  ;;  %v1223_v16 = vld [vmem:[%s11355_s25 + $0x100] sm:$0xff]  ;;  %v1225_v17 = vld [vmem:[%s11355_s25 + $0x110] sm:$0xff] }
  0x18   : > { %1208 = vst [vmem:[%s11360_s26 + $0x40] sm:$0xff] %v1207_v8  ;;  %v1227_v18 = vld [vmem:[%s11355_s25 + $0x120] sm:$0xff]  ;;  %v1229_v19 = vld [vmem:[%s11355_s25 + $0x130] sm:$0xff] }
  0x19   : > { %1210 = vst [vmem:[%s11360_s26 + $0x48] sm:$0xff] %v1209_v9  ;;  %v1231_v20 = vld [vmem:[%s11355_s25 + $0x140] sm:$0xff]  ;;  %v1233_v21 = vld [vmem:[%s11355_s25 + $0x150] sm:$0xff] }
  0x1a   : > { %1212 = vst [vmem:[%s11360_s26 + $0x50] sm:$0xff] %v1211_v10  ;;  %v1235_v22 = vld [vmem:[%s11355_s25 + $0x160] sm:$0xff]  ;;  %v1237_v23 = vld [vmem:[%s11355_s25 + $0x170] sm:$0xff] }
  0x1b   : > { %1214 = vst [vmem:[%s11360_s26 + $0x58] sm:$0xff] %v1213_v11  ;;  %v1239_v24 = vld [vmem:[%s11355_s25 + $0x180] sm:$0xff]  ;;  %v1241_v25 = vld [vmem:[%s11355_s25 + $0x190] sm:$0xff] }
  0x1c   : > { %1216 = vst [vmem:[%s11360_s26 + $0x60] sm:$0xff] %v1215_v12  ;;  %v1243_v26 = vld [vmem:[%s11355_s25 + $0x1a0] sm:$0xff]  ;;  %v1245_v27 = vld [vmem:[%s11355_s25 + $0x1b0] sm:$0xff] }
  0x1d   : > { %1218 = vst [vmem:[%s11360_s26 + $0x68] sm:$0xff] %v1217_v13  ;;  %v1247_v28 = vld [vmem:[%s11355_s25 + $0x1c0] sm:$0xff]  ;;  %v1249_v29 = vld [vmem:[%s11355_s25 + $0x1d0] sm:$0xff] }
  0x1e   : > { %1220 = vst [vmem:[%s11360_s26 + $0x70] sm:$0xff] %v1219_v14  ;;  %v1251_v30 = vld [vmem:[%s11355_s25 + $0x1e0] sm:$0xff]  ;;  %v1253_v31 = vld [vmem:[%s11355_s25 + $0x1f0] sm:$0xff] }
  0x1f   : > { %1222 = vst [vmem:[%s11360_s26 + $0x78] sm:$0xff] %v1221_v15  ;;  %v1255_v32 = vld [vmem:[%s11355_s25 + $0x200] sm:$0xff]  ;;  %v1257_v33 = vld [vmem:[%s11355_s25 + $0x210] sm:$0xff] }
  0x20   : > { %1224 = vst [vmem:[%s11360_s26 + $0x80] sm:$0xff] %v1223_v16  ;;  %v1259_v34 = vld [vmem:[%s11355_s25 + $0x220] sm:$0xff]  ;;  %v1261_v35 = vld [vmem:[%s11355_s25 + $0x230] sm:$0xff] }
  0x21   : > { %1226 = vst [vmem:[%s11360_s26 + $0x88] sm:$0xff] %v1225_v17  ;;  %v1263_v36 = vld [vmem:[%s11355_s25 + $0x240] sm:$0xff]  ;;  %v1265_v37 = vld [vmem:[%s11355_s25 + $0x250] sm:$0xff] }
  0x22   : > { %1228 = vst [vmem:[%s11360_s26 + $0x90] sm:$0xff] %v1227_v18  ;;  %v1267_v38 = vld [vmem:[%s11355_s25 + $0x260] sm:$0xff]  ;;  %v1269_v39 = vld [vmem:[%s11355_s25 + $0x270] sm:$0xff] }
  0x23   : > { %1230 = vst [vmem:[%s11360_s26 + $0x98] sm:$0xff] %v1229_v19  ;;  %v1271_v40 = vld [vmem:[%s11355_s25 + $0x280] sm:$0xff]  ;;  %v1273_v41 = vld [vmem:[%s11355_s25 + $0x290] sm:$0xff] }
  0x24   : > { %1232 = vst [vmem:[%s11360_s26 + $0xa0] sm:$0xff] %v1231_v20  ;;  %v1275_v42 = vld [vmem:[%s11355_s25 + $0x2a0] sm:$0xff]  ;;  %v1277_v43 = vld [vmem:[%s11355_s25 + $0x2b0] sm:$0xff] }
  0x25   : > { %1234 = vst [vmem:[%s11360_s26 + $0xa8] sm:$0xff] %v1233_v21  ;;  %v1279_v44 = vld [vmem:[%s11355_s25 + $0x2c0] sm:$0xff]  ;;  %v1281_v45 = vld [vmem:[%s11355_s25 + $0x2d0] sm:$0xff] }
  0x26   : > { %1236 = vst [vmem:[%s11360_s26 + $0xb0] sm:$0xff] %v1235_v22  ;;  %v1283_v46 = vld [vmem:[%s11355_s25 + $0x2e0] sm:$0xff]  ;;  %v1285_v47 = vld [vmem:[%s11355_s25 + $0x2f0] sm:$0xff] }
  0x27   : > { %1238 = vst [vmem:[%s11360_s26 + $0xb8] sm:$0xff] %v1237_v23  ;;  %v1287_v48 = vld [vmem:[%s11355_s25 + $0x300] sm:$0xff]  ;;  %v1289_v49 = vld [vmem:[%s11355_s25 + $0x310] sm:$0xff] }
  0x28   : > { %1240 = vst [vmem:[%s11360_s26 + $0xc0] sm:$0xff] %v1239_v24  ;;  %v1291_v50 = vld [vmem:[%s11355_s25 + $0x320] sm:$0xff]  ;;  %v1293_v51 = vld [vmem:[%s11355_s25 + $0x330] sm:$0xff] }
  0x29   : > { %1242 = vst [vmem:[%s11360_s26 + $0xc8] sm:$0xff] %v1241_v25  ;;  %v1295_v52 = vld [vmem:[%s11355_s25 + $0x340] sm:$0xff]  ;;  %v1297_v53 = vld [vmem:[%s11355_s25 + $0x350] sm:$0xff] }
  0x2a   : > { %1244 = vst [vmem:[%s11360_s26 + $0xd0] sm:$0xff] %v1243_v26  ;;  %v1299_v54 = vld [vmem:[%s11355_s25 + $0x360] sm:$0xff]  ;;  %v1301_v55 = vld [vmem:[%s11355_s25 + $0x370] sm:$0xff] }
  0x2b   : > { %1246 = vst [vmem:[%s11360_s26 + $0xd8] sm:$0xff] %v1245_v27  ;;  %v1303_v56 = vld [vmem:[%s11355_s25 + $0x380] sm:$0xff]  ;;  %v1305_v57 = vld [vmem:[%s11355_s25 + $0x390] sm:$0xff] }
  0x2c   : > { %1248 = vst [vmem:[%s11360_s26 + $0xe0] sm:$0xff] %v1247_v28  ;;  %v1307_v58 = vld [vmem:[%s11355_s25 + $0x3a0] sm:$0xff]  ;;  %v1309_v59 = vld [vmem:[%s11355_s25 + $0x3b0] sm:$0xff] }
  0x2d   : > { %1250 = vst [vmem:[%s11360_s26 + $0xe8] sm:$0xff] %v1249_v29  ;;  %v1311_v60 = vld [vmem:[%s11355_s25 + $0x3c0] sm:$0xff]  ;;  %v1313_v61 = vld [vmem:[%s11355_s25 + $0x3d0] sm:$0xff] }
  0x2e   : > { %1252 = vst [vmem:[%s11360_s26 + $0xf0] sm:$0xff] %v1251_v30  ;;  %v1315_v62 = vld [vmem:[%s11355_s25 + $0x3e0] sm:$0xff]  ;;  %v1317_v63 = vld [vmem:[%s11355_s25 + $0x3f0] sm:$0xff] }
  0x2f   : > { %1254 = vst [vmem:[%s11360_s26 + $0xf8] sm:$0xff] %v1253_v31  ;;  %v1319_v0 = vld [vmem:[%s11355_s25 + $0x400] sm:$0xff]  ;;  %v1321_v1 = vld [vmem:[%s11355_s25 + $0x410] sm:$0xff] }
  0x30   : > { %1256 = vst [vmem:[%s11360_s26 + $0x100] sm:$0xff] %v1255_v32  ;;  %v1323_v2 = vld [vmem:[%s11355_s25 + $0x420] sm:$0xff]  ;;  %v1325_v3 = vld [vmem:[%s11355_s25 + $0x430] sm:$0xff] }
  0x31   : > { %1258 = vst [vmem:[%s11360_s26 + $0x108] sm:$0xff] %v1257_v33  ;;  %v1327_v4 = vld [vmem:[%s11355_s25 + $0x440] sm:$0xff]  ;;  %v1329_v5 = vld [vmem:[%s11355_s25 + $0x450] sm:$0xff] }
  0x32   : > { %1260 = vst [vmem:[%s11360_s26 + $0x110] sm:$0xff] %v1259_v34  ;;  %v1331_v6 = vld [vmem:[%s11355_s25 + $0x460] sm:$0xff]  ;;  %v1333_v7 = vld [vmem:[%s11355_s25 + $0x470] sm:$0xff] }
  0x33   : > { %1262 = vst [vmem:[%s11360_s26 + $0x118] sm:$0xff] %v1261_v35  ;;  %v1335_v8 = vld [vmem:[%s11355_s25 + $0x480] sm:$0xff]  ;;  %v1337_v9 = vld [vmem:[%s11355_s25 + $0x490] sm:$0xff] }
  0x34   : > { %1264 = vst [vmem:[%s11360_s26 + $0x120] sm:$0xff] %v1263_v36  ;;  %v1339_v10 = vld [vmem:[%s11355_s25 + $0x4a0] sm:$0xff]  ;;  %v1341_v11 = vld [vmem:[%s11355_s25 + $0x4b0] sm:$0xff] }
  0x35   : > { %1266 = vst [vmem:[%s11360_s26 + $0x128] sm:$0xff] %v1265_v37  ;;  %v1343_v12 = vld [vmem:[%s11355_s25 + $0x4c0] sm:$0xff]  ;;  %v1345_v13 = vld [vmem:[%s11355_s25 + $0x4d0] sm:$0xff] }
  0x36   : > { %1268 = vst [vmem:[%s11360_s26 + $0x130] sm:$0xff] %v1267_v38  ;;  %v1347_v14 = vld [vmem:[%s11355_s25 + $0x4e0] sm:$0xff]  ;;  %v1349_v15 = vld [vmem:[%s11355_s25 + $0x4f0] sm:$0xff] }
  0x37   : > { %1270 = vst [vmem:[%s11360_s26 + $0x138] sm:$0xff] %v1269_v39  ;;  %v1351_v16 = vld [vmem:[%s11355_s25 + $0x500] sm:$0xff]  ;;  %v1353_v17 = vld [vmem:[%s11355_s25 + $0x510] sm:$0xff] }
  0x38   : > { %1272 = vst [vmem:[%s11360_s26 + $0x140] sm:$0xff] %v1271_v40  ;;  %v1355_v18 = vld [vmem:[%s11355_s25 + $0x520] sm:$0xff]  ;;  %v1357_v19 = vld [vmem:[%s11355_s25 + $0x530] sm:$0xff] }
  0x39   : > { %1274 = vst [vmem:[%s11360_s26 + $0x148] sm:$0xff] %v1273_v41  ;;  %v1359_v20 = vld [vmem:[%s11355_s25 + $0x540] sm:$0xff]  ;;  %v1361_v21 = vld [vmem:[%s11355_s25 + $0x550] sm:$0xff] }
  0x3a   : > { %1276 = vst [vmem:[%s11360_s26 + $0x150] sm:$0xff] %v1275_v42  ;;  %v1363_v22 = vld [vmem:[%s11355_s25 + $0x560] sm:$0xff]  ;;  %v1365_v23 = vld [vmem:[%s11355_s25 + $0x570] sm:$0xff] }
  0x3b   : > { %1278 = vst [vmem:[%s11360_s26 + $0x158] sm:$0xff] %v1277_v43  ;;  %v1367_v24 = vld [vmem:[%s11355_s25 + $0x580] sm:$0xff]  ;;  %v1369_v25 = vld [vmem:[%s11355_s25 + $0x590] sm:$0xff] }
  0x3c   : > { %1280 = vst [vmem:[%s11360_s26 + $0x160] sm:$0xff] %v1279_v44  ;;  %v1371_v26 = vld [vmem:[%s11355_s25 + $0x5a0] sm:$0xff]  ;;  %v1373_v27 = vld [vmem:[%s11355_s25 + $0x5b0] sm:$0xff] }
  0x3d   : > { %1282 = vst [vmem:[%s11360_s26 + $0x168] sm:$0xff] %v1281_v45  ;;  %v1375_v28 = vld [vmem:[%s11355_s25 + $0x5c0] sm:$0xff]  ;;  %v1377_v29 = vld [vmem:[%s11355_s25 + $0x5d0] sm:$0xff] }
  0x3e   : > { %1284 = vst [vmem:[%s11360_s26 + $0x170] sm:$0xff] %v1283_v46  ;;  %v1379_v30 = vld [vmem:[%s11355_s25 + $0x5e0] sm:$0xff]  ;;  %v1381_v31 = vld [vmem:[%s11355_s25 + $0x5f0] sm:$0xff] }
  0x3f   : > { %1286 = vst [vmem:[%s11360_s26 + $0x178] sm:$0xff] %v1285_v47  ;;  %v1383_v32 = vld [vmem:[%s11355_s25 + $0x600] sm:$0xff]  ;;  %v1385_v33 = vld [vmem:[%s11355_s25 + $0x610] sm:$0xff] }
  0x40   : > { %1288 = vst [vmem:[%s11360_s26 + $0x180] sm:$0xff] %v1287_v48  ;;  %v1387_v34 = vld [vmem:[%s11355_s25 + $0x620] sm:$0xff]  ;;  %v1389_v35 = vld [vmem:[%s11355_s25 + $0x630] sm:$0xff] }
  0x41   : > { %1290 = vst [vmem:[%s11360_s26 + $0x188] sm:$0xff] %v1289_v49  ;;  %v1391_v36 = vld [vmem:[%s11355_s25 + $0x640] sm:$0xff]  ;;  %v1393_v37 = vld [vmem:[%s11355_s25 + $0x650] sm:$0xff] }
  0x42   : > { %1292 = vst [vmem:[%s11360_s26 + $0x190] sm:$0xff] %v1291_v50  ;;  %v1395_v38 = vld [vmem:[%s11355_s25 + $0x660] sm:$0xff]  ;;  %v1397_v39 = vld [vmem:[%s11355_s25 + $0x670] sm:$0xff] }
  0x43   : > { %1294 = vst [vmem:[%s11360_s26 + $0x198] sm:$0xff] %v1293_v51  ;;  %v1399_v40 = vld [vmem:[%s11355_s25 + $0x680] sm:$0xff]  ;;  %v1401_v41 = vld [vmem:[%s11355_s25 + $0x690] sm:$0xff] }
  0x44   : > { %1296 = vst [vmem:[%s11360_s26 + $0x1a0] sm:$0xff] %v1295_v52  ;;  %v1403_v42 = vld [vmem:[%s11355_s25 + $0x6a0] sm:$0xff]  ;;  %v1405_v43 = vld [vmem:[%s11355_s25 + $0x6b0] sm:$0xff] }
  0x45   : > { %1298 = vst [vmem:[%s11360_s26 + $0x1a8] sm:$0xff] %v1297_v53  ;;  %v1407_v44 = vld [vmem:[%s11355_s25 + $0x6c0] sm:$0xff]  ;;  %v1409_v45 = vld [vmem:[%s11355_s25 + $0x6d0] sm:$0xff] }
  0x46   : > { %1300 = vst [vmem:[%s11360_s26 + $0x1b0] sm:$0xff] %v1299_v54  ;;  %v1411_v46 = vld [vmem:[%s11355_s25 + $0x6e0] sm:$0xff]  ;;  %v1413_v47 = vld [vmem:[%s11355_s25 + $0x6f0] sm:$0xff] }
  0x47   : > { %1302 = vst [vmem:[%s11360_s26 + $0x1b8] sm:$0xff] %v1301_v55  ;;  %v1415_v48 = vld [vmem:[%s11355_s25 + $0x700] sm:$0xff]  ;;  %v1417_v49 = vld [vmem:[%s11355_s25 + $0x710] sm:$0xff] }
  0x48   : > { %1304 = vst [vmem:[%s11360_s26 + $0x1c0] sm:$0xff] %v1303_v56  ;;  %v1419_v50 = vld [vmem:[%s11355_s25 + $0x720] sm:$0xff]  ;;  %v1421_v51 = vld [vmem:[%s11355_s25 + $0x730] sm:$0xff] }
  0x49   : > { %1306 = vst [vmem:[%s11360_s26 + $0x1c8] sm:$0xff] %v1305_v57  ;;  %v1423_v52 = vld [vmem:[%s11355_s25 + $0x740] sm:$0xff]  ;;  %v1425_v53 = vld [vmem:[%s11355_s25 + $0x750] sm:$0xff] }
  0x4a   : > { %1308 = vst [vmem:[%s11360_s26 + $0x1d0] sm:$0xff] %v1307_v58  ;;  %v1427_v54 = vld [vmem:[%s11355_s25 + $0x760] sm:$0xff]  ;;  %v1429_v55 = vld [vmem:[%s11355_s25 + $0x770] sm:$0xff] }
  0x4b   : > { %1310 = vst [vmem:[%s11360_s26 + $0x1d8] sm:$0xff] %v1309_v59  ;;  %v1431_v56 = vld [vmem:[%s11355_s25 + $0x780] sm:$0xff]  ;;  %v1433_v57 = vld [vmem:[%s11355_s25 + $0x790] sm:$0xff] }
  0x4c   : > { %1312 = vst [vmem:[%s11360_s26 + $0x1e0] sm:$0xff] %v1311_v60  ;;  %v1435_v58 = vld [vmem:[%s11355_s25 + $0x7a0] sm:$0xff]  ;;  %v1437_v59 = vld [vmem:[%s11355_s25 + $0x7b0] sm:$0xff] }
  0x4d   : > { %1314 = vst [vmem:[%s11360_s26 + $0x1e8] sm:$0xff] %v1313_v61  ;;  %v1439_v60 = vld [vmem:[%s11355_s25 + $0x7c0] sm:$0xff]  ;;  %v1441_v61 = vld [vmem:[%s11355_s25 + $0x7d0] sm:$0xff] }
  0x4e   : > { %1316 = vst [vmem:[%s11360_s26 + $0x1f0] sm:$0xff] %v1315_v62  ;;  %v1443_v62 = vld [vmem:[%s11355_s25 + $0x7e0] sm:$0xff] }
  0x4f   : > { %1318 = vst [vmem:[%s11360_s26 + $0x1f8] sm:$0xff] %v1317_v63  ;;  %v1445_v63 = vld [vmem:[%s11355_s25 + $0x7f0] sm:$0xff] }
  0x50   : > { %1320 = vst [vmem:[%s11360_s26 + $0x200] sm:$0xff] %v1319_v0  ;;  %v1447_v0 = vld [vmem:[%s11355_s25 + $0x800] sm:$0xff] }
  0x51   : > { %1322 = vst [vmem:[%s11360_s26 + $0x208] sm:$0xff] %v1321_v1  ;;  %v1449_v1 = vld [vmem:[%s11355_s25 + $0x810] sm:$0xff] }
  0x52   : > { %1324 = vst [vmem:[%s11360_s26 + $0x210] sm:$0xff] %v1323_v2  ;;  %v1451_v2 = vld [vmem:[%s11355_s25 + $0x820] sm:$0xff] }
  0x53   : > { %1326 = vst [vmem:[%s11360_s26 + $0x218] sm:$0xff] %v1325_v3  ;;  %v1453_v3 = vld [vmem:[%s11355_s25 + $0x830] sm:$0xff] }
  0x54   : > { %1328 = vst [vmem:[%s11360_s26 + $0x220] sm:$0xff] %v1327_v4  ;;  %v1455_v4 = vld [vmem:[%s11355_s25 + $0x840] sm:$0xff] }
  0x55   : > { %1330 = vst [vmem:[%s11360_s26 + $0x228] sm:$0xff] %v1329_v5  ;;  %v1457_v5 = vld [vmem:[%s11355_s25 + $0x850] sm:$0xff] }
  0x56   : > { %1332 = vst [vmem:[%s11360_s26 + $0x230] sm:$0xff] %v1331_v6  ;;  %v1459_v6 = vld [vmem:[%s11355_s25 + $0x860] sm:$0xff] }
  0x57   : > { %1334 = vst [vmem:[%s11360_s26 + $0x238] sm:$0xff] %v1333_v7  ;;  %v1461_v7 = vld [vmem:[%s11355_s25 + $0x870] sm:$0xff] }
  0x58   : > { %1336 = vst [vmem:[%s11360_s26 + $0x240] sm:$0xff] %v1335_v8  ;;  %v1463_v8 = vld [vmem:[%s11355_s25 + $0x880] sm:$0xff] }
  0x59   : > { %1338 = vst [vmem:[%s11360_s26 + $0x248] sm:$0xff] %v1337_v9  ;;  %v1465_v9 = vld [vmem:[%s11355_s25 + $0x890] sm:$0xff] }
  0x5a   : > { %1340 = vst [vmem:[%s11360_s26 + $0x250] sm:$0xff] %v1339_v10  ;;  %v1467_v10 = vld [vmem:[%s11355_s25 + $0x8a0] sm:$0xff] }
  0x5b   : > { %1342 = vst [vmem:[%s11360_s26 + $0x258] sm:$0xff] %v1341_v11  ;;  %v1469_v11 = vld [vmem:[%s11355_s25 + $0x8b0] sm:$0xff] }
  0x5c   : > { %1344 = vst [vmem:[%s11360_s26 + $0x260] sm:$0xff] %v1343_v12  ;;  %v1471_v12 = vld [vmem:[%s11355_s25 + $0x8c0] sm:$0xff] }
  0x5d   : > { %1346 = vst [vmem:[%s11360_s26 + $0x268] sm:$0xff] %v1345_v13  ;;  %v1473_v13 = vld [vmem:[%s11355_s25 + $0x8d0] sm:$0xff] }
  0x5e   : > { %1348 = vst [vmem:[%s11360_s26 + $0x270] sm:$0xff] %v1347_v14  ;;  %v1475_v14 = vld [vmem:[%s11355_s25 + $0x8e0] sm:$0xff] }
  0x5f   : > { %1350 = vst [vmem:[%s11360_s26 + $0x278] sm:$0xff] %v1349_v15  ;;  %v1477_v15 = vld [vmem:[%s11355_s25 + $0x8f0] sm:$0xff] }
  0x60   : > { %1352 = vst [vmem:[%s11360_s26 + $0x280] sm:$0xff] %v1351_v16  ;;  %v1479_v16 = vld [vmem:[%s11355_s25 + $0x900] sm:$0xff] }
  0x61   : > { %1354 = vst [vmem:[%s11360_s26 + $0x288] sm:$0xff] %v1353_v17  ;;  %v1481_v17 = vld [vmem:[%s11355_s25 + $0x910] sm:$0xff] }
  0x62   : > { %1356 = vst [vmem:[%s11360_s26 + $0x290] sm:$0xff] %v1355_v18  ;;  %v1483_v18 = vld [vmem:[%s11355_s25 + $0x920] sm:$0xff] }
  0x63   : > { %1358 = vst [vmem:[%s11360_s26 + $0x298] sm:$0xff] %v1357_v19  ;;  %v1485_v19 = vld [vmem:[%s11355_s25 + $0x930] sm:$0xff] }
  0x64   : > { %1360 = vst [vmem:[%s11360_s26 + $0x2a0] sm:$0xff] %v1359_v20  ;;  %v1487_v20 = vld [vmem:[%s11355_s25 + $0x940] sm:$0xff] }
  0x65   : > { %1362 = vst [vmem:[%s11360_s26 + $0x2a8] sm:$0xff] %v1361_v21  ;;  %v1489_v21 = vld [vmem:[%s11355_s25 + $0x950] sm:$0xff] }
  0x66   : > { %1364 = vst [vmem:[%s11360_s26 + $0x2b0] sm:$0xff] %v1363_v22  ;;  %v1491_v22 = vld [vmem:[%s11355_s25 + $0x960] sm:$0xff] }
  0x67   : > { %1366 = vst [vmem:[%s11360_s26 + $0x2b8] sm:$0xff] %v1365_v23  ;;  %v1493_v23 = vld [vmem:[%s11355_s25 + $0x970] sm:$0xff] }
  0x68   : > { %1368 = vst [vmem:[%s11360_s26 + $0x2c0] sm:$0xff] %v1367_v24  ;;  %v1495_v24 = vld [vmem:[%s11355_s25 + $0x980] sm:$0xff] }
  0x69   : > { %1370 = vst [vmem:[%s11360_s26 + $0x2c8] sm:$0xff] %v1369_v25  ;;  %v1497_v25 = vld [vmem:[%s11355_s25 + $0x990] sm:$0xff] }
  0x6a   : > { %1372 = vst [vmem:[%s11360_s26 + $0x2d0] sm:$0xff] %v1371_v26  ;;  %v1499_v26 = vld [vmem:[%s11355_s25 + $0x9a0] sm:$0xff] }
  0x6b   : > { %1374 = vst [vmem:[%s11360_s26 + $0x2d8] sm:$0xff] %v1373_v27  ;;  %v1501_v27 = vld [vmem:[%s11355_s25 + $0x9b0] sm:$0xff] }
  0x6c   : > { %1376 = vst [vmem:[%s11360_s26 + $0x2e0] sm:$0xff] %v1375_v28  ;;  %v1503_v28 = vld [vmem:[%s11355_s25 + $0x9c0] sm:$0xff] }
  0x6d   : > { %1378 = vst [vmem:[%s11360_s26 + $0x2e8] sm:$0xff] %v1377_v29  ;;  %v1505_v29 = vld [vmem:[%s11355_s25 + $0x9d0] sm:$0xff] }
  0x6e   : > { %1380 = vst [vmem:[%s11360_s26 + $0x2f0] sm:$0xff] %v1379_v30  ;;  %v1507_v30 = vld [vmem:[%s11355_s25 + $0x9e0] sm:$0xff] }
  0x6f   : > { %1382 = vst [vmem:[%s11360_s26 + $0x2f8] sm:$0xff] %v1381_v31  ;;  %v1509_v31 = vld [vmem:[%s11355_s25 + $0x9f0] sm:$0xff] }
  0x70   : > { %1384 = vst [vmem:[%s11360_s26 + $0x300] sm:$0xff] %v1383_v32  ;;  %v1511_v32 = vld [vmem:[%s11355_s25 + $0xa00] sm:$0xff] }
  0x71   : > { %1386 = vst [vmem:[%s11360_s26 + $0x308] sm:$0xff] %v1385_v33  ;;  %v1513_v33 = vld [vmem:[%s11355_s25 + $0xa10] sm:$0xff] }
  0x72   : > { %1388 = vst [vmem:[%s11360_s26 + $0x310] sm:$0xff] %v1387_v34  ;;  %v1515_v34 = vld [vmem:[%s11355_s25 + $0xa20] sm:$0xff] }
  0x73   : > { %1390 = vst [vmem:[%s11360_s26 + $0x318] sm:$0xff] %v1389_v35  ;;  %v1517_v35 = vld [vmem:[%s11355_s25 + $0xa30] sm:$0xff] }
  0x74   : > { %1392 = vst [vmem:[%s11360_s26 + $0x320] sm:$0xff] %v1391_v36  ;;  %v1519_v36 = vld [vmem:[%s11355_s25 + $0xa40] sm:$0xff] }
  0x75   : > { %1394 = vst [vmem:[%s11360_s26 + $0x328] sm:$0xff] %v1393_v37  ;;  %v1521_v37 = vld [vmem:[%s11355_s25 + $0xa50] sm:$0xff] }
  0x76   : > { %1396 = vst [vmem:[%s11360_s26 + $0x330] sm:$0xff] %v1395_v38  ;;  %v1523_v38 = vld [vmem:[%s11355_s25 + $0xa60] sm:$0xff] }
  0x77   : > { %1398 = vst [vmem:[%s11360_s26 + $0x338] sm:$0xff] %v1397_v39  ;;  %v1525_v39 = vld [vmem:[%s11355_s25 + $0xa70] sm:$0xff] }
  0x78   : > { %1400 = vst [vmem:[%s11360_s26 + $0x340] sm:$0xff] %v1399_v40  ;;  %v1527_v40 = vld [vmem:[%s11355_s25 + $0xa80] sm:$0xff] }
  0x79   : > { %1402 = vst [vmem:[%s11360_s26 + $0x348] sm:$0xff] %v1401_v41  ;;  %v1529_v41 = vld [vmem:[%s11355_s25 + $0xa90] sm:$0xff] }
  0x7a   : > { %1404 = vst [vmem:[%s11360_s26 + $0x350] sm:$0xff] %v1403_v42  ;;  %v1531_v42 = vld [vmem:[%s11355_s25 + $0xaa0] sm:$0xff] }
  0x7b   : > { %1406 = vst [vmem:[%s11360_s26 + $0x358] sm:$0xff] %v1405_v43  ;;  %v1533_v43 = vld [vmem:[%s11355_s25 + $0xab0] sm:$0xff] }
  0x7c   : > { %1408 = vst [vmem:[%s11360_s26 + $0x360] sm:$0xff] %v1407_v44  ;;  %v1535_v44 = vld [vmem:[%s11355_s25 + $0xac0] sm:$0xff] }
  0x7d   : > { %1410 = vst [vmem:[%s11360_s26 + $0x368] sm:$0xff] %v1409_v45  ;;  %v1537_v45 = vld [vmem:[%s11355_s25 + $0xad0] sm:$0xff] }
  0x7e   : > { %1412 = vst [vmem:[%s11360_s26 + $0x370] sm:$0xff] %v1411_v46  ;;  %v1539_v46 = vld [vmem:[%s11355_s25 + $0xae0] sm:$0xff] }
  0x7f   : > { %1414 = vst [vmem:[%s11360_s26 + $0x378] sm:$0xff] %v1413_v47  ;;  %v1541_v47 = vld [vmem:[%s11355_s25 + $0xaf0] sm:$0xff] }
  0x80   : > { %1416 = vst [vmem:[%s11360_s26 + $0x380] sm:$0xff] %v1415_v48  ;;  %v1543_v48 = vld [vmem:[%s11355_s25 + $0xb00] sm:$0xff] }
  0x81   : > { %1418 = vst [vmem:[%s11360_s26 + $0x388] sm:$0xff] %v1417_v49  ;;  %v1545_v49 = vld [vmem:[%s11355_s25 + $0xb10] sm:$0xff] }
  0x82   : > { %1420 = vst [vmem:[%s11360_s26 + $0x390] sm:$0xff] %v1419_v50  ;;  %v1547_v50 = vld [vmem:[%s11355_s25 + $0xb20] sm:$0xff] }
  0x83   : > { %1422 = vst [vmem:[%s11360_s26 + $0x398] sm:$0xff] %v1421_v51  ;;  %v1549_v51 = vld [vmem:[%s11355_s25 + $0xb30] sm:$0xff] }
  0x84   : > { %1424 = vst [vmem:[%s11360_s26 + $0x3a0] sm:$0xff] %v1423_v52  ;;  %v1551_v52 = vld [vmem:[%s11355_s25 + $0xb40] sm:$0xff] }
  0x85   : > { %1426 = vst [vmem:[%s11360_s26 + $0x3a8] sm:$0xff] %v1425_v53  ;;  %v1553_v53 = vld [vmem:[%s11355_s25 + $0xb50] sm:$0xff] }
  0x86   : > { %1428 = vst [vmem:[%s11360_s26 + $0x3b0] sm:$0xff] %v1427_v54  ;;  %v1555_v54 = vld [vmem:[%s11355_s25 + $0xb60] sm:$0xff] }
  0x87   : > { %1430 = vst [vmem:[%s11360_s26 + $0x3b8] sm:$0xff] %v1429_v55  ;;  %v1557_v55 = vld [vmem:[%s11355_s25 + $0xb70] sm:$0xff] }
  0x88   : > { %1432 = vst [vmem:[%s11360_s26 + $0x3c0] sm:$0xff] %v1431_v56  ;;  %v1559_v56 = vld [vmem:[%s11355_s25 + $0xb80] sm:$0xff] }
  0x89   : > { %1434 = vst [vmem:[%s11360_s26 + $0x3c8] sm:$0xff] %v1433_v57  ;;  %v1561_v57 = vld [vmem:[%s11355_s25 + $0xb90] sm:$0xff] }
  0x8a   : > { %1436 = vst [vmem:[%s11360_s26 + $0x3d0] sm:$0xff] %v1435_v58  ;;  %v1563_v58 = vld [vmem:[%s11355_s25 + $0xba0] sm:$0xff] }
  0x8b   : > { %1438 = vst [vmem:[%s11360_s26 + $0x3d8] sm:$0xff] %v1437_v59  ;;  %v1565_v59 = vld [vmem:[%s11355_s25 + $0xbb0] sm:$0xff] }
  0x8c   : > { %1440 = vst [vmem:[%s11360_s26 + $0x3e0] sm:$0xff] %v1439_v60  ;;  %v1567_v60 = vld [vmem:[%s11355_s25 + $0xbc0] sm:$0xff] }
  0x8d   : > { %1442 = vst [vmem:[%s11360_s26 + $0x3e8] sm:$0xff] %v1441_v61  ;;  %v1569_v61 = vld [vmem:[%s11355_s25 + $0xbd0] sm:$0xff] }
  0x8e   : > { %1444 = vst [vmem:[%s11360_s26 + $0x3f0] sm:$0xff] %v1443_v62  ;;  %v1571_v62 = vld [vmem:[%s11355_s25 + $0xbe0] sm:$0xff] }
  0x8f   : > { %1446 = vst [vmem:[%s11360_s26 + $0x3f8] sm:$0xff] %v1445_v63  ;;  %v1573_v63 = vld [vmem:[%s11355_s25 + $0xbf0] sm:$0xff] }
  0x90   : > { %1448 = vst [vmem:[%s11360_s26 + $0x400] sm:$0xff] %v1447_v0  ;;  %v1575_v0 = vld [vmem:[%s11355_s25 + $0xc00] sm:$0xff] }
  0x91   : > { %1450 = vst [vmem:[%s11360_s26 + $0x408] sm:$0xff] %v1449_v1  ;;  %v1577_v1 = vld [vmem:[%s11355_s25 + $0xc10] sm:$0xff] }
  0x92   : > { %1452 = vst [vmem:[%s11360_s26 + $0x410] sm:$0xff] %v1451_v2  ;;  %v1579_v2 = vld [vmem:[%s11355_s25 + $0xc20] sm:$0xff] }
  0x93   : > { %1454 = vst [vmem:[%s11360_s26 + $0x418] sm:$0xff] %v1453_v3  ;;  %v1581_v3 = vld [vmem:[%s11355_s25 + $0xc30] sm:$0xff] }
  0x94   : > { %1456 = vst [vmem:[%s11360_s26 + $0x420] sm:$0xff] %v1455_v4  ;;  %v1583_v4 = vld [vmem:[%s11355_s25 + $0xc40] sm:$0xff] }
  0x95   : > { %1458 = vst [vmem:[%s11360_s26 + $0x428] sm:$0xff] %v1457_v5  ;;  %v1585_v5 = vld [vmem:[%s11355_s25 + $0xc50] sm:$0xff] }
  0x96   : > { %1460 = vst [vmem:[%s11360_s26 + $0x430] sm:$0xff] %v1459_v6  ;;  %v1587_v6 = vld [vmem:[%s11355_s25 + $0xc60] sm:$0xff] }
  0x97   : > { %1462 = vst [vmem:[%s11360_s26 + $0x438] sm:$0xff] %v1461_v7  ;;  %v1589_v7 = vld [vmem:[%s11355_s25 + $0xc70] sm:$0xff] }
  0x98   : > { %1464 = vst [vmem:[%s11360_s26 + $0x440] sm:$0xff] %v1463_v8  ;;  %v1591_v8 = vld [vmem:[%s11355_s25 + $0xc80] sm:$0xff] }
  0x99   : > { %1466 = vst [vmem:[%s11360_s26 + $0x448] sm:$0xff] %v1465_v9  ;;  %v1593_v9 = vld [vmem:[%s11355_s25 + $0xc90] sm:$0xff] }
  0x9a   : > { %1468 = vst [vmem:[%s11360_s26 + $0x450] sm:$0xff] %v1467_v10  ;;  %v1595_v10 = vld [vmem:[%s11355_s25 + $0xca0] sm:$0xff] }
  0x9b   : > { %1470 = vst [vmem:[%s11360_s26 + $0x458] sm:$0xff] %v1469_v11  ;;  %v1597_v11 = vld [vmem:[%s11355_s25 + $0xcb0] sm:$0xff] }
  0x9c   : > { %1472 = vst [vmem:[%s11360_s26 + $0x460] sm:$0xff] %v1471_v12  ;;  %v1599_v12 = vld [vmem:[%s11355_s25 + $0xcc0] sm:$0xff] }
  0x9d   : > { %1474 = vst [vmem:[%s11360_s26 + $0x468] sm:$0xff] %v1473_v13  ;;  %v1601_v13 = vld [vmem:[%s11355_s25 + $0xcd0] sm:$0xff] }
  0x9e   : > { %1476 = vst [vmem:[%s11360_s26 + $0x470] sm:$0xff] %v1475_v14  ;;  %v1603_v14 = vld [vmem:[%s11355_s25 + $0xce0] sm:$0xff] }
  0x9f   : > { %1478 = vst [vmem:[%s11360_s26 + $0x478] sm:$0xff] %v1477_v15  ;;  %v1605_v15 = vld [vmem:[%s11355_s25 + $0xcf0] sm:$0xff] }
  0xa0   : > { %1480 = vst [vmem:[%s11360_s26 + $0x480] sm:$0xff] %v1479_v16  ;;  %v1607_v16 = vld [vmem:[%s11355_s25 + $0xd00] sm:$0xff] }
  0xa1   : > { %1482 = vst [vmem:[%s11360_s26 + $0x488] sm:$0xff] %v1481_v17  ;;  %v1609_v17 = vld [vmem:[%s11355_s25 + $0xd10] sm:$0xff] }
  0xa2   : > { %1484 = vst [vmem:[%s11360_s26 + $0x490] sm:$0xff] %v1483_v18  ;;  %v1611_v18 = vld [vmem:[%s11355_s25 + $0xd20] sm:$0xff] }
  0xa3   : > { %1486 = vst [vmem:[%s11360_s26 + $0x498] sm:$0xff] %v1485_v19  ;;  %v1613_v19 = vld [vmem:[%s11355_s25 + $0xd30] sm:$0xff] }
  0xa4   : > { %1488 = vst [vmem:[%s11360_s26 + $0x4a0] sm:$0xff] %v1487_v20  ;;  %v1615_v20 = vld [vmem:[%s11355_s25 + $0xd40] sm:$0xff] }
  0xa5   : > { %1490 = vst [vmem:[%s11360_s26 + $0x4a8] sm:$0xff] %v1489_v21  ;;  %v1617_v21 = vld [vmem:[%s11355_s25 + $0xd50] sm:$0xff] }
  0xa6   : > { %1492 = vst [vmem:[%s11360_s26 + $0x4b0] sm:$0xff] %v1491_v22  ;;  %v1619_v22 = vld [vmem:[%s11355_s25 + $0xd60] sm:$0xff] }
  0xa7   : > { %1494 = vst [vmem:[%s11360_s26 + $0x4b8] sm:$0xff] %v1493_v23  ;;  %v1621_v23 = vld [vmem:[%s11355_s25 + $0xd70] sm:$0xff] }
  0xa8   : > { %1496 = vst [vmem:[%s11360_s26 + $0x4c0] sm:$0xff] %v1495_v24  ;;  %v1623_v24 = vld [vmem:[%s11355_s25 + $0xd80] sm:$0xff] }
  0xa9   : > { %1498 = vst [vmem:[%s11360_s26 + $0x4c8] sm:$0xff] %v1497_v25  ;;  %v1625_v25 = vld [vmem:[%s11355_s25 + $0xd90] sm:$0xff] }
  0xaa   : > { %1500 = vst [vmem:[%s11360_s26 + $0x4d0] sm:$0xff] %v1499_v26  ;;  %v1627_v26 = vld [vmem:[%s11355_s25 + $0xda0] sm:$0xff] }
  0xab   : > { %1502 = vst [vmem:[%s11360_s26 + $0x4d8] sm:$0xff] %v1501_v27  ;;  %v1629_v27 = vld [vmem:[%s11355_s25 + $0xdb0] sm:$0xff] }
  0xac   : > { %1504 = vst [vmem:[%s11360_s26 + $0x4e0] sm:$0xff] %v1503_v28  ;;  %v1631_v28 = vld [vmem:[%s11355_s25 + $0xdc0] sm:$0xff] }
  0xad   : > { %1506 = vst [vmem:[%s11360_s26 + $0x4e8] sm:$0xff] %v1505_v29  ;;  %v1633_v29 = vld [vmem:[%s11355_s25 + $0xdd0] sm:$0xff] }
  0xae   : > { %1508 = vst [vmem:[%s11360_s26 + $0x4f0] sm:$0xff] %v1507_v30  ;;  %v1635_v30 = vld [vmem:[%s11355_s25 + $0xde0] sm:$0xff] }
  0xaf   : > { %1510 = vst [vmem:[%s11360_s26 + $0x4f8] sm:$0xff] %v1509_v31  ;;  %v1637_v31 = vld [vmem:[%s11355_s25 + $0xdf0] sm:$0xff] }
  0xb0   : > { %1512 = vst [vmem:[%s11360_s26 + $0x500] sm:$0xff] %v1511_v32  ;;  %v1639_v32 = vld [vmem:[%s11355_s25 + $0xe00] sm:$0xff] }
  0xb1   : > { %1514 = vst [vmem:[%s11360_s26 + $0x508] sm:$0xff] %v1513_v33  ;;  %v1641_v33 = vld [vmem:[%s11355_s25 + $0xe10] sm:$0xff] }
  0xb2   : > { %1516 = vst [vmem:[%s11360_s26 + $0x510] sm:$0xff] %v1515_v34  ;;  %v1643_v34 = vld [vmem:[%s11355_s25 + $0xe20] sm:$0xff] }
  0xb3   : > { %1518 = vst [vmem:[%s11360_s26 + $0x518] sm:$0xff] %v1517_v35  ;;  %v1645_v35 = vld [vmem:[%s11355_s25 + $0xe30] sm:$0xff] }
  0xb4   : > { %1520 = vst [vmem:[%s11360_s26 + $0x520] sm:$0xff] %v1519_v36  ;;  %v1647_v36 = vld [vmem:[%s11355_s25 + $0xe40] sm:$0xff] }
  0xb5   : > { %1522 = vst [vmem:[%s11360_s26 + $0x528] sm:$0xff] %v1521_v37  ;;  %v1649_v37 = vld [vmem:[%s11355_s25 + $0xe50] sm:$0xff] }
  0xb6   : > { %1524 = vst [vmem:[%s11360_s26 + $0x530] sm:$0xff] %v1523_v38  ;;  %v1651_v38 = vld [vmem:[%s11355_s25 + $0xe60] sm:$0xff] }
  0xb7   : > { %1526 = vst [vmem:[%s11360_s26 + $0x538] sm:$0xff] %v1525_v39  ;;  %v1653_v39 = vld [vmem:[%s11355_s25 + $0xe70] sm:$0xff] }
  0xb8   : > { %1528 = vst [vmem:[%s11360_s26 + $0x540] sm:$0xff] %v1527_v40  ;;  %v1655_v40 = vld [vmem:[%s11355_s25 + $0xe80] sm:$0xff] }
  0xb9   : > { %1530 = vst [vmem:[%s11360_s26 + $0x548] sm:$0xff] %v1529_v41  ;;  %v1657_v41 = vld [vmem:[%s11355_s25 + $0xe90] sm:$0xff] }
  0xba   : > { %1532 = vst [vmem:[%s11360_s26 + $0x550] sm:$0xff] %v1531_v42  ;;  %v1659_v42 = vld [vmem:[%s11355_s25 + $0xea0] sm:$0xff] }
  0xbb   : > { %1534 = vst [vmem:[%s11360_s26 + $0x558] sm:$0xff] %v1533_v43  ;;  %v1661_v43 = vld [vmem:[%s11355_s25 + $0xeb0] sm:$0xff] }
  0xbc   : > { %1536 = vst [vmem:[%s11360_s26 + $0x560] sm:$0xff] %v1535_v44  ;;  %v1663_v44 = vld [vmem:[%s11355_s25 + $0xec0] sm:$0xff] }
  0xbd   : > { %1538 = vst [vmem:[%s11360_s26 + $0x568] sm:$0xff] %v1537_v45  ;;  %v1665_v45 = vld [vmem:[%s11355_s25 + $0xed0] sm:$0xff] }
  0xbe   : > { %1540 = vst [vmem:[%s11360_s26 + $0x570] sm:$0xff] %v1539_v46  ;;  %v1667_v46 = vld [vmem:[%s11355_s25 + $0xee0] sm:$0xff] }
  0xbf   : > { %1542 = vst [vmem:[%s11360_s26 + $0x578] sm:$0xff] %v1541_v47  ;;  %v1669_v47 = vld [vmem:[%s11355_s25 + $0xef0] sm:$0xff] }
  0xc0   : > { %1544 = vst [vmem:[%s11360_s26 + $0x580] sm:$0xff] %v1543_v48  ;;  %v1671_v48 = vld [vmem:[%s11355_s25 + $0xf00] sm:$0xff] }
  0xc1   : > { %1546 = vst [vmem:[%s11360_s26 + $0x588] sm:$0xff] %v1545_v49  ;;  %v1673_v49 = vld [vmem:[%s11355_s25 + $0xf10] sm:$0xff] }
  0xc2   : > { %1548 = vst [vmem:[%s11360_s26 + $0x590] sm:$0xff] %v1547_v50  ;;  %v1675_v50 = vld [vmem:[%s11355_s25 + $0xf20] sm:$0xff] }
  0xc3   : > { %1550 = vst [vmem:[%s11360_s26 + $0x598] sm:$0xff] %v1549_v51  ;;  %v1677_v51 = vld [vmem:[%s11355_s25 + $0xf30] sm:$0xff] }
  0xc4   : > { %1552 = vst [vmem:[%s11360_s26 + $0x5a0] sm:$0xff] %v1551_v52  ;;  %v1679_v52 = vld [vmem:[%s11355_s25 + $0xf40] sm:$0xff] }
  0xc5   : > { %1554 = vst [vmem:[%s11360_s26 + $0x5a8] sm:$0xff] %v1553_v53  ;;  %v1681_v53 = vld [vmem:[%s11355_s25 + $0xf50] sm:$0xff] }
  0xc6   : > { %1556 = vst [vmem:[%s11360_s26 + $0x5b0] sm:$0xff] %v1555_v54  ;;  %v1683_v54 = vld [vmem:[%s11355_s25 + $0xf60] sm:$0xff] }
  0xc7   : > { %1558 = vst [vmem:[%s11360_s26 + $0x5b8] sm:$0xff] %v1557_v55  ;;  %v1685_v55 = vld [vmem:[%s11355_s25 + $0xf70] sm:$0xff] }
  0xc8   : > { %1560 = vst [vmem:[%s11360_s26 + $0x5c0] sm:$0xff] %v1559_v56  ;;  %v1687_v56 = vld [vmem:[%s11355_s25 + $0xf80] sm:$0xff] }
  0xc9   : > { %1562 = vst [vmem:[%s11360_s26 + $0x5c8] sm:$0xff] %v1561_v57  ;;  %v1689_v57 = vld [vmem:[%s11355_s25 + $0xf90] sm:$0xff] }
  0xca   : > { %1564 = vst [vmem:[%s11360_s26 + $0x5d0] sm:$0xff] %v1563_v58  ;;  %v1691_v58 = vld [vmem:[%s11355_s25 + $0xfa0] sm:$0xff] }
  0xcb   : > { %1566 = vst [vmem:[%s11360_s26 + $0x5d8] sm:$0xff] %v1565_v59  ;;  %v1693_v59 = vld [vmem:[%s11355_s25 + $0xfb0] sm:$0xff] }
  0xcc   : > { %1568 = vst [vmem:[%s11360_s26 + $0x5e0] sm:$0xff] %v1567_v60  ;;  %v1695_v60 = vld [vmem:[%s11355_s25 + $0xfc0] sm:$0xff] }
  0xcd   : > { %1570 = vst [vmem:[%s11360_s26 + $0x5e8] sm:$0xff] %v1569_v61  ;;  %v1697_v61 = vld [vmem:[%s11355_s25 + $0xfd0] sm:$0xff] }
  0xce   : > { %1572 = vst [vmem:[%s11360_s26 + $0x5f0] sm:$0xff] %v1571_v62  ;;  %v1699_v62 = vld [vmem:[%s11355_s25 + $0xfe0] sm:$0xff] }
  0xcf   : > { %1574 = vst [vmem:[%s11360_s26 + $0x5f8] sm:$0xff] %v1573_v63  ;;  %v1701_v63 = vld [vmem:[%s11355_s25 + $0xff0] sm:$0xff] }
  0xd0   : > { %1576 = vst [vmem:[%s11360_s26 + $0x600] sm:$0xff] %v1575_v0  ;;  %v1703_v0 = vld [vmem:[%s11355_s25 + $0x1000] sm:$0xff] }
  0xd1   : > { %1578 = vst [vmem:[%s11360_s26 + $0x608] sm:$0xff] %v1577_v1  ;;  %v1705_v1 = vld [vmem:[%s11355_s25 + $0x1010] sm:$0xff] }
  0xd2   : > { %1580 = vst [vmem:[%s11360_s26 + $0x610] sm:$0xff] %v1579_v2  ;;  %v1707_v2 = vld [vmem:[%s11355_s25 + $0x1020] sm:$0xff] }
  0xd3   : > { %1582 = vst [vmem:[%s11360_s26 + $0x618] sm:$0xff] %v1581_v3  ;;  %v1709_v3 = vld [vmem:[%s11355_s25 + $0x1030] sm:$0xff] }
  0xd4   : > { %1584 = vst [vmem:[%s11360_s26 + $0x620] sm:$0xff] %v1583_v4  ;;  %v1711_v4 = vld [vmem:[%s11355_s25 + $0x1040] sm:$0xff] }
  0xd5   : > { %1586 = vst [vmem:[%s11360_s26 + $0x628] sm:$0xff] %v1585_v5  ;;  %v1713_v5 = vld [vmem:[%s11355_s25 + $0x1050] sm:$0xff] }
  0xd6   : > { %1588 = vst [vmem:[%s11360_s26 + $0x630] sm:$0xff] %v1587_v6  ;;  %v1715_v6 = vld [vmem:[%s11355_s25 + $0x1060] sm:$0xff] }
  0xd7   : > { %1590 = vst [vmem:[%s11360_s26 + $0x638] sm:$0xff] %v1589_v7  ;;  %v1717_v7 = vld [vmem:[%s11355_s25 + $0x1070] sm:$0xff] }
  0xd8   : > { %1592 = vst [vmem:[%s11360_s26 + $0x640] sm:$0xff] %v1591_v8  ;;  %v1719_v8 = vld [vmem:[%s11355_s25 + $0x1080] sm:$0xff] }
  0xd9   : > { %1594 = vst [vmem:[%s11360_s26 + $0x648] sm:$0xff] %v1593_v9  ;;  %v1721_v9 = vld [vmem:[%s11355_s25 + $0x1090] sm:$0xff] }
  0xda   : > { %1596 = vst [vmem:[%s11360_s26 + $0x650] sm:$0xff] %v1595_v10  ;;  %v1723_v10 = vld [vmem:[%s11355_s25 + $0x10a0] sm:$0xff] }
  0xdb   : > { %1598 = vst [vmem:[%s11360_s26 + $0x658] sm:$0xff] %v1597_v11  ;;  %v1725_v11 = vld [vmem:[%s11355_s25 + $0x10b0] sm:$0xff] }
  0xdc   : > { %1600 = vst [vmem:[%s11360_s26 + $0x660] sm:$0xff] %v1599_v12  ;;  %v1727_v12 = vld [vmem:[%s11355_s25 + $0x10c0] sm:$0xff] }
  0xdd   : > { %1602 = vst [vmem:[%s11360_s26 + $0x668] sm:$0xff] %v1601_v13  ;;  %v1729_v13 = vld [vmem:[%s11355_s25 + $0x10d0] sm:$0xff] }
  0xde   : > { %1604 = vst [vmem:[%s11360_s26 + $0x670] sm:$0xff] %v1603_v14  ;;  %v1731_v14 = vld [vmem:[%s11355_s25 + $0x10e0] sm:$0xff] }
  0xdf   : > { %1606 = vst [vmem:[%s11360_s26 + $0x678] sm:$0xff] %v1605_v15  ;;  %v1733_v15 = vld [vmem:[%s11355_s25 + $0x10f0] sm:$0xff] }
  0xe0   : > { %1608 = vst [vmem:[%s11360_s26 + $0x680] sm:$0xff] %v1607_v16  ;;  %v1735_v16 = vld [vmem:[%s11355_s25 + $0x1100] sm:$0xff] }
  0xe1   : > { %1610 = vst [vmem:[%s11360_s26 + $0x688] sm:$0xff] %v1609_v17  ;;  %v1737_v17 = vld [vmem:[%s11355_s25 + $0x1110] sm:$0xff] }
  0xe2   : > { %1612 = vst [vmem:[%s11360_s26 + $0x690] sm:$0xff] %v1611_v18  ;;  %v1739_v18 = vld [vmem:[%s11355_s25 + $0x1120] sm:$0xff] }
  0xe3   : > { %1614 = vst [vmem:[%s11360_s26 + $0x698] sm:$0xff] %v1613_v19  ;;  %v1741_v19 = vld [vmem:[%s11355_s25 + $0x1130] sm:$0xff] }
  0xe4   : > { %1616 = vst [vmem:[%s11360_s26 + $0x6a0] sm:$0xff] %v1615_v20  ;;  %v1743_v20 = vld [vmem:[%s11355_s25 + $0x1140] sm:$0xff] }
  0xe5   : > { %1618 = vst [vmem:[%s11360_s26 + $0x6a8] sm:$0xff] %v1617_v21  ;;  %v1745_v21 = vld [vmem:[%s11355_s25 + $0x1150] sm:$0xff] }
  0xe6   : > { %1620 = vst [vmem:[%s11360_s26 + $0x6b0] sm:$0xff] %v1619_v22  ;;  %v1747_v22 = vld [vmem:[%s11355_s25 + $0x1160] sm:$0xff] }
  0xe7   : > { %1622 = vst [vmem:[%s11360_s26 + $0x6b8] sm:$0xff] %v1621_v23  ;;  %v1749_v23 = vld [vmem:[%s11355_s25 + $0x1170] sm:$0xff] }
  0xe8   : > { %1624 = vst [vmem:[%s11360_s26 + $0x6c0] sm:$0xff] %v1623_v24  ;;  %v1751_v24 = vld [vmem:[%s11355_s25 + $0x1180] sm:$0xff] }
  0xe9   : > { %1626 = vst [vmem:[%s11360_s26 + $0x6c8] sm:$0xff] %v1625_v25  ;;  %v1753_v25 = vld [vmem:[%s11355_s25 + $0x1190] sm:$0xff] }
  0xea   : > { %1628 = vst [vmem:[%s11360_s26 + $0x6d0] sm:$0xff] %v1627_v26  ;;  %v1755_v26 = vld [vmem:[%s11355_s25 + $0x11a0] sm:$0xff] }
  0xeb   : > { %1630 = vst [vmem:[%s11360_s26 + $0x6d8] sm:$0xff] %v1629_v27  ;;  %v1757_v27 = vld [vmem:[%s11355_s25 + $0x11b0] sm:$0xff] }
  0xec   : > { %1632 = vst [vmem:[%s11360_s26 + $0x6e0] sm:$0xff] %v1631_v28  ;;  %v1759_v28 = vld [vmem:[%s11355_s25 + $0x11c0] sm:$0xff] }
  0xed   : > { %1634 = vst [vmem:[%s11360_s26 + $0x6e8] sm:$0xff] %v1633_v29  ;;  %v1761_v29 = vld [vmem:[%s11355_s25 + $0x11d0] sm:$0xff] }
  0xee   : > { %1636 = vst [vmem:[%s11360_s26 + $0x6f0] sm:$0xff] %v1635_v30  ;;  %v1763_v30 = vld [vmem:[%s11355_s25 + $0x11e0] sm:$0xff] }
  0xef   : > { %1638 = vst [vmem:[%s11360_s26 + $0x6f8] sm:$0xff] %v1637_v31  ;;  %v1765_v31 = vld [vmem:[%s11355_s25 + $0x11f0] sm:$0xff] }
  0xf0   : > { %1640 = vst [vmem:[%s11360_s26 + $0x700] sm:$0xff] %v1639_v32  ;;  %v1767_v32 = vld [vmem:[%s11355_s25 + $0x1200] sm:$0xff] }
  0xf1   : > { %1642 = vst [vmem:[%s11360_s26 + $0x708] sm:$0xff] %v1641_v33  ;;  %v1769_v33 = vld [vmem:[%s11355_s25 + $0x1210] sm:$0xff] }
  0xf2   : > { %1644 = vst [vmem:[%s11360_s26 + $0x710] sm:$0xff] %v1643_v34  ;;  %v1771_v34 = vld [vmem:[%s11355_s25 + $0x1220] sm:$0xff] }
  0xf3   : > { %1646 = vst [vmem:[%s11360_s26 + $0x718] sm:$0xff] %v1645_v35  ;;  %v1773_v35 = vld [vmem:[%s11355_s25 + $0x1230] sm:$0xff] }
  0xf4   : > { %1648 = vst [vmem:[%s11360_s26 + $0x720] sm:$0xff] %v1647_v36  ;;  %v1775_v36 = vld [vmem:[%s11355_s25 + $0x1240] sm:$0xff] }
  0xf5   : > { %1650 = vst [vmem:[%s11360_s26 + $0x728] sm:$0xff] %v1649_v37  ;;  %v1777_v37 = vld [vmem:[%s11355_s25 + $0x1250] sm:$0xff] }
  0xf6   : > { %1652 = vst [vmem:[%s11360_s26 + $0x730] sm:$0xff] %v1651_v38  ;;  %v1779_v38 = vld [vmem:[%s11355_s25 + $0x1260] sm:$0xff] }
  0xf7   : > { %1654 = vst [vmem:[%s11360_s26 + $0x738] sm:$0xff] %v1653_v39  ;;  %v1781_v39 = vld [vmem:[%s11355_s25 + $0x1270] sm:$0xff] }
  0xf8   : > { %1656 = vst [vmem:[%s11360_s26 + $0x740] sm:$0xff] %v1655_v40  ;;  %v1783_v40 = vld [vmem:[%s11355_s25 + $0x1280] sm:$0xff] }
  0xf9   : > { %1658 = vst [vmem:[%s11360_s26 + $0x748] sm:$0xff] %v1657_v41  ;;  %v1785_v41 = vld [vmem:[%s11355_s25 + $0x1290] sm:$0xff] }
  0xfa   : > { %1660 = vst [vmem:[%s11360_s26 + $0x750] sm:$0xff] %v1659_v42  ;;  %v1787_v42 = vld [vmem:[%s11355_s25 + $0x12a0] sm:$0xff] }
  0xfb   : > { %1662 = vst [vmem:[%s11360_s26 + $0x758] sm:$0xff] %v1661_v43  ;;  %v1789_v43 = vld [vmem:[%s11355_s25 + $0x12b0] sm:$0xff] }
  0xfc   : > { %1664 = vst [vmem:[%s11360_s26 + $0x760] sm:$0xff] %v1663_v44  ;;  %v1791_v44 = vld [vmem:[%s11355_s25 + $0x12c0] sm:$0xff] }
  0xfd   : > { %1666 = vst [vmem:[%s11360_s26 + $0x768] sm:$0xff] %v1665_v45  ;;  %v1793_v45 = vld [vmem:[%s11355_s25 + $0x12d0] sm:$0xff] }
  0xfe   : > { %1668 = vst [vmem:[%s11360_s26 + $0x770] sm:$0xff] %v1667_v46  ;;  %v1795_v46 = vld [vmem:[%s11355_s25 + $0x12e0] sm:$0xff] }
  0xff   : > { %1670 = vst [vmem:[%s11360_s26 + $0x778] sm:$0xff] %v1669_v47  ;;  %v1797_v47 = vld [vmem:[%s11355_s25 + $0x12f0] sm:$0xff] }
 0x100   : > { %1672 = vst [vmem:[%s11360_s26 + $0x780] sm:$0xff] %v1671_v48  ;;  %v1799_v48 = vld [vmem:[%s11355_s25 + $0x1300] sm:$0xff] }
 0x101   : > { %1674 = vst [vmem:[%s11360_s26 + $0x788] sm:$0xff] %v1673_v49  ;;  %v1801_v49 = vld [vmem:[%s11355_s25 + $0x1310] sm:$0xff] }
 0x102   : > { %1676 = vst [vmem:[%s11360_s26 + $0x790] sm:$0xff] %v1675_v50  ;;  %v1803_v50 = vld [vmem:[%s11355_s25 + $0x1320] sm:$0xff] }
 0x103   : > { %1678 = vst [vmem:[%s11360_s26 + $0x798] sm:$0xff] %v1677_v51  ;;  %v1805_v51 = vld [vmem:[%s11355_s25 + $0x1330] sm:$0xff] }
 0x104   : > { %1680 = vst [vmem:[%s11360_s26 + $0x7a0] sm:$0xff] %v1679_v52  ;;  %v1807_v52 = vld [vmem:[%s11355_s25 + $0x1340] sm:$0xff] }
 0x105   : > { %1682 = vst [vmem:[%s11360_s26 + $0x7a8] sm:$0xff] %v1681_v53  ;;  %v1809_v53 = vld [vmem:[%s11355_s25 + $0x1350] sm:$0xff] }
 0x106   : > { %1684 = vst [vmem:[%s11360_s26 + $0x7b0] sm:$0xff] %v1683_v54  ;;  %v1811_v54 = vld [vmem:[%s11355_s25 + $0x1360] sm:$0xff] }
 0x107   : > { %1686 = vst [vmem:[%s11360_s26 + $0x7b8] sm:$0xff] %v1685_v55  ;;  %v1813_v55 = vld [vmem:[%s11355_s25 + $0x1370] sm:$0xff] }
 0x108   : > { %1688 = vst [vmem:[%s11360_s26 + $0x7c0] sm:$0xff] %v1687_v56  ;;  %v1815_v56 = vld [vmem:[%s11355_s25 + $0x1380] sm:$0xff] }
 0x109   : > { %1690 = vst [vmem:[%s11360_s26 + $0x7c8] sm:$0xff] %v1689_v57  ;;  %v1817_v57 = vld [vmem:[%s11355_s25 + $0x1390] sm:$0xff] }
 0x10a   : > { %1692 = vst [vmem:[%s11360_s26 + $0x7d0] sm:$0xff] %v1691_v58  ;;  %v1819_v58 = vld [vmem:[%s11355_s25 + $0x13a0] sm:$0xff] }
 0x10b   : > { %1694 = vst [vmem:[%s11360_s26 + $0x7d8] sm:$0xff] %v1693_v59  ;;  %v1821_v59 = vld [vmem:[%s11355_s25 + $0x13b0] sm:$0xff] }
 0x10c   : > { %1696 = vst [vmem:[%s11360_s26 + $0x7e0] sm:$0xff] %v1695_v60  ;;  %v1823_v60 = vld [vmem:[%s11355_s25 + $0x13c0] sm:$0xff] }
 0x10d   : > { %1698 = vst [vmem:[%s11360_s26 + $0x7e8] sm:$0xff] %v1697_v61  ;;  %v1825_v61 = vld [vmem:[%s11355_s25 + $0x13d0] sm:$0xff] }
 0x10e   : > { %1700 = vst [vmem:[%s11360_s26 + $0x7f0] sm:$0xff] %v1699_v62  ;;  %v1827_v62 = vld [vmem:[%s11355_s25 + $0x13e0] sm:$0xff] }
 0x10f   : > { %1702 = vst [vmem:[%s11360_s26 + $0x7f8] sm:$0xff] %v1701_v63  ;;  %v1829_v63 = vld [vmem:[%s11355_s25 + $0x13f0] sm:$0xff] }
 0x110   : > { %1704 = vst [vmem:[%s11360_s26 + $0x800] sm:$0xff] %v1703_v0  ;;  %v1831_v0 = vld [vmem:[%s11355_s25 + $0x1400] sm:$0xff] }
 0x111   : > { %1706 = vst [vmem:[%s11360_s26 + $0x808] sm:$0xff] %v1705_v1  ;;  %v1833_v1 = vld [vmem:[%s11355_s25 + $0x1410] sm:$0xff] }
 0x112   : > { %1708 = vst [vmem:[%s11360_s26 + $0x810] sm:$0xff] %v1707_v2  ;;  %v1835_v2 = vld [vmem:[%s11355_s25 + $0x1420] sm:$0xff] }
 0x113   : > { %1710 = vst [vmem:[%s11360_s26 + $0x818] sm:$0xff] %v1709_v3  ;;  %v1837_v3 = vld [vmem:[%s11355_s25 + $0x1430] sm:$0xff] }
 0x114   : > { %1712 = vst [vmem:[%s11360_s26 + $0x820] sm:$0xff] %v1711_v4  ;;  %v1839_v4 = vld [vmem:[%s11355_s25 + $0x1440] sm:$0xff] }
 0x115   : > { %1714 = vst [vmem:[%s11360_s26 + $0x828] sm:$0xff] %v1713_v5  ;;  %v1841_v5 = vld [vmem:[%s11355_s25 + $0x1450] sm:$0xff] }
 0x116   : > { %1716 = vst [vmem:[%s11360_s26 + $0x830] sm:$0xff] %v1715_v6  ;;  %v1843_v6 = vld [vmem:[%s11355_s25 + $0x1460] sm:$0xff] }
 0x117   : > { %1718 = vst [vmem:[%s11360_s26 + $0x838] sm:$0xff] %v1717_v7  ;;  %v1845_v7 = vld [vmem:[%s11355_s25 + $0x1470] sm:$0xff] }
 0x118   : > { %1720 = vst [vmem:[%s11360_s26 + $0x840] sm:$0xff] %v1719_v8  ;;  %v1847_v8 = vld [vmem:[%s11355_s25 + $0x1480] sm:$0xff] }
 0x119   : > { %1722 = vst [vmem:[%s11360_s26 + $0x848] sm:$0xff] %v1721_v9  ;;  %v1849_v9 = vld [vmem:[%s11355_s25 + $0x1490] sm:$0xff] }
 0x11a   : > { %1724 = vst [vmem:[%s11360_s26 + $0x850] sm:$0xff] %v1723_v10  ;;  %v1851_v10 = vld [vmem:[%s11355_s25 + $0x14a0] sm:$0xff] }
 0x11b   : > { %1726 = vst [vmem:[%s11360_s26 + $0x858] sm:$0xff] %v1725_v11  ;;  %v1853_v11 = vld [vmem:[%s11355_s25 + $0x14b0] sm:$0xff] }
 0x11c   : > { %1728 = vst [vmem:[%s11360_s26 + $0x860] sm:$0xff] %v1727_v12  ;;  %v1855_v12 = vld [vmem:[%s11355_s25 + $0x14c0] sm:$0xff] }
 0x11d   : > { %1730 = vst [vmem:[%s11360_s26 + $0x868] sm:$0xff] %v1729_v13  ;;  %v1857_v13 = vld [vmem:[%s11355_s25 + $0x14d0] sm:$0xff] }
 0x11e   : > { %1732 = vst [vmem:[%s11360_s26 + $0x870] sm:$0xff] %v1731_v14  ;;  %v1859_v14 = vld [vmem:[%s11355_s25 + $0x14e0] sm:$0xff] }
 0x11f   : > { %1734 = vst [vmem:[%s11360_s26 + $0x878] sm:$0xff] %v1733_v15  ;;  %v1861_v15 = vld [vmem:[%s11355_s25 + $0x14f0] sm:$0xff] }
 0x120   : > { %1736 = vst [vmem:[%s11360_s26 + $0x880] sm:$0xff] %v1735_v16  ;;  %v1863_v16 = vld [vmem:[%s11355_s25 + $0x1500] sm:$0xff] }
 0x121   : > { %1738 = vst [vmem:[%s11360_s26 + $0x888] sm:$0xff] %v1737_v17  ;;  %v1865_v17 = vld [vmem:[%s11355_s25 + $0x1510] sm:$0xff] }
 0x122   : > { %1740 = vst [vmem:[%s11360_s26 + $0x890] sm:$0xff] %v1739_v18  ;;  %v1867_v18 = vld [vmem:[%s11355_s25 + $0x1520] sm:$0xff] }
 0x123   : > { %1742 = vst [vmem:[%s11360_s26 + $0x898] sm:$0xff] %v1741_v19  ;;  %v1869_v19 = vld [vmem:[%s11355_s25 + $0x1530] sm:$0xff] }
 0x124   : > { %1744 = vst [vmem:[%s11360_s26 + $0x8a0] sm:$0xff] %v1743_v20  ;;  %v1871_v20 = vld [vmem:[%s11355_s25 + $0x1540] sm:$0xff] }
 0x125   : > { %1746 = vst [vmem:[%s11360_s26 + $0x8a8] sm:$0xff] %v1745_v21  ;;  %v1873_v21 = vld [vmem:[%s11355_s25 + $0x1550] sm:$0xff] }
 0x126   : > { %1748 = vst [vmem:[%s11360_s26 + $0x8b0] sm:$0xff] %v1747_v22  ;;  %v1875_v22 = vld [vmem:[%s11355_s25 + $0x1560] sm:$0xff] }
 0x127   : > { %1750 = vst [vmem:[%s11360_s26 + $0x8b8] sm:$0xff] %v1749_v23  ;;  %v1877_v23 = vld [vmem:[%s11355_s25 + $0x1570] sm:$0xff] }
 0x128   : > { %1752 = vst [vmem:[%s11360_s26 + $0x8c0] sm:$0xff] %v1751_v24  ;;  %v1879_v24 = vld [vmem:[%s11355_s25 + $0x1580] sm:$0xff] }
 0x129   : > { %1754 = vst [vmem:[%s11360_s26 + $0x8c8] sm:$0xff] %v1753_v25  ;;  %v1881_v25 = vld [vmem:[%s11355_s25 + $0x1590] sm:$0xff] }
 0x12a   : > { %1756 = vst [vmem:[%s11360_s26 + $0x8d0] sm:$0xff] %v1755_v26  ;;  %v1883_v26 = vld [vmem:[%s11355_s25 + $0x15a0] sm:$0xff] }
 0x12b   : > { %1758 = vst [vmem:[%s11360_s26 + $0x8d8] sm:$0xff] %v1757_v27  ;;  %v1885_v27 = vld [vmem:[%s11355_s25 + $0x15b0] sm:$0xff] }
 0x12c   : > { %1760 = vst [vmem:[%s11360_s26 + $0x8e0] sm:$0xff] %v1759_v28  ;;  %v1887_v28 = vld [vmem:[%s11355_s25 + $0x15c0] sm:$0xff] }
 0x12d   : > { %1762 = vst [vmem:[%s11360_s26 + $0x8e8] sm:$0xff] %v1761_v29  ;;  %v1889_v29 = vld [vmem:[%s11355_s25 + $0x15d0] sm:$0xff] }
 0x12e   : > { %1764 = vst [vmem:[%s11360_s26 + $0x8f0] sm:$0xff] %v1763_v30  ;;  %v1891_v30 = vld [vmem:[%s11355_s25 + $0x15e0] sm:$0xff] }
 0x12f   : > { %1766 = vst [vmem:[%s11360_s26 + $0x8f8] sm:$0xff] %v1765_v31  ;;  %v1893_v31 = vld [vmem:[%s11355_s25 + $0x15f0] sm:$0xff] }
 0x130   : > { %1768 = vst [vmem:[%s11360_s26 + $0x900] sm:$0xff] %v1767_v32  ;;  %v1895_v32 = vld [vmem:[%s11355_s25 + $0x1600] sm:$0xff] }
 0x131   : > { %1770 = vst [vmem:[%s11360_s26 + $0x908] sm:$0xff] %v1769_v33  ;;  %v1897_v33 = vld [vmem:[%s11355_s25 + $0x1610] sm:$0xff] }
 0x132   : > { %1772 = vst [vmem:[%s11360_s26 + $0x910] sm:$0xff] %v1771_v34  ;;  %v1899_v34 = vld [vmem:[%s11355_s25 + $0x1620] sm:$0xff] }
 0x133   : > { %1774 = vst [vmem:[%s11360_s26 + $0x918] sm:$0xff] %v1773_v35  ;;  %v1901_v35 = vld [vmem:[%s11355_s25 + $0x1630] sm:$0xff] }
 0x134   : > { %1776 = vst [vmem:[%s11360_s26 + $0x920] sm:$0xff] %v1775_v36  ;;  %v1903_v36 = vld [vmem:[%s11355_s25 + $0x1640] sm:$0xff] }
 0x135   : > { %1778 = vst [vmem:[%s11360_s26 + $0x928] sm:$0xff] %v1777_v37  ;;  %v1905_v37 = vld [vmem:[%s11355_s25 + $0x1650] sm:$0xff] }
 0x136   : > { %1780 = vst [vmem:[%s11360_s26 + $0x930] sm:$0xff] %v1779_v38  ;;  %v1907_v38 = vld [vmem:[%s11355_s25 + $0x1660] sm:$0xff] }
 0x137   : > { %1782 = vst [vmem:[%s11360_s26 + $0x938] sm:$0xff] %v1781_v39  ;;  %v1909_v39 = vld [vmem:[%s11355_s25 + $0x1670] sm:$0xff] }
 0x138   : > { %1784 = vst [vmem:[%s11360_s26 + $0x940] sm:$0xff] %v1783_v40  ;;  %v1911_v40 = vld [vmem:[%s11355_s25 + $0x1680] sm:$0xff] }
 0x139   : > { %1786 = vst [vmem:[%s11360_s26 + $0x948] sm:$0xff] %v1785_v41  ;;  %v1913_v41 = vld [vmem:[%s11355_s25 + $0x1690] sm:$0xff] }
 0x13a   : > { %1788 = vst [vmem:[%s11360_s26 + $0x950] sm:$0xff] %v1787_v42  ;;  %v1915_v42 = vld [vmem:[%s11355_s25 + $0x16a0] sm:$0xff] }
 0x13b   : > { %1790 = vst [vmem:[%s11360_s26 + $0x958] sm:$0xff] %v1789_v43  ;;  %v1917_v43 = vld [vmem:[%s11355_s25 + $0x16b0] sm:$0xff] }
 0x13c   : > { %1792 = vst [vmem:[%s11360_s26 + $0x960] sm:$0xff] %v1791_v44  ;;  %v1919_v44 = vld [vmem:[%s11355_s25 + $0x16c0] sm:$0xff] }
 0x13d   : > { %1794 = vst [vmem:[%s11360_s26 + $0x968] sm:$0xff] %v1793_v45  ;;  %v1921_v45 = vld [vmem:[%s11355_s25 + $0x16d0] sm:$0xff] }
 0x13e   : > { %1796 = vst [vmem:[%s11360_s26 + $0x970] sm:$0xff] %v1795_v46  ;;  %v1923_v46 = vld [vmem:[%s11355_s25 + $0x16e0] sm:$0xff] }
 0x13f   : > { %1798 = vst [vmem:[%s11360_s26 + $0x978] sm:$0xff] %v1797_v47  ;;  %v1925_v47 = vld [vmem:[%s11355_s25 + $0x16f0] sm:$0xff] }
 0x140   : > { %1800 = vst [vmem:[%s11360_s26 + $0x980] sm:$0xff] %v1799_v48  ;;  %v1927_v48 = vld [vmem:[%s11355_s25 + $0x1700] sm:$0xff] }
 0x141   : > { %1802 = vst [vmem:[%s11360_s26 + $0x988] sm:$0xff] %v1801_v49  ;;  %v1929_v49 = vld [vmem:[%s11355_s25 + $0x1710] sm:$0xff] }
 0x142   : > { %1804 = vst [vmem:[%s11360_s26 + $0x990] sm:$0xff] %v1803_v50  ;;  %v1931_v50 = vld [vmem:[%s11355_s25 + $0x1720] sm:$0xff] }
 0x143   : > { %1806 = vst [vmem:[%s11360_s26 + $0x998] sm:$0xff] %v1805_v51  ;;  %v1933_v51 = vld [vmem:[%s11355_s25 + $0x1730] sm:$0xff] }
 0x144   : > { %1808 = vst [vmem:[%s11360_s26 + $0x9a0] sm:$0xff] %v1807_v52  ;;  %v1935_v52 = vld [vmem:[%s11355_s25 + $0x1740] sm:$0xff] }
 0x145   : > { %1810 = vst [vmem:[%s11360_s26 + $0x9a8] sm:$0xff] %v1809_v53  ;;  %v1937_v53 = vld [vmem:[%s11355_s25 + $0x1750] sm:$0xff] }
 0x146   : > { %1812 = vst [vmem:[%s11360_s26 + $0x9b0] sm:$0xff] %v1811_v54  ;;  %v1939_v54 = vld [vmem:[%s11355_s25 + $0x1760] sm:$0xff] }
 0x147   : > { %1814 = vst [vmem:[%s11360_s26 + $0x9b8] sm:$0xff] %v1813_v55  ;;  %v1941_v55 = vld [vmem:[%s11355_s25 + $0x1770] sm:$0xff] }
 0x148   : > { %1816 = vst [vmem:[%s11360_s26 + $0x9c0] sm:$0xff] %v1815_v56  ;;  %v1943_v56 = vld [vmem:[%s11355_s25 + $0x1780] sm:$0xff] }
 0x149   : > { %1818 = vst [vmem:[%s11360_s26 + $0x9c8] sm:$0xff] %v1817_v57  ;;  %v1945_v57 = vld [vmem:[%s11355_s25 + $0x1790] sm:$0xff] }
 0x14a   : > { %1820 = vst [vmem:[%s11360_s26 + $0x9d0] sm:$0xff] %v1819_v58  ;;  %v1947_v58 = vld [vmem:[%s11355_s25 + $0x17a0] sm:$0xff] }
 0x14b   : > { %1822 = vst [vmem:[%s11360_s26 + $0x9d8] sm:$0xff] %v1821_v59  ;;  %v1949_v59 = vld [vmem:[%s11355_s25 + $0x17b0] sm:$0xff] }
 0x14c   : > { %1824 = vst [vmem:[%s11360_s26 + $0x9e0] sm:$0xff] %v1823_v60  ;;  %v1951_v60 = vld [vmem:[%s11355_s25 + $0x17c0] sm:$0xff] }
 0x14d   : > { %1826 = vst [vmem:[%s11360_s26 + $0x9e8] sm:$0xff] %v1825_v61  ;;  %v1953_v61 = vld [vmem:[%s11355_s25 + $0x17d0] sm:$0xff] }
 0x14e   : > { %1828 = vst [vmem:[%s11360_s26 + $0x9f0] sm:$0xff] %v1827_v62  ;;  %v1955_v62 = vld [vmem:[%s11355_s25 + $0x17e0] sm:$0xff] }
 0x14f   : > { %1830 = vst [vmem:[%s11360_s26 + $0x9f8] sm:$0xff] %v1829_v63  ;;  %v1957_v63 = vld [vmem:[%s11355_s25 + $0x17f0] sm:$0xff] }
 0x150   : > { %1832 = vst [vmem:[%s11360_s26 + $0xa00] sm:$0xff] %v1831_v0  ;;  %v1959_v0 = vld [vmem:[%s11355_s25 + $0x1800] sm:$0xff] }
 0x151   : > { %1834 = vst [vmem:[%s11360_s26 + $0xa08] sm:$0xff] %v1833_v1  ;;  %v1961_v1 = vld [vmem:[%s11355_s25 + $0x1810] sm:$0xff] }
 0x152   : > { %1836 = vst [vmem:[%s11360_s26 + $0xa10] sm:$0xff] %v1835_v2  ;;  %v1963_v2 = vld [vmem:[%s11355_s25 + $0x1820] sm:$0xff] }
 0x153   : > { %1838 = vst [vmem:[%s11360_s26 + $0xa18] sm:$0xff] %v1837_v3  ;;  %v1965_v3 = vld [vmem:[%s11355_s25 + $0x1830] sm:$0xff] }
 0x154   : > { %1840 = vst [vmem:[%s11360_s26 + $0xa20] sm:$0xff] %v1839_v4  ;;  %v1967_v4 = vld [vmem:[%s11355_s25 + $0x1840] sm:$0xff] }
 0x155   : > { %1842 = vst [vmem:[%s11360_s26 + $0xa28] sm:$0xff] %v1841_v5  ;;  %v1969_v5 = vld [vmem:[%s11355_s25 + $0x1850] sm:$0xff] }
 0x156   : > { %1844 = vst [vmem:[%s11360_s26 + $0xa30] sm:$0xff] %v1843_v6  ;;  %v1971_v6 = vld [vmem:[%s11355_s25 + $0x1860] sm:$0xff] }
 0x157   : > { %1846 = vst [vmem:[%s11360_s26 + $0xa38] sm:$0xff] %v1845_v7  ;;  %v1973_v7 = vld [vmem:[%s11355_s25 + $0x1870] sm:$0xff] }
 0x158   : > { %1848 = vst [vmem:[%s11360_s26 + $0xa40] sm:$0xff] %v1847_v8  ;;  %v1975_v8 = vld [vmem:[%s11355_s25 + $0x1880] sm:$0xff] }
 0x159   : > { %1850 = vst [vmem:[%s11360_s26 + $0xa48] sm:$0xff] %v1849_v9  ;;  %v1977_v9 = vld [vmem:[%s11355_s25 + $0x1890] sm:$0xff] }
 0x15a   : > { %1852 = vst [vmem:[%s11360_s26 + $0xa50] sm:$0xff] %v1851_v10  ;;  %v1979_v10 = vld [vmem:[%s11355_s25 + $0x18a0] sm:$0xff] }
 0x15b   : > { %1854 = vst [vmem:[%s11360_s26 + $0xa58] sm:$0xff] %v1853_v11  ;;  %v1981_v11 = vld [vmem:[%s11355_s25 + $0x18b0] sm:$0xff] }
 0x15c   : > { %1856 = vst [vmem:[%s11360_s26 + $0xa60] sm:$0xff] %v1855_v12  ;;  %v1983_v12 = vld [vmem:[%s11355_s25 + $0x18c0] sm:$0xff] }
 0x15d   : > { %1858 = vst [vmem:[%s11360_s26 + $0xa68] sm:$0xff] %v1857_v13  ;;  %v1985_v13 = vld [vmem:[%s11355_s25 + $0x18d0] sm:$0xff] }
 0x15e   : > { %1860 = vst [vmem:[%s11360_s26 + $0xa70] sm:$0xff] %v1859_v14  ;;  %v1987_v14 = vld [vmem:[%s11355_s25 + $0x18e0] sm:$0xff] }
 0x15f   : > { %1862 = vst [vmem:[%s11360_s26 + $0xa78] sm:$0xff] %v1861_v15  ;;  %v1989_v15 = vld [vmem:[%s11355_s25 + $0x18f0] sm:$0xff] }
 0x160   : > { %1864 = vst [vmem:[%s11360_s26 + $0xa80] sm:$0xff] %v1863_v16  ;;  %v1991_v16 = vld [vmem:[%s11355_s25 + $0x1900] sm:$0xff] }
 0x161   : > { %1866 = vst [vmem:[%s11360_s26 + $0xa88] sm:$0xff] %v1865_v17  ;;  %v1993_v17 = vld [vmem:[%s11355_s25 + $0x1910] sm:$0xff] }
 0x162   : > { %1868 = vst [vmem:[%s11360_s26 + $0xa90] sm:$0xff] %v1867_v18  ;;  %v1995_v18 = vld [vmem:[%s11355_s25 + $0x1920] sm:$0xff] }
 0x163   : > { %1870 = vst [vmem:[%s11360_s26 + $0xa98] sm:$0xff] %v1869_v19  ;;  %v1997_v19 = vld [vmem:[%s11355_s25 + $0x1930] sm:$0xff] }
 0x164   : > { %1872 = vst [vmem:[%s11360_s26 + $0xaa0] sm:$0xff] %v1871_v20  ;;  %v1999_v20 = vld [vmem:[%s11355_s25 + $0x1940] sm:$0xff] }
 0x165   : > { %1874 = vst [vmem:[%s11360_s26 + $0xaa8] sm:$0xff] %v1873_v21  ;;  %v2001_v21 = vld [vmem:[%s11355_s25 + $0x1950] sm:$0xff] }
 0x166   : > { %1876 = vst [vmem:[%s11360_s26 + $0xab0] sm:$0xff] %v1875_v22  ;;  %v2003_v22 = vld [vmem:[%s11355_s25 + $0x1960] sm:$0xff] }
 0x167   : > { %1878 = vst [vmem:[%s11360_s26 + $0xab8] sm:$0xff] %v1877_v23  ;;  %v2005_v23 = vld [vmem:[%s11355_s25 + $0x1970] sm:$0xff] }
 0x168   : > { %1880 = vst [vmem:[%s11360_s26 + $0xac0] sm:$0xff] %v1879_v24  ;;  %v2007_v24 = vld [vmem:[%s11355_s25 + $0x1980] sm:$0xff] }
 0x169   : > { %1882 = vst [vmem:[%s11360_s26 + $0xac8] sm:$0xff] %v1881_v25  ;;  %v2009_v25 = vld [vmem:[%s11355_s25 + $0x1990] sm:$0xff] }
 0x16a   : > { %1884 = vst [vmem:[%s11360_s26 + $0xad0] sm:$0xff] %v1883_v26  ;;  %v2011_v26 = vld [vmem:[%s11355_s25 + $0x19a0] sm:$0xff] }
 0x16b   : > { %1886 = vst [vmem:[%s11360_s26 + $0xad8] sm:$0xff] %v1885_v27  ;;  %v2013_v27 = vld [vmem:[%s11355_s25 + $0x19b0] sm:$0xff] }
 0x16c   : > { %1888 = vst [vmem:[%s11360_s26 + $0xae0] sm:$0xff] %v1887_v28  ;;  %v2015_v28 = vld [vmem:[%s11355_s25 + $0x19c0] sm:$0xff] }
 0x16d   : > { %1890 = vst [vmem:[%s11360_s26 + $0xae8] sm:$0xff] %v1889_v29  ;;  %v2017_v29 = vld [vmem:[%s11355_s25 + $0x19d0] sm:$0xff] }
 0x16e   : > { %1892 = vst [vmem:[%s11360_s26 + $0xaf0] sm:$0xff] %v1891_v30  ;;  %v2019_v30 = vld [vmem:[%s11355_s25 + $0x19e0] sm:$0xff] }
 0x16f   : > { %1894 = vst [vmem:[%s11360_s26 + $0xaf8] sm:$0xff] %v1893_v31  ;;  %v2021_v31 = vld [vmem:[%s11355_s25 + $0x19f0] sm:$0xff] }
 0x170   : > { %1896 = vst [vmem:[%s11360_s26 + $0xb00] sm:$0xff] %v1895_v32  ;;  %v2023_v32 = vld [vmem:[%s11355_s25 + $0x1a00] sm:$0xff] }
 0x171   : > { %1898 = vst [vmem:[%s11360_s26 + $0xb08] sm:$0xff] %v1897_v33  ;;  %v2025_v33 = vld [vmem:[%s11355_s25 + $0x1a10] sm:$0xff] }
 0x172   : > { %1900 = vst [vmem:[%s11360_s26 + $0xb10] sm:$0xff] %v1899_v34  ;;  %v2027_v34 = vld [vmem:[%s11355_s25 + $0x1a20] sm:$0xff] }
 0x173   : > { %1902 = vst [vmem:[%s11360_s26 + $0xb18] sm:$0xff] %v1901_v35  ;;  %v2029_v35 = vld [vmem:[%s11355_s25 + $0x1a30] sm:$0xff] }
 0x174   : > { %1904 = vst [vmem:[%s11360_s26 + $0xb20] sm:$0xff] %v1903_v36  ;;  %v2031_v36 = vld [vmem:[%s11355_s25 + $0x1a40] sm:$0xff] }
 0x175   : > { %1906 = vst [vmem:[%s11360_s26 + $0xb28] sm:$0xff] %v1905_v37  ;;  %v2033_v37 = vld [vmem:[%s11355_s25 + $0x1a50] sm:$0xff] }
 0x176   : > { %1908 = vst [vmem:[%s11360_s26 + $0xb30] sm:$0xff] %v1907_v38  ;;  %v2035_v38 = vld [vmem:[%s11355_s25 + $0x1a60] sm:$0xff] }
 0x177   : > { %1910 = vst [vmem:[%s11360_s26 + $0xb38] sm:$0xff] %v1909_v39  ;;  %v2037_v39 = vld [vmem:[%s11355_s25 + $0x1a70] sm:$0xff] }
 0x178   : > { %1912 = vst [vmem:[%s11360_s26 + $0xb40] sm:$0xff] %v1911_v40  ;;  %v2039_v40 = vld [vmem:[%s11355_s25 + $0x1a80] sm:$0xff] }
 0x179   : > { %1914 = vst [vmem:[%s11360_s26 + $0xb48] sm:$0xff] %v1913_v41  ;;  %v2041_v41 = vld [vmem:[%s11355_s25 + $0x1a90] sm:$0xff] }
 0x17a   : > { %1916 = vst [vmem:[%s11360_s26 + $0xb50] sm:$0xff] %v1915_v42  ;;  %v2043_v42 = vld [vmem:[%s11355_s25 + $0x1aa0] sm:$0xff] }
 0x17b   : > { %1918 = vst [vmem:[%s11360_s26 + $0xb58] sm:$0xff] %v1917_v43  ;;  %v2045_v43 = vld [vmem:[%s11355_s25 + $0x1ab0] sm:$0xff] }
 0x17c   : > { %1920 = vst [vmem:[%s11360_s26 + $0xb60] sm:$0xff] %v1919_v44  ;;  %v2047_v44 = vld [vmem:[%s11355_s25 + $0x1ac0] sm:$0xff] }
 0x17d   : > { %1922 = vst [vmem:[%s11360_s26 + $0xb68] sm:$0xff] %v1921_v45  ;;  %v2049_v45 = vld [vmem:[%s11355_s25 + $0x1ad0] sm:$0xff] }
 0x17e   : > { %1924 = vst [vmem:[%s11360_s26 + $0xb70] sm:$0xff] %v1923_v46  ;;  %v2051_v46 = vld [vmem:[%s11355_s25 + $0x1ae0] sm:$0xff] }
 0x17f   : > { %1926 = vst [vmem:[%s11360_s26 + $0xb78] sm:$0xff] %v1925_v47  ;;  %v2053_v47 = vld [vmem:[%s11355_s25 + $0x1af0] sm:$0xff] }
 0x180   : > { %1928 = vst [vmem:[%s11360_s26 + $0xb80] sm:$0xff] %v1927_v48  ;;  %v2055_v48 = vld [vmem:[%s11355_s25 + $0x1b00] sm:$0xff] }
 0x181   : > { %1930 = vst [vmem:[%s11360_s26 + $0xb88] sm:$0xff] %v1929_v49  ;;  %v2057_v49 = vld [vmem:[%s11355_s25 + $0x1b10] sm:$0xff] }
 0x182   : > { %1932 = vst [vmem:[%s11360_s26 + $0xb90] sm:$0xff] %v1931_v50  ;;  %v2059_v50 = vld [vmem:[%s11355_s25 + $0x1b20] sm:$0xff] }
 0x183   : > { %1934 = vst [vmem:[%s11360_s26 + $0xb98] sm:$0xff] %v1933_v51  ;;  %v2061_v51 = vld [vmem:[%s11355_s25 + $0x1b30] sm:$0xff] }
 0x184   : > { %1936 = vst [vmem:[%s11360_s26 + $0xba0] sm:$0xff] %v1935_v52  ;;  %v2063_v52 = vld [vmem:[%s11355_s25 + $0x1b40] sm:$0xff] }
 0x185   : > { %1938 = vst [vmem:[%s11360_s26 + $0xba8] sm:$0xff] %v1937_v53  ;;  %v2065_v53 = vld [vmem:[%s11355_s25 + $0x1b50] sm:$0xff] }
 0x186   : > { %1940 = vst [vmem:[%s11360_s26 + $0xbb0] sm:$0xff] %v1939_v54  ;;  %v2067_v54 = vld [vmem:[%s11355_s25 + $0x1b60] sm:$0xff] }
 0x187   : > { %1942 = vst [vmem:[%s11360_s26 + $0xbb8] sm:$0xff] %v1941_v55  ;;  %v2069_v55 = vld [vmem:[%s11355_s25 + $0x1b70] sm:$0xff] }
 0x188   : > { %1944 = vst [vmem:[%s11360_s26 + $0xbc0] sm:$0xff] %v1943_v56  ;;  %v2071_v56 = vld [vmem:[%s11355_s25 + $0x1b80] sm:$0xff] }
 0x189   : > { %1946 = vst [vmem:[%s11360_s26 + $0xbc8] sm:$0xff] %v1945_v57  ;;  %v2073_v57 = vld [vmem:[%s11355_s25 + $0x1b90] sm:$0xff] }
 0x18a   : > { %1948 = vst [vmem:[%s11360_s26 + $0xbd0] sm:$0xff] %v1947_v58  ;;  %v2075_v58 = vld [vmem:[%s11355_s25 + $0x1ba0] sm:$0xff] }
 0x18b   : > { %1950 = vst [vmem:[%s11360_s26 + $0xbd8] sm:$0xff] %v1949_v59  ;;  %v2077_v59 = vld [vmem:[%s11355_s25 + $0x1bb0] sm:$0xff] }
 0x18c   : > { %1952 = vst [vmem:[%s11360_s26 + $0xbe0] sm:$0xff] %v1951_v60  ;;  %v2079_v60 = vld [vmem:[%s11355_s25 + $0x1bc0] sm:$0xff] }
 0x18d   : > { %1954 = vst [vmem:[%s11360_s26 + $0xbe8] sm:$0xff] %v1953_v61  ;;  %v2081_v61 = vld [vmem:[%s11355_s25 + $0x1bd0] sm:$0xff] }
 0x18e   : > { %1956 = vst [vmem:[%s11360_s26 + $0xbf0] sm:$0xff] %v1955_v62  ;;  %v2083_v62 = vld [vmem:[%s11355_s25 + $0x1be0] sm:$0xff] }
 0x18f   : > { %1958 = vst [vmem:[%s11360_s26 + $0xbf8] sm:$0xff] %v1957_v63  ;;  %v2085_v63 = vld [vmem:[%s11355_s25 + $0x1bf0] sm:$0xff] }
 0x190   : > { %1960 = vst [vmem:[%s11360_s26 + $0xc00] sm:$0xff] %v1959_v0  ;;  %v2087_v0 = vld [vmem:[%s11355_s25 + $0x1c00] sm:$0xff] }
 0x191   : > { %1962 = vst [vmem:[%s11360_s26 + $0xc08] sm:$0xff] %v1961_v1  ;;  %v2089_v1 = vld [vmem:[%s11355_s25 + $0x1c10] sm:$0xff] }
 0x192   : > { %1964 = vst [vmem:[%s11360_s26 + $0xc10] sm:$0xff] %v1963_v2  ;;  %v2091_v2 = vld [vmem:[%s11355_s25 + $0x1c20] sm:$0xff] }
 0x193   : > { %1966 = vst [vmem:[%s11360_s26 + $0xc18] sm:$0xff] %v1965_v3  ;;  %v2093_v3 = vld [vmem:[%s11355_s25 + $0x1c30] sm:$0xff] }
 0x194   : > { %1968 = vst [vmem:[%s11360_s26 + $0xc20] sm:$0xff] %v1967_v4  ;;  %v2095_v4 = vld [vmem:[%s11355_s25 + $0x1c40] sm:$0xff] }
 0x195   : > { %1970 = vst [vmem:[%s11360_s26 + $0xc28] sm:$0xff] %v1969_v5  ;;  %v2097_v5 = vld [vmem:[%s11355_s25 + $0x1c50] sm:$0xff] }
 0x196   : > { %1972 = vst [vmem:[%s11360_s26 + $0xc30] sm:$0xff] %v1971_v6  ;;  %v2099_v6 = vld [vmem:[%s11355_s25 + $0x1c60] sm:$0xff] }
 0x197   : > { %1974 = vst [vmem:[%s11360_s26 + $0xc38] sm:$0xff] %v1973_v7  ;;  %v2101_v7 = vld [vmem:[%s11355_s25 + $0x1c70] sm:$0xff] }
 0x198   : > { %1976 = vst [vmem:[%s11360_s26 + $0xc40] sm:$0xff] %v1975_v8  ;;  %v2103_v8 = vld [vmem:[%s11355_s25 + $0x1c80] sm:$0xff] }
 0x199   : > { %1978 = vst [vmem:[%s11360_s26 + $0xc48] sm:$0xff] %v1977_v9  ;;  %v2105_v9 = vld [vmem:[%s11355_s25 + $0x1c90] sm:$0xff] }
 0x19a   : > { %1980 = vst [vmem:[%s11360_s26 + $0xc50] sm:$0xff] %v1979_v10  ;;  %v2107_v10 = vld [vmem:[%s11355_s25 + $0x1ca0] sm:$0xff] }
 0x19b   : > { %1982 = vst [vmem:[%s11360_s26 + $0xc58] sm:$0xff] %v1981_v11  ;;  %v2109_v11 = vld [vmem:[%s11355_s25 + $0x1cb0] sm:$0xff] }
 0x19c   : > { %1984 = vst [vmem:[%s11360_s26 + $0xc60] sm:$0xff] %v1983_v12  ;;  %v2111_v12 = vld [vmem:[%s11355_s25 + $0x1cc0] sm:$0xff] }
 0x19d   : > { %1986 = vst [vmem:[%s11360_s26 + $0xc68] sm:$0xff] %v1985_v13  ;;  %v2113_v13 = vld [vmem:[%s11355_s25 + $0x1cd0] sm:$0xff] }
 0x19e   : > { %1988 = vst [vmem:[%s11360_s26 + $0xc70] sm:$0xff] %v1987_v14  ;;  %v2115_v14 = vld [vmem:[%s11355_s25 + $0x1ce0] sm:$0xff] }
 0x19f   : > { %1990 = vst [vmem:[%s11360_s26 + $0xc78] sm:$0xff] %v1989_v15  ;;  %v2117_v15 = vld [vmem:[%s11355_s25 + $0x1cf0] sm:$0xff] }
 0x1a0   : > { %1992 = vst [vmem:[%s11360_s26 + $0xc80] sm:$0xff] %v1991_v16  ;;  %v2119_v16 = vld [vmem:[%s11355_s25 + $0x1d00] sm:$0xff] }
 0x1a1   : > { %1994 = vst [vmem:[%s11360_s26 + $0xc88] sm:$0xff] %v1993_v17  ;;  %v2121_v17 = vld [vmem:[%s11355_s25 + $0x1d10] sm:$0xff] }
 0x1a2   : > { %1996 = vst [vmem:[%s11360_s26 + $0xc90] sm:$0xff] %v1995_v18  ;;  %v2123_v18 = vld [vmem:[%s11355_s25 + $0x1d20] sm:$0xff] }
 0x1a3   : > { %1998 = vst [vmem:[%s11360_s26 + $0xc98] sm:$0xff] %v1997_v19  ;;  %v2125_v19 = vld [vmem:[%s11355_s25 + $0x1d30] sm:$0xff] }
 0x1a4   : > { %2000 = vst [vmem:[%s11360_s26 + $0xca0] sm:$0xff] %v1999_v20  ;;  %v2127_v20 = vld [vmem:[%s11355_s25 + $0x1d40] sm:$0xff] }
 0x1a5   : > { %2002 = vst [vmem:[%s11360_s26 + $0xca8] sm:$0xff] %v2001_v21  ;;  %v2129_v21 = vld [vmem:[%s11355_s25 + $0x1d50] sm:$0xff] }
 0x1a6   : > { %2004 = vst [vmem:[%s11360_s26 + $0xcb0] sm:$0xff] %v2003_v22  ;;  %v2131_v22 = vld [vmem:[%s11355_s25 + $0x1d60] sm:$0xff] }
 0x1a7   : > { %2006 = vst [vmem:[%s11360_s26 + $0xcb8] sm:$0xff] %v2005_v23  ;;  %v2133_v23 = vld [vmem:[%s11355_s25 + $0x1d70] sm:$0xff] }
 0x1a8   : > { %2008 = vst [vmem:[%s11360_s26 + $0xcc0] sm:$0xff] %v2007_v24  ;;  %v2135_v24 = vld [vmem:[%s11355_s25 + $0x1d80] sm:$0xff] }
 0x1a9   : > { %2010 = vst [vmem:[%s11360_s26 + $0xcc8] sm:$0xff] %v2009_v25  ;;  %v2137_v25 = vld [vmem:[%s11355_s25 + $0x1d90] sm:$0xff] }
 0x1aa   : > { %2012 = vst [vmem:[%s11360_s26 + $0xcd0] sm:$0xff] %v2011_v26  ;;  %v2139_v26 = vld [vmem:[%s11355_s25 + $0x1da0] sm:$0xff] }
 0x1ab   : > { %2014 = vst [vmem:[%s11360_s26 + $0xcd8] sm:$0xff] %v2013_v27  ;;  %v2141_v27 = vld [vmem:[%s11355_s25 + $0x1db0] sm:$0xff] }
 0x1ac   : > { %2016 = vst [vmem:[%s11360_s26 + $0xce0] sm:$0xff] %v2015_v28  ;;  %v2143_v28 = vld [vmem:[%s11355_s25 + $0x1dc0] sm:$0xff] }
 0x1ad   : > { %2018 = vst [vmem:[%s11360_s26 + $0xce8] sm:$0xff] %v2017_v29  ;;  %v2145_v29 = vld [vmem:[%s11355_s25 + $0x1dd0] sm:$0xff] }
 0x1ae   : > { %2020 = vst [vmem:[%s11360_s26 + $0xcf0] sm:$0xff] %v2019_v30  ;;  %v2147_v30 = vld [vmem:[%s11355_s25 + $0x1de0] sm:$0xff] }
 0x1af   : > { %2022 = vst [vmem:[%s11360_s26 + $0xcf8] sm:$0xff] %v2021_v31  ;;  %v2149_v31 = vld [vmem:[%s11355_s25 + $0x1df0] sm:$0xff] }
 0x1b0   : > { %2024 = vst [vmem:[%s11360_s26 + $0xd00] sm:$0xff] %v2023_v32  ;;  %v2151_v32 = vld [vmem:[%s11355_s25 + $0x1e00] sm:$0xff] }
 0x1b1   : > { %2026 = vst [vmem:[%s11360_s26 + $0xd08] sm:$0xff] %v2025_v33  ;;  %v2153_v33 = vld [vmem:[%s11355_s25 + $0x1e10] sm:$0xff] }
 0x1b2   : > { %2028 = vst [vmem:[%s11360_s26 + $0xd10] sm:$0xff] %v2027_v34  ;;  %v2155_v34 = vld [vmem:[%s11355_s25 + $0x1e20] sm:$0xff] }
 0x1b3   : > { %2030 = vst [vmem:[%s11360_s26 + $0xd18] sm:$0xff] %v2029_v35  ;;  %v2157_v35 = vld [vmem:[%s11355_s25 + $0x1e30] sm:$0xff] }
 0x1b4   : > { %2032 = vst [vmem:[%s11360_s26 + $0xd20] sm:$0xff] %v2031_v36  ;;  %v2159_v36 = vld [vmem:[%s11355_s25 + $0x1e40] sm:$0xff] }
 0x1b5   : > { %2034 = vst [vmem:[%s11360_s26 + $0xd28] sm:$0xff] %v2033_v37  ;;  %v2161_v37 = vld [vmem:[%s11355_s25 + $0x1e50] sm:$0xff] }
 0x1b6   : > { %2036 = vst [vmem:[%s11360_s26 + $0xd30] sm:$0xff] %v2035_v38  ;;  %v2163_v38 = vld [vmem:[%s11355_s25 + $0x1e60] sm:$0xff] }
 0x1b7   : > { %2038 = vst [vmem:[%s11360_s26 + $0xd38] sm:$0xff] %v2037_v39  ;;  %v2165_v39 = vld [vmem:[%s11355_s25 + $0x1e70] sm:$0xff] }
 0x1b8   : > { %2040 = vst [vmem:[%s11360_s26 + $0xd40] sm:$0xff] %v2039_v40  ;;  %v2167_v40 = vld [vmem:[%s11355_s25 + $0x1e80] sm:$0xff] }
 0x1b9   : > { %2042 = vst [vmem:[%s11360_s26 + $0xd48] sm:$0xff] %v2041_v41  ;;  %v2169_v41 = vld [vmem:[%s11355_s25 + $0x1e90] sm:$0xff] }
 0x1ba   : > { %2044 = vst [vmem:[%s11360_s26 + $0xd50] sm:$0xff] %v2043_v42  ;;  %v2171_v42 = vld [vmem:[%s11355_s25 + $0x1ea0] sm:$0xff] }
 0x1bb   : > { %2046 = vst [vmem:[%s11360_s26 + $0xd58] sm:$0xff] %v2045_v43  ;;  %v2173_v43 = vld [vmem:[%s11355_s25 + $0x1eb0] sm:$0xff] }
 0x1bc   : > { %2048 = vst [vmem:[%s11360_s26 + $0xd60] sm:$0xff] %v2047_v44  ;;  %v2175_v44 = vld [vmem:[%s11355_s25 + $0x1ec0] sm:$0xff] }
 0x1bd   : > { %2050 = vst [vmem:[%s11360_s26 + $0xd68] sm:$0xff] %v2049_v45  ;;  %v2177_v45 = vld [vmem:[%s11355_s25 + $0x1ed0] sm:$0xff] }
 0x1be   : > { %2052 = vst [vmem:[%s11360_s26 + $0xd70] sm:$0xff] %v2051_v46  ;;  %v2179_v46 = vld [vmem:[%s11355_s25 + $0x1ee0] sm:$0xff] }
 0x1bf   : > { %2054 = vst [vmem:[%s11360_s26 + $0xd78] sm:$0xff] %v2053_v47  ;;  %v2181_v47 = vld [vmem:[%s11355_s25 + $0x1ef0] sm:$0xff] }
 0x1c0   : > { %2056 = vst [vmem:[%s11360_s26 + $0xd80] sm:$0xff] %v2055_v48  ;;  %v2183_v48 = vld [vmem:[%s11355_s25 + $0x1f00] sm:$0xff] }
 0x1c1   : > { %2058 = vst [vmem:[%s11360_s26 + $0xd88] sm:$0xff] %v2057_v49  ;;  %v2185_v49 = vld [vmem:[%s11355_s25 + $0x1f10] sm:$0xff] }
 0x1c2   : > { %2060 = vst [vmem:[%s11360_s26 + $0xd90] sm:$0xff] %v2059_v50  ;;  %v2187_v50 = vld [vmem:[%s11355_s25 + $0x1f20] sm:$0xff] }
 0x1c3   : > { %2062 = vst [vmem:[%s11360_s26 + $0xd98] sm:$0xff] %v2061_v51  ;;  %v2189_v51 = vld [vmem:[%s11355_s25 + $0x1f30] sm:$0xff] }
 0x1c4   : > { %2064 = vst [vmem:[%s11360_s26 + $0xda0] sm:$0xff] %v2063_v52  ;;  %v2191_v52 = vld [vmem:[%s11355_s25 + $0x1f40] sm:$0xff] }
 0x1c5   : > { %2066 = vst [vmem:[%s11360_s26 + $0xda8] sm:$0xff] %v2065_v53  ;;  %v2193_v53 = vld [vmem:[%s11355_s25 + $0x1f50] sm:$0xff] }
 0x1c6   : > { %2068 = vst [vmem:[%s11360_s26 + $0xdb0] sm:$0xff] %v2067_v54  ;;  %v2195_v54 = vld [vmem:[%s11355_s25 + $0x1f60] sm:$0xff] }
 0x1c7   : > { %2070 = vst [vmem:[%s11360_s26 + $0xdb8] sm:$0xff] %v2069_v55  ;;  %v2197_v55 = vld [vmem:[%s11355_s25 + $0x1f70] sm:$0xff] }
 0x1c8   : > { %2072 = vst [vmem:[%s11360_s26 + $0xdc0] sm:$0xff] %v2071_v56  ;;  %v2199_v56 = vld [vmem:[%s11355_s25 + $0x1f80] sm:$0xff] }
 0x1c9   : > { %2074 = vst [vmem:[%s11360_s26 + $0xdc8] sm:$0xff] %v2073_v57  ;;  %v2201_v57 = vld [vmem:[%s11355_s25 + $0x1f90] sm:$0xff] }
 0x1ca   : > { %2076 = vst [vmem:[%s11360_s26 + $0xdd0] sm:$0xff] %v2075_v58  ;;  %v2203_v58 = vld [vmem:[%s11355_s25 + $0x1fa0] sm:$0xff] }
 0x1cb   : > { %2078 = vst [vmem:[%s11360_s26 + $0xdd8] sm:$0xff] %v2077_v59  ;;  %v2205_v59 = vld [vmem:[%s11355_s25 + $0x1fb0] sm:$0xff] }
 0x1cc   : > { %2080 = vst [vmem:[%s11360_s26 + $0xde0] sm:$0xff] %v2079_v60  ;;  %v2207_v60 = vld [vmem:[%s11355_s25 + $0x1fc0] sm:$0xff] }
 0x1cd   : > { %2082 = vst [vmem:[%s11360_s26 + $0xde8] sm:$0xff] %v2081_v61  ;;  %v2209_v61 = vld [vmem:[%s11355_s25 + $0x1fd0] sm:$0xff] }
 0x1ce   : > { %2084 = vst [vmem:[%s11360_s26 + $0xdf0] sm:$0xff] %v2083_v62  ;;  %v2211_v62 = vld [vmem:[%s11355_s25 + $0x1fe0] sm:$0xff] }
 0x1cf   : > { %2086 = vst [vmem:[%s11360_s26 + $0xdf8] sm:$0xff] %v2085_v63  ;;  %v2213_v63 = vld [vmem:[%s11355_s25 + $0x1ff0] sm:$0xff] }
 0x1d0   : > { %2088 = vst [vmem:[%s11360_s26 + $0xe00] sm:$0xff] %v2087_v0 }
 0x1d1   : > { %2090 = vst [vmem:[%s11360_s26 + $0xe08] sm:$0xff] %v2089_v1 }
 0x1d2   : > { %2092 = vst [vmem:[%s11360_s26 + $0xe10] sm:$0xff] %v2091_v2 }
 0x1d3   : > { %2094 = vst [vmem:[%s11360_s26 + $0xe18] sm:$0xff] %v2093_v3 }
 0x1d4   : > { %2096 = vst [vmem:[%s11360_s26 + $0xe20] sm:$0xff] %v2095_v4 }
 0x1d5   : > { %2098 = vst [vmem:[%s11360_s26 + $0xe28] sm:$0xff] %v2097_v5 }
 0x1d6   : > { %2100 = vst [vmem:[%s11360_s26 + $0xe30] sm:$0xff] %v2099_v6 }
 0x1d7   : > { %2102 = vst [vmem:[%s11360_s26 + $0xe38] sm:$0xff] %v2101_v7 }
 0x1d8   : > { %2104 = vst [vmem:[%s11360_s26 + $0xe40] sm:$0xff] %v2103_v8 }
 0x1d9   : > { %2106 = vst [vmem:[%s11360_s26 + $0xe48] sm:$0xff] %v2105_v9 }
 0x1da   : > { %2108 = vst [vmem:[%s11360_s26 + $0xe50] sm:$0xff] %v2107_v10 }
 0x1db   : > { %2110 = vst [vmem:[%s11360_s26 + $0xe58] sm:$0xff] %v2109_v11 }
 0x1dc   : > { %2112 = vst [vmem:[%s11360_s26 + $0xe60] sm:$0xff] %v2111_v12 }
 0x1dd   : > { %2114 = vst [vmem:[%s11360_s26 + $0xe68] sm:$0xff] %v2113_v13 }
 0x1de   : > { %2116 = vst [vmem:[%s11360_s26 + $0xe70] sm:$0xff] %v2115_v14 }
 0x1df   : > { %2118 = vst [vmem:[%s11360_s26 + $0xe78] sm:$0xff] %v2117_v15 }
 0x1e0   : > { %2120 = vst [vmem:[%s11360_s26 + $0xe80] sm:$0xff] %v2119_v16 }
 0x1e1   : > { %2122 = vst [vmem:[%s11360_s26 + $0xe88] sm:$0xff] %v2121_v17 }
 0x1e2   : > { %2124 = vst [vmem:[%s11360_s26 + $0xe90] sm:$0xff] %v2123_v18 }
 0x1e3   : > { %2126 = vst [vmem:[%s11360_s26 + $0xe98] sm:$0xff] %v2125_v19 }
 0x1e4   : > { %2128 = vst [vmem:[%s11360_s26 + $0xea0] sm:$0xff] %v2127_v20 }
 0x1e5   : > { %2130 = vst [vmem:[%s11360_s26 + $0xea8] sm:$0xff] %v2129_v21 }
 0x1e6   : > { %2132 = vst [vmem:[%s11360_s26 + $0xeb0] sm:$0xff] %v2131_v22 }
 0x1e7   : > { %2134 = vst [vmem:[%s11360_s26 + $0xeb8] sm:$0xff] %v2133_v23 }
 0x1e8   : > { %2136 = vst [vmem:[%s11360_s26 + $0xec0] sm:$0xff] %v2135_v24 }
 0x1e9   : > { %2138 = vst [vmem:[%s11360_s26 + $0xec8] sm:$0xff] %v2137_v25 }
 0x1ea   : > { %2140 = vst [vmem:[%s11360_s26 + $0xed0] sm:$0xff] %v2139_v26 }
 0x1eb   : > { %2142 = vst [vmem:[%s11360_s26 + $0xed8] sm:$0xff] %v2141_v27 }
 0x1ec   : > { %2144 = vst [vmem:[%s11360_s26 + $0xee0] sm:$0xff] %v2143_v28 }
 0x1ed   : > { %2146 = vst [vmem:[%s11360_s26 + $0xee8] sm:$0xff] %v2145_v29 }
 0x1ee   : > { %2148 = vst [vmem:[%s11360_s26 + $0xef0] sm:$0xff] %v2147_v30 }
 0x1ef   : > { %2150 = vst [vmem:[%s11360_s26 + $0xef8] sm:$0xff] %v2149_v31 }
 0x1f0   : > { %2152 = vst [vmem:[%s11360_s26 + $0xf00] sm:$0xff] %v2151_v32 }
 0x1f1   : > { %2154 = vst [vmem:[%s11360_s26 + $0xf08] sm:$0xff] %v2153_v33 }
 0x1f2   : > { %2156 = vst [vmem:[%s11360_s26 + $0xf10] sm:$0xff] %v2155_v34 }
 0x1f3   : > { %2158 = vst [vmem:[%s11360_s26 + $0xf18] sm:$0xff] %v2157_v35 }
 0x1f4   : > { %2160 = vst [vmem:[%s11360_s26 + $0xf20] sm:$0xff] %v2159_v36 }
 0x1f5   : > { %2162 = vst [vmem:[%s11360_s26 + $0xf28] sm:$0xff] %v2161_v37 }
 0x1f6   : > { %2164 = vst [vmem:[%s11360_s26 + $0xf30] sm:$0xff] %v2163_v38 }
 0x1f7   : > { %2166 = vst [vmem:[%s11360_s26 + $0xf38] sm:$0xff] %v2165_v39 }
 0x1f8   : > { %2168 = vst [vmem:[%s11360_s26 + $0xf40] sm:$0xff] %v2167_v40 }
 0x1f9   : > { %2170 = vst [vmem:[%s11360_s26 + $0xf48] sm:$0xff] %v2169_v41 }
 0x1fa   : > { %2172 = vst [vmem:[%s11360_s26 + $0xf50] sm:$0xff] %v2171_v42 }
 0x1fb   : > { %2174 = vst [vmem:[%s11360_s26 + $0xf58] sm:$0xff] %v2173_v43 }
 0x1fc   : > { %2176 = vst [vmem:[%s11360_s26 + $0xf60] sm:$0xff] %v2175_v44 }
 0x1fd   : > { %2178 = vst [vmem:[%s11360_s26 + $0xf68] sm:$0xff] %v2177_v45 }
 0x1fe   : > { %2180 = vst [vmem:[%s11360_s26 + $0xf70] sm:$0xff] %v2179_v46 }
 0x1ff   : > { %2182 = vst [vmem:[%s11360_s26 + $0xf78] sm:$0xff] %v2181_v47 }
 0x200   : > { %2184 = vst [vmem:[%s11360_s26 + $0xf80] sm:$0xff] %v2183_v48 }
 0x201   : > { %2186 = vst [vmem:[%s11360_s26 + $0xf88] sm:$0xff] %v2185_v49 }
 0x202   : > { %2188 = vst [vmem:[%s11360_s26 + $0xf90] sm:$0xff] %v2187_v50 }
 0x203   : > { %2190 = vst [vmem:[%s11360_s26 + $0xf98] sm:$0xff] %v2189_v51 }
 0x204   : > { %2192 = vst [vmem:[%s11360_s26 + $0xfa0] sm:$0xff] %v2191_v52 }
 0x205   : > { %2194 = vst [vmem:[%s11360_s26 + $0xfa8] sm:$0xff] %v2193_v53 }
 0x206   : > { %2196 = vst [vmem:[%s11360_s26 + $0xfb0] sm:$0xff] %v2195_v54 }
 0x207   : > { %2198 = vst [vmem:[%s11360_s26 + $0xfb8] sm:$0xff] %v2197_v55 }
 0x208   : > { %2200 = vst [vmem:[%s11360_s26 + $0xfc0] sm:$0xff] %v2199_v56 }
 0x209   : > { %2202 = vst [vmem:[%s11360_s26 + $0xfc8] sm:$0xff] %v2201_v57 }
 0x20a   : > { %2204 = vst [vmem:[%s11360_s26 + $0xfd0] sm:$0xff] %v2203_v58 }
 0x20b   : > { %2206 = vst [vmem:[%s11360_s26 + $0xfd8] sm:$0xff] %v2205_v59 }
 0x20c   : > { %2208 = vst [vmem:[%s11360_s26 + $0xfe0] sm:$0xff] %v2207_v60 }
 0x20d   : > { %2210 = vst [vmem:[%s11360_s26 + $0xfe8] sm:$0xff] %v2209_v61 }
 0x20e   : > { %2212 = vst [vmem:[%s11360_s26 + $0xff0] sm:$0xff] %v2211_v62 }
 0x20f   : > { %2214 = vst [vmem:[%s11360_s26 + $0xff8] sm:$0xff] %v2213_v63 }
 0x210 PF: > { %p8672_p5 = scmp.ge.s32.totalorder %s11298_s14, 1  ;;  %p4310_p6 = scmp.lt.s32.totalorder %s11298_s14, 3 }
 0x212   : > { %p4311_p7 = pnand %p8672_p5, %p4310_p6 }
 0x213   : > { %s4317_s27 = sand.u32 (!%p4311_p7), 1, %s11290_s12  }
 0x214   : > { %4314 = sbr.rel (%p4311_p7) target bundleno = 1289 (0x509), region = 80  ;;  %s8673_s28 = sshll.u32 (!%p4311_p7), %s4317_s27, 12 }
 0x215   : > { %s12386_s29 = scalar_lea.vmem (!%p4311_p7), [#allocation2], %s8673_s28  ;;  %s12796_s28 = sshll.u32 (!%p4311_p7), %s8665_s15, 1 }
 0x216   : > { %p4346_p8 = scmp.lt.s32.totalorder (!%p4311_p7), %s12796_s28, 3 }
 0x219   : > { %v8735_v0 = vld [vmem:[%s12386_s29 + $0x70] sm:$0xf]  ;;  %v10743_v1 = vld [vmem:[%s12386_s29 + $0x74] sm:$0xf0]  ;;  %v8727_v11 = vld [vmem:[%s12386_s29 + $0x60] sm:$0xf] }
 0x21a   : > { %v8799_v2 = vld [vmem:[%s12386_s29 + $0xf0] sm:$0xf]  ;;  %v8736_v3 = vor.u32 %v10743_v1, %v8735_v0  ;;  %v10759_v4 = vld [vmem:[%s12386_s29 + $0xf4] sm:$0xf0]  ;;  %v10741_v13 = vld [vmem:[%s12386_s29 + $0x64] sm:$0xf0] }
 0x21b   : > { %v8863_v5 = vld [vmem:[%s12386_s29 + $0x170] sm:$0xf]  ;;  %v10775_v6 = vld [vmem:[%s12386_s29 + $0x174] sm:$0xf0]  ;;  %v8800_v7 = vor.u32 %v10759_v4, %v8799_v2  ;;  %v8791_v14 = vld [vmem:[%s12386_s29 + $0xe0] sm:$0xf]  ;;  %v8728_v16 = vor.u32 %v10741_v13, %v8727_v11 }
 0x21c   : > { %v8864_v8 = vor.u32 %v10775_v6, %v8863_v5  ;;  %v8927_v9 = vld [vmem:[%s12386_s29 + $0x1f0] sm:$0xf]  ;;  %v10791_v10 = vld [vmem:[%s12386_s29 + $0x1f4] sm:$0xf0]  ;;  %7562 = vmatpush.bf16.msra.mxu0 %v8736_v3  ;;  %v10757_v15 = vld [vmem:[%s12386_s29 + $0xe4] sm:$0xf0] }
 0x21d   : > { %v8928_v12 = vor.u32 %v10791_v10, %v8927_v9  ;;  %7575 = vmatpush.bf16.msra.mxu1 %v8800_v7  ;;  %v8792_v17 = vor.u32 %v10757_v15, %v8791_v14  ;;  %v8855_v18 = vld [vmem:[%s12386_s29 + $0x160] sm:$0xf]  ;;  %v10773_v19 = vld [vmem:[%s12386_s29 + $0x164] sm:$0xf0]  ;;  %v8719_v23 = vld [vmem:[%s12386_s29 + $0x50] sm:$0xf] }
 0x21e   : > { %7588 = vmatpush.bf16.msra.mxu2 %v8864_v8  ;;  %v8919_v20 = vld [vmem:[%s12386_s29 + $0x1e0] sm:$0xf]  ;;  %v8856_v21 = vor.u32 %v10773_v19, %v8855_v18  ;;  %v10789_v22 = vld [vmem:[%s12386_s29 + $0x1e4] sm:$0xf0]  ;;  %v10739_v24 = vld [vmem:[%s12386_s29 + $0x54] sm:$0xf0] }
 0x21f   : > { %7601 = vmatpush.bf16.msra.mxu3 %v8928_v12  ;;  %v8920_v25 = vor.u32 %v10789_v22, %v8919_v20  ;;  %v8783_v26 = vld [vmem:[%s12386_s29 + $0xd0] sm:$0xf]  ;;  %v10755_v27 = vld [vmem:[%s12386_s29 + $0xd4] sm:$0xf0]  ;;  %v8720_v29 = vor.u32 %v10739_v24, %v8719_v23  ;;  %v8711_v35 = vld [vmem:[%s12386_s29 + $0x40] sm:$0xf] }
 0x220   : > { %v8847_v28 = vld [vmem:[%s12386_s29 + $0x150] sm:$0xf]  ;;  %7563 = vmatpush.bf16.msra.mxu0 %v8728_v16  ;;  %v10771_v30 = vld [vmem:[%s12386_s29 + $0x154] sm:$0xf0]  ;;  %v8784_v33 = vor.u32 %v10755_v27, %v8783_v26  ;;  %v10737_v36 = vld [vmem:[%s12386_s29 + $0x44] sm:$0xf0] }
 0x221   : > { %v8911_v31 = vld [vmem:[%s12386_s29 + $0x1d0] sm:$0xf]  ;;  %v10787_v32 = vld [vmem:[%s12386_s29 + $0x1d4] sm:$0xf0]  ;;  %7576 = vmatpush.bf16.msra.mxu1 %v8792_v17  ;;  %v8848_v34 = vor.u32 %v10771_v30, %v8847_v28  ;;  %v8775_v37 = vld [vmem:[%s12386_s29 + $0xc0] sm:$0xf]  ;;  %v8712_v44 = vor.u32 %v10737_v36, %v8711_v35 }
 0x222   : > { %7589 = vmatpush.bf16.msra.mxu2 %v8856_v21  ;;  %v8912_v38 = vor.u32 %v10787_v32, %v8911_v31  ;;  %v10753_v39 = vld [vmem:[%s12386_s29 + $0xc4] sm:$0xf0]  ;;  %v8839_v40 = vld [vmem:[%s12386_s29 + $0x140] sm:$0xf]  ;;  %v8703_v47 = vld [vmem:[%s12386_s29 + $0x30] sm:$0xf] }
 0x223   : > { %7602 = vmatpush.bf16.msra.mxu3 %v8920_v25  ;;  %v10769_v41 = vld [vmem:[%s12386_s29 + $0x144] sm:$0xf0]  ;;  %v8903_v42 = vld [vmem:[%s12386_s29 + $0x1c0] sm:$0xf]  ;;  %v8776_v45 = vor.u32 %v10753_v39, %v8775_v37  ;;  %v10735_v48 = vld [vmem:[%s12386_s29 + $0x34] sm:$0xf0] }
 0x224   : > { %v10785_v43 = vld [vmem:[%s12386_s29 + $0x1c4] sm:$0xf0]  ;;  %7564 = vmatpush.bf16.msra.mxu0 %v8720_v29  ;;  %v8840_v46 = vor.u32 %v10769_v41, %v8839_v40  ;;  %v8767_v49 = vld [vmem:[%s12386_s29 + $0xb0] sm:$0xf]  ;;  %v10751_v51 = vld [vmem:[%s12386_s29 + $0xb4] sm:$0xf0]  ;;  %v8704_v56 = vor.u32 %v10735_v48, %v8703_v47 }
 0x225   : > { %7577 = vmatpush.bf16.msra.mxu1 %v8784_v33  ;;  %v8904_v50 = vor.u32 %v10785_v43, %v8903_v42  ;;  %v8831_v52 = vld [vmem:[%s12386_s29 + $0x130] sm:$0xf]  ;;  %v10767_v53 = vld [vmem:[%s12386_s29 + $0x134] sm:$0xf0]  ;;  %v8768_v57 = vor.u32 %v10751_v51, %v8767_v49  ;;  %v8695_v59 = vld [vmem:[%s12386_s29 + $0x20] sm:$0xf] }
 0x226   : > { %7590 = vmatpush.bf16.msra.mxu2 %v8848_v34  ;;  %v8895_v54 = vld [vmem:[%s12386_s29 + $0x1b0] sm:$0xf]  ;;  %v10783_v55 = vld [vmem:[%s12386_s29 + $0x1b4] sm:$0xf0]  ;;  %v8832_v58 = vor.u32 %v10767_v53, %v8831_v52  ;;  %v10733_v60 = vld [vmem:[%s12386_s29 + $0x24] sm:$0xf0] }
 0x227   : > { %7603 = vmatpush.bf16.msra.mxu3 %v8912_v38  ;;  %v8759_v61 = vld [vmem:[%s12386_s29 + $0xa0] sm:$0xf]  ;;  %v8896_v62 = vor.u32 %v10783_v55, %v8895_v54  ;;  %v10749_v63 = vld [vmem:[%s12386_s29 + $0xa4] sm:$0xf0]  ;;  %v8696_v4 = vor.u32 %v10733_v60, %v8695_v59  ;;  %v8687_v7 = vld [vmem:[%s12386_s29 + $0x10] sm:$0xf] }
 0x228   : > { %7565 = vmatpush.bf16.msra.mxu0 %v8712_v44  ;;  %v8823_v0 = vld [vmem:[%s12386_s29 + $0x120] sm:$0xf]  ;;  %v10765_v1 = vld [vmem:[%s12386_s29 + $0x124] sm:$0xf0]  ;;  %v8760_v5 = vor.u32 %v10749_v63, %v8759_v61  ;;  %v10731_v8 = vld [vmem:[%s12386_s29 + $0x14] sm:$0xf0] }
 0x229   : > { %7578 = vmatpush.bf16.msra.mxu1 %v8776_v45  ;;  %v8887_v2 = vld [vmem:[%s12386_s29 + $0x1a0] sm:$0xf]  ;;  %v10781_v3 = vld [vmem:[%s12386_s29 + $0x1a4] sm:$0xf0]  ;;  %v8824_v6 = vor.u32 %v10765_v1, %v8823_v0  ;;  %v8751_v9 = vld [vmem:[%s12386_s29 + $0x90] sm:$0xf]  ;;  %v8688_v16 = vor.u32 %v10731_v8, %v8687_v7 }
 0x22a   : > { %7591 = vmatpush.bf16.msra.mxu2 %v8840_v46  ;;  %v8888_v10 = vor.u32 %v10781_v3, %v8887_v2  ;;  %v10747_v11 = vld [vmem:[%s12386_s29 + $0x94] sm:$0xf0]  ;;  %v8815_v12 = vld [vmem:[%s12386_s29 + $0x110] sm:$0xf]  ;;  %v8679_v17 = vld [vmem:[%s12386_s29] sm:$0xf] }
 0x22b   : > { %7604 = vmatpush.bf16.msra.mxu3 %v8904_v50  ;;  %v10763_v13 = vld [vmem:[%s12386_s29 + $0x114] sm:$0xf0]  ;;  %v8879_v14 = vld [vmem:[%s12386_s29 + $0x190] sm:$0xf]  ;;  %v10729_v18 = vld [vmem:[%s12386_s29 + $0x4] sm:$0xf0]  ;;  %v8752_v19 = vor.u32 %v10747_v11, %v8751_v9 }
 0x22c   : > { %7566 = vmatpush.bf16.msra.mxu0 %v8704_v56  ;;  %v10779_v15 = vld [vmem:[%s12386_s29 + $0x194] sm:$0xf0]  ;;  %v8816_v20 = vor.u32 %v10763_v13, %v8815_v12  ;;  %v8743_v21 = vld [vmem:[%s12386_s29 + $0x80] sm:$0xf]  ;;  %v10745_v22 = vld [vmem:[%s12386_s29 + $0x84] sm:$0xf0]  ;;  %v8680_v31 = vor.u32 %v10729_v18, %v8679_v17 }
 0x22d   : > { %7579 = vmatpush.bf16.msra.mxu1 %v8768_v57  ;;  %v8807_v23 = vld [vmem:[%s12386_s29 + $0x100] sm:$0xf]  ;;  %v8880_v24 = vor.u32 %v10779_v15, %v8879_v14  ;;  %v10761_v25 = vld [vmem:[%s12386_s29 + $0x104] sm:$0xf0]  ;;  %v8991_v28 = vld [vmem:[%s12386_s29 + $0x270] sm:$0xf]  ;;  %v8744_v35 = vor.u32 %v10745_v22, %v8743_v21 }
 0x22e   : > { %7592 = vmatpush.bf16.msra.mxu2 %v8832_v58  ;;  %v8871_v26 = vld [vmem:[%s12386_s29 + $0x180] sm:$0xf]  ;;  %v10777_v27 = vld [vmem:[%s12386_s29 + $0x184] sm:$0xf0]  ;;  %v10807_v29 = vld [vmem:[%s12386_s29 + $0x274] sm:$0xf0]  ;;  %v8808_v36 = vor.u32 %v10761_v25, %v8807_v23 }
 0x22f   : > { %7605 = vmatpush.bf16.msra.mxu3 %v8896_v62  ;;  %v9055_v30 = vld [vmem:[%s12386_s29 + $0x2f0] sm:$0xf]  ;;  %v10823_v32 = vld [vmem:[%s12386_s29 + $0x2f4] sm:$0xf0]  ;;  %v8872_v39 = vor.u32 %v10777_v27, %v8871_v26  ;;  %v8992_v40 = vor.u32 %v10807_v29, %v8991_v28  ;;  %v8983_v43 = vld [vmem:[%s12386_s29 + $0x260] sm:$0xf] }
 0x230   : > { %7567 = vmatpush.bf16.msra.mxu0 %v8696_v4  ;;  %v9119_v33 = vld [vmem:[%s12386_s29 + $0x370] sm:$0xf]  ;;  %v10839_v34 = vld [vmem:[%s12386_s29 + $0x374] sm:$0xf0]  ;;  %v9056_v41 = vor.u32 %v10823_v32, %v9055_v30  ;;  %v10805_v44 = vld [vmem:[%s12386_s29 + $0x264] sm:$0xf0] }
 0x231   : > { %7580 = vmatpush.bf16.msra.mxu1 %v8760_v5  ;;  %v9183_v37 = vld [vmem:[%s12386_s29 + $0x3f0] sm:$0xf]  ;;  %v10855_v38 = vld [vmem:[%s12386_s29 + $0x3f4] sm:$0xf0]  ;;  %v9120_v42 = vor.u32 %v10839_v34, %v9119_v33  ;;  %v9047_v45 = vld [vmem:[%s12386_s29 + $0x2e0] sm:$0xf]  ;;  %v8984_v52 = vor.u32 %v10805_v44, %v8983_v43 }
 0x232   : > { %7593 = vmatpush.bf16.msra.mxu2 %v8824_v6  ;;  %v9184_v46 = vor.u32 %v10855_v38, %v9183_v37  ;;  %v10821_v47 = vld [vmem:[%s12386_s29 + $0x2e4] sm:$0xf0]  ;;  %v9111_v48 = vld [vmem:[%s12386_s29 + $0x360] sm:$0xf]  ;;  %v8975_v53 = vld [vmem:[%s12386_s29 + $0x250] sm:$0xf] }
 0x233   : > { %7606 = vmatpush.bf16.msra.mxu3 %v8888_v10  ;;  %v10837_v49 = vld [vmem:[%s12386_s29 + $0x364] sm:$0xf0]  ;;  %v9175_v50 = vld [vmem:[%s12386_s29 + $0x3e0] sm:$0xf]  ;;  %v9048_v54 = vor.u32 %v10821_v47, %v9047_v45  ;;  %v10803_v56 = vld [vmem:[%s12386_s29 + $0x254] sm:$0xf0] }
 0x234   : > { %7568 = vmatpush.bf16.msra.mxu0 %v8688_v16  ;;  %v10853_v51 = vld [vmem:[%s12386_s29 + $0x3e4] sm:$0xf0]  ;;  %v9112_v55 = vor.u32 %v10837_v49, %v9111_v48  ;;  %v9039_v57 = vld [vmem:[%s12386_s29 + $0x2d0] sm:$0xf]  ;;  %v10819_v58 = vld [vmem:[%s12386_s29 + $0x2d4] sm:$0xf0]  ;;  %v8976_v0 = vor.u32 %v10803_v56, %v8975_v53 }
 0x235   : > { %7581 = vmatpush.bf16.msra.mxu1 %v8752_v19  ;;  %v9176_v59 = vor.u32 %v10853_v51, %v9175_v50  ;;  %v9103_v60 = vld [vmem:[%s12386_s29 + $0x350] sm:$0xf]  ;;  %v10835_v61 = vld [vmem:[%s12386_s29 + $0x354] sm:$0xf0]  ;;  %v9040_v1 = vor.u32 %v10819_v58, %v9039_v57  ;;  %v4357_v2 = vld [vmem:[%s13675_s0 + $0x8] sm:$0xff]  ;;  %s13683_s28 = smov (!%p4346_p8, %s12796_s28), 3 }
 0x236   : > { %7594 = vmatpush.bf16.msra.mxu2 %v8816_v20  ;;  %v9167_v62 = vld [vmem:[%s12386_s29 + $0x3d0] sm:$0xf]  ;;  %v10851_v63 = vld [vmem:[%s12386_s29 + $0x3d4] sm:$0xf0]  ;;  %v9104_v4 = vor.u32 %v10835_v61, %v9103_v60  ;;  %v8967_v5 = vld [vmem:[%s12386_s29 + $0x240] sm:$0xf]  ;;  %v4908_v8 = vunpack.c.l.b16 %v4357_v2  ;;  %v4909_v10 = vunpack.c.h.b16 %v4357_v2  ;;  %s12844_s30 = scalar_lea.vmem %s13677_s2, %s13683_s28 }
 0x237   : > { %7607 = vmatpush.bf16.msra.mxu3 %v8880_v24  ;;  %v4356_v3 = vld [vmem:[%s13675_s0] sm:$0xff]  ;;  %v10801_v6 = vld [vmem:[%s12386_s29 + $0x244] sm:$0xf0]  ;;  %v9031_v7 = vld [vmem:[%s12386_s29 + $0x2c0] sm:$0xf]  ;;  %v9168_v11 = vor.u32 %v10851_v63, %v9167_v62  ;;  %vm8397_vm0 = vcmask 1043456  }
 0x238   : > { %7569 = vmatpush.bf16.msra.mxu0 %v8680_v31  ;;  %v4906_v9 = vunpack.c.l.b16 %v4356_v3  ;;  %v10817_v12 = vld [vmem:[%s12386_s29 + $0x2c4] sm:$0xf0]  ;;  %v9095_v13 = vld [vmem:[%s12386_s29 + $0x340] sm:$0xf]  ;;  %v4907_v15 = vunpack.c.h.b16 %v4356_v3  ;;  %v12490_v18 = vpack.c.b16 %v4908_v8, %v4908_v8  ;;  %v12494_v20 = vpack.c.b16 %v4909_v10, %v4909_v10  ;;  %v8959_v25 = vld [vmem:[%s12386_s29 + $0x230] sm:$0xf] }
 0x239   : > { %7582 = vmatpush.bf16.msra.mxu1 %v8744_v35  ;;  %v10833_v14 = vld [vmem:[%s12386_s29 + $0x344] sm:$0xf0]  ;;  %v9159_v16 = vld [vmem:[%s12386_s29 + $0x3c0] sm:$0xf]  ;;  %v8968_v21 = vor.u32 %v10801_v6, %v8967_v5  ;;  %v9032_v23 = vor.u32 %v10817_v12, %v9031_v7  ;;  %v10799_v26 = vld [vmem:[%s12386_s29 + $0x234] sm:$0xf0] }
 0x23a   : > { %7595 = vmatpush.bf16.msra.mxu2 %v8808_v36  ;;  %v10849_v17 = vld [vmem:[%s12386_s29 + $0x3c4] sm:$0xf0]  ;;  %v12492_v19 = vpack.c.b16 %v4906_v9, %v4906_v9  ;;  %v12496_v22 = vpack.c.b16 %v4907_v15, %v4907_v15  ;;  %v9096_v24 = vor.u32 %v10833_v14, %v9095_v13  ;;  %v9023_v27 = vld [vmem:[%s12386_s29 + $0x2b0] sm:$0xf]  ;;  %v10815_v29 = vld [vmem:[%s12386_s29 + $0x2b4] sm:$0xf0]  ;;  %v8960_v34 = vor.u32 %v10799_v26, %v8959_v25 }
 0x23b   : > { %7608 = vmatpush.bf16.msra.mxu3 %v8872_v39  ;;  %v9160_v28 = vor.u32 %v10849_v17, %v9159_v16  ;;  %v9087_v30 = vld [vmem:[%s12386_s29 + $0x330] sm:$0xf]  ;;  %v10831_v31 = vld [vmem:[%s12386_s29 + $0x334] sm:$0xf0]  ;;  %v9024_v35 = vor.u32 %v10815_v29, %v9023_v27  ;;  %v8951_v37 = vld [vmem:[%s12386_s29 + $0x220] sm:$0xf] }
 0x23c   : > { %7614 = vmatpush.bf16.msrb.mxu0 %v8992_v40  ;;  %v9151_v32 = vld [vmem:[%s12386_s29 + $0x3b0] sm:$0xf]  ;;  %v10847_v33 = vld [vmem:[%s12386_s29 + $0x3b4] sm:$0xf0]  ;;  %7583 = vmatmul.bf16.vlgmr.msra.gmra.mxu1 %v12496_v22  ;;  %v9088_v36 = vor.u32 %v10831_v31, %v9087_v30  ;;  %v10797_v38 = vld [vmem:[%s12386_s29 + $0x224] sm:$0xf0] }
 0x23d   : > { %7627 = vmatpush.bf16.msrb.mxu1 %v9056_v41  ;;  %7596 = vmatmul.bf16.vlgmr.msra.gmra.mxu2 %v12490_v18  ;;  %v9015_v39 = vld [vmem:[%s12386_s29 + $0x2a0] sm:$0xf]  ;;  %v9152_v40 = vor.u32 %v10847_v33, %v9151_v32  ;;  %v10813_v41 = vld [vmem:[%s12386_s29 + $0x2a4] sm:$0xf0]  ;;  %v8943_v49 = vld [vmem:[%s12386_s29 + $0x210] sm:$0xf] }
 0x23e   : > { %7640 = vmatpush.bf16.msrb.mxu2 %v9120_v42  ;;  %7570 = vmatmul.bf16.vlgmr.msra.gmra.mxu0 %v12492_v19  ;;  %v9079_v42 = vld [vmem:[%s12386_s29 + $0x320] sm:$0xf]  ;;  %v10829_v43 = vld [vmem:[%s12386_s29 + $0x324] sm:$0xf0]  ;;  %v9016_v47 = vor.u32 %v10813_v41, %v9015_v39  ;;  %v10795_v50 = vld [vmem:[%s12386_s29 + $0x214] sm:$0xf0] }
 0x23f   : > { %7653 = vmatpush.bf16.msrb.mxu3 %v9184_v46  ;;  %v9143_v44 = vld [vmem:[%s12386_s29 + $0x3a0] sm:$0xf]  ;;  %v10845_v45 = vld [vmem:[%s12386_s29 + $0x3a4] sm:$0xf0]  ;;  %v8952_v46 = vor.u32 %v10797_v38, %v8951_v37  ;;  %v9080_v48 = vor.u32 %v10829_v43, %v9079_v42  ;;  %v9007_v51 = vld [vmem:[%s12386_s29 + $0x290] sm:$0xf] }
 0x240   : > { %7615 = vmatpush.bf16.msrb.mxu0 %v8984_v52  ;;  %7609 = vmatmul.bf16.vlgmr.msra.gmra.mxu3 %v12494_v20  ;;  %v9144_v52 = vor.u32 %v10845_v45, %v9143_v44  ;;  %v10811_v53 = vld [vmem:[%s12386_s29 + $0x294] sm:$0xf0]  ;;  %v9135_v56 = vld [vmem:[%s12386_s29 + $0x390] sm:$0xf]  ;;  %v8935_v58 = vld [vmem:[%s12386_s29 + $0x200] sm:$0xf] }
 0x241   : > { %7628 = vmatpush.bf16.msrb.mxu1 %v9048_v54  ;;  %v9071_v54 = vld [vmem:[%s12386_s29 + $0x310] sm:$0xf]  ;;  %v10843_v57 = vld [vmem:[%s12386_s29 + $0x394] sm:$0xf0]  ;;  %v10793_v60 = vld [vmem:[%s12386_s29 + $0x204] sm:$0xf0]  ;;  %v9008_v63 = vor.u32 %v10811_v53, %v9007_v51 }
 0x242   : > { %7641 = vmatpush.bf16.msrb.mxu2 %v9112_v55  ;;  %v10827_v55 = vld [vmem:[%s12386_s29 + $0x314] sm:$0xf0]  ;;  %v8999_v61 = vld [vmem:[%s12386_s29 + $0x280] sm:$0xf]  ;;  %v10809_v62 = vld [vmem:[%s12386_s29 + $0x284] sm:$0xf0] }
 0x243   : > { %7654 = vmatpush.bf16.msrb.mxu3 %v9176_v59  ;;  %v8944_v59 = vor.u32 %v10795_v50, %v8943_v49  ;;  %v10825_v2 = vld [vmem:[%s12386_s29 + $0x304] sm:$0xf0]  ;;  %v4359_v3 = vld [vmem:[%s13675_s0 + $0x18] sm:$0xff]  ;;  %v9127_v5 = vld [vmem:[%s12386_s29 + $0x380] sm:$0xf]  ;;  %v9000_v16 = vor.u32 %v10809_v62, %v8999_v61 }
 0x244   : > { %7616 = vmatpush.bf16.msrb.mxu0 %v8976_v0  ;;  %v9072_v0 = vor.u32 %v10827_v55, %v9071_v54  ;;  %v10841_v6 = vld [vmem:[%s12386_s29 + $0x384] sm:$0xf0]  ;;  %v9247_v8 = vld [vmem:[%s12386_s29 + $0x470] sm:$0xf]  ;;  %v10871_v9 = vld [vmem:[%s12386_s29 + $0x474] sm:$0xf0]  ;;  %v4912_v15 = vunpack.c.l.b16 %v4359_v3  ;;  %v4913_v25 = vunpack.c.h.b16 %v4359_v3 }
 0x245   : > { %7629 = vmatpush.bf16.msrb.mxu1 %v9040_v1  ;;  %v9063_v1 = vld [vmem:[%s12386_s29 + $0x300] sm:$0xf]  ;;  %v4358_v7 = vld [vmem:[%s13675_s0 + $0x10] sm:$0xff]  ;;  %v9311_v10 = vld [vmem:[%s12386_s29 + $0x4f0] sm:$0xf]  ;;  %v9128_v26 = vor.u32 %v10841_v6, %v9127_v5  ;;  %v9248_v27 = vor.u32 %v10871_v9, %v9247_v8 }
 0x246   : > { %7642 = vmatpush.bf16.msrb.mxu2 %v9104_v4  ;;  %v9136_v4 = vor.u32 %v10843_v57, %v9135_v56  ;;  %v10887_v12 = vld [vmem:[%s12386_s29 + $0x4f4] sm:$0xf0]  ;;  %v9375_v13 = vld [vmem:[%s12386_s29 + $0x570] sm:$0xf]  ;;  %v9064_v17 = vor.u32 %v10825_v2, %v9063_v1  ;;  %v9239_v31 = vld [vmem:[%s12386_s29 + $0x460] sm:$0xf]  ;;  %v12554_v38 = vpack.c.b16 %v4912_v15, %v4912_v15  ;;  %v12560_v42 = vpack.c.b16 %v4913_v25, %v4913_v25 }
 0x247   : > { %7655 = vmatpush.bf16.msrb.mxu3 %v9168_v11  ;;  %v8936_v11 = vor.u32 %v10793_v60, %v8935_v58  ;;  %v10903_v14 = vld [vmem:[%s12386_s29 + $0x574] sm:$0xf0]  ;;  %v9312_v29 = vor.u32 %v10887_v12, %v9311_v10  ;;  %v10869_v32 = vld [vmem:[%s12386_s29 + $0x464] sm:$0xf0]  ;;  %v9303_v33 = vld [vmem:[%s12386_s29 + $0x4e0] sm:$0xf] }
 0x248   : > { %7617 = vmatpush.bf16.msrb.mxu0 %v8968_v21  ;;  %v9439_v21 = vld [vmem:[%s12386_s29 + $0x5f0] sm:$0xf]  ;;  %v9376_v30 = vor.u32 %v10903_v14, %v9375_v13  ;;  %v10901_v37 = vld [vmem:[%s12386_s29 + $0x564] sm:$0xf0]  ;;  %v9431_v39 = vld [vmem:[%s12386_s29 + $0x5e0] sm:$0xf]  ;;  %v9240_v43 = vor.u32 %v10869_v32, %v9239_v31 }
 0x249   : > { %7630 = vmatpush.bf16.msrb.mxu1 %v9032_v23  ;;  %v10919_v23 = vld [vmem:[%s12386_s29 + $0x5f4] sm:$0xf0]  ;;  %v9295_v49 = vld [vmem:[%s12386_s29 + $0x4d0] sm:$0xf]  ;;  %v10865_v60 = vld [vmem:[%s12386_s29 + $0x444] sm:$0xf0] }
 0x24a   : > { %7643 = vmatpush.bf16.msrb.mxu2 %v9096_v24  ;;  %v4910_v24 = vunpack.c.l.b16 %v4358_v7  ;;  %v10883_v51 = vld [vmem:[%s12386_s29 + $0x4d4] sm:$0xf0]  ;;  %v9423_v54 = vld [vmem:[%s12386_s29 + $0x5d0] sm:$0xf]  ;;  %v9287_v61 = vld [vmem:[%s12386_s29 + $0x4c0] sm:$0xf] }
 0x24b   : > { %7656 = vmatpush.bf16.msrb.mxu3 %v9160_v28  ;;  %v4911_v28 = vunpack.c.h.b16 %v4358_v7  ;;  %v10899_v53 = vld [vmem:[%s12386_s29 + $0x554] sm:$0xf0]  ;;  %v9296_v57 = vor.u32 %v10883_v51, %v9295_v49  ;;  %v10897_v1 = vld [vmem:[%s12386_s29 + $0x544] sm:$0xf0]  ;;  %v9415_v2 = vld [vmem:[%s12386_s29 + $0x5c0] sm:$0xf] }
 0x24c   : > { %7618 = vmatpush.bf16.msrb.mxu0 %v8960_v34  ;;  %v9440_v34 = vor.u32 %v10919_v23, %v9439_v21  ;;  %v12558_v41 = vpack.c.b16 %v4910_v24, %v4910_v24  ;;  %v10915_v55 = vld [vmem:[%s12386_s29 + $0x5d4] sm:$0xf0]  ;;  %v10913_v3 = vld [vmem:[%s12386_s29 + $0x5c4] sm:$0xf0]  ;;  %v9215_v7 = vld [vmem:[%s12386_s29 + $0x430] sm:$0xf] }
 0x24d   : > { %7631 = vmatpush.bf16.msrb.mxu1 %v9024_v35  ;;  %v10885_v35 = vld [vmem:[%s12386_s29 + $0x4e4] sm:$0xf0]  ;;  %v12562_v44 = vpack.c.b16 %v4911_v28, %v4911_v28  ;;  %v9424_v62 = vor.u32 %v10915_v55, %v9423_v54  ;;  %v10863_v8 = vld [vmem:[%s12386_s29 + $0x434] sm:$0xf0]  ;;  %v9279_v9 = vld [vmem:[%s12386_s29 + $0x4b0] sm:$0xf]  ;;  %v9416_v10 = vor.u32 %v10913_v3, %v9415_v2 }
 0x24e   : > { %7644 = vmatpush.bf16.msrb.mxu2 %v9088_v36  ;;  %v9367_v36 = vld [vmem:[%s12386_s29 + $0x560] sm:$0xf]  ;;  %v9304_v45 = vor.u32 %v10885_v35, %v9303_v33  ;;  %v9343_v12 = vld [vmem:[%s12386_s29 + $0x530] sm:$0xf]  ;;  %v10895_v13 = vld [vmem:[%s12386_s29 + $0x534] sm:$0xf0] }
 0x24f   : > { %7657 = vmatpush.bf16.msrb.mxu3 %v9152_v40  ;;  %v10917_v40 = vld [vmem:[%s12386_s29 + $0x5e4] sm:$0xf0]  ;;  %v9407_v14 = vld [vmem:[%s12386_s29 + $0x5b0] sm:$0xf]  ;;  %v10911_v15 = vld [vmem:[%s12386_s29 + $0x5b4] sm:$0xf0]  ;;  %v9344_v21 = vor.u32 %v10895_v13, %v9343_v12 }
 0x250   : > { %7619 = vmatpush.bf16.msrb.mxu0 %v8952_v46  ;;  %v9368_v46 = vor.u32 %v10901_v37, %v9367_v36  ;;  %v9432_v50 = vor.u32 %v10917_v40, %v9431_v39  ;;  %v9207_v23 = vld [vmem:[%s12386_s29 + $0x420] sm:$0xf]  ;;  %v10861_v24 = vld [vmem:[%s12386_s29 + $0x424] sm:$0xf0]  ;;  %v9199_v35 = vld [vmem:[%s12386_s29 + $0x410] sm:$0xf] }
 0x251   : > { %7632 = vmatpush.bf16.msrb.mxu1 %v9016_v47  ;;  %v9231_v47 = vld [vmem:[%s12386_s29 + $0x450] sm:$0xf]  ;;  %v9271_v25 = vld [vmem:[%s12386_s29 + $0x4a0] sm:$0xf]  ;;  %v10909_v31 = vld [vmem:[%s12386_s29 + $0x5a4] sm:$0xf0]  ;;  %v9208_v32 = vor.u32 %v10861_v24, %v9207_v23 }
 0x252   : > { %7645 = vmatpush.bf16.msrb.mxu2 %v9080_v48  ;;  %v10867_v48 = vld [vmem:[%s12386_s29 + $0x454] sm:$0xf0]  ;;  %v9335_v28 = vld [vmem:[%s12386_s29 + $0x520] sm:$0xf]  ;;  %v9263_v37 = vld [vmem:[%s12386_s29 + $0x490] sm:$0xf] }
 0x253   : > { %7658 = vmatpush.bf16.msrb.mxu3 %v9144_v52  ;;  %v9359_v52 = vld [vmem:[%s12386_s29 + $0x550] sm:$0xf]  ;;  %v9232_v56 = vor.u32 %v10867_v48, %v9231_v47  ;;  %v10859_v36 = vld [vmem:[%s12386_s29 + $0x414] sm:$0xf0]  ;;  %v9191_v48 = vld [vmem:[%s12386_s29 + $0x400] sm:$0xf] }
 0x254   : > { %7620 = vmatpush.bf16.msrb.mxu0 %v8944_v59  ;;  %v9360_v58 = vor.u32 %v10899_v53, %v9359_v52  ;;  %v9223_v59 = vld [vmem:[%s12386_s29 + $0x440] sm:$0xf]  ;;  %v10875_v40 = vld [vmem:[%s12386_s29 + $0x494] sm:$0xf0]  ;;  %v9200_v49 = vor.u32 %v10859_v36, %v9199_v35  ;;  %v10873_v52 = vld [vmem:[%s12386_s29 + $0x484] sm:$0xf0] }
 0x255   : > { %7633 = vmatpush.bf16.msrb.mxu1 %v9008_v63  ;;  %v10881_v63 = vld [vmem:[%s12386_s29 + $0x4c4] sm:$0xf0]  ;;  %v10907_v47 = vld [vmem:[%s12386_s29 + $0x594] sm:$0xf0]  ;;  %v9255_v51 = vld [vmem:[%s12386_s29 + $0x480] sm:$0xf]  ;;  %v9264_v53 = vor.u32 %v10875_v40, %v9263_v37 }
 0x256   : > { %7646 = vmatpush.bf16.msrb.mxu2 %v9072_v0  ;;  %v9351_v0 = vld [vmem:[%s12386_s29 + $0x540] sm:$0xf]  ;;  %v9288_v5 = vor.u32 %v10881_v63, %v9287_v61  ;;  %v10935_v63 = vld [vmem:[%s12386_s29 + $0x674] sm:$0xf0]  ;;  %v9631_v3 = vld [vmem:[%s12386_s29 + $0x770] sm:$0xf] }
 0x257   : > { %7659 = vmatpush.bf16.msrb.mxu3 %v9136_v4  ;;  %v9224_v4 = vor.u32 %v10865_v60, %v9223_v59  ;;  %v9352_v6 = vor.u32 %v10897_v1, %v9351_v0  ;;  %v9319_v55 = vld [vmem:[%s12386_s29 + $0x500] sm:$0xf]  ;;  %v10905_v60 = vld [vmem:[%s12386_s29 + $0x584] sm:$0xf0]  ;;  %v9567_v0 = vld [vmem:[%s12386_s29 + $0x6f0] sm:$0xf] }
 0x258   : > { %7621 = vmatpush.bf16.msrb.mxu0 %v8936_v11  ;;  %v10879_v11 = vld [vmem:[%s12386_s29 + $0x4b4] sm:$0xf0]  ;;  %v9383_v59 = vld [vmem:[%s12386_s29 + $0x580] sm:$0xf]  ;;  %v9487_v37 = vld [vmem:[%s12386_s29 + $0x650] sm:$0xf] }
 0x259   : > { %7634 = vmatpush.bf16.msrb.mxu1 %v9000_v16  ;;  %v9216_v16 = vor.u32 %v10863_v8, %v9215_v7  ;;  %v4361_v61 = vld [vmem:[%s13675_s0 + $0x28] sm:$0xff]  ;;  %v10951_v2 = vld [vmem:[%s12386_s29 + $0x6f4] sm:$0xf0]  ;;  %v9695_v8 = vld [vmem:[%s12386_s29 + $0x7f0] sm:$0xf]  ;;  %v9384_v12 = vor.u32 %v10905_v60, %v9383_v59 }
 0x25a   : > { %7647 = vmatpush.bf16.msrb.mxu2 %v9064_v17  ;;  %v9280_v17 = vor.u32 %v10879_v11, %v9279_v9  ;;  %v10983_v9 = vld [vmem:[%s12386_s29 + $0x7f4] sm:$0xf0]  ;;  %v9559_v23 = vld [vmem:[%s12386_s29 + $0x6e0] sm:$0xf]  ;;  %v9551_v40 = vld [vmem:[%s12386_s29 + $0x6d0] sm:$0xf] }
 0x25b   : > { %7660 = vmatpush.bf16.msrb.mxu3 %v9128_v26  ;;  %7622 = vmatmul.bf16.vlgmr.msrb.gmra.mxu0 %v12558_v41  ;;  %v9408_v26 = vor.u32 %v10911_v15, %v9407_v14  ;;  %v4917_v14 = vunpack.c.h.b16 %v4361_v61  ;;  %v9568_v15 = vor.u32 %v10951_v2, %v9567_v0  ;;  %v9696_v24 = vor.u32 %v10983_v9, %v9695_v8  ;;  %v10961_v59 = vld [vmem:[%s12386_s29 + $0x744] sm:$0xf0]  ;;  %v9671_v60 = vld [vmem:[%s12386_s29 + $0x7c0] sm:$0xf]  ;;  %v10927_v2 = vld [vmem:[%s12386_s29 + $0x634] sm:$0xf0] }
 0x25c   : > { %7666 = vmatpush.bf16.msra.mxu0 %v9248_v27  ;;  %7635 = vmatmul.bf16.vlgmr.msrb.gmra.mxu1 %v12562_v44  ;;  %v10877_v27 = vld [vmem:[%s12386_s29 + $0x4a4] sm:$0xf0]  ;;  %v9663_v8 = vld [vmem:[%s12386_s29 + $0x7b0] sm:$0xf]  ;;  %v10975_v9 = vld [vmem:[%s12386_s29 + $0x7b4] sm:$0xf0] }
 0x25d   : > { %7679 = vmatpush.bf16.msra.mxu1 %v9312_v29  ;;  %7648 = vmatmul.bf16.vlgmr.msrb.gmra.mxu2 %v12554_v38  ;;  %v10893_v29 = vld [vmem:[%s12386_s29 + $0x524] sm:$0xf0]  ;;  %v9272_v33 = vor.u32 %v10877_v27, %v9271_v25  ;;  %v9623_v27 = vld [vmem:[%s12386_s29 + $0x760] sm:$0xf] }
 0x25e   : > { %7692 = vmatpush.bf16.msra.mxu2 %v9376_v30  ;;  %7661 = vmatmul.bf16.vlgmr.msrb.gmra.mxu3 %v12560_v42  ;;  %v9399_v30 = vld [vmem:[%s12386_s29 + $0x5a0] sm:$0xf] }
 0x25f   : > { %7705 = vmatpush.bf16.msra.mxu3 %v9440_v34  ;;  %v9336_v34 = vor.u32 %v10893_v29, %v9335_v28  ;;  %v9400_v39 = vor.u32 %v10909_v31, %v9399_v30  ;;  %v10965_v28 = vld [vmem:[%s12386_s29 + $0x764] sm:$0xf0]  ;;  %v9687_v31 = vld [vmem:[%s12386_s29 + $0x7e0] sm:$0xf] }
 0x260   : > { %7667 = vmatpush.bf16.msra.mxu0 %v9240_v43  ;;  %v9327_v43 = vld [vmem:[%s12386_s29 + $0x510] sm:$0xf]  ;;  %v9624_v36 = vor.u32 %v10965_v28, %v9623_v27 }
 0x261   : > { %7680 = vmatpush.bf16.msra.mxu1 %v9304_v45  ;;  %v10891_v45 = vld [vmem:[%s12386_s29 + $0x514] sm:$0xf0] }
 0x262   : > { %7693 = vmatpush.bf16.msra.mxu2 %v9368_v46  ;;  %v9391_v46 = vld [vmem:[%s12386_s29 + $0x590] sm:$0xf]  ;;  %v9328_v54 = vor.u32 %v10891_v45, %v9327_v43  ;;  %v10947_v45 = vld [vmem:[%s12386_s29 + $0x6d4] sm:$0xf0] }
 0x263   : > { %7706 = vmatpush.bf16.msra.mxu3 %v9432_v50  ;;  %v10857_v50 = vld [vmem:[%s12386_s29 + $0x404] sm:$0xf0] }
 0x264   : > { %7668 = vmatpush.bf16.msra.mxu0 %v9232_v56  ;;  %v10889_v56 = vld [vmem:[%s12386_s29 + $0x504] sm:$0xf0]  ;;  %v9192_v1 = vor.u32 %v10857_v50, %v9191_v48  ;;  %v9679_v48 = vld [vmem:[%s12386_s29 + $0x7d0] sm:$0xf] }
 0x265   : > { %7681 = vmatpush.bf16.msra.mxu1 %v9296_v57  ;;  %v4360_v57 = vld [vmem:[%s13675_s0 + $0x20] sm:$0xff]  ;;  %v9320_v7 = vor.u32 %v10889_v56, %v9319_v55  ;;  %v9543_v55 = vld [vmem:[%s12386_s29 + $0x6c0] sm:$0xf] }
 0x266   : > { %7694 = vmatpush.bf16.msra.mxu2 %v9360_v58  ;;  %v9392_v58 = vor.u32 %v10907_v47, %v9391_v46  ;;  %v4915_v11 = vunpack.c.h.b16 %v4360_v57  ;;  %v9615_v46 = vld [vmem:[%s12386_s29 + $0x750] sm:$0xf]  ;;  %v10963_v47 = vld [vmem:[%s12386_s29 + $0x754] sm:$0xf0] }
 0x267   : > { %7707 = vmatpush.bf16.msra.mxu3 %v9424_v62  ;;  %v9503_v62 = vld [vmem:[%s12386_s29 + $0x670] sm:$0xf] }
 0x268   : > { %7669 = vmatpush.bf16.msra.mxu0 %v9224_v4  ;;  %v10967_v4 = vld [vmem:[%s12386_s29 + $0x774] sm:$0xf0]  ;;  %v9504_v13 = vor.u32 %v10935_v63, %v9503_v62  ;;  %v12640_v30 = vpack.c.b16 %v4915_v11, %v4915_v11 }
 0x269   : > { %7682 = vmatpush.bf16.msra.mxu1 %v9288_v5  ;;  %v4914_v5 = vunpack.c.l.b16 %v4360_v57  ;;  %v10945_v57 = vld [vmem:[%s12386_s29 + $0x6c4] sm:$0xf0] }
 0x26a   : > { %7695 = vmatpush.bf16.msra.mxu2 %v9352_v6  ;;  %v9256_v6 = vor.u32 %v10873_v52, %v9255_v51  ;;  %v9552_v51 = vor.u32 %v10947_v45, %v9551_v40  ;;  %v9616_v52 = vor.u32 %v10963_v47, %v9615_v46  ;;  %v9544_v63 = vor.u32 %v10945_v57, %v9543_v55  ;;  %v10955_v40 = vld [vmem:[%s12386_s29 + $0x714] sm:$0xf0]  ;;  %v9447_v46 = vld [vmem:[%s12386_s29 + $0x600] sm:$0xf]  ;;  %v4362_v55 = vld [vmem:[%s13675_s0 + $0x30] sm:$0xff] }
 0x26b   : > { %7708 = vmatpush.bf16.msra.mxu3 %v9416_v10  ;;  %v4916_v10 = vunpack.c.l.b16 %v4361_v61  ;;  %v12633_v25 = vpack.c.b16 %v4914_v5, %v4914_v5  ;;  %v10977_v61 = vld [vmem:[%s12386_s29 + $0x7c4] sm:$0xf0]  ;;  %v10943_v5 = vld [vmem:[%s12386_s29 + $0x6b4] sm:$0xf0]  ;;  %v9639_v57 = vld [vmem:[%s12386_s29 + $0x780] sm:$0xf] }
 0x26c   : > { %7670 = vmatpush.bf16.msra.mxu0 %v9216_v16  ;;  %v9632_v16 = vor.u32 %v10967_v4, %v9631_v3  ;;  %v9535_v3 = vld [vmem:[%s12386_s29 + $0x6b0] sm:$0xf]  ;;  %v9672_v4 = vor.u32 %v10977_v61, %v9671_v60  ;;  %v10971_v45 = vld [vmem:[%s12386_s29 + $0x794] sm:$0xf0] }
 0x26d   : > { %7683 = vmatpush.bf16.msra.mxu1 %v9280_v17  ;;  %v9495_v17 = vld [vmem:[%s12386_s29 + $0x660] sm:$0xf]  ;;  %v12638_v29 = vpack.c.b16 %v4916_v10, %v4916_v10  ;;  %v9536_v11 = vor.u32 %v10943_v5, %v9535_v3  ;;  %v9759_v60 = vld [vmem:[%s12386_s29 + $0x870] sm:$0xf]  ;;  %v10999_v61 = vld [vmem:[%s12386_s29 + $0x874] sm:$0xf0]  ;;  %v4918_v3 = vunpack.c.l.b16 %v4362_v55 }
 0x26e   : > { %7696 = vmatpush.bf16.msra.mxu2 %v9344_v21  ;;  %v10933_v21 = vld [vmem:[%s12386_s29 + $0x664] sm:$0xf0] }
 0x26f   : > { %7709 = vmatpush.bf16.msra.mxu3 %v9408_v26  ;;  %v10949_v26 = vld [vmem:[%s12386_s29 + $0x6e4] sm:$0xf0] }
 0x270   : > { %7671 = vmatpush.bf16.msra.mxu0 %v9208_v32  ;;  %v10981_v32 = vld [vmem:[%s12386_s29 + $0x7e4] sm:$0xf0]  ;;  %v9560_v35 = vor.u32 %v10949_v26, %v9559_v23 }
 0x271   : > { %7684 = vmatpush.bf16.msra.mxu1 %v9272_v33  ;;  %v12644_v33 = vpack.c.b16 %v4917_v14, %v4917_v14  ;;  %v9688_v43 = vor.u32 %v10981_v32, %v9687_v31  ;;  %v10925_v14 = vld [vmem:[%s12386_s29 + $0x624] sm:$0xf0]  ;;  %v9455_v32 = vld [vmem:[%s12386_s29 + $0x610] sm:$0xf] }
 0x272   : > { %7697 = vmatpush.bf16.msra.mxu2 %v9336_v34  ;;  %v9496_v34 = vor.u32 %v10933_v21, %v9495_v17  ;;  %v10941_v17 = vld [vmem:[%s12386_s29 + $0x6a4] sm:$0xf0]  ;;  %v9591_v21 = vld [vmem:[%s12386_s29 + $0x720] sm:$0xf] }
 0x273   : > { %7710 = vmatpush.bf16.msra.mxu3 %v9400_v39  ;;  %v10931_v39 = vld [vmem:[%s12386_s29 + $0x654] sm:$0xf0]  ;;  %v10957_v23 = vld [vmem:[%s12386_s29 + $0x724] sm:$0xf0] }
 0x274   : > { %7672 = vmatpush.bf16.msra.mxu0 %v9200_v49  ;;  %v10979_v49 = vld [vmem:[%s12386_s29 + $0x7d4] sm:$0xf0]  ;;  %v9488_v50 = vor.u32 %v10931_v39, %v9487_v37  ;;  %v10973_v26 = vld [vmem:[%s12386_s29 + $0x7a4] sm:$0xf0]  ;;  %v9592_v31 = vor.u32 %v10957_v23, %v9591_v21  ;;  %v9583_v39 = vld [vmem:[%s12386_s29 + $0x710] sm:$0xf]  ;;  %v12715_v23 = vpack.c.b16 %v4918_v3, %v4918_v3 }
 0x275   : > { %7685 = vmatpush.bf16.msra.mxu1 %v9264_v53  ;;  %v9479_v53 = vld [vmem:[%s12386_s29 + $0x640] sm:$0xf]  ;;  %v9680_v56 = vor.u32 %v10979_v49, %v9679_v48  ;;  %v10939_v37 = vld [vmem:[%s12386_s29 + $0x694] sm:$0xf0]  ;;  %v10921_v48 = vld [vmem:[%s12386_s29 + $0x604] sm:$0xf0] }
 0x276   : > { %7698 = vmatpush.bf16.msra.mxu2 %v9328_v54  ;;  %v10929_v54 = vld [vmem:[%s12386_s29 + $0x644] sm:$0xf0]  ;;  %v9511_v49 = vld [vmem:[%s12386_s29 + $0x680] sm:$0xf]  ;;  %v9727_v3 = vld [vmem:[%s12386_s29 + $0x830] sm:$0xf] }
 0x277   : > { %7711 = vmatpush.bf16.msra.mxu3 %v9392_v58  ;;  %v9607_v58 = vld [vmem:[%s12386_s29 + $0x740] sm:$0xf]  ;;  %v9480_v62 = vor.u32 %v10929_v54, %v9479_v53  ;;  %v10953_v54 = vld [vmem:[%s12386_s29 + $0x704] sm:$0xf0] }
 0x278   : > { %7673 = vmatpush.bf16.msra.mxu0 %v9192_v1  ;;  %v9608_v0 = vor.u32 %v10961_v59, %v9607_v58  ;;  %v9471_v1 = vld [vmem:[%s12386_s29 + $0x630] sm:$0xf]  ;;  %v9575_v53 = vld [vmem:[%s12386_s29 + $0x700] sm:$0xf]  ;;  %v10969_v58 = vld [vmem:[%s12386_s29 + $0x784] sm:$0xf0] }
 0x279   : > { %7686 = vmatpush.bf16.msra.mxu1 %v9256_v6  ;;  %v9599_v6 = vld [vmem:[%s12386_s29 + $0x730] sm:$0xf]  ;;  %v9472_v10 = vor.u32 %v10927_v2, %v9471_v1  ;;  %v11031_v2 = vld [vmem:[%s12386_s29 + $0x974] sm:$0xf0]  ;;  %v9576_v5 = vor.u32 %v10953_v54, %v9575_v53 }
 0x27a   : > { %7699 = vmatpush.bf16.msra.mxu2 %v9320_v7  ;;  %v10959_v7 = vld [vmem:[%s12386_s29 + $0x734] sm:$0xf0]  ;;  %v4363_v59 = vld [vmem:[%s13675_s0 + $0x38] sm:$0xff] }
 0x27b   : > { %7712 = vmatpush.bf16.msra.mxu3 %v9384_v12  ;;  %7674 = vmatmul.bf16.vlgmr.msra.gmra.mxu0 %v12633_v25  ;;  %v9600_v12 = vor.u32 %v10959_v7, %v9599_v6  ;;  %v9887_v1 = vld [vmem:[%s12386_s29 + $0x970] sm:$0xf]  ;;  %v11047_v7 = vld [vmem:[%s12386_s29 + $0x9f4] sm:$0xf0] }
 0x27c   : > { %7718 = vmatpush.bf16.msrb.mxu0 %v9504_v13  ;;  %7687 = vmatmul.bf16.vlgmr.msra.gmra.mxu1 %v12640_v30  ;;  %v9463_v13 = vld [vmem:[%s12386_s29 + $0x620] sm:$0xf]  ;;  %v9951_v6 = vld [vmem:[%s12386_s29 + $0x9f0] sm:$0xf] }
 0x27d   : > { %7731 = vmatpush.bf16.msrb.mxu1 %v9568_v15  ;;  %7700 = vmatmul.bf16.vlgmr.msra.gmra.mxu2 %v12638_v29  ;;  %v9527_v15 = vld [vmem:[%s12386_s29 + $0x6a0] sm:$0xf]  ;;  %v9464_v27 = vor.u32 %v10925_v14, %v9463_v13  ;;  %v9888_v14 = vor.u32 %v11031_v2, %v9887_v1  ;;  %v9952_v21 = vor.u32 %v11047_v7, %v9951_v6  ;;  %v11007_v7 = vld [vmem:[%s12386_s29 + $0x8b4] sm:$0xf0] }
 0x27e   : > { %7744 = vmatpush.bf16.msrb.mxu2 %v9632_v16  ;;  %7713 = vmatmul.bf16.vlgmr.msra.gmra.mxu3 %v12644_v33  ;;  %v9664_v16 = vor.u32 %v10975_v9, %v9663_v8  ;;  %v9528_v28 = vor.u32 %v10941_v17, %v9527_v15  ;;  %v4920_v8 = vunpack.c.l.b16 %v4363_v59  ;;  %v4919_v9 = vunpack.c.h.b16 %v4362_v55  ;;  %v9751_v15 = vld [vmem:[%s12386_s29 + $0x860] sm:$0xf] }
 0x27f   : > { %7757 = vmatpush.bf16.msrb.mxu3 %v9696_v24  ;;  %v9655_v24 = vld [vmem:[%s12386_s29 + $0x7a0] sm:$0xf] }
 0x280   : > { %7719 = vmatpush.bf16.msrb.mxu0 %v9496_v34  ;;  %v10923_v34 = vld [vmem:[%s12386_s29 + $0x614] sm:$0xf0]  ;;  %v9815_v17 = vld [vmem:[%s12386_s29 + $0x8e0] sm:$0xf] }
 0x281   : > { %7732 = vmatpush.bf16.msrb.mxu1 %v9560_v35  ;;  %v9519_v35 = vld [vmem:[%s12386_s29 + $0x690] sm:$0xf]  ;;  %v9456_v47 = vor.u32 %v10923_v34, %v9455_v32  ;;  %v9943_v32 = vld [vmem:[%s12386_s29 + $0x9e0] sm:$0xf]  ;;  %v11045_v34 = vld [vmem:[%s12386_s29 + $0x9e4] sm:$0xf0] }
 0x282   : > { %7745 = vmatpush.bf16.msrb.mxu2 %v9624_v36  ;;  %v9656_v36 = vor.u32 %v10973_v26, %v9655_v24  ;;  %v11013_v24 = vld [vmem:[%s12386_s29 + $0x8e4] sm:$0xf0]  ;;  %v9879_v26 = vld [vmem:[%s12386_s29 + $0x960] sm:$0xf] }
 0x283   : > { %7758 = vmatpush.bf16.msrb.mxu3 %v9688_v43  ;;  %v9647_v43 = vld [vmem:[%s12386_s29 + $0x790] sm:$0xf]  ;;  %v9735_v55 = vld [vmem:[%s12386_s29 + $0x840] sm:$0xf] }
 0x284   : > { %7720 = vmatpush.bf16.msrb.mxu0 %v9488_v50  ;;  %v10937_v50 = vld [vmem:[%s12386_s29 + $0x684] sm:$0xf0] }
 0x285   : > { %7733 = vmatpush.bf16.msrb.mxu1 %v9552_v51  ;;  %v9520_v51 = vor.u32 %v10939_v37, %v9519_v35  ;;  %v9816_v37 = vor.u32 %v11013_v24, %v9815_v17  ;;  %v9783_v17 = vld [vmem:[%s12386_s29 + $0x8a0] sm:$0xf]  ;;  %v11005_v24 = vld [vmem:[%s12386_s29 + $0x8a4] sm:$0xf0] }
 0x286   : > { %7746 = vmatpush.bf16.msrb.mxu2 %v9616_v52  ;;  %v9584_v52 = vor.u32 %v10955_v40, %v9583_v39  ;;  %v9743_v40 = vld [vmem:[%s12386_s29 + $0x850] sm:$0xf] }
 0x287   : > { %7759 = vmatpush.bf16.msrb.mxu3 %v9680_v56  ;;  %v9648_v56 = vor.u32 %v10971_v45, %v9647_v43  ;;  %v10995_v43 = vld [vmem:[%s12386_s29 + $0x854] sm:$0xf0]  ;;  %v9807_v45 = vld [vmem:[%s12386_s29 + $0x8d0] sm:$0xf] }
 0x288   : > { %7721 = vmatpush.bf16.msrb.mxu0 %v9480_v62  ;;  %v9823_v62 = vld [vmem:[%s12386_s29 + $0x8f0] sm:$0xf] }
 0x289   : > { %7734 = vmatpush.bf16.msrb.mxu1 %v9544_v63  ;;  %v9448_v63 = vor.u32 %v10921_v48, %v9447_v46  ;;  %v9944_v46 = vor.u32 %v11045_v34, %v9943_v32  ;;  %v9871_v48 = vld [vmem:[%s12386_s29 + $0x950] sm:$0xf]  ;;  %v9911_v32 = vld [vmem:[%s12386_s29 + $0x9a0] sm:$0xf]  ;;  %v11037_v34 = vld [vmem:[%s12386_s29 + $0x9a4] sm:$0xf0] }
 0x28a   : > { %7747 = vmatpush.bf16.msrb.mxu2 %v9608_v0  ;;  %v11015_v0 = vld [vmem:[%s12386_s29 + $0x8f4] sm:$0xf0] }
 0x28b   : > { %7760 = vmatpush.bf16.msrb.mxu3 %v9672_v4  ;;  %v9512_v4 = vor.u32 %v10937_v50, %v9511_v49  ;;  %v9824_v13 = vor.u32 %v11015_v0, %v9823_v62  ;;  %v11027_v49 = vld [vmem:[%s12386_s29 + $0x954] sm:$0xf0]  ;;  %v9935_v50 = vld [vmem:[%s12386_s29 + $0x9d0] sm:$0xf]  ;;  %v9927_v62 = vld [vmem:[%s12386_s29 + $0x9c0] sm:$0xf] }
 0x28c   : > { %7722 = vmatpush.bf16.msrb.mxu0 %v9472_v10  ;;  %v9640_v10 = vor.u32 %v10969_v58, %v9639_v57  ;;  %v9872_v54 = vor.u32 %v11027_v49, %v9871_v48  ;;  %v9799_v57 = vld [vmem:[%s12386_s29 + $0x8c0] sm:$0xf]  ;;  %v9839_v48 = vld [vmem:[%s12386_s29 + $0x910] sm:$0xf]  ;;  %v11019_v49 = vld [vmem:[%s12386_s29 + $0x914] sm:$0xf0] }
 0x28d   : > { %7735 = vmatpush.bf16.msrb.mxu1 %v9536_v11  ;;  %v9760_v11 = vor.u32 %v10999_v61, %v9759_v60  ;;  %v9863_v60 = vld [vmem:[%s12386_s29 + $0x940] sm:$0xf]  ;;  %v11025_v61 = vld [vmem:[%s12386_s29 + $0x944] sm:$0xf0] }
 0x28e   : > { %7748 = vmatpush.bf16.msrb.mxu2 %v9600_v12  ;;  %v4921_v12 = vunpack.c.h.b16 %v4363_v59  ;;  %v11009_v59 = vld [vmem:[%s12386_s29 + $0x8c4] sm:$0xf0]  ;;  %v9864_v2 = vor.u32 %v11025_v61, %v9863_v60  ;;  %v4364_v61 = vld [vmem:[%s13675_s0 + $0x40] sm:$0xff] }
 0x28f   : > { %7761 = vmatpush.bf16.msrb.mxu3 %v9664_v16  ;;  %v10997_v16 = vld [vmem:[%s12386_s29 + $0x864] sm:$0xf0]  ;;  %v9800_v1 = vor.u32 %v11009_v59, %v9799_v57  ;;  %v9831_v59 = vld [vmem:[%s12386_s29 + $0x900] sm:$0xf] }
 0x290   : > { %7723 = vmatpush.bf16.msrb.mxu0 %v9464_v27  ;;  %v11029_v27 = vld [vmem:[%s12386_s29 + $0x964] sm:$0xf0]  ;;  %v12726_v35 = vpack.c.b16 %v4921_v12, %v4921_v12 }
 0x291   : > { %7736 = vmatpush.bf16.msrb.mxu1 %v9528_v28  ;;  %v12720_v28 = vpack.c.b16 %v4920_v8, %v4920_v8  ;;  %v9880_v39 = vor.u32 %v11029_v27, %v9879_v26  ;;  %v9855_v8 = vld [vmem:[%s12386_s29 + $0x930] sm:$0xf]  ;;  %v9847_v26 = vld [vmem:[%s12386_s29 + $0x920] sm:$0xf]  ;;  %v11021_v27 = vld [vmem:[%s12386_s29 + $0x924] sm:$0xf0] }
 0x292   : > { %7749 = vmatpush.bf16.msrb.mxu2 %v9592_v31  ;;  %v12722_v31 = vpack.c.b16 %v4919_v9, %v4919_v9  ;;  %v11023_v9 = vld [vmem:[%s12386_s29 + $0x934] sm:$0xf0]  ;;  %v11017_v60 = vld [vmem:[%s12386_s29 + $0x904] sm:$0xf0] }
 0x293   : > { %7762 = vmatpush.bf16.msrb.mxu3 %v9656_v36  ;;  %v9752_v36 = vor.u32 %v10997_v16, %v9751_v15  ;;  %v9719_v15 = vld [vmem:[%s12386_s29 + $0x820] sm:$0xf]  ;;  %v10989_v16 = vld [vmem:[%s12386_s29 + $0x824] sm:$0xf0] }
 0x294   : > { %7724 = vmatpush.bf16.msrb.mxu0 %v9456_v47  ;;  %v11011_v47 = vld [vmem:[%s12386_s29 + $0x8d4] sm:$0xf0] }
 0x295   : > { %7737 = vmatpush.bf16.msrb.mxu1 %v9520_v51  ;;  %v11043_v51 = vld [vmem:[%s12386_s29 + $0x9d4] sm:$0xf0]  ;;  %v9808_v53 = vor.u32 %v11011_v47, %v9807_v45  ;;  %v9775_v45 = vld [vmem:[%s12386_s29 + $0x890] sm:$0xf] }
 0x296   : > { %7750 = vmatpush.bf16.msrb.mxu2 %v9584_v52  ;;  %v9744_v52 = vor.u32 %v10995_v43, %v9743_v40  ;;  %v9936_v58 = vor.u32 %v11043_v51, %v9935_v50  ;;  %v9711_v40 = vld [vmem:[%s12386_s29 + $0x810] sm:$0xf]  ;;  %v10987_v43 = vld [vmem:[%s12386_s29 + $0x814] sm:$0xf0] }
 0x297   : > { %7763 = vmatpush.bf16.msrb.mxu3 %v9648_v56  ;;  %v10993_v56 = vld [vmem:[%s12386_s29 + $0x844] sm:$0xf0]  ;;  %v11003_v47 = vld [vmem:[%s12386_s29 + $0x894] sm:$0xf0]  ;;  %v9903_v50 = vld [vmem:[%s12386_s29 + $0x990] sm:$0xf] }
 0x298   : > { %7725 = vmatpush.bf16.msrb.mxu0 %v9448_v63  ;;  %v11041_v63 = vld [vmem:[%s12386_s29 + $0x9c4] sm:$0xf0]  ;;  %v9736_v0 = vor.u32 %v10993_v56, %v9735_v55  ;;  %v11035_v51 = vld [vmem:[%s12386_s29 + $0x994] sm:$0xf0]  ;;  %v9767_v55 = vld [vmem:[%s12386_s29 + $0x880] sm:$0xf]  ;;  %v9776_v57 = vor.u32 %v11003_v47, %v9775_v45 }
 0x299   : > { %7738 = vmatpush.bf16.msrb.mxu1 %v9512_v4  ;;  %v10991_v4 = vld [vmem:[%s12386_s29 + $0x834] sm:$0xf0]  ;;  %v9928_v6 = vor.u32 %v11041_v63, %v9927_v62  ;;  %v11001_v56 = vld [vmem:[%s12386_s29 + $0x884] sm:$0xf0]  ;;  %v9904_v62 = vor.u32 %v11035_v51, %v9903_v50  ;;  %v9895_v63 = vld [vmem:[%s12386_s29 + $0x980] sm:$0xf] }
 0x29a   : > { %7751 = vmatpush.bf16.msrb.mxu2 %v9576_v5  ;;  %v9791_v5 = vld [vmem:[%s12386_s29 + $0x8b0] sm:$0xf]  ;;  %v9728_v12 = vor.u32 %v10991_v4, %v9727_v3  ;;  %v11063_v3 = vld [vmem:[%s12386_s29 + $0xa74] sm:$0xf0]  ;;  %v10199_v47 = vld [vmem:[%s12386_s29 + $0xbe0] sm:$0xf] }
 0x29b   : > { %7764 = vmatpush.bf16.msrb.mxu3 %v9640_v10  ;;  %7726 = vmatmul.bf16.vlgmr.msrb.gmra.mxu0 %v12715_v23  ;;  %v9919_v10 = vld [vmem:[%s12386_s29 + $0x9b0] sm:$0xf] }
 0x29c   : > { %7770 = vmatpush.bf16.msra.mxu0 %v9760_v11  ;;  %7739 = vmatmul.bf16.vlgmr.msrb.gmra.mxu1 %v12722_v31  ;;  %v11039_v11 = vld [vmem:[%s12386_s29 + $0x9b4] sm:$0xf0]  ;;  %v10079_v4 = vld [vmem:[%s12386_s29 + $0xaf0] sm:$0xf] }
 0x29d   : > { %7783 = vmatpush.bf16.msra.mxu1 %v9824_v13  ;;  %7752 = vmatmul.bf16.vlgmr.msrb.gmra.mxu2 %v12720_v28  ;;  %v9792_v13 = vor.u32 %v11007_v7, %v9791_v5  ;;  %v10143_v7 = vld [vmem:[%s12386_s29 + $0xb70] sm:$0xf] }
 0x29e   : > { %7796 = vmatpush.bf16.msra.mxu2 %v9888_v14  ;;  %7765 = vmatmul.bf16.vlgmr.msrb.gmra.mxu3 %v12726_v35  ;;  %v9856_v14 = vor.u32 %v11023_v9, %v9855_v8  ;;  %v11095_v8 = vld [vmem:[%s12386_s29 + $0xb74] sm:$0xf0]  ;;  %v4922_v9 = vunpack.c.l.b16 %v4364_v61 }
 0x29f   : > { %7809 = vmatpush.bf16.msra.mxu3 %v9952_v21  ;;  %v9920_v21 = vor.u32 %v11039_v11, %v9919_v10  ;;  %v9768_v10 = vor.u32 %v11001_v56, %v9767_v55  ;;  %v9832_v11 = vor.u32 %v11017_v60, %v9831_v59  ;;  %v10063_v55 = vld [vmem:[%s12386_s29 + $0xad0] sm:$0xf]  ;;  %v11091_v59 = vld [vmem:[%s12386_s29 + $0xb54] sm:$0xf0] }
 0x2a0   : > { %7771 = vmatpush.bf16.msra.mxu0 %v9752_v36  ;;  %v9720_v36 = vor.u32 %v10989_v16, %v9719_v15  ;;  %v4923_v15 = vunpack.c.h.b16 %v4364_v61  ;;  %v10191_v60 = vld [vmem:[%s12386_s29 + $0xbd0] sm:$0xf]  ;;  %v11107_v61 = vld [vmem:[%s12386_s29 + $0xbd4] sm:$0xf0] }
 0x2a1   : > { %7784 = vmatpush.bf16.msra.mxu1 %v9816_v37  ;;  %v9784_v37 = vor.u32 %v11005_v24, %v9783_v17 }
 0x2a2   : > { %7797 = vmatpush.bf16.msra.mxu2 %v9880_v39  ;;  %v9848_v39 = vor.u32 %v11021_v27, %v9847_v26  ;;  %v10144_v26 = vor.u32 %v11095_v8, %v10143_v7  ;;  %v10007_v27 = vld [vmem:[%s12386_s29 + $0xa60] sm:$0xf]  ;;  %v11089_v7 = vld [vmem:[%s12386_s29 + $0xb44] sm:$0xf0] }
 0x2a3   : > { %7810 = vmatpush.bf16.msra.mxu3 %v9944_v46  ;;  %v9912_v46 = vor.u32 %v11037_v34, %v9911_v32  ;;  %v11061_v32 = vld [vmem:[%s12386_s29 + $0xa64] sm:$0xf0]  ;;  %v10071_v34 = vld [vmem:[%s12386_s29 + $0xae0] sm:$0xf] }
 0x2a4   : > { %7772 = vmatpush.bf16.msra.mxu0 %v9744_v52  ;;  %v9703_v52 = vld [vmem:[%s12386_s29 + $0x800] sm:$0xf]  ;;  %v10008_v50 = vor.u32 %v11061_v32, %v10007_v27  ;;  %v10175_v27 = vld [vmem:[%s12386_s29 + $0xbb0] sm:$0xf]  ;;  %v11103_v32 = vld [vmem:[%s12386_s29 + $0xbb4] sm:$0xf0] }
 0x2a5   : > { %7785 = vmatpush.bf16.msra.mxu1 %v9808_v53  ;;  %v9712_v53 = vor.u32 %v10987_v43, %v9711_v40  ;;  %v10135_v40 = vld [vmem:[%s12386_s29 + $0xb60] sm:$0xf]  ;;  %v11093_v43 = vld [vmem:[%s12386_s29 + $0xb64] sm:$0xf0] }
 0x2a6   : > { %7798 = vmatpush.bf16.msra.mxu2 %v9872_v54  ;;  %v10985_v54 = vld [vmem:[%s12386_s29 + $0x804] sm:$0xf0]  ;;  %v10183_v8 = vld [vmem:[%s12386_s29 + $0xbc0] sm:$0xf] }
 0x2a7   : > { %7811 = vmatpush.bf16.msra.mxu3 %v9936_v58  ;;  %v9840_v58 = vor.u32 %v11019_v49, %v9839_v48  ;;  %v9704_v5 = vor.u32 %v10985_v54, %v9703_v52  ;;  %v11109_v48 = vld [vmem:[%s12386_s29 + $0xbe4] sm:$0xf0]  ;;  %v10136_v52 = vor.u32 %v11093_v43, %v10135_v40  ;;  %v11059_v54 = vld [vmem:[%s12386_s29 + $0xa54] sm:$0xf0] }
 0x2a8   : > { %7773 = vmatpush.bf16.msra.mxu0 %v9736_v0  ;;  %v11033_v0 = vld [vmem:[%s12386_s29 + $0x984] sm:$0xf0]  ;;  %v10200_v56 = vor.u32 %v11109_v48, %v10199_v47  ;;  %v10039_v47 = vld [vmem:[%s12386_s29 + $0xaa0] sm:$0xf] }
 0x2a9   : > { %7786 = vmatpush.bf16.msra.mxu1 %v9800_v1  ;;  %v4365_v1 = vld [vmem:[%s13675_s0 + $0x48] sm:$0xff]  ;;  %v9896_v16 = vor.u32 %v11033_v0, %v9895_v63  ;;  %v11053_v43 = vld [vmem:[%s12386_s29 + $0xa24] sm:$0xf0] }
 0x2aa   : > { %7799 = vmatpush.bf16.msra.mxu2 %v9864_v2  ;;  %v10015_v2 = vld [vmem:[%s12386_s29 + $0xa70] sm:$0xf] }
 0x2ab   : > { %7812 = vmatpush.bf16.msra.mxu3 %v9928_v6  ;;  %v11079_v6 = vld [vmem:[%s12386_s29 + $0xaf4] sm:$0xf0]  ;;  %v10016_v17 = vor.u32 %v11063_v3, %v10015_v2  ;;  %v11057_v2 = vld [vmem:[%s12386_s29 + $0xa44] sm:$0xf0]  ;;  %v10055_v3 = vld [vmem:[%s12386_s29 + $0xac0] sm:$0xf] }
 0x2ac   : > { %7774 = vmatpush.bf16.msra.mxu0 %v9728_v12  ;;  %v10207_v12 = vld [vmem:[%s12386_s29 + $0xbf0] sm:$0xf]  ;;  %v10080_v24 = vor.u32 %v11079_v6, %v10079_v4  ;;  %v10192_v4 = vor.u32 %v11107_v61, %v10191_v60  ;;  %v10119_v6 = vld [vmem:[%s12386_s29 + $0xb40] sm:$0xf]  ;;  %v11051_v61 = vld [vmem:[%s12386_s29 + $0xa14] sm:$0xf0] }
 0x2ad   : > { %7787 = vmatpush.bf16.msra.mxu1 %v9792_v13  ;;  %v11111_v13 = vld [vmem:[%s12386_s29 + $0xbf4] sm:$0xf0]  ;;  %v9967_v60 = vld [vmem:[%s12386_s29 + $0xa10] sm:$0xf] }
 0x2ae   : > { %7800 = vmatpush.bf16.msra.mxu2 %v9856_v14  ;;  %v4924_v14 = vunpack.c.l.b16 %v4365_v1 }
 0x2af   : > { %7813 = vmatpush.bf16.msra.mxu3 %v9920_v21  ;;  %v4925_v21 = vunpack.c.h.b16 %v4365_v1  ;;  %v9991_v1 = vld [vmem:[%s12386_s29 + $0xa40] sm:$0xf] }
 0x2b0   : > { %7775 = vmatpush.bf16.msra.mxu0 %v9720_v36  ;;  %v10208_v36 = vor.u32 %v11111_v13, %v10207_v12  ;;  %v12806_v45 = vpack.c.b16 %v4924_v14, %v4924_v14  ;;  %v10120_v13 = vor.u32 %v11089_v7, %v10119_v6  ;;  %v11055_v14 = vld [vmem:[%s12386_s29 + $0xa34] sm:$0xf0]  ;;  %v9959_v7 = vld [vmem:[%s12386_s29 + $0xa00] sm:$0xf] }
 0x2b1   : > { %7788 = vmatpush.bf16.msra.mxu1 %v9784_v37  ;;  %v12801_v37 = vpack.c.b16 %v4922_v9, %v4922_v9  ;;  %v12813_v49 = vpack.c.b16 %v4925_v21, %v4925_v21  ;;  %v11105_v9 = vld [vmem:[%s12386_s29 + $0xbc4] sm:$0xf0]  ;;  %v10111_v21 = vld [vmem:[%s12386_s29 + $0xb30] sm:$0xf]  ;;  %v11099_v6 = vld [vmem:[%s12386_s29 + $0xb94] sm:$0xf0] }
 0x2b2   : > { %7801 = vmatpush.bf16.msra.mxu2 %v9848_v39  ;;  %v11077_v39 = vld [vmem:[%s12386_s29 + $0xae4] sm:$0xf0] }
 0x2b3   : > { %7814 = vmatpush.bf16.msra.mxu3 %v9912_v46  ;;  %v12808_v46 = vpack.c.b16 %v4923_v15, %v4923_v15  ;;  %v10072_v51 = vor.u32 %v11077_v39, %v10071_v34  ;;  %v10047_v15 = vld [vmem:[%s12386_s29 + $0xab0] sm:$0xf] }
 0x2b4   : > { %7776 = vmatpush.bf16.msra.mxu0 %v9712_v53  ;;  %v9999_v53 = vld [vmem:[%s12386_s29 + $0xa50] sm:$0xf] }
 0x2b5   : > { %7789 = vmatpush.bf16.msra.mxu1 %v9776_v57  ;;  %v11075_v57 = vld [vmem:[%s12386_s29 + $0xad4] sm:$0xf0] }
 0x2b6   : > { %7802 = vmatpush.bf16.msra.mxu2 %v9840_v58  ;;  %v10127_v58 = vld [vmem:[%s12386_s29 + $0xb50] sm:$0xf]  ;;  %v10064_v63 = vor.u32 %v11075_v57, %v10063_v55  ;;  %v11101_v55 = vld [vmem:[%s12386_s29 + $0xba4] sm:$0xf0] }
 0x2b7   : > { %7815 = vmatpush.bf16.msra.mxu3 %v9904_v62  ;;  %v10000_v62 = vor.u32 %v11059_v54, %v9999_v53  ;;  %v10128_v0 = vor.u32 %v11091_v59, %v10127_v58  ;;  %v11085_v53 = vld [vmem:[%s12386_s29 + $0xb24] sm:$0xf0]  ;;  %v10167_v54 = vld [vmem:[%s12386_s29 + $0xba0] sm:$0xf] }
 0x2b8   : > { %7777 = vmatpush.bf16.msra.mxu0 %v9704_v5  ;;  %v11073_v5 = vld [vmem:[%s12386_s29 + $0xac4] sm:$0xf0] }
 0x2b9   : > { %7790 = vmatpush.bf16.msra.mxu1 %v9768_v10  ;;  %v9992_v10 = vor.u32 %v11057_v2, %v9991_v1  ;;  %v10056_v12 = vor.u32 %v11073_v5, %v10055_v3  ;;  %v10168_v1 = vor.u32 %v11101_v55, %v10167_v54  ;;  %v11067_v2 = vld [vmem:[%s12386_s29 + $0xa94] sm:$0xf0]  ;;  %v10095_v3 = vld [vmem:[%s12386_s29 + $0xb10] sm:$0xf] }
 0x2ba   : > { %7803 = vmatpush.bf16.msra.mxu2 %v9832_v11  ;;  %v9983_v11 = vld [vmem:[%s12386_s29 + $0xa30] sm:$0xf] }
 0x2bb   : > { %7816 = vmatpush.bf16.msra.mxu3 %v9896_v16  ;;  %7778 = vmatmul.bf16.vlgmr.msra.gmra.mxu0 %v12801_v37  ;;  %v11071_v16 = vld [vmem:[%s12386_s29 + $0xab4] sm:$0xf0]  ;;  %v9984_v34 = vor.u32 %v11055_v14, %v9983_v11  ;;  %v7571_v57 = vpop.f32.mrf.mxu0  ;;  %v10159_v5 = vld [vmem:[%s12386_s29 + $0xb90] sm:$0xf]  ;;  %v10023_v11 = vld [vmem:[%s12386_s29 + $0xa80] sm:$0xf] }
 0x2bc   : > { %7822 = vmatpush.bf16.msrb.mxu0 %v10016_v17  ;;  %7791 = vmatmul.bf16.vlgmr.msra.gmra.mxu1 %v12808_v46  ;;  %v10184_v17 = vor.u32 %v11105_v9, %v10183_v8  ;;  %v10048_v39 = vor.u32 %v11071_v16, %v10047_v15  ;;  %v9968_v9 = vor.u32 %v11051_v61, %v9967_v60  ;;  %v10087_v15 = vld [vmem:[%s12386_s29 + $0xb00] sm:$0xf]  ;;  %v11081_v16 = vld [vmem:[%s12386_s29 + $0xb04] sm:$0xf0] }
 0x2bd   : > { %7835 = vmatpush.bf16.msrb.mxu1 %v10080_v24  ;;  %7804 = vmatmul.bf16.vlgmr.msra.gmra.mxu2 %v12806_v45  ;;  %v11087_v24 = vld [vmem:[%s12386_s29 + $0xb34] sm:$0xf0] }
 0x2be   : > { %7848 = vmatpush.bf16.msrb.mxu2 %v10144_v26  ;;  %7817 = vmatmul.bf16.vlgmr.msra.gmra.mxu3 %v12813_v49  ;;  %v4884_v26 = vld [vmem:[%s12844_s30] sm:$0x3]  ;;  %v10112_v40 = vor.u32 %v11087_v24, %v10111_v21  ;;  %v10160_v24 = vor.u32 %v11099_v6, %v10159_v5  ;;  %v10327_v5 = vld [vmem:[%s12386_s29 + $0xce0] sm:$0xf] }
 0x2bf   : > { %7861 = vmatpush.bf16.msrb.mxu3 %v10208_v36  ;;  %v9975_v36 = vld [vmem:[%s12386_s29 + $0xa20] sm:$0xf]  ;;  %v4886_v48 = vperm.slane %v4884_v26, 0 }
 0x2c0   : > { %7823 = vmatpush.bf16.msrb.mxu0 %v10008_v50  ;;  %v10176_v50 = vor.u32 %v11103_v32, %v10175_v27  ;;  %v7597_v21 = vpop.f32.mrf.mxu2  ;;  %v10151_v26 = vld [vmem:[%s12386_s29 + $0xb80] sm:$0xf]  ;;  %v11097_v27 = vld [vmem:[%s12386_s29 + $0xb84] sm:$0xf0]  ;;  %v4367_v32 = vld [vmem:[%s13675_s0 + $0x58] sm:$0xff] }
 0x2c1   : > { %7836 = vmatpush.bf16.msrb.mxu1 %v10072_v51  ;;  %v11069_v51 = vld [vmem:[%s12386_s29 + $0xaa4] sm:$0xf0] }
 0x2c2   : > { %7849 = vmatpush.bf16.msrb.mxu2 %v10136_v52  ;;  %v10103_v52 = vld [vmem:[%s12386_s29 + $0xb20] sm:$0xf]  ;;  %v10040_v58 = vor.u32 %v11069_v51, %v10039_v47  ;;  %v11159_v51 = vld [vmem:[%s12386_s29 + $0xd74] sm:$0xf0] }
 0x2c3   : > { %7862 = vmatpush.bf16.msrb.mxu3 %v10200_v56  ;;  %v9976_v56 = vor.u32 %v11053_v43, %v9975_v36  ;;  %v10104_v59 = vor.u32 %v11085_v53, %v10103_v52  ;;  %v7610_v36 = vpop.f32.mrf.mxu3  ;;  %v10335_v43 = vld [vmem:[%s12386_s29 + $0xcf0] sm:$0xf]  ;;  %v7573_v54 = vpop.f32.mrf.mxu0 }
 0x2c4   : > { %7824 = vmatpush.bf16.msrb.mxu0 %v10000_v62  ;;  %v10031_v62 = vld [vmem:[%s12386_s29 + $0xa90] sm:$0xf]  ;;  %v10247_v54 = vld [vmem:[%s12386_s29 + $0xc40] sm:$0xf] }
 0x2c5   : > { %7837 = vmatpush.bf16.msrb.mxu1 %v10064_v63  ;;  %v7572_v63 = vadd.f32 %v7571_v57, %v4886_v48  ;;  %v11143_v48 = vld [vmem:[%s12386_s29 + $0xcf4] sm:$0xf0]  ;;  %v10463_v57 = vld [vmem:[%s12386_s29 + $0xdf0] sm:$0xf] }
 0x2c6   : > { %7850 = vmatpush.bf16.msrb.mxu2 %v10128_v0  ;;  %v7584_v0 = vpop.f32.mrf.mxu1 }
 0x2c7   : > { %7863 = vmatpush.bf16.msrb.mxu3 %v10192_v4  ;;  %v11083_v4 = vld [vmem:[%s12386_s29 + $0xb14] sm:$0xf0]  ;;  %v7585_v8 = vadd.f32 %v7584_v0, %v7572_v63  ;;  %v4929_v0 = vunpack.c.h.b16 %v4367_v32 }
 0x2c8   : > { %7825 = vmatpush.bf16.msrb.mxu0 %v9992_v10  ;;  %v11049_v10 = vld [vmem:[%s12386_s29 + $0xa04] sm:$0xf0]  ;;  %v10096_v14 = vor.u32 %v11083_v4, %v10095_v3  ;;  %v10263_v3 = vld [vmem:[%s12386_s29 + $0xc60] sm:$0xf] }
 0x2c9   : > { %7838 = vmatpush.bf16.msrb.mxu1 %v10056_v12  ;;  %v11065_v12 = vld [vmem:[%s12386_s29 + $0xa84] sm:$0xf0]  ;;  %v9960_v47 = vor.u32 %v11049_v10, %v9959_v7 }
 0x2ca   : > { %7851 = vmatpush.bf16.msrb.mxu2 %v10120_v13  ;;  %v10032_v13 = vor.u32 %v11067_v2, %v10031_v62  ;;  %v10024_v55 = vor.u32 %v11065_v12, %v10023_v11  ;;  %v10152_v62 = vor.u32 %v11097_v27, %v10151_v26  ;;  %v11125_v4 = vld [vmem:[%s12386_s29 + $0xc64] sm:$0xf0]  ;;  %v10255_v27 = vld [vmem:[%s12386_s29 + $0xc50] sm:$0xf] }
 0x2cb   : > { %7864 = vmatpush.bf16.msrb.mxu3 %v10184_v17  ;;  %v4366_v17 = vld [vmem:[%s13675_s0 + $0x50] sm:$0xff] }
 0x2cc   : > { %7826 = vmatpush.bf16.msrb.mxu0 %v9984_v34  ;;  %v7598_v34 = vadd.f32 %v7597_v21, %v7585_v8  ;;  %v4926_v52 = vunpack.c.l.b16 %v4366_v17  ;;  %v4927_v60 = vunpack.c.h.b16 %v4366_v17  ;;  %v11141_v8 = vld [vmem:[%s12386_s29 + $0xce4] sm:$0xf0]  ;;  %v10264_v17 = vor.u32 %v11125_v4, %v10263_v3  ;;  %v7612_v21 = vpop.f32.mrf.mxu3  ;;  %v10239_v3 = vld [vmem:[%s12386_s29 + $0xc30] sm:$0xf]  ;;  %v11119_v4 = vld [vmem:[%s12386_s29 + $0xc34] sm:$0xf0] }
 0x2cd   : > { %7839 = vmatpush.bf16.msrb.mxu1 %v10048_v39  ;;  %v10271_v39 = vld [vmem:[%s12386_s29 + $0xc70] sm:$0xf]  ;;  %v11157_v10 = vld [vmem:[%s12386_s29 + $0xd64] sm:$0xf0] }
 0x2ce   : > { %7852 = vmatpush.bf16.msrb.mxu2 %v10112_v40  ;;  %v11127_v40 = vld [vmem:[%s12386_s29 + $0xc74] sm:$0xf0]  ;;  %v12891_v53 = vadd.f32 %v7610_v36, %v7598_v34  ;;  %v7586_v61 = vpop.f32.mrf.mxu1  ;;  %v12898_v7 = vpack.c.b16 %v4926_v52, %v4926_v52  ;;  %v12905_v12 = vpack.c.b16 %v4927_v60, %v4927_v60  ;;  %v10319_v34 = vld [vmem:[%s12386_s29 + $0xcd0] sm:$0xf]  ;;  %v11153_v60 = vld [vmem:[%s12386_s29 + $0xd44] sm:$0xf0] }
 0x2cf   : > { %7865 = vmatpush.bf16.msrb.mxu3 %v10176_v50  ;;  %v10399_v50 = vld [vmem:[%s12386_s29 + $0xd70] sm:$0xf]  ;;  %v10272_v63 = vor.u32 %v11127_v40, %v10271_v39  ;;  %v11139_v39 = vld [vmem:[%s12386_s29 + $0xcd4] sm:$0xf0]  ;;  %v10439_v61 = vld [vmem:[%s12386_s29 + $0xdc0] sm:$0xf] }
 0x2d0   : > { %7827 = vmatpush.bf16.msrb.mxu0 %v9976_v56  ;;  %v10088_v56 = vor.u32 %v11081_v16, %v10087_v15  ;;  %v10400_v2 = vor.u32 %v11159_v51, %v10399_v50  ;;  %v7599_v15 = vpop.f32.mrf.mxu2  ;;  %v12909_v16 = vpack.c.b16 %v4929_v0, %v4929_v0  ;;  %v10383_v40 = vld [vmem:[%s12386_s29 + $0xd50] sm:$0xf]  ;;  %v10320_v51 = vor.u32 %v11139_v39, %v10319_v34  ;;  %v10295_v34 = vld [vmem:[%s12386_s29 + $0xca0] sm:$0xf] }
 0x2d1   : > { %7840 = vmatpush.bf16.msrb.mxu1 %v10040_v58  ;;  %v11175_v58 = vld [vmem:[%s12386_s29 + $0xdf4] sm:$0xf0]  ;;  %v10431_v15 = vld [vmem:[%s12386_s29 + $0xdb0] sm:$0xf] }
 0x2d2   : > { %7853 = vmatpush.bf16.msrb.mxu2 %v10104_v59  ;;  %v4928_v59 = vunpack.c.l.b16 %v4367_v32  ;;  %v10464_v6 = vor.u32 %v11175_v58, %v10463_v57  ;;  %v11123_v32 = vld [vmem:[%s12386_s29 + $0xc54] sm:$0xf0]  ;;  %v11137_v58 = vld [vmem:[%s12386_s29 + $0xcc4] sm:$0xf0] }
 0x2d3   : > { %7866 = vmatpush.bf16.msrb.mxu3 %v10168_v1  ;;  %v10336_v1 = vor.u32 %v11143_v48, %v10335_v43  ;;  %v11155_v43 = vld [vmem:[%s12386_s29 + $0xd54] sm:$0xf0]  ;;  %v10256_v50 = vor.u32 %v11123_v32, %v10255_v27  ;;  %v10231_v27 = vld [vmem:[%s12386_s29 + $0xc20] sm:$0xf]  ;;  %v11117_v32 = vld [vmem:[%s12386_s29 + $0xc24] sm:$0xf0] }
 0x2d4   : > { %7828 = vmatpush.bf16.msrb.mxu0 %v9968_v9  ;;  %v10391_v9 = vld [vmem:[%s12386_s29 + $0xd60] sm:$0xf]  ;;  %v12903_v11 = vpack.c.b16 %v4928_v59, %v4928_v59  ;;  %v11171_v48 = vld [vmem:[%s12386_s29 + $0xdd4] sm:$0xf0]  ;;  %v10384_v52 = vor.u32 %v11155_v43, %v10383_v40  ;;  %v11133_v40 = vld [vmem:[%s12386_s29 + $0xca4] sm:$0xf0] }
 0x2d5   : > { %7841 = vmatpush.bf16.msrb.mxu1 %v10032_v13  ;;  %v10455_v13 = vld [vmem:[%s12386_s29 + $0xde0] sm:$0xf]  ;;  %v10392_v26 = vor.u32 %v11157_v10, %v10391_v9  ;;  %v11135_v10 = vld [vmem:[%s12386_s29 + $0xcb4] sm:$0xf0] }
 0x2d6   : > { %7854 = vmatpush.bf16.msrb.mxu2 %v10096_v14  ;;  %v11173_v14 = vld [vmem:[%s12386_s29 + $0xde4] sm:$0xf0]  ;;  %v10375_v59 = vld [vmem:[%s12386_s29 + $0xd40] sm:$0xf] }
 0x2d7   : > { %7867 = vmatpush.bf16.msrb.mxu3 %v10160_v24  ;;  %v10328_v24 = vor.u32 %v11141_v8, %v10327_v5  ;;  %v10456_v36 = vor.u32 %v11173_v14, %v10455_v13  ;;  %v10303_v5 = vld [vmem:[%s12386_s29 + $0xcb0] sm:$0xf]  ;;  %v11151_v14 = vld [vmem:[%s12386_s29 + $0xd34] sm:$0xf0]  ;;  %v10359_v43 = vld [vmem:[%s12386_s29 + $0xd20] sm:$0xf] }
 0x2d8   : > { %7829 = vmatpush.bf16.msrb.mxu0 %v9960_v47  ;;  %v10447_v47 = vld [vmem:[%s12386_s29 + $0xdd0] sm:$0xf]  ;;  %v7623_v0 = vpop.f32.mrf.mxu0 }
 0x2d9   : > { %7842 = vmatpush.bf16.msrb.mxu1 %v10024_v55  ;;  %v11121_v55 = vld [vmem:[%s12386_s29 + $0xc44] sm:$0xf0]  ;;  %v10448_v57 = vor.u32 %v11171_v48, %v10447_v47  ;;  %v7636_v8 = vpop.f32.mrf.mxu1  ;;  %v10367_v13 = vld [vmem:[%s12386_s29 + $0xd30] sm:$0xf] }
 0x2da   : > { %7855 = vmatpush.bf16.msrb.mxu2 %v10088_v56  ;;  %v10311_v56 = vld [vmem:[%s12386_s29 + $0xcc0] sm:$0xf]  ;;  %v11149_v47 = vld [vmem:[%s12386_s29 + $0xd24] sm:$0xf0] }
 0x2db   : > { %7868 = vmatpush.bf16.msrb.mxu3 %v10152_v62  ;;  %7830 = vmatmul.bf16.vlgmr.msrb.gmra.mxu0 %v12898_v7  ;;  %v11169_v62 = vld [vmem:[%s12386_s29 + $0xdc4] sm:$0xf0] }
 0x2dc   : > { %7874 = vmatpush.bf16.msra.mxu0 %v10272_v63  ;;  %7843 = vmatmul.bf16.vlgmr.msrb.gmra.mxu1 %v12905_v12  ;;  %v10248_v63 = vor.u32 %v11121_v55, %v10247_v54  ;;  %v10440_v9 = vor.u32 %v11169_v62, %v10439_v61  ;;  %v10232_v54 = vor.u32 %v11117_v32, %v10231_v27  ;;  %v10287_v61 = vld [vmem:[%s12386_s29 + $0xc90] sm:$0xf]  ;;  %v11161_v27 = vld [vmem:[%s12386_s29 + $0xd84] sm:$0xf0]  ;;  %v4369_v32 = vld [vmem:[%s13675_s0 + $0x68] sm:$0xff] }
 0x2dd   : > { %7887 = vmatpush.bf16.msra.mxu1 %v10336_v1  ;;  %7856 = vmatmul.bf16.vlgmr.msrb.gmra.mxu2 %v12903_v11  ;;  %v10312_v1 = vor.u32 %v11137_v58, %v10311_v56  ;;  %v10360_v58 = vor.u32 %v11149_v47, %v10359_v43  ;;  %v11207_v47 = vld [vmem:[%s12386_s29 + $0xef4] sm:$0xf0] }
 0x2de   : > { %7900 = vmatpush.bf16.msra.mxu2 %v10400_v2  ;;  %7869 = vmatmul.bf16.vlgmr.msrb.gmra.mxu3 %v12909_v16  ;;  %v10376_v2 = vor.u32 %v11153_v60, %v10375_v59  ;;  %v10223_v59 = vld [vmem:[%s12386_s29 + $0xc10] sm:$0xf]  ;;  %v11115_v60 = vld [vmem:[%s12386_s29 + $0xc14] sm:$0xf0] }
 0x2df   : > { %7913 = vmatpush.bf16.msra.mxu3 %v10464_v6  ;;  %v7624_v6 = vadd.f32 %v7623_v0, %v12891_v53  ;;  %v10304_v53 = vor.u32 %v11135_v10, %v10303_v5  ;;  %v11131_v0 = vld [vmem:[%s12386_s29 + $0xc94] sm:$0xf0]  ;;  %v10215_v5 = vld [vmem:[%s12386_s29 + $0xc00] sm:$0xf]  ;;  %v11129_v10 = vld [vmem:[%s12386_s29 + $0xc84] sm:$0xf0] }
 0x2e0   : > { %7875 = vmatpush.bf16.msra.mxu0 %v10264_v17  ;;  %v11167_v17 = vld [vmem:[%s12386_s29 + $0xdb4] sm:$0xf0]  ;;  %v7625_v56 = vpop.f32.mrf.mxu0 }
 0x2e1   : > { %7888 = vmatpush.bf16.msra.mxu1 %v10328_v24  ;;  %v7637_v21 = vadd.f32 %v7636_v8, %v7624_v6  ;;  %v10240_v24 = vor.u32 %v11119_v4, %v10239_v3  ;;  %v10432_v39 = vor.u32 %v11167_v17, %v10431_v15  ;;  %v7638_v62 = vpop.f32.mrf.mxu1  ;;  %v10415_v3 = vld [vmem:[%s12386_s29 + $0xd90] sm:$0xf]  ;;  %v11163_v4 = vld [vmem:[%s12386_s29 + $0xd94] sm:$0xf0]  ;;  %v10224_v6 = vor.u32 %v11115_v60, %v10223_v59  ;;  %v11113_v8 = vld [vmem:[%s12386_s29 + $0xc04] sm:$0xf0] }
 0x2e2   : > { %7901 = vmatpush.bf16.msra.mxu2 %v10392_v26  ;;  %v10368_v26 = vor.u32 %v11151_v14, %v10367_v13  ;;  %v10288_v13 = vor.u32 %v11131_v0, %v10287_v61  ;;  %v10343_v15 = vld [vmem:[%s12386_s29 + $0xd00] sm:$0xf]  ;;  %v11145_v17 = vld [vmem:[%s12386_s29 + $0xd04] sm:$0xf0]  ;;  %v10216_v43 = vor.u32 %v11113_v8, %v10215_v5  ;;  %v10719_v56 = vld [vmem:[%s12386_s29 + $0xff0] sm:$0xf]  ;;  %v4933_v62 = vunpack.c.h.b16 %v4369_v32 }
 0x2e3   : > { %7914 = vmatpush.bf16.msra.mxu3 %v10456_v36  ;;  %v7649_v36 = vpop.f32.mrf.mxu2  ;;  %v10647_v8 = vld [vmem:[%s12386_s29 + $0xf60] sm:$0xf] }
 0x2e4   : > { %7876 = vmatpush.bf16.msra.mxu0 %v10256_v50  ;;  %v7650_v48 = vadd.f32 %v7649_v36, %v7637_v21  ;;  %v7662_v50 = vpop.f32.mrf.mxu3  ;;  %v4368_v21 = vld [vmem:[%s13675_s0 + $0x60] sm:$0xff]  ;;  %v10527_v36 = vld [vmem:[%s12386_s29 + $0xe70] sm:$0xf] }
 0x2e5   : > { %7889 = vmatpush.bf16.msra.mxu1 %v10320_v51  ;;  %v10423_v51 = vld [vmem:[%s12386_s29 + $0xda0] sm:$0xf]  ;;  %v4931_v59 = vunpack.c.h.b16 %v4368_v21 }
 0x2e6   : > { %7902 = vmatpush.bf16.msra.mxu2 %v10384_v52  ;;  %v11165_v52 = vld [vmem:[%s12386_s29 + $0xda4] sm:$0xf0]  ;;  %v12948_v55 = vadd.f32 %v7662_v50, %v7650_v48  ;;  %v10655_v48 = vld [vmem:[%s12386_s29 + $0xf70] sm:$0xf]  ;;  %v11223_v50 = vld [vmem:[%s12386_s29 + $0xf74] sm:$0xf0] }
 0x2e7   : > { %7915 = vmatpush.bf16.msra.mxu3 %v10448_v57  ;;  %v10296_v57 = vor.u32 %v11133_v40, %v10295_v34  ;;  %v10591_v40 = vld [vmem:[%s12386_s29 + $0xef0] sm:$0xf]  ;;  %v10656_v0 = vor.u32 %v11223_v50, %v10655_v48 }
 0x2e8   : > { %7877 = vmatpush.bf16.msra.mxu0 %v10248_v63  ;;  %v10424_v63 = vor.u32 %v11165_v52, %v10423_v51  ;;  %v4930_v51 = vunpack.c.l.b16 %v4368_v21 }
 0x2e9   : > { %7890 = vmatpush.bf16.msra.mxu1 %v10312_v1  ;;  %v10351_v1 = vld [vmem:[%s12386_s29 + $0xd10] sm:$0xf] }
 0x2ea   : > { %7903 = vmatpush.bf16.msra.mxu2 %v10376_v2  ;;  %v11147_v2 = vld [vmem:[%s12386_s29 + $0xd14] sm:$0xf0]  ;;  %v12983_v5 = vpack.c.b16 %v4930_v51, %v4930_v51 }
 0x2eb   : > { %7916 = vmatpush.bf16.msra.mxu3 %v10440_v9  ;;  %v10279_v9 = vld [vmem:[%s12386_s29 + $0xc80] sm:$0xf]  ;;  %v10352_v14 = vor.u32 %v11147_v2, %v10351_v1  ;;  %v11189_v2 = vld [vmem:[%s12386_s29 + $0xe64] sm:$0xf0] }
 0x2ec   : > { %7878 = vmatpush.bf16.msra.mxu0 %v10240_v24  ;;  %v7651_v24 = vpop.f32.mrf.mxu2  ;;  %v7664_v34 = vpop.f32.mrf.mxu3  ;;  %v10280_v52 = vor.u32 %v11129_v10, %v10279_v9  ;;  %v10519_v1 = vld [vmem:[%s12386_s29 + $0xe60] sm:$0xf]  ;;  %v11221_v9 = vld [vmem:[%s12386_s29 + $0xf64] sm:$0xf0] }
 0x2ed   : > { %7891 = vmatpush.bf16.msra.mxu1 %v10304_v53  ;;  %v10416_v53 = vor.u32 %v11163_v4, %v10415_v3  ;;  %v10583_v3 = vld [vmem:[%s12386_s29 + $0xee0] sm:$0xf]  ;;  %v10520_v21 = vor.u32 %v11189_v2, %v10519_v1 }
 0x2ee   : > { %7904 = vmatpush.bf16.msra.mxu2 %v10368_v26  ;;  %v10407_v26 = vld [vmem:[%s12386_s29 + $0xd80] sm:$0xf] }
 0x2ef   : > { %7917 = vmatpush.bf16.msra.mxu3 %v10432_v39  ;;  %v11191_v39 = vld [vmem:[%s12386_s29 + $0xe74] sm:$0xf0]  ;;  %v10408_v60 = vor.u32 %v11161_v27, %v10407_v26  ;;  %v10511_v26 = vld [vmem:[%s12386_s29 + $0xe50] sm:$0xf] }
 0x2f0   : > { %7879 = vmatpush.bf16.msra.mxu0 %v10232_v54  ;;  %v10344_v54 = vor.u32 %v11145_v17, %v10343_v15  ;;  %v10528_v61 = vor.u32 %v11191_v39, %v10527_v36  ;;  %v11237_v15 = vld [vmem:[%s12386_s29 + $0xfe4] sm:$0xf0]  ;;  %v12994_v17 = vpack.c.b16 %v4933_v62, %v4933_v62  ;;  %v11187_v27 = vld [vmem:[%s12386_s29 + $0xe54] sm:$0xf0]  ;;  %v10639_v39 = vld [vmem:[%s12386_s29 + $0xf50] sm:$0xf] }
 0x2f1   : > { %7892 = vmatpush.bf16.msra.mxu1 %v10296_v57  ;;  %v11239_v57 = vld [vmem:[%s12386_s29 + $0xff4] sm:$0xf0]  ;;  %v10512_v48 = vor.u32 %v11187_v27, %v10511_v26  ;;  %v10695_v62 = vld [vmem:[%s12386_s29 + $0xfc0] sm:$0xf] }
 0x2f2   : > { %7905 = vmatpush.bf16.msra.mxu2 %v10360_v58  ;;  %v4932_v58 = vunpack.c.l.b16 %v4369_v32  ;;  %v10720_v4 = vor.u32 %v11239_v57, %v10719_v56  ;;  %v10575_v32 = vld [vmem:[%s12386_s29 + $0xed0] sm:$0xf]  ;;  %v11203_v36 = vld [vmem:[%s12386_s29 + $0xed4] sm:$0xf0]  ;;  %v10567_v56 = vld [vmem:[%s12386_s29 + $0xec0] sm:$0xf] }
 0x2f3   : > { %7918 = vmatpush.bf16.msra.mxu3 %v10424_v63  ;;  %v10592_v63 = vor.u32 %v11207_v47, %v10591_v40  ;;  %v11219_v40 = vld [vmem:[%s12386_s29 + $0xf54] sm:$0xf0]  ;;  %v10576_v50 = vor.u32 %v11203_v36, %v10575_v32  ;;  %v10487_v36 = vld [vmem:[%s12386_s29 + $0xe20] sm:$0xf] }
 0x2f4   : > { %7880 = vmatpush.bf16.msra.mxu0 %v10224_v6  ;;  %v11205_v6 = vld [vmem:[%s12386_s29 + $0xee4] sm:$0xf0]  ;;  %v12988_v10 = vpack.c.b16 %v4932_v58, %v4932_v58  ;;  %v11235_v47 = vld [vmem:[%s12386_s29 + $0xfd4] sm:$0xf0]  ;;  %v10640_v51 = vor.u32 %v11219_v40, %v10639_v39  ;;  %v10551_v40 = vld [vmem:[%s12386_s29 + $0xea0] sm:$0xf] }
 0x2f5   : > { %7893 = vmatpush.bf16.msra.mxu1 %v10288_v13  ;;  %v12990_v13 = vpack.c.b16 %v4931_v59, %v4931_v59  ;;  %v10584_v24 = vor.u32 %v11205_v6, %v10583_v3  ;;  %v11201_v58 = vld [vmem:[%s12386_s29 + $0xec4] sm:$0xf0]  ;;  %v10631_v59 = vld [vmem:[%s12386_s29 + $0xf40] sm:$0xf]  ;;  %v10495_v6 = vld [vmem:[%s12386_s29 + $0xe30] sm:$0xf] }
 0x2f6   : > { %7906 = vmatpush.bf16.msra.mxu2 %v10352_v14  ;;  %v10711_v14 = vld [vmem:[%s12386_s29 + $0xfe0] sm:$0xf]  ;;  %v10568_v3 = vor.u32 %v11201_v58, %v10567_v56  ;;  %v11231_v26 = vld [vmem:[%s12386_s29 + $0xfb4] sm:$0xf0]  ;;  %v11181_v39 = vld [vmem:[%s12386_s29 + $0xe24] sm:$0xf0] }
 0x2f7   : > { %7919 = vmatpush.bf16.msra.mxu3 %v10416_v53  ;;  %v10648_v53 = vor.u32 %v11221_v9, %v10647_v8  ;;  %v10712_v34 = vor.u32 %v11237_v15, %v10711_v14  ;;  %v11183_v8 = vld [vmem:[%s12386_s29 + $0xe34] sm:$0xf0]  ;;  %v10559_v9 = vld [vmem:[%s12386_s29 + $0xeb0] sm:$0xf]  ;;  %v10679_v56 = vld [vmem:[%s12386_s29 + $0xfa0] sm:$0xf] }
 0x2f8   : > { %7881 = vmatpush.bf16.msra.mxu0 %v10216_v43  ;;  %v10703_v43 = vld [vmem:[%s12386_s29 + $0xfd0] sm:$0xf]  ;;  %v10496_v27 = vor.u32 %v11183_v8, %v10495_v6  ;;  %v11211_v8 = vld [vmem:[%s12386_s29 + $0xf14] sm:$0xf0] }
 0x2f9   : > { %7894 = vmatpush.bf16.msra.mxu1 %v10280_v52  ;;  %v10503_v52 = vld [vmem:[%s12386_s29 + $0xe40] sm:$0xf]  ;;  %v10704_v57 = vor.u32 %v11235_v47, %v10703_v43  ;;  %v7688_v2 = vpop.f32.mrf.mxu1  ;;  %v10607_v6 = vld [vmem:[%s12386_s29 + $0xf10] sm:$0xf] }
 0x2fa   : > { %7907 = vmatpush.bf16.msra.mxu2 %v10344_v54  ;;  %v11185_v54 = vld [vmem:[%s12386_s29 + $0xe44] sm:$0xf0] }
 0x2fb   : > { %7920 = vmatpush.bf16.msra.mxu3 %v10408_v60  ;;  %7882 = vmatmul.bf16.vlgmr.msra.gmra.mxu0 %v12983_v5  ;;  %v11217_v60 = vld [vmem:[%s12386_s29 + $0xf44] sm:$0xf0]  ;;  %v10504_v1 = vor.u32 %v11185_v54, %v10503_v52 }
 0x2fc   : > { %7926 = vmatpush.bf16.msrb.mxu0 %v10528_v61  ;;  %7895 = vmatmul.bf16.vlgmr.msra.gmra.mxu1 %v12990_v13  ;;  %v7675_v61 = vpop.f32.mrf.mxu0 }
 0x2fd   : > { %7939 = vmatpush.bf16.msrb.mxu1 %v10592_v63  ;;  %7908 = vmatmul.bf16.vlgmr.msra.gmra.mxu2 %v12988_v10  ;;  %v11233_v63 = vld [vmem:[%s12386_s29 + $0xfc4] sm:$0xf0] }
 0x2fe   : > { %7952 = vmatpush.bf16.msrb.mxu2 %v10656_v0  ;;  %7921 = vmatmul.bf16.vlgmr.msra.gmra.mxu3 %v12994_v17  ;;  %v7676_v0 = vadd.f32 %v7675_v61, %v12948_v55  ;;  %v10696_v14 = vor.u32 %v11233_v63, %v10695_v62  ;;  %v11215_v55 = vld [vmem:[%s12386_s29 + $0xf34] sm:$0xf0] }
 0x2ff   : > { %7965 = vmatpush.bf16.msrb.mxu3 %v10720_v4  ;;  %v10632_v4 = vor.u32 %v11217_v60, %v10631_v59  ;;  %v10488_v59 = vor.u32 %v11181_v39, %v10487_v36  ;;  %v4370_v36 = vld [vmem:[%s13675_s0 + $0x70] sm:$0xff] }
 0x300   : > { %7927 = vmatpush.bf16.msrb.mxu0 %v10520_v21  ;;  %v7689_v15 = vadd.f32 %v7688_v2, %v7676_v0  ;;  %v11199_v21 = vld [vmem:[%s12386_s29 + $0xeb4] sm:$0xf0]  ;;  %v7701_v47 = vpop.f32.mrf.mxu2  ;;  %v10479_v0 = vld [vmem:[%s12386_s29 + $0xe10] sm:$0xf] }
 0x301   : > { %7940 = vmatpush.bf16.msrb.mxu1 %v10584_v24  ;;  %v10623_v24 = vld [vmem:[%s12386_s29 + $0xf30] sm:$0xf]  ;;  %v10560_v32 = vor.u32 %v11199_v21, %v10559_v9  ;;  %v7714_v54 = vpop.f32.mrf.mxu3  ;;  %v7690_v60 = vpop.f32.mrf.mxu1 }
 0x302   : > { %7953 = vmatpush.bf16.msrb.mxu2 %v10648_v53  ;;  %v10687_v53 = vld [vmem:[%s12386_s29 + $0xfb0] sm:$0xf]  ;;  %v7702_v52 = vadd.f32 %v7701_v47, %v7689_v15  ;;  %v10471_v15 = vld [vmem:[%s12386_s29 + $0xe00] sm:$0xf]  ;;  %v4934_v60 = vunpack.c.l.b16 %v4370_v36 }
 0x303   : > { %7966 = vmatpush.bf16.msrb.mxu3 %v10712_v34  ;;  %v10624_v34 = vor.u32 %v11215_v55, %v10623_v24  ;;  %v10688_v43 = vor.u32 %v11231_v26, %v10687_v53  ;;  %v10543_v2 = vld [vmem:[%s12386_s29 + $0xe90] sm:$0xf]  ;;  %v11177_v24 = vld [vmem:[%s12386_s29 + $0xe04] sm:$0xf0]  ;;  %v10535_v55 = vld [vmem:[%s12386_s29 + $0xe80] sm:$0xf] }
 0x304   : > { %7928 = vmatpush.bf16.msrb.mxu0 %v10512_v48  ;;  %v11197_v48 = vld [vmem:[%s12386_s29 + $0xea4] sm:$0xf0]  ;;  %v7677_v58 = vpop.f32.mrf.mxu0  ;;  %v13033_v61 = vadd.f32 %v7714_v54, %v7702_v52  ;;  %v10671_v9 = vld [vmem:[%s12386_s29 + $0xf90] sm:$0xf]  ;;  %v10758_v52 = vld [vmem:[%s12386_s29 + $0xf4] sm:$0xf] }
 0x305   : > { %7941 = vmatpush.bf16.msrb.mxu1 %v10576_v50  ;;  %v10615_v50 = vld [vmem:[%s12386_s29 + $0xf20] sm:$0xf]  ;;  %v10552_v62 = vor.u32 %v11197_v48, %v10551_v40  ;;  %v11193_v53 = vld [vmem:[%s12386_s29 + $0xe84] sm:$0xf0]  ;;  %v4371_v47 = vld [vmem:[%s13675_s0 + $0x78] sm:$0xff] }
 0x306   : > { %7954 = vmatpush.bf16.msrb.mxu2 %v10640_v51  ;;  %v11213_v51 = vld [vmem:[%s12386_s29 + $0xf24] sm:$0xf0]  ;;  %v10663_v40 = vld [vmem:[%s12386_s29 + $0xf80] sm:$0xf]  ;;  %v10774_v58 = vld [vmem:[%s12386_s29 + $0x174] sm:$0xf] }
 0x307   : > { %7967 = vmatpush.bf16.msrb.mxu3 %v10704_v57  ;;  %v11229_v57 = vld [vmem:[%s12386_s29 + $0xfa4] sm:$0xf0]  ;;  %v10616_v63 = vor.u32 %v11213_v51, %v10615_v50  ;;  %v10742_v50 = vld [vmem:[%s12386_s29 + $0x74] sm:$0xf]  ;;  %v8737_v51 = vld [vmem:[%s12386_s29 + $0x78] sm:$0xf0] }
 0x308   : > { %7929 = vmatpush.bf16.msrb.mxu0 %v10504_v1  ;;  %v11179_v1 = vld [vmem:[%s12386_s29 + $0xe14] sm:$0xf0]  ;;  %v7703_v48 = vpop.f32.mrf.mxu2 }
 0x309   : > { %7942 = vmatpush.bf16.msrb.mxu1 %v10568_v3  ;;  %v10680_v3 = vor.u32 %v11229_v57, %v10679_v56  ;;  %v10480_v21 = vor.u32 %v11179_v1, %v10479_v0  ;;  %v7716_v54 = vpop.f32.mrf.mxu3  ;;  %v10472_v56 = vor.u32 %v11177_v24, %v10471_v15  ;;  %v8801_v57 = vld [vmem:[%s12386_s29 + $0xf8] sm:$0xf0]  ;;  %v10790_v0 = vld [vmem:[%s12386_s29 + $0x1f4] sm:$0xf]  ;;  %v10740_v15 = vld [vmem:[%s12386_s29 + $0x64] sm:$0xf] }
 0x30a   : > { %7955 = vmatpush.bf16.msrb.mxu2 %v10632_v4  ;;  %v11195_v4 = vld [vmem:[%s12386_s29 + $0xe94] sm:$0xf0]  ;;  %v8929_v1 = vld [vmem:[%s12386_s29 + $0x1f8] sm:$0xf0]  ;;  %v10756_v24 = vld [vmem:[%s12386_s29 + $0xe4] sm:$0xf] }
 0x30b   : > { %7968 = vmatpush.bf16.msrb.mxu3 %v10696_v14  ;;  %v11227_v14 = vld [vmem:[%s12386_s29 + $0xf94] sm:$0xf0]  ;;  %v10544_v26 = vor.u32 %v11195_v4, %v10543_v2  ;;  %v4936_v2 = vunpack.c.l.b16 %v4371_v47  ;;  %v10754_v54 = vld [vmem:[%s12386_s29 + $0xd4] sm:$0xf] }
 0x30c   : > { %7930 = vmatpush.bf16.msrb.mxu0 %v10496_v27  ;;  %v10608_v27 = vor.u32 %v11211_v8, %v10607_v6  ;;  %v10672_v39 = vor.u32 %v11227_v14, %v10671_v9  ;;  %v8740_v6 = vor.u32 %v10742_v50, %v8737_v51  ;;  %v4937_v8 = vunpack.c.h.b16 %v4371_v47  ;;  %v10738_v51 = vld [vmem:[%s12386_s29 + $0x54] sm:$0xf] }
 0x30d   : > { %7943 = vmatpush.bf16.msrb.mxu1 %v10560_v32  ;;  %v10599_v32 = vld [vmem:[%s12386_s29 + $0xf00] sm:$0xf]  ;;  %v8804_v9 = vor.u32 %v10758_v52, %v8801_v57  ;;  %v8721_v52 = vld [vmem:[%s12386_s29 + $0x58] sm:$0xf0] }
 0x30e   : > { %7956 = vmatpush.bf16.msrb.mxu2 %v10624_v34  ;;  %v11209_v34 = vld [vmem:[%s12386_s29 + $0xf04] sm:$0xf0]  ;;  %v8785_v57 = vld [vmem:[%s12386_s29 + $0xd8] sm:$0xf0] }
 0x30f   : > { %7969 = vmatpush.bf16.msrb.mxu3 %v10688_v43  ;;  %v11225_v43 = vld [vmem:[%s12386_s29 + $0xf84] sm:$0xf0] }
 0x310   : > { %7931 = vmatpush.bf16.msrb.mxu0 %v10488_v59  ;;  %v8865_v59 = vld [vmem:[%s12386_s29 + $0x178] sm:$0xf0]  ;;  %v10664_v4 = vor.u32 %v11225_v43, %v10663_v40  ;;  %v8921_v40 = vld [vmem:[%s12386_s29 + $0x1e8] sm:$0xf0]  ;;  %v13079_v43 = vpack.c.b16 %v4937_v8, %v4937_v8 }
 0x311   : > { %7944 = vmatpush.bf16.msrb.mxu1 %v10552_v62  ;;  %v10536_v62 = vor.u32 %v11193_v53, %v10535_v55  ;;  %v8868_v14 = vor.u32 %v10774_v58, %v8865_v59  ;;  %v8932_v55 = vor.u32 %v10790_v0, %v8929_v1  ;;  %v13068_v53 = vpack.c.b16 %v4934_v60, %v4934_v60  ;;  %v10770_v58 = vld [vmem:[%s12386_s29 + $0x154] sm:$0xf]  ;;  %v8849_v59 = vld [vmem:[%s12386_s29 + $0x158] sm:$0xf0]  ;;  %v8777_v8 = vld [vmem:[%s12386_s29 + $0xc8] sm:$0xf0] }
 0x312   : > { %7957 = vmatpush.bf16.msrb.mxu2 %v10616_v63  ;;  %v10600_v63 = vor.u32 %v11209_v34, %v10599_v32  ;;  %v8857_v32 = vld [vmem:[%s12386_s29 + $0x168] sm:$0xf0]  ;;  %v13073_v34 = vpack.c.b16 %v4936_v2, %v4936_v2  ;;  %v10786_v60 = vld [vmem:[%s12386_s29 + $0x1d4] sm:$0xf]  ;;  %v8788_v0 = vor.u32 %v10754_v54, %v8785_v57  ;;  %v8852_v1 = vor.u32 %v10770_v58, %v8849_v59  ;;  %v10736_v2 = vld [vmem:[%s12386_s29 + $0x44] sm:$0xf] }
 0x313   : > { %7970 = vmatpush.bf16.msrb.mxu3 %v10680_v3  ;;  %v4935_v3 = vunpack.c.h.b16 %v4370_v36  ;;  %v10766_v54 = vld [vmem:[%s12386_s29 + $0x134] sm:$0xf]  ;;  %v8897_v57 = vld [vmem:[%s12386_s29 + $0x1b8] sm:$0xf0] }
 0x314   : > { %7932 = vmatpush.bf16.msrb.mxu0 %v10480_v21  ;;  %v8729_v21 = vld [vmem:[%s12386_s29 + $0x68] sm:$0xf0] }
 0x315   : > { %7945 = vmatpush.bf16.msrb.mxu1 %v10544_v26  ;;  %v8793_v26 = vld [vmem:[%s12386_s29 + $0xe8] sm:$0xf0]  ;;  %v13075_v36 = vpack.c.b16 %v4935_v3, %v4935_v3  ;;  %v8732_v47 = vor.u32 %v10740_v15, %v8729_v21  ;;  %v10784_v21 = vld [vmem:[%s12386_s29 + $0x1c4] sm:$0xf] }
 0x316   : > { %7958 = vmatpush.bf16.msrb.mxu2 %v10608_v27  ;;  %v10772_v27 = vld [vmem:[%s12386_s29 + $0x164] sm:$0xf]  ;;  %v8796_v48 = vor.u32 %v10756_v24, %v8793_v26  ;;  %v8713_v3 = vld [vmem:[%s12386_s29 + $0x48] sm:$0xf0] }
 0x317   : > { %7971 = vmatpush.bf16.msrb.mxu3 %v10672_v39  ;;  %v10788_v39 = vld [vmem:[%s12386_s29 + $0x1e4] sm:$0xf]  ;;  %v8860_v50 = vor.u32 %v10772_v27, %v8857_v32  ;;  %v8905_v24 = vld [vmem:[%s12386_s29 + $0x1c8] sm:$0xf0]  ;;  %v8716_v26 = vor.u32 %v10736_v2, %v8713_v3 }
 0x318   : > { %7933 = vmatpush.bf16.msrb.mxu0 %v10472_v56  ;;  %v8924_v56 = vor.u32 %v10788_v39, %v8921_v40  ;;  %v7727_v15 = vpop.f32.mrf.mxu0  ;;  %v10734_v40 = vld [vmem:[%s12386_s29 + $0x34] sm:$0xf]  ;;  %v8761_v3 = vld [vmem:[%s12386_s29 + $0xa8] sm:$0xf0] }
 0x319   : > { %7946 = vmatpush.bf16.msrb.mxu1 %v10536_v62  ;;  %v8913_v62 = vld [vmem:[%s12386_s29 + $0x1d8] sm:$0xf0]  ;;  %v7740_v27 = vpop.f32.mrf.mxu1 }
 0x31a   : > { %7959 = vmatpush.bf16.msrb.mxu2 %v10600_v63  ;;  %v8724_v63 = vor.u32 %v10738_v51, %v8721_v52  ;;  %v8769_v52 = vld [vmem:[%s12386_s29 + $0xb8] sm:$0xf0] }
 0x31b   : > { %7972 = vmatpush.bf16.msrb.mxu3 %v10664_v4  ;;  %7934 = vmatmul.bf16.vlgmr.msrb.gmra.mxu0 %v13068_v53  ;;  %v10752_v4 = vld [vmem:[%s12386_s29 + $0xc4] sm:$0xf] }
 0x31c   : > { %7978 = vmatpush.bf16.msra.mxu0 %v8740_v6  ;;  %7947 = vmatmul.bf16.vlgmr.msrb.gmra.mxu1 %v13075_v36  ;;  %v8916_v6 = vor.u32 %v10786_v60, %v8913_v62  ;;  %v8780_v32 = vor.u32 %v10752_v4, %v8777_v8  ;;  %v10732_v62 = vld [vmem:[%s12386_s29 + $0x24] sm:$0xf] }
 0x31d   : > { %7991 = vmatpush.bf16.msra.mxu1 %v8804_v9  ;;  %7960 = vmatmul.bf16.vlgmr.msrb.gmra.mxu2 %v13073_v34  ;;  %v10768_v9 = vld [vmem:[%s12386_s29 + $0x144] sm:$0xf] }
 0x31e   : > { %8004 = vmatpush.bf16.msra.mxu2 %v8868_v14  ;;  %7973 = vmatmul.bf16.vlgmr.msrb.gmra.mxu3 %v13079_v43  ;;  %v8841_v14 = vld [vmem:[%s12386_s29 + $0x148] sm:$0xf0]  ;;  %v10764_v4 = vld [vmem:[%s12386_s29 + $0x124] sm:$0xf] }
 0x31f   : > { %8017 = vmatpush.bf16.msra.mxu3 %v8932_v55  ;;  %v7728_v55 = vadd.f32 %v7727_v15, %v13033_v61  ;;  %v8844_v39 = vor.u32 %v10768_v9, %v8841_v14  ;;  %v8833_v61 = vld [vmem:[%s12386_s29 + $0x138] sm:$0xf0]  ;;  %v10780_v14 = vld [vmem:[%s12386_s29 + $0x1a4] sm:$0xf]  ;;  %v8889_v15 = vld [vmem:[%s12386_s29 + $0x1a8] sm:$0xf0] }
 0x320   : > { %7979 = vmatpush.bf16.msra.mxu0 %v8732_v47  ;;  %v8705_v47 = vld [vmem:[%s12386_s29 + $0x38] sm:$0xf0]  ;;  %v8836_v60 = vor.u32 %v10766_v54, %v8833_v61  ;;  %v7753_v2 = vpop.f32.mrf.mxu2  ;;  %v10778_v54 = vld [vmem:[%s12386_s29 + $0x194] sm:$0xf] }
 0x321   : > { %7992 = vmatpush.bf16.msra.mxu1 %v8796_v48  ;;  %v10750_v48 = vld [vmem:[%s12386_s29 + $0xb4] sm:$0xf]  ;;  %v7741_v51 = vadd.f32 %v7740_v27, %v7728_v55  ;;  %v8708_v58 = vor.u32 %v10734_v40, %v8705_v47  ;;  %v7766_v9 = vpop.f32.mrf.mxu3  ;;  %v7742_v55 = vpop.f32.mrf.mxu1  ;;  %v8689_v40 = vld [vmem:[%s12386_s29 + $0x18] sm:$0xf0] }
 0x322   : > { %8005 = vmatpush.bf16.msra.mxu2 %v8860_v50  ;;  %v8908_v50 = vor.u32 %v10784_v21, %v8905_v24  ;;  %v8772_v59 = vor.u32 %v10750_v48, %v8769_v52  ;;  %v7729_v21 = vpop.f32.mrf.mxu0  ;;  %v10746_v47 = vld [vmem:[%s12386_s29 + $0x94] sm:$0xf]  ;;  %v8892_v48 = vor.u32 %v10780_v14, %v8889_v15  ;;  %v8817_v52 = vld [vmem:[%s12386_s29 + $0x118] sm:$0xf0] }
 0x323   : > { %8018 = vmatpush.bf16.msra.mxu3 %v8924_v56  ;;  %v10782_v56 = vld [vmem:[%s12386_s29 + $0x1b4] sm:$0xf]  ;;  %v7754_v8 = vadd.f32 %v7753_v2, %v7741_v51  ;;  %v8881_v61 = vld [vmem:[%s12386_s29 + $0x198] sm:$0xf0]  ;;  %v8809_v2 = vld [vmem:[%s12386_s29 + $0x108] sm:$0xf0] }
 0x324   : > { %7980 = vmatpush.bf16.msra.mxu0 %v8724_v63  ;;  %v8697_v63 = vld [vmem:[%s12386_s29 + $0x28] sm:$0xf0]  ;;  %v10762_v51 = vld [vmem:[%s12386_s29 + $0x114] sm:$0xf] }
 0x325   : > { %7993 = vmatpush.bf16.msra.mxu1 %v8788_v0  ;;  %v10748_v0 = vld [vmem:[%s12386_s29 + $0xa4] sm:$0xf]  ;;  %v8700_v24 = vor.u32 %v10732_v62, %v8697_v63  ;;  %v8745_v63 = vld [vmem:[%s12386_s29 + $0x88] sm:$0xf0]  ;;  %v10822_v14 = vld [vmem:[%s12386_s29 + $0x2f4] sm:$0xf] }
 0x326   : > { %8006 = vmatpush.bf16.msra.mxu2 %v8852_v1  ;;  %v8900_v1 = vor.u32 %v10782_v56, %v8897_v57  ;;  %v8764_v27 = vor.u32 %v10748_v0, %v8761_v3  ;;  %v10728_v57 = vld [vmem:[%s12386_s29 + $0x4] sm:$0xf]  ;;  %v10838_v55 = vld [vmem:[%s12386_s29 + $0x374] sm:$0xf] }
 0x327   : > { %8019 = vmatpush.bf16.msra.mxu3 %v8916_v6  ;;  %v8825_v6 = vld [vmem:[%s12386_s29 + $0x128] sm:$0xf0]  ;;  %v10744_v62 = vld [vmem:[%s12386_s29 + $0x84] sm:$0xf] }
 0x328   : > { %7981 = vmatpush.bf16.msra.mxu0 %v8716_v26  ;;  %v13118_v26 = vadd.f32 %v7766_v9, %v7754_v8  ;;  %v10760_v0 = vld [vmem:[%s12386_s29 + $0x104] sm:$0xf]  ;;  %v10806_v8 = vld [vmem:[%s12386_s29 + $0x274] sm:$0xf]  ;;  %v8993_v9 = vld [vmem:[%s12386_s29 + $0x278] sm:$0xf0] }
 0x329   : > { %7994 = vmatpush.bf16.msra.mxu1 %v8780_v32  ;;  %v8828_v32 = vor.u32 %v10764_v4, %v8825_v6  ;;  %v10776_v3 = vld [vmem:[%s12386_s29 + $0x184] sm:$0xf]  ;;  %v8873_v4 = vld [vmem:[%s12386_s29 + $0x188] sm:$0xf0]  ;;  %v7755_v6 = vpop.f32.mrf.mxu2  ;;  %v7768_v15 = vpop.f32.mrf.mxu3 }
 0x32a   : > { %8007 = vmatpush.bf16.msra.mxu2 %v8844_v39  ;;  %v10730_v39 = vld [vmem:[%s12386_s29 + $0x14] sm:$0xf]  ;;  %v9105_v15 = vld [vmem:[%s12386_s29 + $0x358] sm:$0xf0] }
 0x32b   : > { %8020 = vmatpush.bf16.msra.mxu3 %v8908_v50  ;;  %v8753_v50 = vld [vmem:[%s12386_s29 + $0x98] sm:$0xf0]  ;;  %v8692_v56 = vor.u32 %v10730_v39, %v8689_v40  ;;  %v8812_v39 = vor.u32 %v10760_v0, %v8809_v2  ;;  %v10854_v40 = vld [vmem:[%s12386_s29 + $0x3f4] sm:$0xf] }
 0x32c   : > { %7982 = vmatpush.bf16.msra.mxu0 %v8708_v58  ;;  %v8681_v58 = vld [vmem:[%s12386_s29 + $0x8] sm:$0xf0]  ;;  %v10818_v6 = vld [vmem:[%s12386_s29 + $0x2d4] sm:$0xf] }
 0x32d   : > { %7995 = vmatpush.bf16.msra.mxu1 %v8772_v59  ;;  %v8756_v59 = vor.u32 %v10746_v47, %v8753_v50  ;;  %v8684_v21 = vor.u32 %v10728_v57, %v8681_v58  ;;  %v9185_v47 = vld [vmem:[%s12386_s29 + $0x3f8] sm:$0xf0]  ;;  %v8996_v50 = vor.u32 %v10806_v8, %v8993_v9  ;;  %v9049_v58 = vld [vmem:[%s12386_s29 + $0x2e8] sm:$0xf0] }
 0x32e   : > { %8008 = vmatpush.bf16.msra.mxu2 %v8836_v60  ;;  %v8820_v60 = vor.u32 %v10762_v51, %v8817_v52  ;;  %v9188_v57 = vor.u32 %v10854_v40, %v9185_v47  ;;  %v9041_v9 = vld [vmem:[%s12386_s29 + $0x2d8] sm:$0xf0]  ;;  %v10816_v40 = vld [vmem:[%s12386_s29 + $0x2c4] sm:$0xf] }
 0x32f   : > { %8021 = vmatpush.bf16.msra.mxu3 %v8900_v1  ;;  %v8884_v1 = vor.u32 %v10778_v54, %v8881_v61  ;;  %v10804_v54 = vld [vmem:[%s12386_s29 + $0x264] sm:$0xf]  ;;  %v8985_v61 = vld [vmem:[%s12386_s29 + $0x268] sm:$0xf0] }
 0x330   : > { %7983 = vmatpush.bf16.msra.mxu0 %v8700_v24  ;;  %v9057_v24 = vld [vmem:[%s12386_s29 + $0x2f8] sm:$0xf0]  ;;  %v8988_v0 = vor.u32 %v10804_v54, %v8985_v61 }
 0x331   : > { %7996 = vmatpush.bf16.msra.mxu1 %v8764_v27  ;;  %v9121_v27 = vld [vmem:[%s12386_s29 + $0x378] sm:$0xf0]  ;;  %v9060_v51 = vor.u32 %v10822_v14, %v9057_v24  ;;  %v10834_v14 = vld [vmem:[%s12386_s29 + $0x354] sm:$0xf] }
 0x332   : > { %8009 = vmatpush.bf16.msra.mxu2 %v8828_v32  ;;  %v8748_v32 = vor.u32 %v10744_v62, %v8745_v63  ;;  %v9124_v52 = vor.u32 %v10838_v55, %v9121_v27  ;;  %v10852_v62 = vld [vmem:[%s12386_s29 + $0x3e4] sm:$0xf]  ;;  %v9177_v63 = vld [vmem:[%s12386_s29 + $0x3e8] sm:$0xf0]  ;;  %v9169_v24 = vld [vmem:[%s12386_s29 + $0x3d8] sm:$0xf0]  ;;  %v9044_v27 = vor.u32 %v10818_v6, %v9041_v9 }
 0x333   : > { %8022 = vmatpush.bf16.msra.mxu3 %v8892_v48  ;;  %v8876_v48 = vor.u32 %v10776_v3, %v8873_v4  ;;  %v10802_v3 = vld [vmem:[%s12386_s29 + $0x254] sm:$0xf]  ;;  %v8977_v4 = vld [vmem:[%s12386_s29 + $0x258] sm:$0xf0]  ;;  %v9180_v8 = vor.u32 %v10852_v62, %v9177_v63  ;;  %v10796_v9 = vld [vmem:[%s12386_s29 + $0x224] sm:$0xf] }
 0x334   : > { %7984 = vmatpush.bf16.msra.mxu0 %v8692_v56  ;;  %v10820_v56 = vld [vmem:[%s12386_s29 + $0x2e4] sm:$0xf]  ;;  %v8980_v55 = vor.u32 %v10802_v3, %v8977_v4  ;;  %v9153_v3 = vld [vmem:[%s12386_s29 + $0x3b8] sm:$0xf0] }
 0x335   : > { %7997 = vmatpush.bf16.msra.mxu1 %v8756_v59  ;;  %v10836_v59 = vld [vmem:[%s12386_s29 + $0x364] sm:$0xf] }
 0x336   : > { %8010 = vmatpush.bf16.msra.mxu2 %v8820_v60  ;;  %v9113_v60 = vld [vmem:[%s12386_s29 + $0x368] sm:$0xf0] }
 0x337   : > { %8023 = vmatpush.bf16.msra.mxu3 %v8884_v1  ;;  %v9052_v1 = vor.u32 %v10820_v56, %v9049_v58  ;;  %v9116_v2 = vor.u32 %v10836_v59, %v9113_v60  ;;  %v10798_v58 = vld [vmem:[%s12386_s29 + $0x234] sm:$0xf]  ;;  %v8961_v59 = vld [vmem:[%s12386_s29 + $0x238] sm:$0xf0] }
 0x338   : > { %7985 = vmatpush.bf16.msra.mxu0 %v8684_v21  ;;  %v10850_v21 = vld [vmem:[%s12386_s29 + $0x3d4] sm:$0xf]  ;;  %v8964_v4 = vor.u32 %v10798_v58, %v8961_v59  ;;  %v9073_v59 = vld [vmem:[%s12386_s29 + $0x318] sm:$0xf0] }
 0x339   : > { %7998 = vmatpush.bf16.msra.mxu1 %v8748_v32  ;;  %v9108_v32 = vor.u32 %v10834_v14, %v9105_v15  ;;  %v9172_v47 = vor.u32 %v10850_v21, %v9169_v24  ;;  %v7792_v61 = vpop.f32.mrf.mxu1  ;;  %v10814_v60 = vld [vmem:[%s12386_s29 + $0x2b4] sm:$0xf]  ;;  %v8953_v14 = vld [vmem:[%s12386_s29 + $0x228] sm:$0xf0]  ;;  %v10812_v15 = vld [vmem:[%s12386_s29 + $0x2a4] sm:$0xf] }
 0x33a   : > { %8011 = vmatpush.bf16.msra.mxu2 %v8812_v39  ;;  %v8969_v39 = vld [vmem:[%s12386_s29 + $0x248] sm:$0xf0]  ;;  %v10826_v58 = vld [vmem:[%s12386_s29 + $0x314] sm:$0xf] }
 0x33b   : > { %8024 = vmatpush.bf16.msra.mxu3 %v8876_v48  ;;  %7986 = vmatmul.bf16.vlgmr.msra.gmra.mxu0 %v12492_v19  ;;  %v9033_v19 = vld [vmem:[%s12386_s29 + $0x2c8] sm:$0xf0] }
 0x33c   : > { %8030 = vmatpush.bf16.msrb.mxu0 %v8996_v50  ;;  %7999 = vmatmul.bf16.vlgmr.msra.gmra.mxu1 %v12496_v22  ;;  %v9097_v48 = vld [vmem:[%s12386_s29 + $0x348] sm:$0xf0]  ;;  %v7779_v50 = vpop.f32.mrf.mxu0  ;;  %v9036_v56 = vor.u32 %v10816_v40, %v9033_v19  ;;  %v10844_v40 = vld [vmem:[%s12386_s29 + $0x3a4] sm:$0xf] }
 0x33d   : > { %8043 = vmatpush.bf16.msrb.mxu1 %v9060_v51  ;;  %8012 = vmatmul.bf16.vlgmr.msra.gmra.mxu2 %v12490_v18  ;;  %v10800_v18 = vld [vmem:[%s12386_s29 + $0x244] sm:$0xf]  ;;  %v7780_v22 = vadd.f32 %v7779_v50, %v13118_v26  ;;  %v9089_v26 = vld [vmem:[%s12386_s29 + $0x338] sm:$0xf0] }
 0x33e   : > { %8056 = vmatpush.bf16.msrb.mxu2 %v9124_v52  ;;  %8025 = vmatmul.bf16.vlgmr.msra.gmra.mxu3 %v12494_v20  ;;  %v10832_v20 = vld [vmem:[%s12386_s29 + $0x344] sm:$0xf]  ;;  %v9161_v52 = vld [vmem:[%s12386_s29 + $0x3c8] sm:$0xf0]  ;;  %v8972_v54 = vor.u32 %v10800_v18, %v8969_v39 }
 0x33f   : > { %8069 = vmatpush.bf16.msrb.mxu3 %v9188_v57  ;;  %v10848_v51 = vld [vmem:[%s12386_s29 + $0x3c4] sm:$0xf]  ;;  %v9100_v57 = vor.u32 %v10832_v20, %v9097_v48  ;;  %v7793_v63 = vadd.f32 %v7792_v61, %v7780_v22  ;;  %v8956_v20 = vor.u32 %v10796_v9, %v8953_v14  ;;  %v10794_v22 = vld [vmem:[%s12386_s29 + $0x214] sm:$0xf]  ;;  %v9065_v9 = vld [vmem:[%s12386_s29 + $0x308] sm:$0xf0] }
 0x340   : > { %8031 = vmatpush.bf16.msrb.mxu0 %v8988_v0  ;;  %v9164_v62 = vor.u32 %v10848_v51, %v9161_v52  ;;  %v9025_v0 = vld [vmem:[%s12386_s29 + $0x2b8] sm:$0xf0]  ;;  %v7805_v24 = vpop.f32.mrf.mxu2  ;;  %v10810_v61 = vld [vmem:[%s12386_s29 + $0x294] sm:$0xf]  ;;  %v10840_v14 = vld [vmem:[%s12386_s29 + $0x384] sm:$0xf] }
 0x341   : > { %8044 = vmatpush.bf16.msrb.mxu1 %v9052_v1  ;;  %v10830_v1 = vld [vmem:[%s12386_s29 + $0x334] sm:$0xf]  ;;  %v9028_v6 = vor.u32 %v10814_v60, %v9025_v0  ;;  %v7806_v18 = vadd.f32 %v7805_v24, %v7793_v63  ;;  %v7818_v39 = vpop.f32.mrf.mxu3  ;;  %v7794_v48 = vpop.f32.mrf.mxu1  ;;  %v10792_v0 = vld [vmem:[%s12386_s29 + $0x204] sm:$0xf] }
 0x342   : > { %8057 = vmatpush.bf16.msrb.mxu2 %v9116_v2  ;;  %v10846_v2 = vld [vmem:[%s12386_s29 + $0x3b4] sm:$0xf] }
 0x343   : > { %8070 = vmatpush.bf16.msrb.mxu3 %v9180_v8  ;;  %v9092_v8 = vor.u32 %v10830_v1, %v9089_v26  ;;  %v9156_v21 = vor.u32 %v10846_v2, %v9153_v3  ;;  %v13189_v50 = vadd.f32 %v7818_v39, %v7806_v18  ;;  %v10842_v60 = vld [vmem:[%s12386_s29 + $0x394] sm:$0xf]  ;;  %v8937_v1 = vld [vmem:[%s12386_s29 + $0x208] sm:$0xf0]  ;;  %v9076_v2 = vor.u32 %v10826_v58, %v9073_v59  ;;  %v10808_v3 = vld [vmem:[%s12386_s29 + $0x284] sm:$0xf] }
 0x344   : > { %8032 = vmatpush.bf16.msrb.mxu0 %v8980_v55  ;;  %v9017_v55 = vld [vmem:[%s12386_s29 + $0x2a8] sm:$0xf0]  ;;  %v7781_v19 = vpop.f32.mrf.mxu0  ;;  %v10870_v24 = vld [vmem:[%s12386_s29 + $0x474] sm:$0xf]  ;;  %v8940_v18 = vor.u32 %v10792_v0, %v8937_v1  ;;  %v9313_v39 = vld [vmem:[%s12386_s29 + $0x4f8] sm:$0xf0] }
 0x345   : > { %8045 = vmatpush.bf16.msrb.mxu1 %v9044_v27  ;;  %v10828_v27 = vld [vmem:[%s12386_s29 + $0x324] sm:$0xf]  ;;  %v9020_v51 = vor.u32 %v10812_v15, %v9017_v55  ;;  %v9129_v15 = vld [vmem:[%s12386_s29 + $0x388] sm:$0xf0]  ;;  %v9249_v55 = vld [vmem:[%s12386_s29 + $0x478] sm:$0xf0] }
 0x346   : > { %8058 = vmatpush.bf16.msrb.mxu2 %v9108_v32  ;;  %v9081_v32 = vld [vmem:[%s12386_s29 + $0x328] sm:$0xf0]  ;;  %v10918_v48 = vld [vmem:[%s12386_s29 + $0x5f4] sm:$0xf]  ;;  %v10884_v58 = vld [vmem:[%s12386_s29 + $0x4e4] sm:$0xf] }
 0x347   : > { %8071 = vmatpush.bf16.msrb.mxu3 %v9172_v47  ;;  %v9145_v47 = vld [vmem:[%s12386_s29 + $0x3a8] sm:$0xf0]  ;;  %v9084_v52 = vor.u32 %v10828_v27, %v9081_v32  ;;  %v10886_v27 = vld [vmem:[%s12386_s29 + $0x4f4] sm:$0xf]  ;;  %v10916_v0 = vld [vmem:[%s12386_s29 + $0x5e4] sm:$0xf] }
 0x348   : > { %8033 = vmatpush.bf16.msrb.mxu0 %v8972_v54  ;;  %v8945_v54 = vld [vmem:[%s12386_s29 + $0x218] sm:$0xf0]  ;;  %v9433_v1 = vld [vmem:[%s12386_s29 + $0x5e8] sm:$0xf0] }
 0x349   : > { %8046 = vmatpush.bf16.msrb.mxu1 %v9036_v56  ;;  %v9148_v56 = vor.u32 %v10844_v40, %v9145_v47  ;;  %v8948_v63 = vor.u32 %v10794_v22, %v8945_v54  ;;  %v7820_v32 = vpop.f32.mrf.mxu3  ;;  %v10902_v40 = vld [vmem:[%s12386_s29 + $0x574] sm:$0xf]  ;;  %v9377_v47 = vld [vmem:[%s12386_s29 + $0x578] sm:$0xf0]  ;;  %v9252_v22 = vor.u32 %v10870_v24, %v9249_v55  ;;  %v9316_v54 = vor.u32 %v10886_v27, %v9313_v39  ;;  %v9225_v39 = vld [vmem:[%s12386_s29 + $0x448] sm:$0xf0] }
 0x34a   : > { %8059 = vmatpush.bf16.msrb.mxu2 %v9100_v57  ;;  %v9009_v57 = vld [vmem:[%s12386_s29 + $0x298] sm:$0xf0]  ;;  %v10914_v24 = vld [vmem:[%s12386_s29 + $0x5d4] sm:$0xf] }
 0x34b   : > { %8072 = vmatpush.bf16.msrb.mxu3 %v9164_v62  ;;  %v9137_v62 = vld [vmem:[%s12386_s29 + $0x398] sm:$0xf0]  ;;  %v9012_v26 = vor.u32 %v10810_v61, %v9009_v57  ;;  %v9380_v61 = vor.u32 %v10902_v40, %v9377_v47  ;;  %v9241_v57 = vld [vmem:[%s12386_s29 + $0x468] sm:$0xf0]  ;;  %v10880_v40 = vld [vmem:[%s12386_s29 + $0x4c4] sm:$0xf] }
 0x34c   : > { %8034 = vmatpush.bf16.msrb.mxu0 %v8964_v4  ;;  %v9001_v4 = vld [vmem:[%s12386_s29 + $0x288] sm:$0xf0]  ;;  %v9425_v55 = vld [vmem:[%s12386_s29 + $0x5d8] sm:$0xf0] }
 0x34d   : > { %8047 = vmatpush.bf16.msrb.mxu1 %v9028_v6  ;;  %v10824_v6 = vld [vmem:[%s12386_s29 + $0x304] sm:$0xf]  ;;  %v9004_v19 = vor.u32 %v10808_v3, %v9001_v4  ;;  %v10866_v4 = vld [vmem:[%s12386_s29 + $0x454] sm:$0xf]  ;;  %v9428_v47 = vor.u32 %v10914_v24, %v9425_v55  ;;  %v9337_v24 = vld [vmem:[%s12386_s29 + $0x528] sm:$0xf0] }
 0x34e   : > { %8060 = vmatpush.bf16.msrb.mxu2 %v9092_v8  ;;  %v9140_v8 = vor.u32 %v10842_v60, %v9137_v62  ;;  %v9305_v60 = vld [vmem:[%s12386_s29 + $0x4e8] sm:$0xf0]  ;;  %v10900_v62 = vld [vmem:[%s12386_s29 + $0x564] sm:$0xf] }
 0x34f   : > { %8073 = vmatpush.bf16.msrb.mxu3 %v9156_v21  ;;  %v7807_v21 = vpop.f32.mrf.mxu2 }
 0x350   : > { %8035 = vmatpush.bf16.msrb.mxu0 %v8956_v20  ;;  %v9068_v20 = vor.u32 %v10824_v6, %v9065_v9  ;;  %v9233_v6 = vld [vmem:[%s12386_s29 + $0x458] sm:$0xf0]  ;;  %v9436_v9 = vor.u32 %v10916_v0, %v9433_v1  ;;  %v10910_v0 = vld [vmem:[%s12386_s29 + $0x5b4] sm:$0xf] }
 0x351   : > { %8048 = vmatpush.bf16.msrb.mxu1 %v9020_v51  ;;  %v9441_v51 = vld [vmem:[%s12386_s29 + $0x5f8] sm:$0xf0]  ;;  %v9236_v27 = vor.u32 %v10866_v4, %v9233_v6  ;;  %v10860_v4 = vld [vmem:[%s12386_s29 + $0x424] sm:$0xf]  ;;  %v9209_v6 = vld [vmem:[%s12386_s29 + $0x428] sm:$0xf0] }
 0x352   : > { %8061 = vmatpush.bf16.msrb.mxu2 %v9084_v52  ;;  %v9132_v52 = vor.u32 %v10840_v14, %v9129_v15  ;;  %v9444_v59 = vor.u32 %v10918_v48, %v9441_v51  ;;  %v9297_v14 = vld [vmem:[%s12386_s29 + $0x4d8] sm:$0xf0]  ;;  %v10898_v15 = vld [vmem:[%s12386_s29 + $0x554] sm:$0xf]  ;;  %v10912_v48 = vld [vmem:[%s12386_s29 + $0x5c4] sm:$0xf] }
 0x353   : > { %8074 = vmatpush.bf16.msrb.mxu3 %v9148_v56  ;;  %v10868_v56 = vld [vmem:[%s12386_s29 + $0x464] sm:$0xf]  ;;  %v9361_v21 = vld [vmem:[%s12386_s29 + $0x558] sm:$0xf0]  ;;  %v9417_v51 = vld [vmem:[%s12386_s29 + $0x5c8] sm:$0xf0] }
 0x354   : > { %8036 = vmatpush.bf16.msrb.mxu0 %v8948_v63  ;;  %v9369_v63 = vld [vmem:[%s12386_s29 + $0x568] sm:$0xf0]  ;;  %v9364_v32 = vor.u32 %v10898_v15, %v9361_v21  ;;  %v9409_v1 = vld [vmem:[%s12386_s29 + $0x5b8] sm:$0xf0]  ;;  %v10892_v21 = vld [vmem:[%s12386_s29 + $0x524] sm:$0xf] }
 0x355   : > { %8049 = vmatpush.bf16.msrb.mxu1 %v9012_v26  ;;  %v9244_v26 = vor.u32 %v10868_v56, %v9241_v57  ;;  %v9372_v3 = vor.u32 %v10900_v62, %v9369_v63  ;;  %v10862_v56 = vld [vmem:[%s12386_s29 + $0x434] sm:$0xf]  ;;  %v9217_v57 = vld [vmem:[%s12386_s29 + $0x438] sm:$0xf0]  ;;  %v9273_v15 = vld [vmem:[%s12386_s29 + $0x4a8] sm:$0xf0] }
 0x356   : > { %8062 = vmatpush.bf16.msrb.mxu2 %v9076_v2  ;;  %v9308_v2 = vor.u32 %v10884_v58, %v9305_v60  ;;  %v10878_v58 = vld [vmem:[%s12386_s29 + $0x4b4] sm:$0xf]  ;;  %v9281_v62 = vld [vmem:[%s12386_s29 + $0x4b8] sm:$0xf0] }
 0x357   : > { %8075 = vmatpush.bf16.msrb.mxu3 %v9140_v8  ;;  %v10882_v8 = vld [vmem:[%s12386_s29 + $0x4d4] sm:$0xf] }
 0x358   : > { %8037 = vmatpush.bf16.msrb.mxu0 %v8940_v18  ;;  %v10864_v18 = vld [vmem:[%s12386_s29 + $0x444] sm:$0xf]  ;;  %v10894_v63 = vld [vmem:[%s12386_s29 + $0x534] sm:$0xf] }
 0x359   : > { %8050 = vmatpush.bf16.msrb.mxu1 %v9004_v19  ;;  %v9353_v19 = vld [vmem:[%s12386_s29 + $0x548] sm:$0xf0] }
 0x35a   : > { %8063 = vmatpush.bf16.msrb.mxu2 %v9068_v20  ;;  %v7831_v20 = vpop.f32.mrf.mxu0 }
 0x35b   : > { %8076 = vmatpush.bf16.msrb.mxu3 %v9132_v52  ;;  %8038 = vmatmul.bf16.vlgmr.msrb.gmra.mxu0 %v12558_v41  ;;  %v9289_v41 = vld [vmem:[%s12386_s29 + $0x4c8] sm:$0xf0]  ;;  %v9228_v52 = vor.u32 %v10864_v18, %v9225_v39  ;;  %v9212_v39 = vor.u32 %v10860_v4, %v9209_v6  ;;  %v10934_v4 = vld [vmem:[%s12386_s29 + $0x674] sm:$0xf]  ;;  %v9505_v6 = vld [vmem:[%s12386_s29 + $0x678] sm:$0xf0] }
 0x35c   : > { %8082 = vmatpush.bf16.msra.mxu0 %v9252_v22  ;;  %8051 = vmatmul.bf16.vlgmr.msrb.gmra.mxu1 %v12562_v44  ;;  %v7832_v44 = vadd.f32 %v7831_v20, %v13189_v50  ;;  %v7844_v22 = vpop.f32.mrf.mxu1  ;;  %v9345_v50 = vld [vmem:[%s12386_s29 + $0x538] sm:$0xf0] }
 0x35d   : > { %8095 = vmatpush.bf16.msra.mxu1 %v9316_v54  ;;  %8064 = vmatmul.bf16.vlgmr.msrb.gmra.mxu2 %v12554_v38  ;;  %v9300_v38 = vor.u32 %v10882_v8, %v9297_v14  ;;  %v9292_v54 = vor.u32 %v10880_v40, %v9289_v41  ;;  %v10876_v8 = vld [vmem:[%s12386_s29 + $0x4a4] sm:$0xf]  ;;  %v9201_v20 = vld [vmem:[%s12386_s29 + $0x418] sm:$0xf0] }
 0x35e   : > { %8108 = vmatpush.bf16.msra.mxu2 %v9380_v61  ;;  %8077 = vmatmul.bf16.vlgmr.msrb.gmra.mxu3 %v12560_v42  ;;  %v10896_v42 = vld [vmem:[%s12386_s29 + $0x544] sm:$0xf]  ;;  %v7845_v60 = vadd.f32 %v7844_v22, %v7832_v44  ;;  %v9276_v41 = vor.u32 %v10876_v8, %v9273_v15  ;;  %v9265_v44 = vld [vmem:[%s12386_s29 + $0x498] sm:$0xf0]  ;;  %v10950_v8 = vld [vmem:[%s12386_s29 + $0x6f4] sm:$0xf] }
 0x35f   : > { %8121 = vmatpush.bf16.msra.mxu3 %v9444_v59  ;;  %v9356_v61 = vor.u32 %v10896_v42, %v9353_v19  ;;  %v9420_v59 = vor.u32 %v10912_v48, %v9417_v51  ;;  %v9340_v42 = vor.u32 %v10892_v21, %v9337_v24  ;;  %v10858_v19 = vld [vmem:[%s12386_s29 + $0x414] sm:$0xf]  ;;  %v9329_v22 = vld [vmem:[%s12386_s29 + $0x518] sm:$0xf0] }
 0x360   : > { %8083 = vmatpush.bf16.msra.mxu0 %v9244_v26  ;;  %v9220_v26 = vor.u32 %v10862_v56, %v9217_v57  ;;  %v7857_v14 = vpop.f32.mrf.mxu2  ;;  %v10874_v48 = vld [vmem:[%s12386_s29 + $0x494] sm:$0xf]  ;;  %v9204_v56 = vor.u32 %v10858_v19, %v9201_v20  ;;  %v10856_v57 = vld [vmem:[%s12386_s29 + $0x404] sm:$0xf]  ;;  %v9569_v15 = vld [vmem:[%s12386_s29 + $0x6f8] sm:$0xf0] }
 0x361   : > { %8096 = vmatpush.bf16.msra.mxu1 %v9308_v2  ;;  %v9284_v2 = vor.u32 %v10878_v58, %v9281_v62  ;;  %v7858_v55 = vadd.f32 %v7857_v14, %v7845_v60  ;;  %v9193_v58 = vld [vmem:[%s12386_s29 + $0x408] sm:$0xf0]  ;;  %v10872_v62 = vld [vmem:[%s12386_s29 + $0x484] sm:$0xf]  ;;  %v10966_v21 = vld [vmem:[%s12386_s29 + $0x774] sm:$0xf] }
 0x362   : > { %8109 = vmatpush.bf16.msra.mxu2 %v9372_v3  ;;  %v9348_v3 = vor.u32 %v10894_v63, %v9345_v50  ;;  %v7833_v18 = vpop.f32.mrf.mxu0  ;;  %v9257_v63 = vld [vmem:[%s12386_s29 + $0x488] sm:$0xf0]  ;;  %v10888_v50 = vld [vmem:[%s12386_s29 + $0x504] sm:$0xf]  ;;  %v9196_v14 = vor.u32 %v10856_v57, %v9193_v58  ;;  %v9633_v24 = vld [vmem:[%s12386_s29 + $0x778] sm:$0xf0] }
 0x363   : > { %8122 = vmatpush.bf16.msra.mxu3 %v9436_v9  ;;  %v9412_v9 = vor.u32 %v10910_v0, %v9409_v1  ;;  %v9321_v1 = vld [vmem:[%s12386_s29 + $0x508] sm:$0xf0]  ;;  %v10948_v20 = vld [vmem:[%s12386_s29 + $0x6e4] sm:$0xf]  ;;  %v10930_v58 = vld [vmem:[%s12386_s29 + $0x654] sm:$0xf] }
 0x364   : > { %8084 = vmatpush.bf16.msra.mxu0 %v9236_v27  ;;  %v7870_v27 = vpop.f32.mrf.mxu3  ;;  %v7846_v40 = vpop.f32.mrf.mxu1  ;;  %v9497_v19 = vld [vmem:[%s12386_s29 + $0x668] sm:$0xf0] }
 0x365   : > { %8097 = vmatpush.bf16.msra.mxu1 %v9300_v38  ;;  %v10908_v38 = vld [vmem:[%s12386_s29 + $0x5a4] sm:$0xf]  ;;  %v9572_v40 = vor.u32 %v10950_v8, %v9569_v15  ;;  %v9545_v8 = vld [vmem:[%s12386_s29 + $0x6c8] sm:$0xf0] }
 0x366   : > { %8110 = vmatpush.bf16.msra.mxu2 %v9364_v32  ;;  %v9401_v32 = vld [vmem:[%s12386_s29 + $0x5a8] sm:$0xf0]  ;;  %v10976_v15 = vld [vmem:[%s12386_s29 + $0x7c4] sm:$0xf] }
 0x367   : > { %8123 = vmatpush.bf16.msra.mxu3 %v9428_v47  ;;  %v13260_v47 = vadd.f32 %v7870_v27, %v7858_v55  ;;  %v9404_v51 = vor.u32 %v10908_v38, %v9401_v32  ;;  %v9260_v55 = vor.u32 %v10872_v62, %v9257_v63  ;;  %v9324_v27 = vor.u32 %v10888_v50, %v9321_v1  ;;  %v10982_v38 = vld [vmem:[%s12386_s29 + $0x7f4] sm:$0xf]  ;;  %v9697_v32 = vld [vmem:[%s12386_s29 + $0x7f8] sm:$0xf0] }
 0x368   : > { %8085 = vmatpush.bf16.msra.mxu0 %v9228_v52  ;;  %v10890_v52 = vld [vmem:[%s12386_s29 + $0x514] sm:$0xf]  ;;  %v9553_v63 = vld [vmem:[%s12386_s29 + $0x6d8] sm:$0xf0] }
 0x369   : > { %8098 = vmatpush.bf16.msra.mxu1 %v9292_v54  ;;  %v10906_v54 = vld [vmem:[%s12386_s29 + $0x594] sm:$0xf]  ;;  %v9332_v60 = vor.u32 %v10890_v52, %v9329_v22  ;;  %v9625_v52 = vld [vmem:[%s12386_s29 + $0x768] sm:$0xf0]  ;;  %v10980_v22 = vld [vmem:[%s12386_s29 + $0x7e4] sm:$0xf] }
 0x36a   : > { %8111 = vmatpush.bf16.msra.mxu2 %v9356_v61  ;;  %v9393_v61 = vld [vmem:[%s12386_s29 + $0x598] sm:$0xf0]  ;;  %v10962_v50 = vld [vmem:[%s12386_s29 + $0x754] sm:$0xf] }
 0x36b   : > { %8124 = vmatpush.bf16.msra.mxu3 %v9420_v59  ;;  %v9268_v59 = vor.u32 %v10874_v48, %v9265_v44  ;;  %v9396_v0 = vor.u32 %v10906_v54, %v9393_v61  ;;  %v9700_v48 = vor.u32 %v10982_v38, %v9697_v32  ;;  %v10964_v44 = vld [vmem:[%s12386_s29 + $0x764] sm:$0xf]  ;;  %v9689_v54 = vld [vmem:[%s12386_s29 + $0x7e8] sm:$0xf0]  ;;  %v10978_v1 = vld [vmem:[%s12386_s29 + $0x7d4] sm:$0xf] }
 0x36c   : > { %8086 = vmatpush.bf16.msra.mxu0 %v9220_v26  ;;  %v10904_v26 = vld [vmem:[%s12386_s29 + $0x584] sm:$0xf]  ;;  %v9628_v57 = vor.u32 %v10964_v44, %v9625_v52  ;;  %v9692_v62 = vor.u32 %v10980_v22, %v9689_v54 }
 0x36d   : > { %8099 = vmatpush.bf16.msra.mxu1 %v9284_v2  ;;  %v9385_v2 = vld [vmem:[%s12386_s29 + $0x588] sm:$0xf0]  ;;  %v10924_v54 = vld [vmem:[%s12386_s29 + $0x624] sm:$0xf] }
 0x36e   : > { %8112 = vmatpush.bf16.msra.mxu2 %v9348_v3  ;;  %v7859_v3 = vpop.f32.mrf.mxu2  ;;  %v9388_v18 = vor.u32 %v10904_v26, %v9385_v2  ;;  %v9681_v26 = vld [vmem:[%s12386_s29 + $0x7d8] sm:$0xf0] }
 0x36f   : > { %8125 = vmatpush.bf16.msra.mxu3 %v9412_v9  ;;  %v7872_v9 = vpop.f32.mrf.mxu3 }
 0x370   : > { %8087 = vmatpush.bf16.msra.mxu0 %v9212_v39  ;;  %v9508_v39 = vor.u32 %v10934_v4, %v9505_v6  ;;  %v10928_v4 = vld [vmem:[%s12386_s29 + $0x644] sm:$0xf]  ;;  %v9481_v6 = vld [vmem:[%s12386_s29 + $0x648] sm:$0xf0] }
 0x371   : > { %8100 = vmatpush.bf16.msra.mxu1 %v9276_v41  ;;  %v9636_v41 = vor.u32 %v10966_v21, %v9633_v24  ;;  %v10960_v9 = vld [vmem:[%s12386_s29 + $0x744] sm:$0xf]  ;;  %v9673_v21 = vld [vmem:[%s12386_s29 + $0x7c8] sm:$0xf0] }
 0x372   : > { %8113 = vmatpush.bf16.msra.mxu2 %v9340_v42  ;;  %v10932_v42 = vld [vmem:[%s12386_s29 + $0x664] sm:$0xf] }
 0x373   : > { %8126 = vmatpush.bf16.msra.mxu3 %v9404_v51  ;;  %v9561_v51 = vld [vmem:[%s12386_s29 + $0x6e8] sm:$0xf0]  ;;  %v9500_v61 = vor.u32 %v10932_v42, %v9497_v19  ;;  %v9537_v19 = vld [vmem:[%s12386_s29 + $0x6b8] sm:$0xf0] }
 0x374   : > { %8088 = vmatpush.bf16.msra.mxu0 %v9204_v56  ;;  %v9564_v56 = vor.u32 %v10948_v20, %v9561_v51  ;;  %v10958_v20 = vld [vmem:[%s12386_s29 + $0x734] sm:$0xf]  ;;  %v9665_v51 = vld [vmem:[%s12386_s29 + $0x7b8] sm:$0xf0] }
 0x375   : > { %8101 = vmatpush.bf16.msra.mxu1 %v9268_v59  ;;  %v9489_v59 = vld [vmem:[%s12386_s29 + $0x658] sm:$0xf0] }
 0x376   : > { %8114 = vmatpush.bf16.msra.mxu2 %v9332_v60  ;;  %v10946_v60 = vld [vmem:[%s12386_s29 + $0x6d4] sm:$0xf] }
 0x377   : > { %8127 = vmatpush.bf16.msra.mxu3 %v9396_v0  ;;  %v9617_v0 = vld [vmem:[%s12386_s29 + $0x758] sm:$0xf0]  ;;  %v9556_v2 = vor.u32 %v10946_v60, %v9553_v63  ;;  %v10956_v60 = vld [vmem:[%s12386_s29 + $0x724] sm:$0xf] }
 0x378   : > { %8089 = vmatpush.bf16.msra.mxu0 %v9196_v14  ;;  %v9620_v3 = vor.u32 %v10962_v50, %v9617_v0  ;;  %v9609_v14 = vld [vmem:[%s12386_s29 + $0x748] sm:$0xf0]  ;;  %v10972_v0 = vld [vmem:[%s12386_s29 + $0x7a4] sm:$0xf] }
 0x379   : > { %8102 = vmatpush.bf16.msra.mxu1 %v9260_v55  ;;  %v9484_v55 = vor.u32 %v10928_v4, %v9481_v6  ;;  %v9612_v32 = vor.u32 %v10960_v9, %v9609_v14  ;;  %v9521_v14 = vld [vmem:[%s12386_s29 + $0x698] sm:$0xf0] }
 0x37a   : > { %8115 = vmatpush.bf16.msra.mxu2 %v9324_v27  ;;  %v7896_v27 = vpop.f32.mrf.mxu1 }
 0x37b   : > { %8128 = vmatpush.bf16.msra.mxu3 %v9388_v18  ;;  %8090 = vmatmul.bf16.vlgmr.msra.gmra.mxu0 %v12633_v25  ;;  %v9492_v25 = vor.u32 %v10930_v58, %v9489_v59  ;;  %v10926_v18 = vld [vmem:[%s12386_s29 + $0x634] sm:$0xf]  ;;  %v9529_v59 = vld [vmem:[%s12386_s29 + $0x6a8] sm:$0xf0] }
 0x37c   : > { %8134 = vmatpush.bf16.msrb.mxu0 %v9508_v39  ;;  %8103 = vmatmul.bf16.vlgmr.msra.gmra.mxu1 %v12640_v30  ;;  %v9684_v30 = vor.u32 %v10978_v1, %v9681_v26  ;;  %v9473_v39 = vld [vmem:[%s12386_s29 + $0x638] sm:$0xf0]  ;;  %v9657_v1 = vld [vmem:[%s12386_s29 + $0x7a8] sm:$0xf0] }
 0x37d   : > { %8147 = vmatpush.bf16.msrb.mxu1 %v9572_v40  ;;  %8116 = vmatmul.bf16.vlgmr.msra.gmra.mxu2 %v12638_v29  ;;  %v10944_v29 = vld [vmem:[%s12386_s29 + $0x6c4] sm:$0xf]  ;;  %v10942_v40 = vld [vmem:[%s12386_s29 + $0x6b4] sm:$0xf]  ;;  %v9476_v44 = vor.u32 %v10926_v18, %v9473_v39  ;;  %v9660_v9 = vor.u32 %v10972_v0, %v9657_v1 }
 0x37e   : > { %8160 = vmatpush.bf16.msrb.mxu2 %v9636_v41  ;;  %8129 = vmatmul.bf16.vlgmr.msra.gmra.mxu3 %v12644_v33  ;;  %v7883_v33 = vpop.f32.mrf.mxu0  ;;  %v9548_v38 = vor.u32 %v10944_v29, %v9545_v8  ;;  %v9676_v41 = vor.u32 %v10976_v15, %v9673_v21  ;;  %v9540_v52 = vor.u32 %v10942_v40, %v9537_v19  ;;  %v10922_v29 = vld [vmem:[%s12386_s29 + $0x614] sm:$0xf]  ;;  %v9585_v15 = vld [vmem:[%s12386_s29 + $0x718] sm:$0xf0]  ;;  %v10936_v39 = vld [vmem:[%s12386_s29 + $0x684] sm:$0xf] }
 0x37f   : > { %8173 = vmatpush.bf16.msrb.mxu3 %v9700_v48  ;;  %v7884_v24 = vadd.f32 %v7883_v33, %v13260_v47  ;;  %v9601_v47 = vld [vmem:[%s12386_s29 + $0x738] sm:$0xf0]  ;;  %v10974_v48 = vld [vmem:[%s12386_s29 + $0x7b4] sm:$0xf]  ;;  %v9513_v40 = vld [vmem:[%s12386_s29 + $0x688] sm:$0xf0] }
 0x380   : > { %8135 = vmatpush.bf16.msrb.mxu0 %v9500_v61  ;;  %v9604_v22 = vor.u32 %v10958_v20, %v9601_v47  ;;  %v9465_v61 = vld [vmem:[%s12386_s29 + $0x628] sm:$0xf0]  ;;  %v7909_v58 = vpop.f32.mrf.mxu2  ;;  %v10938_v8 = vld [vmem:[%s12386_s29 + $0x694] sm:$0xf]  ;;  %v10968_v20 = vld [vmem:[%s12386_s29 + $0x784] sm:$0xf] }
 0x381   : > { %8148 = vmatpush.bf16.msrb.mxu1 %v9564_v56  ;;  %v7897_v42 = vadd.f32 %v7896_v27, %v7884_v24  ;;  %v10940_v56 = vld [vmem:[%s12386_s29 + $0x6a4] sm:$0xf]  ;;  %v7922_v50 = vpop.f32.mrf.mxu3  ;;  %v10954_v33 = vld [vmem:[%s12386_s29 + $0x714] sm:$0xf]  ;;  %v9649_v24 = vld [vmem:[%s12386_s29 + $0x798] sm:$0xf0] }
 0x382   : > { %8161 = vmatpush.bf16.msrb.mxu2 %v9628_v57  ;;  %v9668_v57 = vor.u32 %v10974_v48, %v9665_v51  ;;  %v9532_v4 = vor.u32 %v10940_v56, %v9529_v59  ;;  %v10970_v21 = vld [vmem:[%s12386_s29 + $0x794] sm:$0xf]  ;;  %v10920_v27 = vld [vmem:[%s12386_s29 + $0x604] sm:$0xf]  ;;  %v9588_v18 = vor.u32 %v10954_v33, %v9585_v15  ;;  %v9577_v19 = vld [vmem:[%s12386_s29 + $0x708] sm:$0xf0] }
 0x383   : > { %8174 = vmatpush.bf16.msrb.mxu3 %v9692_v62  ;;  %v9593_v62 = vld [vmem:[%s12386_s29 + $0x728] sm:$0xf0]  ;;  %v7910_v63 = vadd.f32 %v7909_v58, %v7897_v42  ;;  %v9652_v42 = vor.u32 %v10970_v21, %v9649_v24  ;;  %v10998_v51 = vld [vmem:[%s12386_s29 + $0x874] sm:$0xf]  ;;  %v9516_v58 = vor.u32 %v10936_v39, %v9513_v40  ;;  %v9745_v24 = vld [vmem:[%s12386_s29 + $0x858] sm:$0xf0] }
 0x384   : > { %8136 = vmatpush.bf16.msrb.mxu0 %v9492_v25  ;;  %v9468_v25 = vor.u32 %v10924_v54, %v9465_v61  ;;  %v9596_v6 = vor.u32 %v10956_v60, %v9593_v62  ;;  %v9641_v47 = vld [vmem:[%s12386_s29 + $0x788] sm:$0xf0]  ;;  %v9825_v61 = vld [vmem:[%s12386_s29 + $0x8f8] sm:$0xf0]  ;;  %v11030_v56 = vld [vmem:[%s12386_s29 + $0x974] sm:$0xf] }
 0x385   : > { %8149 = vmatpush.bf16.msrb.mxu1 %v9556_v2  ;;  %v7898_v2 = vpop.f32.mrf.mxu1  ;;  %v11046_v60 = vld [vmem:[%s12386_s29 + $0x9f4] sm:$0xf]  ;;  %v9953_v62 = vld [vmem:[%s12386_s29 + $0x9f8] sm:$0xf0] }
 0x386   : > { %8162 = vmatpush.bf16.msrb.mxu2 %v9620_v3  ;;  %v7885_v26 = vpop.f32.mrf.mxu0  ;;  %v13331_v3 = vadd.f32 %v7922_v50, %v7910_v63  ;;  %v9644_v63 = vor.u32 %v10968_v20, %v9641_v47  ;;  %v11012_v2 = vld [vmem:[%s12386_s29 + $0x8e4] sm:$0xf]  ;;  %v10994_v21 = vld [vmem:[%s12386_s29 + $0x854] sm:$0xf]  ;;  %v9937_v40 = vld [vmem:[%s12386_s29 + $0x9d8] sm:$0xf0] }
 0x387   : > { %8175 = vmatpush.bf16.msrb.mxu3 %v9684_v30  ;;  %v9457_v30 = vld [vmem:[%s12386_s29 + $0x618] sm:$0xf0]  ;;  %v10996_v26 = vld [vmem:[%s12386_s29 + $0x864] sm:$0xf]  ;;  %v11042_v39 = vld [vmem:[%s12386_s29 + $0x9d4] sm:$0xf] }
 0x388   : > { %8137 = vmatpush.bf16.msrb.mxu0 %v9484_v55  ;;  %v9460_v55 = vor.u32 %v10922_v29, %v9457_v30  ;;  %v7911_v48 = vpop.f32.mrf.mxu2  ;;  %v11028_v29 = vld [vmem:[%s12386_s29 + $0x964] sm:$0xf]  ;;  %v9881_v30 = vld [vmem:[%s12386_s29 + $0x968] sm:$0xf0] }
 0x389   : > { %8150 = vmatpush.bf16.msrb.mxu1 %v9548_v38  ;;  %v9449_v38 = vld [vmem:[%s12386_s29 + $0x608] sm:$0xf0]  ;;  %v9884_v15 = vor.u32 %v11028_v29, %v9881_v30  ;;  %v11024_v48 = vld [vmem:[%s12386_s29 + $0x944] sm:$0xf] }
 0x38a   : > { %8163 = vmatpush.bf16.msrb.mxu2 %v9612_v32  ;;  %v9524_v32 = vor.u32 %v10938_v8, %v9521_v14  ;;  %v9452_v54 = vor.u32 %v10920_v27, %v9449_v38  ;;  %v11044_v8 = vld [vmem:[%s12386_s29 + $0x9e4] sm:$0xf]  ;;  %v9809_v38 = vld [vmem:[%s12386_s29 + $0x8d8] sm:$0xf0]  ;;  %v9737_v20 = vld [vmem:[%s12386_s29 + $0x848] sm:$0xf0] }
 0x38b   : > { %8176 = vmatpush.bf16.msrb.mxu3 %v9676_v41  ;;  %v10952_v41 = vld [vmem:[%s12386_s29 + $0x704] sm:$0xf]  ;;  %v9801_v47 = vld [vmem:[%s12386_s29 + $0x8c8] sm:$0xf0] }
 0x38c   : > { %8138 = vmatpush.bf16.msrb.mxu0 %v9476_v44  ;;  %v9761_v44 = vld [vmem:[%s12386_s29 + $0x878] sm:$0xf0]  ;;  %v9580_v59 = vor.u32 %v10952_v41, %v9577_v19  ;;  %v10992_v19 = vld [vmem:[%s12386_s29 + $0x844] sm:$0xf]  ;;  %v9721_v29 = vld [vmem:[%s12386_s29 + $0x828] sm:$0xf0] }
 0x38d   : > { %8151 = vmatpush.bf16.msrb.mxu1 %v9540_v52  ;;  %v11014_v52 = vld [vmem:[%s12386_s29 + $0x8f4] sm:$0xf]  ;;  %v9764_v50 = vor.u32 %v10998_v51, %v9761_v44  ;;  %v9865_v51 = vld [vmem:[%s12386_s29 + $0x948] sm:$0xf0]  ;;  %v11040_v44 = vld [vmem:[%s12386_s29 + $0x9c4] sm:$0xf] }
 0x38e   : > { %8164 = vmatpush.bf16.msrb.mxu2 %v9604_v22  ;;  %v7924_v22 = vpop.f32.mrf.mxu3  ;;  %v9828_v0 = vor.u32 %v11014_v52, %v9825_v61  ;;  %v9929_v52 = vld [vmem:[%s12386_s29 + $0x9c8] sm:$0xf0]  ;;  %v11004_v30 = vld [vmem:[%s12386_s29 + $0x8a4] sm:$0xf] }
 0x38f   : > { %8177 = vmatpush.bf16.msrb.mxu3 %v9668_v57  ;;  %v9889_v57 = vld [vmem:[%s12386_s29 + $0x978] sm:$0xf0] }
 0x390   : > { %8139 = vmatpush.bf16.msrb.mxu0 %v9468_v25  ;;  %v9892_v1 = vor.u32 %v11030_v56, %v9889_v57  ;;  %v9753_v25 = vld [vmem:[%s12386_s29 + $0x868] sm:$0xf0]  ;;  %v9868_v57 = vor.u32 %v11024_v48, %v9865_v51  ;;  %v11034_v48 = vld [vmem:[%s12386_s29 + $0x994] sm:$0xf]  ;;  %v9905_v51 = vld [vmem:[%s12386_s29 + $0x998] sm:$0xf0] }
 0x391   : > { %8152 = vmatpush.bf16.msrb.mxu1 %v9532_v4  ;;  %v9956_v4 = vor.u32 %v11046_v60, %v9953_v62  ;;  %v9756_v14 = vor.u32 %v10996_v26, %v9753_v25  ;;  %v11006_v60 = vld [vmem:[%s12386_s29 + $0x8b4] sm:$0xf]  ;;  %v9932_v62 = vor.u32 %v11040_v44, %v9929_v52  ;;  %v9921_v26 = vld [vmem:[%s12386_s29 + $0x9b8] sm:$0xf0]  ;;  %v10984_v44 = vld [vmem:[%s12386_s29 + $0x804] sm:$0xf] }
 0x392   : > { %8165 = vmatpush.bf16.msrb.mxu2 %v9596_v6  ;;  %v9817_v6 = vld [vmem:[%s12386_s29 + $0x8e8] sm:$0xf0] }
 0x393   : > { %8178 = vmatpush.bf16.msrb.mxu3 %v9660_v9  ;;  %v9945_v9 = vld [vmem:[%s12386_s29 + $0x9e8] sm:$0xf0]  ;;  %v9820_v33 = vor.u32 %v11012_v2, %v9817_v6  ;;  %v10988_v6 = vld [vmem:[%s12386_s29 + $0x824] sm:$0xf] }
 0x394   : > { %8140 = vmatpush.bf16.msrb.mxu0 %v9460_v55  ;;  %v11010_v55 = vld [vmem:[%s12386_s29 + $0x8d4] sm:$0xf]  ;;  %v9948_v27 = vor.u32 %v11044_v8, %v9945_v9  ;;  %v9705_v52 = vld [vmem:[%s12386_s29 + $0x808] sm:$0xf0] }
 0x395   : > { %8153 = vmatpush.bf16.msrb.mxu1 %v9524_v32  ;;  %v11026_v32 = vld [vmem:[%s12386_s29 + $0x954] sm:$0xf]  ;;  %v9812_v41 = vor.u32 %v11010_v55, %v9809_v38  ;;  %v11036_v55 = vld [vmem:[%s12386_s29 + $0x9a4] sm:$0xf] }
 0x396   : > { %8166 = vmatpush.bf16.msrb.mxu2 %v9588_v18  ;;  %v9873_v18 = vld [vmem:[%s12386_s29 + $0x958] sm:$0xf0] }
 0x397   : > { %8179 = vmatpush.bf16.msrb.mxu3 %v9652_v42  ;;  %v9876_v42 = vor.u32 %v11026_v32, %v9873_v18  ;;  %v9724_v32 = vor.u32 %v10988_v6, %v9721_v29 }
 0x398   : > { %8141 = vmatpush.bf16.msrb.mxu0 %v9452_v54  ;;  %v9740_v54 = vor.u32 %v10992_v19, %v9737_v20  ;;  %v11002_v19 = vld [vmem:[%s12386_s29 + $0x894] sm:$0xf] }
 0x399   : > { %8154 = vmatpush.bf16.msrb.mxu1 %v9516_v58  ;;  %v7948_v61 = vpop.f32.mrf.mxu1  ;;  %v10990_v58 = vld [vmem:[%s12386_s29 + $0x834] sm:$0xf] }
 0x39a   : > { %8167 = vmatpush.bf16.msrb.mxu2 %v9580_v59  ;;  %v9729_v59 = vld [vmem:[%s12386_s29 + $0x838] sm:$0xf0] }
 0x39b   : > { %8180 = vmatpush.bf16.msrb.mxu3 %v9644_v63  ;;  %8142 = vmatmul.bf16.vlgmr.msrb.gmra.mxu0 %v12715_v23  ;;  %v9748_v23 = vor.u32 %v10994_v21, %v9745_v24  ;;  %v9732_v25 = vor.u32 %v10990_v58, %v9729_v59  ;;  %v9908_v58 = vor.u32 %v11034_v48, %v9905_v51  ;;  %v9833_v59 = vld [vmem:[%s12386_s29 + $0x908] sm:$0xf0]  ;;  %v10065_v48 = vld [vmem:[%s12386_s29 + $0xad8] sm:$0xf0]  ;;  %v11090_v51 = vld [vmem:[%s12386_s29 + $0xb54] sm:$0xf] }
 0x39c   : > { %8186 = vmatpush.bf16.msra.mxu0 %v9764_v50  ;;  %8155 = vmatmul.bf16.vlgmr.msrb.gmra.mxu1 %v12722_v31  ;;  %v9940_v31 = vor.u32 %v11042_v39, %v9937_v40  ;;  %v9793_v50 = vld [vmem:[%s12386_s29 + $0x8b8] sm:$0xf0] }
 0x39d   : > { %8199 = vmatpush.bf16.msra.mxu1 %v9828_v0  ;;  %8168 = vmatmul.bf16.vlgmr.msrb.gmra.mxu2 %v12720_v28  ;;  %v11008_v28 = vld [vmem:[%s12386_s29 + $0x8c4] sm:$0xf]  ;;  %v11022_v0 = vld [vmem:[%s12386_s29 + $0x934] sm:$0xf]  ;;  %v9796_v2 = vor.u32 %v11006_v60, %v9793_v50 }
 0x39e   : > { %8212 = vmatpush.bf16.msra.mxu2 %v9892_v1  ;;  %8181 = vmatmul.bf16.vlgmr.msrb.gmra.mxu3 %v12726_v35  ;;  %v7935_v35 = vpop.f32.mrf.mxu0  ;;  %v9804_v56 = vor.u32 %v11008_v28, %v9801_v47  ;;  %v11038_v1 = vld [vmem:[%s12386_s29 + $0x9b4] sm:$0xf]  ;;  %v9777_v28 = vld [vmem:[%s12386_s29 + $0x898] sm:$0xf0]  ;;  %v11032_v60 = vld [vmem:[%s12386_s29 + $0x984] sm:$0xf] }
 0x39f   : > { %8225 = vmatpush.bf16.msra.mxu3 %v9956_v4  ;;  %v7936_v22 = vadd.f32 %v7935_v35, %v13331_v3  ;;  %v9857_v3 = vld [vmem:[%s12386_s29 + $0x938] sm:$0xf0]  ;;  %v9924_v8 = vor.u32 %v11038_v1, %v9921_v26  ;;  %v11062_v50 = vld [vmem:[%s12386_s29 + $0xa74] sm:$0xf]  ;;  %v9708_v26 = vor.u32 %v10984_v44, %v9705_v52 }
 0x3a0   : > { %8187 = vmatpush.bf16.msra.mxu0 %v9756_v14  ;;  %v9860_v4 = vor.u32 %v11022_v0, %v9857_v3  ;;  %v7961_v9 = vpop.f32.mrf.mxu2  ;;  %v9785_v14 = vld [vmem:[%s12386_s29 + $0x8a8] sm:$0xf0]  ;;  %v9841_v47 = vld [vmem:[%s12386_s29 + $0x918] sm:$0xf0]  ;;  %v11078_v3 = vld [vmem:[%s12386_s29 + $0xaf4] sm:$0xf] }
 0x3a1   : > { %8200 = vmatpush.bf16.msra.mxu1 %v9820_v33  ;;  %v7949_v63 = vadd.f32 %v7948_v61, %v7936_v22  ;;  %v11020_v33 = vld [vmem:[%s12386_s29 + $0x924] sm:$0xf]  ;;  %v7974_v24 = vpop.f32.mrf.mxu3  ;;  %v7950_v18 = vpop.f32.mrf.mxu1  ;;  %v9788_v40 = vor.u32 %v11004_v30, %v9785_v14  ;;  %v9780_v22 = vor.u32 %v11002_v19, %v9777_v28  ;;  %v10017_v0 = vld [vmem:[%s12386_s29 + $0xa78] sm:$0xf0]  ;;  %v11110_v30 = vld [vmem:[%s12386_s29 + $0xbf4] sm:$0xf] }
 0x3a2   : > { %8213 = vmatpush.bf16.msra.mxu2 %v9884_v15  ;;  %v9849_v15 = vld [vmem:[%s12386_s29 + $0x928] sm:$0xf0]  ;;  %v11000_v61 = vld [vmem:[%s12386_s29 + $0x884] sm:$0xf]  ;;  %v10020_v14 = vor.u32 %v11062_v50, %v10017_v0  ;;  %v10001_v28 = vld [vmem:[%s12386_s29 + $0xa58] sm:$0xf0] }
 0x3a3   : > { %8226 = vmatpush.bf16.msra.mxu3 %v9948_v27  ;;  %v7962_v21 = vadd.f32 %v7961_v9, %v7949_v63  ;;  %v9913_v27 = vld [vmem:[%s12386_s29 + $0x9a8] sm:$0xf0]  ;;  %v11106_v44 = vld [vmem:[%s12386_s29 + $0xbd4] sm:$0xf]  ;;  %v10193_v52 = vld [vmem:[%s12386_s29 + $0xbd8] sm:$0xf0] }
 0x3a4   : > { %8188 = vmatpush.bf16.msra.mxu0 %v9748_v23  ;;  %v9852_v23 = vor.u32 %v11020_v33, %v9849_v15  ;;  %v9916_v20 = vor.u32 %v11036_v55, %v9913_v27  ;;  %v11076_v55 = vld [vmem:[%s12386_s29 + $0xae4] sm:$0xf]  ;;  %v10137_v18 = vld [vmem:[%s12386_s29 + $0xb68] sm:$0xf0] }
 0x3a5   : > { %8201 = vmatpush.bf16.msra.mxu1 %v9812_v41  ;;  %v13402_v39 = vadd.f32 %v7974_v24, %v7962_v21  ;;  %v10986_v41 = vld [vmem:[%s12386_s29 + $0x814] sm:$0xf]  ;;  %v11060_v21 = vld [vmem:[%s12386_s29 + $0xa64] sm:$0xf]  ;;  %v10009_v24 = vld [vmem:[%s12386_s29 + $0xa68] sm:$0xf0] }
 0x3a6   : > { %8214 = vmatpush.bf16.msra.mxu2 %v9876_v42  ;;  %v7937_v38 = vpop.f32.mrf.mxu0  ;;  %v9713_v42 = vld [vmem:[%s12386_s29 + $0x818] sm:$0xf0] }
 0x3a7   : > { %8227 = vmatpush.bf16.msra.mxu3 %v9940_v31  ;;  %v11018_v31 = vld [vmem:[%s12386_s29 + $0x914] sm:$0xf]  ;;  %v9716_v35 = vor.u32 %v10986_v41, %v9713_v42  ;;  %v10073_v38 = vld [vmem:[%s12386_s29 + $0xae8] sm:$0xf0]  ;;  %v10012_v41 = vor.u32 %v11060_v21, %v10009_v24 }
 0x3a8   : > { %8189 = vmatpush.bf16.msra.mxu0 %v9740_v54  ;;  %v9844_v54 = vor.u32 %v11018_v31, %v9841_v47  ;;  %v7963_v63 = vpop.f32.mrf.mxu2  ;;  %v10076_v42 = vor.u32 %v11076_v55, %v10073_v38  ;;  %v11074_v31 = vld [vmem:[%s12386_s29 + $0xad4] sm:$0xf]  ;;  %v9977_v38 = vld [vmem:[%s12386_s29 + $0xa28] sm:$0xf0] }
 0x3a9   : > { %8202 = vmatpush.bf16.msra.mxu1 %v9804_v56  ;;  %v9769_v56 = vld [vmem:[%s12386_s29 + $0x888] sm:$0xf0]  ;;  %v7976_v1 = vpop.f32.mrf.mxu3 }
 0x3aa   : > { %8215 = vmatpush.bf16.msra.mxu2 %v9868_v57  ;;  %v11016_v57 = vld [vmem:[%s12386_s29 + $0x904] sm:$0xf]  ;;  %v9772_v6 = vor.u32 %v11000_v61, %v9769_v56  ;;  %v9993_v56 = vld [vmem:[%s12386_s29 + $0xa48] sm:$0xf0] }
 0x3ab   : > { %8228 = vmatpush.bf16.msra.mxu3 %v9932_v62  ;;  %v9897_v62 = vld [vmem:[%s12386_s29 + $0x988] sm:$0xf0]  ;;  %v9836_v29 = vor.u32 %v11016_v57, %v9833_v59  ;;  %v11275_v57 = vld [vmem:[%s12844_s30] sm:$0x3]  ;;  %v11088_v59 = vld [vmem:[%s12386_s29 + $0xb44] sm:$0xf] }
 0x3ac   : > { %8190 = vmatpush.bf16.msra.mxu0 %v9732_v25  ;;  %v10081_v25 = vld [vmem:[%s12386_s29 + $0xaf8] sm:$0xf0]  ;;  %v9900_v9 = vor.u32 %v11032_v60, %v9897_v62  ;;  %v10121_v60 = vld [vmem:[%s12386_s29 + $0xb48] sm:$0xf0]  ;;  %v11104_v62 = vld [vmem:[%s12386_s29 + $0xbc4] sm:$0xf] }
 0x3ad   : > { %8203 = vmatpush.bf16.msra.mxu1 %v9796_v2  ;;  %v11094_v2 = vld [vmem:[%s12386_s29 + $0xb74] sm:$0xf]  ;;  %v10084_v33 = vor.u32 %v11078_v3, %v10081_v25  ;;  %v10185_v63 = vld [vmem:[%s12386_s29 + $0xbc8] sm:$0xf0]  ;;  %v10124_v1 = vor.u32 %v11088_v59, %v10121_v60  ;;  %v9985_v25 = vld [vmem:[%s12386_s29 + $0xa38] sm:$0xf0] }
 0x3ae   : > { %8216 = vmatpush.bf16.msra.mxu2 %v9860_v4  ;;  %v10145_v4 = vld [vmem:[%s12386_s29 + $0xb78] sm:$0xf0]  ;;  %v11048_v59 = vld [vmem:[%s12386_s29 + $0xa04] sm:$0xf]  ;;  %v9961_v60 = vld [vmem:[%s12386_s29 + $0xa08] sm:$0xf0] }
 0x3af   : > { %8229 = vmatpush.bf16.msra.mxu3 %v9924_v8  ;;  %v10209_v8 = vld [vmem:[%s12386_s29 + $0xbf8] sm:$0xf0]  ;;  %v10148_v15 = vor.u32 %v11094_v2, %v10145_v4  ;;  %v11070_v2 = vld [vmem:[%s12386_s29 + $0xab4] sm:$0xf] }
 0x3b0   : > { %8191 = vmatpush.bf16.msra.mxu0 %v9724_v32  ;;  %v10212_v27 = vor.u32 %v11110_v30, %v10209_v8  ;;  %v11092_v32 = vld [vmem:[%s12386_s29 + $0xb64] sm:$0xf]  ;;  %v10049_v30 = vld [vmem:[%s12386_s29 + $0xab8] sm:$0xf0]  ;;  %v11086_v8 = vld [vmem:[%s12386_s29 + $0xb34] sm:$0xf] }
 0x3b1   : > { %8204 = vmatpush.bf16.msra.mxu1 %v9788_v40  ;;  %v11108_v40 = vld [vmem:[%s12386_s29 + $0xbe4] sm:$0xf]  ;;  %v10140_v19 = vor.u32 %v11092_v32, %v10137_v18  ;;  %v10052_v24 = vor.u32 %v11070_v2, %v10049_v30  ;;  %v10273_v30 = vld [vmem:[%s12386_s29 + $0xc78] sm:$0xf0] }
 0x3b2   : > { %8217 = vmatpush.bf16.msra.mxu2 %v9852_v23  ;;  %v10201_v23 = vld [vmem:[%s12386_s29 + $0xbe8] sm:$0xf0]  ;;  %v11068_v32 = vld [vmem:[%s12386_s29 + $0xaa4] sm:$0xf] }
 0x3b3   : > { %8230 = vmatpush.bf16.msra.mxu3 %v9916_v20  ;;  %v11058_v20 = vld [vmem:[%s12386_s29 + $0xa54] sm:$0xf]  ;;  %v10204_v47 = vor.u32 %v11108_v40, %v10201_v23  ;;  %v10041_v23 = vld [vmem:[%s12386_s29 + $0xaa8] sm:$0xf0]  ;;  %v11096_v2 = vld [vmem:[%s12386_s29 + $0xb84] sm:$0xf] }
 0x3b4   : > { %8192 = vmatpush.bf16.msra.mxu0 %v9716_v35  ;;  %v10129_v35 = vld [vmem:[%s12386_s29 + $0xb58] sm:$0xf0] }
 0x3b5   : > { %8205 = vmatpush.bf16.msra.mxu1 %v9780_v22  ;;  %v11056_v22 = vld [vmem:[%s12386_s29 + $0xa44] sm:$0xf]  ;;  %v10132_v61 = vor.u32 %v11090_v51, %v10129_v35  ;;  %v10044_v35 = vor.u32 %v11068_v32, %v10041_v23 }
 0x3b6   : > { %8218 = vmatpush.bf16.msra.mxu2 %v9844_v54  ;;  %v10068_v54 = vor.u32 %v11074_v31, %v10065_v48  ;;  %v9996_v50 = vor.u32 %v11056_v22, %v9993_v56  ;;  %v10169_v31 = vld [vmem:[%s12386_s29 + $0xba8] sm:$0xf0]  ;;  %v11066_v22 = vld [vmem:[%s12386_s29 + $0xa94] sm:$0xf]  ;;  %v10033_v56 = vld [vmem:[%s12386_s29 + $0xa98] sm:$0xf0] }
 0x3b7   : > { %8231 = vmatpush.bf16.msra.mxu3 %v9908_v58  ;;  %v10196_v58 = vor.u32 %v11106_v44, %v10193_v52  ;;  %v11050_v52 = vld [vmem:[%s12386_s29 + $0xa14] sm:$0xf]  ;;  %v11124_v23 = vld [vmem:[%s12386_s29 + $0xc64] sm:$0xf] }
 0x3b8   : > { %8193 = vmatpush.bf16.msra.mxu0 %v9708_v26  ;;  %v7987_v0 = vpop.f32.mrf.mxu0  ;;  %v11054_v26 = vld [vmem:[%s12386_s29 + $0xa34] sm:$0xf] }
 0x3b9   : > { %8206 = vmatpush.bf16.msra.mxu1 %v9772_v6  ;;  %v8000_v6 = vpop.f32.mrf.mxu1  ;;  %v9988_v21 = vor.u32 %v11054_v26, %v9985_v25  ;;  %v10089_v25 = vld [vmem:[%s12386_s29 + $0xb08] sm:$0xf0] }
 0x3ba   : > { %8219 = vmatpush.bf16.msra.mxu2 %v9836_v29  ;;  %v10188_v29 = vor.u32 %v11104_v62, %v10185_v63  ;;  %v10036_v62 = vor.u32 %v11066_v22, %v10033_v56  ;;  %v10257_v22 = vld [vmem:[%s12386_s29 + $0xc58] sm:$0xf0] }
 0x3bb   : > { %8232 = vmatpush.bf16.msra.mxu3 %v9900_v9  ;;  %8194 = vmatmul.bf16.vlgmr.msra.gmra.mxu0 %v12801_v37  ;;  %v10004_v37 = vor.u32 %v11058_v20, %v10001_v28  ;;  %v10113_v9 = vld [vmem:[%s12386_s29 + $0xb38] sm:$0xf0]  ;;  %v11100_v28 = vld [vmem:[%s12386_s29 + $0xba4] sm:$0xf] }
 0x3bc   : > { %8238 = vmatpush.bf16.msrb.mxu0 %v10020_v14  ;;  %8207 = vmatmul.bf16.vlgmr.msra.gmra.mxu1 %v12808_v46  ;;  %v4887_v46 = vperm.slane %v11275_v57, 1  ;;  %v11102_v14 = vld [vmem:[%s12386_s29 + $0xbb4] sm:$0xf]  ;;  %v10116_v55 = vor.u32 %v11086_v8, %v10113_v9  ;;  %v10097_v57 = vld [vmem:[%s12386_s29 + $0xb18] sm:$0xf0]  ;;  %v9964_v9 = vor.u32 %v11048_v59, %v9961_v60 }
 0x3bd   : > { %8251 = vmatpush.bf16.msrb.mxu1 %v10084_v33  ;;  %8220 = vmatmul.bf16.vlgmr.msra.gmra.mxu2 %v12806_v45  ;;  %v11072_v45 = vld [vmem:[%s12386_s29 + $0xac4] sm:$0xf]  ;;  %v10177_v33 = vld [vmem:[%s12386_s29 + $0xbb8] sm:$0xf0]  ;;  %v11142_v8 = vld [vmem:[%s12386_s29 + $0xcf4] sm:$0xf] }
 0x3be   : > { %8264 = vmatpush.bf16.msrb.mxu2 %v10148_v15  ;;  %8233 = vmatmul.bf16.vlgmr.msra.gmra.mxu3 %v12813_v49  ;;  %v10057_v49 = vld [vmem:[%s12386_s29 + $0xac8] sm:$0xf0]  ;;  %v7988_v4 = vadd.f32 %v7987_v0, %v4887_v46  ;;  %v10180_v40 = vor.u32 %v11102_v14, %v10177_v33  ;;  %v11098_v46 = vld [vmem:[%s12386_s29 + $0xb94] sm:$0xf]  ;;  %v10337_v14 = vld [vmem:[%s12386_s29 + $0xcf8] sm:$0xf0] }
 0x3bf   : > { %8277 = vmatpush.bf16.msrb.mxu3 %v10212_v27  ;;  %v10060_v3 = vor.u32 %v11072_v45, %v10057_v49  ;;  %v11052_v27 = vld [vmem:[%s12386_s29 + $0xa24] sm:$0xf]  ;;  %v11082_v45 = vld [vmem:[%s12386_s29 + $0xb14] sm:$0xf]  ;;  %v10025_v0 = vld [vmem:[%s12386_s29 + $0xa88] sm:$0xf0] }
 0x3c0   : > { %8239 = vmatpush.bf16.msrb.mxu0 %v10012_v41  ;;  %v8001_v15 = vadd.f32 %v8000_v6, %v7988_v4  ;;  %v8013_v18 = vpop.f32.mrf.mxu2  ;;  %v11084_v41 = vld [vmem:[%s12386_s29 + $0xb24] sm:$0xf]  ;;  %v7989_v51 = vpop.f32.mrf.mxu0  ;;  %v10100_v63 = vor.u32 %v11082_v45, %v10097_v57  ;;  %v10153_v4 = vld [vmem:[%s12386_s29 + $0xb88] sm:$0xf0]  ;;  %v11158_v33 = vld [vmem:[%s12386_s29 + $0xd74] sm:$0xf] }
 0x3c1   : > { %8252 = vmatpush.bf16.msrb.mxu1 %v10076_v42  ;;  %v10105_v42 = vld [vmem:[%s12386_s29 + $0xb28] sm:$0xf0]  ;;  %v8026_v20 = vpop.f32.mrf.mxu3  ;;  %v10321_v56 = vld [vmem:[%s12386_s29 + $0xcd8] sm:$0xf0]  ;;  %v11154_v45 = vld [vmem:[%s12386_s29 + $0xd54] sm:$0xf] }
 0x3c2   : > { %8265 = vmatpush.bf16.msrb.mxu2 %v10140_v19  ;;  %v8014_v19 = vadd.f32 %v8013_v18, %v8001_v15  ;;  %v10108_v44 = vor.u32 %v11084_v41, %v10105_v42  ;;  %v10401_v15 = vld [vmem:[%s12386_s29 + $0xd78] sm:$0xf0]  ;;  %v10340_v18 = vor.u32 %v11142_v8, %v10337_v14  ;;  %v10265_v41 = vld [vmem:[%s12386_s29 + $0xc68] sm:$0xf0]  ;;  %v11140_v42 = vld [vmem:[%s12386_s29 + $0xce4] sm:$0xf] }
 0x3c3   : > { %8278 = vmatpush.bf16.msrb.mxu3 %v10204_v47  ;;  %v9980_v47 = vor.u32 %v11052_v27, %v9977_v38  ;;  %v10465_v27 = vld [vmem:[%s12386_s29 + $0xdf8] sm:$0xf0]  ;;  %v10156_v38 = vor.u32 %v11096_v2, %v10153_v4  ;;  %v10457_v51 = vld [vmem:[%s12386_s29 + $0xde8] sm:$0xf0]  ;;  %v11120_v60 = vld [vmem:[%s12386_s29 + $0xc44] sm:$0xf] }
 0x3c4   : > { %8240 = vmatpush.bf16.msrb.mxu0 %v10004_v37  ;;  %v13473_v48 = vadd.f32 %v8026_v20, %v8014_v19  ;;  %v9969_v37 = vld [vmem:[%s12386_s29 + $0xa18] sm:$0xf0]  ;;  %v10329_v20 = vld [vmem:[%s12386_s29 + $0xce8] sm:$0xf0]  ;;  %v11118_v4 = vld [vmem:[%s12386_s29 + $0xc34] sm:$0xf] }
 0x3c5   : > { %8253 = vmatpush.bf16.msrb.mxu1 %v10068_v54  ;;  %v8002_v54 = vpop.f32.mrf.mxu1  ;;  %v9972_v49 = vor.u32 %v11050_v52, %v9969_v37  ;;  %v11122_v37 = vld [vmem:[%s12386_s29 + $0xc54] sm:$0xf]  ;;  %v10385_v57 = vld [vmem:[%s12386_s29 + $0xd58] sm:$0xf0] }
 0x3c6   : > { %8266 = vmatpush.bf16.msrb.mxu2 %v10132_v61  ;;  %v10172_v61 = vor.u32 %v11100_v28, %v10169_v31  ;;  %v11156_v28 = vld [vmem:[%s12386_s29 + $0xd64] sm:$0xf]  ;;  %v10393_v31 = vld [vmem:[%s12386_s29 + $0xd68] sm:$0xf0]  ;;  %v11138_v54 = vld [vmem:[%s12386_s29 + $0xcd4] sm:$0xf]  ;;  %v10388_v59 = vor.u32 %v11154_v45, %v10385_v57 }
 0x3c7   : > { %8279 = vmatpush.bf16.msrb.mxu3 %v10196_v58  ;;  %v10161_v58 = vld [vmem:[%s12386_s29 + $0xb98] sm:$0xf0]  ;;  %v10396_v52 = vor.u32 %v11156_v28, %v10393_v31 }
 0x3c8   : > { %8241 = vmatpush.bf16.msrb.mxu0 %v9996_v50  ;;  %v11064_v50 = vld [vmem:[%s12386_s29 + $0xa84] sm:$0xf]  ;;  %v10164_v26 = vor.u32 %v11098_v46, %v10161_v58  ;;  %v11170_v46 = vld [vmem:[%s12386_s29 + $0xdd4] sm:$0xf]  ;;  %v10449_v58 = vld [vmem:[%s12386_s29 + $0xdd8] sm:$0xf0] }
 0x3c9   : > { %8254 = vmatpush.bf16.msrb.mxu1 %v10060_v3  ;;  %v11080_v3 = vld [vmem:[%s12386_s29 + $0xb04] sm:$0xf]  ;;  %v8028_v6 = vpop.f32.mrf.mxu3  ;;  %v10305_v14 = vld [vmem:[%s12386_s29 + $0xcb8] sm:$0xf0] }
 0x3ca   : > { %8267 = vmatpush.bf16.msrb.mxu2 %v10124_v1  ;;  %v8015_v1 = vpop.f32.mrf.mxu2  ;;  %v10241_v6 = vld [vmem:[%s12386_s29 + $0xc38] sm:$0xf0] }
 0x3cb   : > { %8280 = vmatpush.bf16.msrb.mxu3 %v10188_v29  ;;  %v11126_v29 = vld [vmem:[%s12386_s29 + $0xc74] sm:$0xf] }
 0x3cc   : > { %8242 = vmatpush.bf16.msrb.mxu0 %v9988_v21  ;;  %v10028_v21 = vor.u32 %v11064_v50, %v10025_v0  ;;  %v10276_v32 = vor.u32 %v11126_v29, %v10273_v30  ;;  %v11152_v50 = vld [vmem:[%s12386_s29 + $0xd44] sm:$0xf]  ;;  %v10377_v0 = vld [vmem:[%s12386_s29 + $0xd48] sm:$0xf0]  ;;  %v11134_v29 = vld [vmem:[%s12386_s29 + $0xcb4] sm:$0xf] }
 0x3cd   : > { %8255 = vmatpush.bf16.msrb.mxu1 %v10052_v24  ;;  %v10092_v24 = vor.u32 %v11080_v3, %v10089_v25  ;;  %v11168_v3 = vld [vmem:[%s12386_s29 + $0xdc4] sm:$0xf]  ;;  %v10380_v2 = vor.u32 %v11152_v50, %v10377_v0  ;;  %v10281_v0 = vld [vmem:[%s12386_s29 + $0xc88] sm:$0xf0] }
 0x3ce   : > { %8268 = vmatpush.bf16.msrb.mxu2 %v10116_v55  ;;  %v11174_v55 = vld [vmem:[%s12386_s29 + $0xdf4] sm:$0xf]  ;;  %v11128_v50 = vld [vmem:[%s12386_s29 + $0xc84] sm:$0xf] }
 0x3cf   : > { %8281 = vmatpush.bf16.msrb.mxu3 %v10180_v40  ;;  %v10404_v40 = vor.u32 %v11158_v33, %v10401_v15  ;;  %v10468_v19 = vor.u32 %v11174_v55, %v10465_v27  ;;  %v11150_v33 = vld [vmem:[%s12386_s29 + $0xd34] sm:$0xf]  ;;  %v10369_v15 = vld [vmem:[%s12386_s29 + $0xd38] sm:$0xf0]  ;;  %v10244_v27 = vor.u32 %v11118_v4, %v10241_v6 }
 0x3d0   : > { %8243 = vmatpush.bf16.msrb.mxu0 %v9980_v47  ;;  %v11172_v47 = vld [vmem:[%s12386_s29 + $0xde4] sm:$0xf]  ;;  %v11190_v6 = vld [vmem:[%s12386_s29 + $0xe74] sm:$0xf] }
 0x3d1   : > { %8256 = vmatpush.bf16.msrb.mxu1 %v10044_v35  ;;  %v10268_v35 = vor.u32 %v11124_v23, %v10265_v41 }
 0x3d2   : > { %8269 = vmatpush.bf16.msrb.mxu2 %v10108_v44  ;;  %v10332_v44 = vor.u32 %v11140_v42, %v10329_v20  ;;  %v10297_v42 = vld [vmem:[%s12386_s29 + $0xca8] sm:$0xf0] }
 0x3d3   : > { %8282 = vmatpush.bf16.msrb.mxu3 %v10172_v61  ;;  %v10460_v61 = vor.u32 %v11172_v47, %v10457_v51  ;;  %v10361_v20 = vld [vmem:[%s12386_s29 + $0xd28] sm:$0xf0]  ;;  %v11164_v47 = vld [vmem:[%s12386_s29 + $0xda4] sm:$0xf] }
 0x3d4   : > { %8244 = vmatpush.bf16.msrb.mxu0 %v9972_v49  ;;  %v10324_v49 = vor.u32 %v11138_v54, %v10321_v56  ;;  %v10425_v51 = vld [vmem:[%s12386_s29 + $0xda8] sm:$0xf0]  ;;  %v11114_v54 = vld [vmem:[%s12386_s29 + $0xc14] sm:$0xf] }
 0x3d5   : > { %8257 = vmatpush.bf16.msrb.mxu1 %v10036_v62  ;;  %v10249_v62 = vld [vmem:[%s12386_s29 + $0xc48] sm:$0xf0]  ;;  %v11130_v56 = vld [vmem:[%s12386_s29 + $0xc94] sm:$0xf]  ;;  %v10428_v57 = vor.u32 %v11164_v47, %v10425_v51 }
 0x3d6   : > { %8270 = vmatpush.bf16.msrb.mxu2 %v10100_v63  ;;  %v10313_v63 = vld [vmem:[%s12386_s29 + $0xcc8] sm:$0xf0]  ;;  %v10252_v1 = vor.u32 %v11120_v60, %v10249_v62  ;;  %v11112_v62 = vld [vmem:[%s12386_s29 + $0xc04] sm:$0xf] }
 0x3d7   : > { %8283 = vmatpush.bf16.msrb.mxu3 %v10164_v26 }
 0x3d8   : > { %8245 = vmatpush.bf16.msrb.mxu0 %v9964_v9  ;;  %v8039_v26 = vpop.f32.mrf.mxu0 }
 0x3d9   : > { %8258 = vmatpush.bf16.msrb.mxu1 %v10028_v21  ;;  %v8040_v30 = vadd.f32 %v8039_v26, %v13473_v48  ;;  %v8052_v8 = vpop.f32.mrf.mxu1  ;;  %v11166_v21 = vld [vmem:[%s12386_s29 + $0xdb4] sm:$0xf]  ;;  %v10308_v48 = vor.u32 %v11134_v29, %v10305_v14  ;;  %v10345_v26 = vld [vmem:[%s12386_s29 + $0xd08] sm:$0xf0]  ;;  %v10529_v29 = vld [vmem:[%s12386_s29 + $0xe78] sm:$0xf0] }
 0x3da   : > { %8271 = vmatpush.bf16.msrb.mxu2 %v10092_v24  ;;  %v10433_v24 = vld [vmem:[%s12386_s29 + $0xdb8] sm:$0xf0]  ;;  %v11222_v14 = vld [vmem:[%s12386_s29 + $0xf74] sm:$0xf] }
 0x3db   : > { %8284 = vmatpush.bf16.msrb.mxu3 %v10156_v38  ;;  %8246 = vmatmul.bf16.vlgmr.msrb.gmra.mxu0 %v12898_v7  ;;  %v10260_v7 = vor.u32 %v11122_v37, %v10257_v22  ;;  %v8053_v55 = vadd.f32 %v8052_v8, %v8040_v30  ;;  %v10372_v38 = vor.u32 %v11150_v33, %v10369_v15  ;;  %v11206_v30 = vld [vmem:[%s12386_s29 + $0xef4] sm:$0xf]  ;;  %v10657_v33 = vld [vmem:[%s12386_s29 + $0xf78] sm:$0xf0] }
 0x3dc   : > { %8290 = vmatpush.bf16.msra.mxu0 %v10276_v32  ;;  %8259 = vmatmul.bf16.vlgmr.msrb.gmra.mxu1 %v12905_v12  ;;  %v10452_v12 = vor.u32 %v11170_v46, %v10449_v58  ;;  %v11116_v32 = vld [vmem:[%s12386_s29 + $0xc24] sm:$0xf]  ;;  %v10436_v41 = vor.u32 %v11166_v21, %v10433_v24  ;;  %v10289_v46 = vld [vmem:[%s12386_s29 + $0xc98] sm:$0xf0]  ;;  %v11146_v58 = vld [vmem:[%s12386_s29 + $0xd14] sm:$0xf]  ;;  %v10284_v15 = vor.u32 %v11128_v50, %v10281_v0 }
 0x3dd   : > { %8303 = vmatpush.bf16.msra.mxu1 %v10340_v18  ;;  %8272 = vmatmul.bf16.vlgmr.msrb.gmra.mxu2 %v12903_v11  ;;  %v11136_v11 = vld [vmem:[%s12386_s29 + $0xcc4] sm:$0xf]  ;;  %v10233_v18 = vld [vmem:[%s12386_s29 + $0xc28] sm:$0xf0]  ;;  %v11238_v24 = vld [vmem:[%s12386_s29 + $0xff4] sm:$0xf] }
 0x3de   : > { %8316 = vmatpush.bf16.msra.mxu2 %v10404_v40  ;;  %8285 = vmatmul.bf16.vlgmr.msrb.gmra.mxu3 %v12909_v16  ;;  %v10441_v16 = vld [vmem:[%s12386_s29 + $0xdc8] sm:$0xf0]  ;;  %v10316_v25 = vor.u32 %v11136_v11, %v10313_v63  ;;  %v11132_v40 = vld [vmem:[%s12386_s29 + $0xca4] sm:$0xf] }
 0x3df   : > { %8329 = vmatpush.bf16.msra.mxu3 %v10468_v19  ;;  %v10444_v9 = vor.u32 %v11168_v3, %v10441_v16  ;;  %v11148_v19 = vld [vmem:[%s12386_s29 + $0xd24] sm:$0xf]  ;;  %v10300_v37 = vor.u32 %v11132_v40, %v10297_v42  ;;  %v10217_v11 = vld [vmem:[%s12386_s29 + $0xc08] sm:$0xf0] }
 0x3e0   : > { %8291 = vmatpush.bf16.msra.mxu0 %v10268_v35  ;;  %v8065_v23 = vpop.f32.mrf.mxu2  ;;  %v10236_v35 = vor.u32 %v11116_v32, %v10233_v18  ;;  %v10364_v22 = vor.u32 %v11148_v19, %v10361_v20  ;;  %v11144_v3 = vld [vmem:[%s12386_s29 + $0xd04] sm:$0xf]  ;;  %v10220_v8 = vor.u32 %v11112_v62, %v10217_v11  ;;  %v10660_v32 = vor.u32 %v11222_v14, %v10657_v33  ;;  %v10521_v40 = vld [vmem:[%s12386_s29 + $0xe68] sm:$0xf0] }
 0x3e1   : > { %8304 = vmatpush.bf16.msra.mxu1 %v10332_v44  ;;  %v8066_v28 = vadd.f32 %v8065_v23, %v8053_v55  ;;  %v8078_v31 = vpop.f32.mrf.mxu3  ;;  %v8054_v45 = vpop.f32.mrf.mxu1  ;;  %v10348_v21 = vor.u32 %v11144_v3, %v10345_v26  ;;  %v10721_v55 = vld [vmem:[%s12386_s29 + $0xff8] sm:$0xf0]  ;;  %v11188_v18 = vld [vmem:[%s12386_s29 + $0xe64] sm:$0xf]  ;;  %v10585_v42 = vld [vmem:[%s12386_s29 + $0xee8] sm:$0xf0] }
 0x3e2   : > { %8317 = vmatpush.bf16.msra.mxu2 %v10396_v52  ;;  %v8041_v52 = vpop.f32.mrf.mxu0  ;;  %v11204_v23 = vld [vmem:[%s12386_s29 + $0xee4] sm:$0xf]  ;;  %v10649_v20 = vld [vmem:[%s12386_s29 + $0xf68] sm:$0xf0]  ;;  %v10524_v47 = vor.u32 %v11188_v18, %v10521_v40  ;;  %v10641_v45 = vld [vmem:[%s12386_s29 + $0xf58] sm:$0xf0] }
 0x3e3   : > { %8330 = vmatpush.bf16.msra.mxu3 %v10460_v61  ;;  %v13544_v44 = vadd.f32 %v8078_v31, %v8066_v28  ;;  %v10225_v61 = vld [vmem:[%s12386_s29 + $0xc18] sm:$0xf0]  ;;  %v11220_v19 = vld [vmem:[%s12386_s29 + $0xf64] sm:$0xf]  ;;  %v10713_v31 = vld [vmem:[%s12386_s29 + $0xfe8] sm:$0xf0]  ;;  %v10588_v51 = vor.u32 %v11204_v23, %v10585_v42 }
 0x3e4   : > { %8292 = vmatpush.bf16.msra.mxu0 %v10260_v7  ;;  %v10353_v7 = vld [vmem:[%s12386_s29 + $0xd18] sm:$0xf0]  ;;  %v10228_v60 = vor.u32 %v11114_v54, %v10225_v61  ;;  %v11236_v28 = vld [vmem:[%s12386_s29 + $0xfe4] sm:$0xf]  ;;  %v11186_v52 = vld [vmem:[%s12386_s29 + $0xe54] sm:$0xf] }
 0x3e5   : > { %8305 = vmatpush.bf16.msra.mxu1 %v10324_v49  ;;  %v11162_v49 = vld [vmem:[%s12386_s29 + $0xd94] sm:$0xf]  ;;  %v10356_v63 = vor.u32 %v11146_v58, %v10353_v7  ;;  %v10716_v54 = vor.u32 %v11236_v28, %v10713_v31  ;;  %v10577_v61 = vld [vmem:[%s12386_s29 + $0xed8] sm:$0xf0]  ;;  %v11216_v62 = vld [vmem:[%s12386_s29 + $0xf44] sm:$0xf] }
 0x3e6   : > { %8318 = vmatpush.bf16.msra.mxu2 %v10388_v59  ;;  %v10417_v59 = vld [vmem:[%s12386_s29 + $0xd98] sm:$0xf0]  ;;  %v10633_v11 = vld [vmem:[%s12386_s29 + $0xf48] sm:$0xf0]  ;;  %v11182_v26 = vld [vmem:[%s12386_s29 + $0xe34] sm:$0xf] }
 0x3e7   : > { %8331 = vmatpush.bf16.msra.mxu3 %v10452_v12  ;;  %v10292_v12 = vor.u32 %v11130_v56, %v10289_v46  ;;  %v11218_v56 = vld [vmem:[%s12386_s29 + $0xf54] sm:$0xf]  ;;  %v10705_v46 = vld [vmem:[%s12386_s29 + $0xfd8] sm:$0xf0]  ;;  %v10617_v18 = vld [vmem:[%s12386_s29 + $0xf28] sm:$0xf0] }
 0x3e8   : > { %8293 = vmatpush.bf16.msra.mxu0 %v10252_v1  ;;  %v8067_v16 = vpop.f32.mrf.mxu2  ;;  %v10420_v1 = vor.u32 %v11162_v49, %v10417_v59  ;;  %v10644_v7 = vor.u32 %v11218_v56, %v10641_v45  ;;  %v11184_v49 = vld [vmem:[%s12386_s29 + $0xe44] sm:$0xf]  ;;  %v10505_v59 = vld [vmem:[%s12386_s29 + $0xe48] sm:$0xf0]  ;;  %v10609_v56 = vld [vmem:[%s12386_s29 + $0xf18] sm:$0xf0] }
 0x3e9   : > { %8306 = vmatpush.bf16.msra.mxu1 %v10316_v25  ;;  %v11160_v25 = vld [vmem:[%s12386_s29 + $0xd84] sm:$0xf]  ;;  %v8080_v4 = vpop.f32.mrf.mxu3  ;;  %v10508_v0 = vor.u32 %v11184_v49, %v10505_v59  ;;  %v10681_v42 = vld [vmem:[%s12386_s29 + $0xfa8] sm:$0xf0]  ;;  %v11226_v45 = vld [vmem:[%s12386_s29 + $0xf94] sm:$0xf] }
 0x3ea   : > { %8319 = vmatpush.bf16.msra.mxu2 %v10380_v2  ;;  %v10409_v2 = vld [vmem:[%s12386_s29 + $0xd88] sm:$0xf0]  ;;  %v11192_v59 = vld [vmem:[%s12386_s29 + $0xe84] sm:$0xf] }
 0x3eb   : > { %8332 = vmatpush.bf16.msra.mxu3 %v10444_v9  ;;  %v10593_v9 = vld [vmem:[%s12386_s29 + $0xef8] sm:$0xf0]  ;;  %v10473_v49 = vld [vmem:[%s12386_s29 + $0xe08] sm:$0xf0] }
 0x3ec   : > { %8294 = vmatpush.bf16.msra.mxu0 %v10244_v27  ;;  %v10412_v27 = vor.u32 %v11160_v25, %v10409_v2  ;;  %v10497_v25 = vld [vmem:[%s12386_s29 + $0xe38] sm:$0xf0]  ;;  %v11198_v2 = vld [vmem:[%s12386_s29 + $0xeb4] sm:$0xf] }
 0x3ed   : > { %8307 = vmatpush.bf16.msra.mxu1 %v10308_v48  ;;  %v10532_v48 = vor.u32 %v11190_v6, %v10529_v29  ;;  %v10561_v29 = vld [vmem:[%s12386_s29 + $0xeb8] sm:$0xf0]  ;;  %v10500_v14 = vor.u32 %v11182_v26, %v10497_v25 }
 0x3ee   : > { %8320 = vmatpush.bf16.msra.mxu2 %v10372_v38  ;;  %v10596_v38 = vor.u32 %v11206_v30, %v10593_v9  ;;  %v11214_v30 = vld [vmem:[%s12386_s29 + $0xf34] sm:$0xf]  ;;  %v10689_v9 = vld [vmem:[%s12386_s29 + $0xfb8] sm:$0xf0]  ;;  %v10564_v33 = vor.u32 %v11198_v2, %v10561_v29 }
 0x3ef   : > { %8333 = vmatpush.bf16.msra.mxu3 %v10436_v41  ;;  %v10724_v41 = vor.u32 %v11238_v24, %v10721_v55  ;;  %v10489_v24 = vld [vmem:[%s12386_s29 + $0xe28] sm:$0xf0]  ;;  %v11196_v55 = vld [vmem:[%s12386_s29 + $0xea4] sm:$0xf] }
 0x3f0   : > { %8295 = vmatpush.bf16.msra.mxu0 %v10236_v35  ;;  %v10652_v35 = vor.u32 %v11220_v19, %v10649_v20 }
 0x3f1   : > { %8308 = vmatpush.bf16.msra.mxu1 %v10300_v37  ;;  %v10513_v37 = vld [vmem:[%s12386_s29 + $0xe58] sm:$0xf0] }
 0x3f2   : > { %8321 = vmatpush.bf16.msra.mxu2 %v10364_v22  ;;  %v11202_v22 = vld [vmem:[%s12386_s29 + $0xed4] sm:$0xf] }
 0x3f3   : > { %8334 = vmatpush.bf16.msra.mxu3 %v10428_v57  ;;  %v11234_v57 = vld [vmem:[%s12386_s29 + $0xfd4] sm:$0xf]  ;;  %v10580_v58 = vor.u32 %v11202_v22, %v10577_v61 }
 0x3f4   : > { %8296 = vmatpush.bf16.msra.mxu0 %v10228_v60  ;;  %v10569_v60 = vld [vmem:[%s12386_s29 + $0xec8] sm:$0xf0]  ;;  %v11210_v61 = vld [vmem:[%s12386_s29 + $0xf14] sm:$0xf] }
 0x3f5   : > { %8309 = vmatpush.bf16.msra.mxu1 %v10292_v12  ;;  %v11232_v12 = vld [vmem:[%s12386_s29 + $0xfc4] sm:$0xf] }
 0x3f6   : > { %8322 = vmatpush.bf16.msra.mxu2 %v10356_v63  ;;  %v10697_v63 = vld [vmem:[%s12386_s29 + $0xfc8] sm:$0xf0] }
 0x3f7   : > { %8335 = vmatpush.bf16.msra.mxu3 %v10420_v1  ;;  %v10636_v1 = vor.u32 %v11216_v62, %v10633_v11  ;;  %v10700_v4 = vor.u32 %v11232_v12, %v10697_v63  ;;  %v10601_v62 = vld [vmem:[%s12386_s29 + $0xf08] sm:$0xf0] }
 0x3f8   : > { %8297 = vmatpush.bf16.msra.mxu0 %v10220_v8  ;;  %v11230_v8 = vld [vmem:[%s12386_s29 + $0xfb4] sm:$0xf]  ;;  %v10665_v12 = vld [vmem:[%s12386_s29 + $0xf88] sm:$0xf0] }
 0x3f9   : > { %8310 = vmatpush.bf16.msra.mxu1 %v10284_v15  ;;  %v8104_v3 = vpop.f32.mrf.mxu1 }
 0x3fa   : > { %8323 = vmatpush.bf16.msra.mxu2 %v10348_v21  ;;  %v11180_v21 = vld [vmem:[%s12386_s29 + $0xe24] sm:$0xf] }
 0x3fb   : > { %8336 = vmatpush.bf16.msra.mxu3 %v10412_v27  ;;  %8298 = vmatmul.bf16.vlgmr.msra.gmra.mxu0 %v12983_v5  ;;  %v10516_v5 = vor.u32 %v11186_v52, %v10513_v37  ;;  %v10692_v27 = vor.u32 %v11230_v8, %v10689_v9  ;;  %v10492_v20 = vor.u32 %v11180_v21, %v10489_v24  ;;  %v10481_v52 = vld [vmem:[%s12386_s29 + $0xe18] sm:$0xf0]  ;;  %v11194_v37 = vld [vmem:[%s12386_s29 + $0xe94] sm:$0xf] }
 0x3fc   : > { %8342 = vmatpush.bf16.msrb.mxu0 %v10532_v48  ;;  %8311 = vmatmul.bf16.vlgmr.msra.gmra.mxu1 %v12990_v13  ;;  %v10708_v13 = vor.u32 %v11234_v57, %v10705_v46  ;;  %v10673_v57 = vld [vmem:[%s12386_s29 + $0xf98] sm:$0xf0] }
 0x3fd   : > { %8355 = vmatpush.bf16.msrb.mxu1 %v10596_v38  ;;  %8324 = vmatmul.bf16.vlgmr.msra.gmra.mxu2 %v12988_v10  ;;  %v11200_v10 = vld [vmem:[%s12386_s29 + $0xec4] sm:$0xf]  ;;  %v10553_v38 = vld [vmem:[%s12386_s29 + $0xea8] sm:$0xf0] }
 0x3fe   : > { %8368 = vmatpush.bf16.msrb.mxu2 %v10660_v32  ;;  %8337 = vmatmul.bf16.vlgmr.msra.gmra.mxu3 %v12994_v17  ;;  %v8091_v17 = vpop.f32.mrf.mxu0  ;;  %v10572_v16 = vor.u32 %v11200_v10, %v10569_v60  ;;  %v11212_v32 = vld [vmem:[%s12386_s29 + $0xf24] sm:$0xf]  ;;  %v10676_v10 = vor.u32 %v11226_v45, %v10673_v57 }
 0x3ff   : > { %8381 = vmatpush.bf16.msrb.mxu3 %v10724_v41  ;;  %v8092_v50 = vadd.f32 %v8091_v17, %v13544_v44  ;;  %v10625_v44 = vld [vmem:[%s12386_s29 + $0xf38] sm:$0xf0]  ;;  %v11228_v41 = vld [vmem:[%s12386_s29 + $0xfa4] sm:$0xf] }
 0x400   : > { %8343 = vmatpush.bf16.msrb.mxu0 %v10524_v47  ;;  %v10628_v15 = vor.u32 %v11214_v30, %v10625_v44  ;;  %v8117_v48 = vpop.f32.mrf.mxu2  ;;  %v10556_v47 = vor.u32 %v11196_v55, %v10553_v38  ;;  %v10684_v22 = vor.u32 %v11228_v41, %v10681_v42  ;;  %v11208_v60 = vld [vmem:[%s12386_s29 + $0xf04] sm:$0xf] }
 0x401   : > { %8356 = vmatpush.bf16.msrb.mxu1 %v10588_v51  ;;  %v8105_v6 = vadd.f32 %v8104_v3, %v8092_v50  ;;  %v8130_v23 = vpop.f32.mrf.mxu3  ;;  %v8106_v28 = vpop.f32.mrf.mxu1  ;;  %v10620_v51 = vor.u32 %v11212_v32, %v10617_v18  ;;  %v11224_v17 = vld [vmem:[%s12386_s29 + $0xf84] sm:$0xf]  ;;  %v10604_v3 = vor.u32 %v11208_v60, %v10601_v62 }
 0x402   : > { %8369 = vmatpush.bf16.msrb.mxu2 %v10652_v35  ;;  %v11178_v35 = vld [vmem:[%s12386_s29 + $0xe14] sm:$0xf] }
 0x403   : > { %8382 = vmatpush.bf16.msrb.mxu3 %v10716_v54  ;;  %v8118_v40 = vadd.f32 %v8117_v48, %v8105_v6  ;;  %v10545_v54 = vld [vmem:[%s12386_s29 + $0xe98] sm:$0xf0]  ;;  %v10484_v46 = vor.u32 %v11178_v35, %v10481_v52 }
 0x404   : > { %8344 = vmatpush.bf16.msrb.mxu0 %v10516_v5  ;;  %v10548_v5 = vor.u32 %v11194_v37, %v10545_v54 }
 0x405   : > { %8357 = vmatpush.bf16.msrb.mxu1 %v10580_v58  ;;  %v8131_v31 = vadd.f32 %v8130_v23, %v8118_v40  ;;  %v10612_v58 = vor.u32 %v11210_v61, %v10609_v56 }
 0x406   : > { %8370 = vmatpush.bf16.msrb.mxu2 %v10644_v7  ;;  %v8093_v19 = vpop.f32.mrf.mxu0  ;;  %v11176_v7 = vld [vmem:[%s12386_s29 + $0xe04] sm:$0xf] }
 0x407   : > { %8383 = vmatpush.bf16.msrb.mxu3 %v10708_v13  ;;  %v10537_v13 = vld [vmem:[%s12386_s29 + $0xe88] sm:$0xf0]  ;;  %v10476_v50 = vor.u32 %v11176_v7, %v10473_v49  ;;  %s8676_s29 = sshll.u32 %s13683_s28, 2 }
 0x408   : > { %8345 = vmatpush.bf16.msrb.mxu0 %v10508_v0  ;;  %v8119_v11 = vpop.f32.mrf.mxu2  ;;  %v10540_v0 = vor.u32 %v11192_v59, %v10537_v13  ;;  %s4354_s23 = scalar_lea.vmem %s13678_s3, %s8676_s29 }
 0x409   : > { %8358 = vmatpush.bf16.msrb.mxu1 %v10572_v16  ;;  %v8132_v63 = vpop.f32.mrf.mxu3  ;;  %v10668_v16 = vor.u32 %v11224_v17, %v10665_v12  ;;  %v11300_v11 = vmov 4.0  }
 0x40a   : > { %8371 = vmatpush.bf16.msrb.mxu2 %v10636_v1  ;;  %11265 = vrcp.f32 %v11300_v11 }
 0x40b   : > { %8384 = vmatpush.bf16.msrb.mxu3 %v10700_v4 }
 0x40c   : > { %8346 = vmatpush.bf16.msrb.mxu0 %v10500_v14 }
 0x40d   : > { %8359 = vmatpush.bf16.msrb.mxu1 %v10564_v33 }
 0x40e   : > { %8372 = vmatpush.bf16.msrb.mxu2 %v10628_v15 }
 0x40f   : > { %8385 = vmatpush.bf16.msrb.mxu3 %v10692_v27 }
 0x410   : > { %8347 = vmatpush.bf16.msrb.mxu0 %v10492_v20 }
 0x411   : > { %8360 = vmatpush.bf16.msrb.mxu1 %v10556_v47 }
 0x412   : > { %8373 = vmatpush.bf16.msrb.mxu2 %v10620_v51 }
 0x413   : > { %8386 = vmatpush.bf16.msrb.mxu3 %v10684_v22 }
 0x414   : > { %8348 = vmatpush.bf16.msrb.mxu0 %v10484_v46 }
 0x415   : > { %8361 = vmatpush.bf16.msrb.mxu1 %v10548_v5 }
 0x416   : > { %8374 = vmatpush.bf16.msrb.mxu2 %v10612_v58 }
 0x417   : > { %8387 = vmatpush.bf16.msrb.mxu3 %v10676_v10 }
 0x418   : > { %8349 = vmatpush.bf16.msrb.mxu0 %v10476_v50  ;;  %v8143_v1 = vpop.f32.mrf.mxu0 }
 0x419   : > { %8362 = vmatpush.bf16.msrb.mxu1 %v10540_v0  ;;  %v8144_v26 = vadd.f32 %v8143_v1, %v8131_v31  ;;  %v8156_v25 = vpop.f32.mrf.mxu1  ;;  %v11266_v0 = vpop.eup %11265 }
 0x41a   : > { %8375 = vmatpush.bf16.msrb.mxu2 %v10604_v3  ;;  %vm8447_vm1 = vweird.f32 %v11266_v0 }
 0x41b   : > { %8388 = vmatpush.bf16.msrb.mxu3 %v10668_v16  ;;  %8350 = vmatmul.bf16.vlgmr.msrb.gmra.mxu0 %v13068_v53  ;;  %v8157_v2 = vadd.f32 %v8156_v25, %v8144_v26 }
 0x41c   : > { %8363 = vmatmul.bf16.vlgmr.msrb.gmra.mxu1 %v13075_v36 }
 0x41d   : > { %8376 = vmatmul.bf16.vlgmr.msrb.gmra.mxu2 %v13073_v34 }
 0x41e   : > { %8389 = vmatmul.bf16.vlgmr.msrb.gmra.mxu3 %v13079_v43 }
 0x420   : > { %v8169_v4 = vpop.f32.mrf.mxu2  ;;  %v8145_v30 = vpop.f32.mrf.mxu0 }
 0x421   : > { %v8170_v6 = vadd.f32 %v8169_v4, %v8157_v2  ;;  %v8182_v29 = vpop.f32.mrf.mxu3  ;;  %v8158_v44 = vpop.f32.mrf.mxu1  ;;  %v8443_v2 = vmul.f32 4.0, %v11266_v0 }
 0x423   : > { %v8183_v8 = vadd.f32 %v8182_v29, %v8170_v6  ;;  %v8444_v4 = vsub.f32 1.0, %v8443_v2 }
 0x428   : > { %v8171_v9 = vpop.f32.mrf.mxu2 }
 0x429   : > { %v8184_v14 = vpop.f32.mrf.mxu3 }
 0x438   : > { %v8195_v33 = vpop.f32.mrf.mxu0 }
 0x439   : > { %v8196_v53 = vadd.f32 %v8195_v33, %v8183_v8  ;;  %v8208_v15 = vpop.f32.mrf.mxu1 }
 0x43b   : > { %v8209_v36 = vadd.f32 %v8208_v15, %v8196_v53 }
 0x440   : > { %v8221_v21 = vpop.f32.mrf.mxu2  ;;  %v8197_v43 = vpop.f32.mrf.mxu0 }
 0x441   : > { %v8222_v34 = vadd.f32 %v8221_v21, %v8209_v36  ;;  %v8234_v24 = vpop.f32.mrf.mxu3  ;;  %v8210_v55 = vpop.f32.mrf.mxu1  ;;  %v8445_v21 = vmul.f32 %v11266_v0, %v8444_v4 }
 0x443   : > { %v8235_v27 = vadd.f32 %v8234_v24, %v8222_v34 }
 0x448   : > { %v8223_v48 = vpop.f32.mrf.mxu2 }
 0x449   : > { %v8236_v38 = vpop.f32.mrf.mxu3 }
 0x458   : > { %v8247_v32 = vpop.f32.mrf.mxu0 }
 0x459   : > { %v8260_v18 = vpop.f32.mrf.mxu1  ;;  %v8248_v47 = vadd.f32 %v8247_v32, %v8235_v27 }
 0x45b   : > { %v8261_v22 = vadd.f32 %v8260_v18, %v8248_v47  ;;  %v8446_v18 = vadd.f32 %v11266_v0, %v8445_v21 }
 0x45d   : > { %v8448_v47 = vsel %vm8447_vm1, %v11266_v0, %v8446_v18 }
 0x460   : > { %v8273_v40 = vpop.f32.mrf.mxu2  ;;  %v8249_v41 = vpop.f32.mrf.mxu0 }
 0x461   : > { %v8286_v23 = vpop.f32.mrf.mxu3  ;;  %v8262_v42 = vpop.f32.mrf.mxu1  ;;  %v8274_v54 = vadd.f32 %v8273_v40, %v8261_v22 }
 0x463   : > { %v8287_v45 = vadd.f32 %v8286_v23, %v8274_v54 }
 0x468   : > { %v8275_v19 = vpop.f32.mrf.mxu2 }
 0x469   : > { %v8288_v20 = vpop.f32.mrf.mxu3 }
 0x478   : > { %v8299_v28 = vpop.f32.mrf.mxu0 }
 0x479   : > { %v8312_v31 = vpop.f32.mrf.mxu1  ;;  %v8300_v57 = vadd.f32 %v8299_v28, %v8287_v45 }
 0x47b   : > { %v8313_v46 = vadd.f32 %v8312_v31, %v8300_v57 }
 0x480   : > { %v8325_v51 = vpop.f32.mrf.mxu2  ;;  %v8301_v52 = vpop.f32.mrf.mxu0 }
 0x481   : > { %v8338_v35 = vpop.f32.mrf.mxu3  ;;  %v8314_v37 = vpop.f32.mrf.mxu1  ;;  %v8326_v5 = vadd.f32 %v8325_v51, %v8313_v46 }
 0x483   : > { %v8339_v58 = vadd.f32 %v8338_v35, %v8326_v5 }
 0x488   : > { %v8327_v61 = vpop.f32.mrf.mxu2 }
 0x489   : > { %v8340_v56 = vpop.f32.mrf.mxu3 }
 0x498   : > { %v8351_v7 = vpop.f32.mrf.mxu0 }
 0x499   : > { %v8364_v49 = vpop.f32.mrf.mxu1  ;;  %v8352_v59 = vadd.f32 %v8351_v7, %v8339_v58 }
 0x49b   : > { %v8365_v10 = vadd.f32 %v8364_v49, %v8352_v59 }
 0x4a0   : > { %v8377_v13 = vpop.f32.mrf.mxu2  ;;  %v8353_v17 = vpop.f32.mrf.mxu0 }
 0x4a1   : > { %v8378_v60 = vadd.f32 %v8377_v13, %v8365_v10  ;;  %v8390_v62 = vpop.f32.mrf.mxu3  ;;  %v8366_v12 = vpop.f32.mrf.mxu1 }
 0x4a3   : > { %v8391_v63 = vadd.f32 %v8390_v62, %v8378_v60 }
 0x4a5   : > { %v8396_v50 = vrot.slane %v8391_v63, 4 }
 0x4a7   : > { %v8398_v3 = vsel %vm8397_vm0, %v13402_v39, %v8396_v50  ;;  %v8399_v16 = vsel %vm8397_vm0, %v8396_v50, %v13402_v39 }
 0x4a8   : > { %v8400_v1 = vrot.slane %v8399_v16, 4  ;;  %8403 = vst [vmem:[#allocation1] ss:$2 sm:$0xff] %v8398_v3  ;;  %v8379_v26 = vpop.f32.mrf.mxu2 }
 0x4a9   : > { %v8392_v25 = vpop.f32.mrf.mxu3 }
 0x4aa   : > { %8407 = vst [vmem:[#allocation1 + $0x10] ss:$2 sm:$0xff] %v8400_v1 }
 0x4af   : > { %v8404_v6 = vld.sshfl [vmem:[#allocation1] sm:$0xff pattern:$0x75316420]  ;;  %v8405_v29 = vld.sshfl [vmem:[#allocation1 + $0x8] sm:$0xff pattern:$0x75316420] }
 0x4b0   : > { %v8414_v30 = vsel %vm8397_vm0, %v8404_v6, 0.0  ;;  %v8421_v44 = vsel %vm8397_vm0, %v8405_v29, 0.0 }
 0x4b1   : > { %v8408_v8 = vld.sshfl [vmem:[#allocation1 + $0x10] sm:$0xff pattern:$0x75316420]  ;;  %v8409_v9 = vld.sshfl [vmem:[#allocation1 + $0x18] sm:$0xff pattern:$0x75316420] }
 0x4b2   : > { %v8415_v14 = vrot.slane %v8414_v30, 4  ;;  %v8422_v33 = vrot.slane %v8421_v44, 4  ;;  %v8428_v53 = vsel %vm8397_vm0, %v8408_v8, 0.0  ;;  %v8435_v39 = vsel %vm8397_vm0, %v8409_v9, 0.0 }
 0x4b3   : > { %v8429_v15 = vrot.slane %v8428_v53, 4  ;;  %v8436_v36 = vrot.slane %v8435_v39, 4 }
 0x4b4   : > { %v8416_v34 = vadd.f32 %v8415_v14, %v8414_v30  ;;  %v8423_v24 = vadd.f32 %v8422_v33, %v8421_v44 }
 0x4b5   : > { %v8430_v43 = vadd.f32 %v8429_v15, %v8428_v53  ;;  %v8437_v55 = vadd.f32 %v8436_v36, %v8435_v39 }
 0x4b6   : > { %v8417_v27 = vrot.slane %v8416_v34, 2  ;;  %v8424_v48 = vrot.slane %v8423_v24, 2 }
 0x4b7   : > { %v8431_v38 = vrot.slane %v8430_v43, 2  ;;  %v8438_v32 = vrot.slane %v8437_v55, 2 }
 0x4b8   : > { %v8418_v40 = vadd.f32 %v8417_v27, %v8416_v34  ;;  %v8425_v23 = vadd.f32 %v8424_v48, %v8423_v24 }
 0x4b9   : > { %v8432_v41 = vadd.f32 %v8431_v38, %v8430_v43  ;;  %v8439_v42 = vadd.f32 %v8438_v32, %v8437_v55 }
 0x4ba   : > { %v8419_v19 = vrot.slane %v8418_v40, 1  ;;  %v8426_v20 = vrot.slane %v8425_v23, 1 }
 0x4bb   : > { %v8433_v28 = vrot.slane %v8432_v41, 1  ;;  %v8440_v31 = vrot.slane %v8439_v42, 1 }
 0x4bc   : > { %v8420_v51 = vadd.f32 %v8419_v19, %v8418_v40  ;;  %v8427_v35 = vadd.f32 %v8426_v20, %v8425_v23 }
 0x4bd   : > { %v8434_v52 = vadd.f32 %v8433_v28, %v8432_v41  ;;  %v8441_v37 = vadd.f32 %v8440_v31, %v8439_v42 }
 0x4be   : > { %v8450_v22 = vmul.f32 %v8448_v47, %v8427_v35  ;;  %v8449_v61 = vmul.f32 %v8448_v47, %v8420_v51 }
 0x4bf   : > { %v8452_v54 = vmul.f32 %v8448_v47, %v8441_v37  ;;  %v8451_v45 = vmul.f32 %v8448_v47, %v8434_v52 }
 0x4c0   : > { %v8457_v56 = vrot.slane %v8450_v22, 4 }
 0x4c1   : > { %v8458_v57 = vrot.slane %v8452_v54, 4 }
 0x4c2   : > { %v8459_v46 = vsel %vm8397_vm0, %v8449_v61, %v8457_v56 }
 0x4c3   : > { %v8460_v5 = vsel %vm8397_vm0, %v8451_v45, %v8458_v57  ;;  %v13645_v58 = vsub.f32 %v8398_v3, %v8459_v46 }
 0x4c4   : > { %v13647_v7 = vsub.f32 %v8400_v1, %v8460_v5 }
 0x4c5   : > { %v8465_v49 = vmul.f32 %v13645_v58, %v13645_v58 }
 0x4c6   : > { %v8466_v59 = vmul.f32 %v13647_v7, %v13647_v7 }
 0x4c7   : > { %8469 = vst [vmem:[#allocation1] ss:$2 sm:$0xff] %v8465_v49 }
 0x4c8   : > { %8473 = vst [vmem:[#allocation1 + $0x10] ss:$2 sm:$0xff] %v8466_v59 }
 0x4ce   : > { %v8470_v10 = vld.sshfl [vmem:[#allocation1] sm:$0xff pattern:$0x75316420]  ;;  %v8471_v13 = vld.sshfl [vmem:[#allocation1 + $0x8] sm:$0xff pattern:$0x75316420] }
 0x4cf   : > { %v8474_v60 = vld.sshfl [vmem:[#allocation1 + $0x10] sm:$0xff pattern:$0x75316420]  ;;  %v8475_v62 = vld.sshfl [vmem:[#allocation1 + $0x18] sm:$0xff pattern:$0x75316420] }
 0x4d0   : > { %v8480_v11 = vsel %vm8397_vm0, %v8470_v10, 0.0  ;;  %v8487_v17 = vsel %vm8397_vm0, %v8471_v13, 0.0  ;;  %v8494_v12 = vsel %vm8397_vm0, %v8474_v60, 0.0  ;;  %v8501_v63 = vsel %vm8397_vm0, %v8475_v62, 0.0 }
 0x4d1   : > { %v8481_v50 = vrot.slane %v8480_v11, 4  ;;  %v8488_v0 = vrot.slane %v8487_v17, 4  ;;  %v8495_v3 = vrot.slane %v8494_v12, 4  ;;  %v8502_v16 = vrot.slane %v8501_v63, 4 }
 0x4d3   : > { %v8482_v1 = vadd.f32 %v8481_v50, %v8480_v11  ;;  %v8489_v26 = vadd.f32 %v8488_v0, %v8487_v17  ;;  %v8496_v25 = vadd.f32 %v8495_v3, %v8494_v12  ;;  %v8503_v2 = vadd.f32 %v8502_v16, %v8501_v63 }
 0x4d5   : > { %v8483_v4 = vrot.slane %v8482_v1, 2  ;;  %v8490_v6 = vrot.slane %v8489_v26, 2  ;;  %v8497_v29 = vrot.slane %v8496_v25, 2  ;;  %v8504_v30 = vrot.slane %v8503_v2, 2 }
 0x4d7   : > { %v8484_v44 = vadd.f32 %v8483_v4, %v8482_v1  ;;  %v8491_v8 = vadd.f32 %v8490_v6, %v8489_v26  ;;  %v8498_v9 = vadd.f32 %v8497_v29, %v8496_v25  ;;  %v8505_v14 = vadd.f32 %v8504_v30, %v8503_v2 }
 0x4d9   : > { %v8485_v33 = vrot.slane %v8484_v44, 1  ;;  %v8492_v53 = vrot.slane %v8491_v8, 1  ;;  %v8499_v39 = vrot.slane %v8498_v9, 1  ;;  %v8506_v15 = vrot.slane %v8505_v14, 1 }
 0x4db   : > { %v8486_v36 = vadd.f32 %v8485_v33, %v8484_v44  ;;  %v8493_v21 = vadd.f32 %v8492_v53, %v8491_v8  ;;  %v8500_v34 = vadd.f32 %v8499_v39, %v8498_v9  ;;  %v8507_v24 = vadd.f32 %v8506_v15, %v8505_v14 }
 0x4dd   : > { %v8508_v43 = vmul.f32 %v8486_v36, %v8448_v47  ;;  %v8509_v55 = vmul.f32 %v8493_v21, %v8448_v47  ;;  %v8510_v27 = vmul.f32 %v8500_v34, %v8448_v47  ;;  %v8511_v48 = vmul.f32 %v8507_v24, %v8448_v47 }
 0x4df   : > { %v8512_v38 = vadd.f32 1e-05, %v8508_v43  ;;  %v8513_v32 = vadd.f32 1e-05, %v8509_v55  ;;  %v8514_v18 = vadd.f32 1e-05, %v8510_v27 }
 0x4e0   : > { %v8515_v40 = vadd.f32 1e-05, %v8511_v48 }
 0x4e1   : > { %11267 = vrsqrt.f32 %v8512_v38  ;;  %vm8532_vm4 = vweird.f32 %v8513_v32  ;;  %vm8522_vm6 = vweird.f32 %v8512_v38  ;;  %vm8542_vm12 = vweird.f32 %v8514_v18 }
 0x4e2   : > { %11269 = vrsqrt.f32 %v8513_v32  ;;  %vm8552_vm8 = vweird.f32 %v8515_v40 }
 0x4e3   : > { %11271 = vrsqrt.f32 %v8514_v18 }
 0x4e4   : > { %11273 = vrsqrt.f32 %v8515_v40 }
 0x4e7   : > { %v11268_v23 = vpop.eup %11267 }
 0x4e8   : > { %v11270_v41 = vpop.eup %11269  ;;  %v8517_v42 = vmul.f32 %v11268_v23, %v8512_v38  ;;  %vm8523_vm3 = vweird.f32 %v11268_v23 }
 0x4e9   : > { %v11272_v19 = vpop.eup %11271  ;;  %v8527_v20 = vmul.f32 %v11270_v41, %v8513_v32  ;;  %vm8533_vm2 = vweird.f32 %v11270_v41  ;;  %vm8524_vm9 = vmor %vm8522_vm6, %vm8523_vm3 }
 0x4ea   : > { %v11274_v28 = vpop.eup %11273  ;;  %v8518_v31 = vmul.f32 %v11268_v23, %v8517_v42  ;;  %v8537_v51 = vmul.f32 %v11272_v19, %v8514_v18  ;;  %vm8534_vm7 = vmor %vm8532_vm4, %vm8533_vm2  ;;  %vm8543_vm10 = vweird.f32 %v11272_v19 }
 0x4eb   : > { %v8528_v35 = vmul.f32 %v11270_v41, %v8527_v20  ;;  %v8547_v52 = vmul.f32 %v11274_v28, %v8515_v40  ;;  %vm8553_vm5 = vweird.f32 %v11274_v28  ;;  %vm8544_vm13 = vmor %vm8542_vm12, %vm8543_vm10 }
 0x4ec   : > { %v8519_v37 = vmul.f32 0.5, %v8518_v31  ;;  %v8538_v47 = vmul.f32 %v11272_v19, %v8537_v51  ;;  %vm8554_vm11 = vmor %vm8552_vm8, %vm8553_vm5 }
 0x4ed   : > { %v8529_v22 = vmul.f32 0.5, %v8528_v35  ;;  %v8548_v54 = vmul.f32 %v11274_v28, %v8547_v52 }
 0x4ee   : > { %v8520_v61 = vsub.f32 1.5, %v8519_v37  ;;  %v8539_v56 = vmul.f32 0.5, %v8538_v47 }
 0x4ef   : > { %v8530_v45 = vsub.f32 1.5, %v8529_v22  ;;  %v8549_v57 = vmul.f32 0.5, %v8548_v54 }
 0x4f0   : > { %v8540_v46 = vsub.f32 1.5, %v8539_v56  ;;  %v8521_v5 = vmul.f32 %v11268_v23, %v8520_v61 }
 0x4f1   : > { %v8531_v49 = vmul.f32 %v11270_v41, %v8530_v45  ;;  %v8550_v59 = vsub.f32 1.5, %v8549_v57 }
 0x4f2   : > { %v8541_v13 = vmul.f32 %v11272_v19, %v8540_v46  ;;  %v8525_v11 = vsel %vm8524_vm9, %v11268_v23, %v8521_v5 }
 0x4f3   : > { %v8535_v10 = vsel %vm8534_vm7, %v11270_v41, %v8531_v49  ;;  %v8551_v60 = vmul.f32 %v11274_v28, %v8550_v59 }
 0x4f4   : > { %v8560_v62 = vrot.slane %v8535_v10, 4  ;;  %v8545_v50 = vsel %vm8544_vm13, %v11272_v19, %v8541_v13 }
 0x4f5   : > { %v8555_v17 = vsel %vm8554_vm11, %v11274_v28, %v8551_v60 }
 0x4f6   : > { %v8561_v12 = vrot.slane %v8555_v17, 4  ;;  %v8562_v63 = vsel %vm8397_vm0, %v8525_v11, %v8560_v62 }
 0x4f7   : > { %v8566_v0 = vmul.f32 %v8562_v63, %v13645_v58 }
 0x4f8   : > { %v8563_v3 = vsel %vm8397_vm0, %v8545_v50, %v8561_v12 }
 0x4f9   : > { %v8567_v16 = vmul.f32 %v8563_v3, %v13647_v7  ;;  %vm8568_vm14 = vcmp.ge.f32.partialorder %v8566_v0, 0.0  ;;  %v8570_v1 = vmul.f32 0.2, %v8566_v0 }
 0x4fb   : > { %vm8569_vm15 = vcmp.ge.f32.partialorder %v8567_v16, 0.0  ;;  %v8571_v26 = vmul.f32 0.2, %v8567_v16  ;;  %v8572_v25 = vsel %vm8568_vm14, %v8566_v0, %v8570_v1 }
 0x4fc   : > { %8576 = vst [vmem:[#allocation1] ss:$2 sm:$0xff] %v8572_v25 }
 0x4fd   : > { %v8573_v2 = vsel %vm8569_vm15, %v8567_v16, %v8571_v26 }
 0x4fe   : > { %8578 = vst [vmem:[#allocation1 + $0x1] ss:$2 sm:$0xff] %v8573_v2 }
 0x505   : > { %v8579_v4 = vld.sshfl [vmem:[#allocation1] sm:$0xff pattern:$0x75316420]  ;;  %v8580_v6 = vld.sshfl [vmem:[#allocation1 + $0x8] sm:$0xff pattern:$0x75316420] }
 0x506   : > { %v8583_v58 = vpack.c.bf16 %v8580_v6, %v8579_v4 }
 0x508   : > { %8584 = vst [vmem:[%s4354_s23] sm:$0xff] %v8583_v58 }
 0x509 PF: > { %p10_p9 = scmp.ge.s32.totalorder %s11338_s16, 4   ;;  %s13679_s12 = smov %s11294_s13 }
 0x50a   : > { %s13680_s13 = smov %s11347_s19  ;;  %s13681_s14 = smov %s11338_s16 }
 0x50b   :  { %12 = sbr.rel (!%p10_p9) target bundleno = 2 (0x2), region = 131 }

</bundles_post_ra>
